<compile_context>
chip_gen: v5e
topology: v5e:2x2
jax: 0.10.0
libtpu: 0.0.40
codegen_flags: <defaults>
</compile_context>

<pallas_src>
import functools

import jax
import jax.numpy as jnp
from jax import lax
from jax.experimental import pallas as pl
from jax.experimental.pallas import tpu as pltpu

ENCODE = [32, 64, 128, 256]
BN_EPS = 1e-5
MXU_DTYPE = jnp.bfloat16      # MXU operand dtype (f32 accumulation everywhere)
ACT_DTYPE = jnp.bfloat16      # inter-kernel activation handoff dtype


# --------------------------------------------------------------------------
# Pallas kernels
# --------------------------------------------------------------------------
def _basic_blk_kernel(x_ref, w1_ref, s1_ref, b1_ref, w2_ref, s2_ref, b2_ref,
                      o_ref, vpad_ref, cur_ref, *, n_repeat, width):
    """Fused BasicBlk: n_repeat x [conv3x3+BN+ReLU, conv3x3+BN, +res, ReLU].

    x_ref/o_ref : (1, H*W, C) bf16 (flat NHWC spatial)
    w*_ref      : (9*C, C) bf16, tap-major rows (k = dy*3 + dx)
    s*/b*_ref   : (1, C) f32 folded BN affine
    vpad_ref    : ((H+4)*W, C) bf16 row-padded activation scratch
    cur_ref     : (H*W, C) f32 residual-chain carry
    """
    M, C = cur_ref.shape            # M = H*W
    W = width
    OFF = 2 * W                     # interior row offset inside vpad

    # Zero only the halo rows (interior is fully overwritten every conv).
    halo = jnp.zeros((2 * W, C), vpad_ref.dtype)
    vpad_ref[0:OFF, :] = halo
    vpad_ref[OFF + M:OFF + M + 2 * W, :] = halo

    # Left/right column-pad masks over flat rows, built once for all 8 convs.
    col = lax.broadcasted_iota(jnp.int32, (M, 1), 0) % W
    mask_l = (col != 0).astype(jnp.float32)        # zero where w == 0
    mask_r = (col != W - 1).astype(jnp.float32)    # zero where w == W-1

    def conv3x3(v_bf16, w_ref, s_ref, b_ref, relu):
        # v_bf16: (M, C) bf16.  One aligned store, then 9 ref-slice matmuls.
        vpad_ref[OFF:OFF + M, :] = v_bf16
        acc_c = acc_l = acc_r = None
        for dy in range(3):
            for dx in range(3):
                k = dy * 3 + dx
                start = (dy + 1) * W + dx - 1       # dx=1 taps are W-aligned
                slab = vpad_ref[start:start + M, :]
                part = jnp.dot(slab, w_ref[k * C:(k + 1) * C, :],
                               preferred_element_type=jnp.float32)
                if dx == 0:
                    acc_l = part if acc_l is None else acc_l + part
                elif dx == 2:
                    acc_r = part if acc_r is None else acc_r + part
                else:
                    acc_c = part if acc_c is None else acc_c + part
        y = acc_c + mask_l * acc_l + mask_r * acc_r
        y = y * s_ref[...] + b_ref[...]             # eval-mode BN (+conv bias)
        if relu:
            y = jnp.maximum(y, 0.0)
        return y

    cur_ref[...] = x_ref[0].astype(jnp.float32)

    def repeat_body(_, carry):                      # weights shared across repeats
        cur = cur_ref[...]
        h = conv3x3(cur.astype(MXU_DTYPE), w1_ref, s1_ref, b1_ref, relu=True)
        y = conv3x3(h.astype(MXU_DTYPE), w2_ref, s2_ref, b2_ref, relu=False)
        cur_ref[...] = jnp.maximum(cur + y, 0.0)    # residual + ReLU
        return carry

    lax.fori_loop(0, n_repeat, repeat_body, 0)
    o_ref[0] = cur_ref[...].astype(o_ref.dtype)


def _down_conv_kernel(x_ref, w_ref, s_ref, b_ref, *rest, relu, has_add):
    """3x3 conv, stride 2, pad 1 + BN (+ accumulated contribution) (+ ReLU).

    The wrapper reshapes the input (free, row-major) to a parity-split form so
    both the stride-2 row and column selection happen in-kernel with no gather:
      x_ref : (1, Ho, 2, Wo, 2*Cin)   [dim2 = row parity, lanes = col parity]
      w_ref : (12*Cin, Cout)  -- 6 taps t = dy*2 + j, each a (2*Cin, Cout) block
      o_ref : (1, Ho*Wo, Cout)
      add_ref (optional): (1, Ho*Wo, Cout) partial cross-branch sum to add.
    """
    if has_add:
        add_ref, o_ref, epad_ref, opad_ref = rest
    else:
        o_ref, epad_ref, opad_ref = rest
    _, Ho, _, Wo, C2 = x_ref.shape       # C2 = 2*Cin
    M = Ho * Wo
    OFF = 2 * Wo

    halo = jnp.zeros((OFF, C2), epad_ref.dtype)
    epad_ref[0:OFF, :] = halo
    opad_ref[0:OFF, :] = halo
    epad_ref[OFF:OFF + M, :] = x_ref[0, :, 0, :, :].reshape(M, C2)  # even rows
    opad_ref[OFF:OFF + M, :] = x_ref[0, :, 1, :, :].reshape(M, C2)  # odd rows

    col = lax.broadcasted_iota(jnp.int32, (M, 1), 0) % Wo
    mask_l = (col != 0).astype(jnp.float32)          # zero where wo == 0

    # Row sources per dy:  dy=0 -> odd rows @ ho-1, dy=1 -> even @ ho,
    #                      dy=2 -> odd @ ho      (row padding = scratch zeros).
    srcs = [(opad_ref, Wo), (epad_ref, 2 * Wo), (opad_ref, 2 * Wo)]
    acc0 = acc1 = None                               # j=0 needs the left mask
    for dy in range(3):
        ref, base = srcs[dy]
        for j in range(2):
            t = dy * 2 + j
            slab = ref[base + j - 1:base + j - 1 + M, :]
            part = jnp.dot(slab, w_ref[t * C2:(t + 1) * C2, :],
                           preferred_element_type=jnp.float32)
            if j == 0:
                acc0 = part if acc0 is None else acc0 + part
            else:
                acc1 = part if acc1 is None else acc1 + part

    y = acc1 + mask_l * acc0
    y = y * s_ref[...] + b_ref[...]
    if has_add:
        y = y + add_ref[0].astype(jnp.float32)
    if relu:
        y = jnp.maximum(y, 0.0)
    o_ref[0] = y.astype(o_ref.dtype)


def _up_conv_kernel(x_ref, w_ref, s_ref, b_ref, *rest, relu, has_add):
    """1x1 conv + BN + nearest x`f` upsample (+ accumulated contribution) (+ReLU).

    The column replication of the upsample is folded into the (column-tiled)
    weight; the row replication is a broadcast over dim 1 of the output block.
      x_ref : (1, Hs*Ws, Cin)      w_ref : (Cin, f*Cout)
      o_ref : (1, Hs, f, Ws, f*Cout)  (row-major identical to NHWC upsampled)
    """
    if has_add:
        add_ref, o_ref = rest
    else:
        (o_ref,) = rest
    _, Hs, f, Ws, FC = o_ref.shape
    y = jnp.dot(x_ref[0], w_ref[...], preferred_element_type=jnp.float32)
    y = y * s_ref[...] + b_ref[...]      # BN before nearest upsample == after
    out = jnp.broadcast_to(y.reshape(Hs, 1, Ws, FC), (Hs, f, Ws, FC))
    if has_add:
        out = out + add_ref[0].astype(jnp.float32)
    if relu:
        out = jnp.maximum(out, 0.0)
    o_ref[0] = out.astype(o_ref.dtype)


# --------------------------------------------------------------------------
# Kernel wrappers (all spatial reshapes here are free / row-major identical)
# --------------------------------------------------------------------------
def fused_basic_blk(x_flat, p, height, width, *, n_repeat=4):
    """x_flat: (N, H*W, C) bf16 -> (N, H*W, C) bf16, whole BasicBlk chain."""
    N, M, C = x_flat.shape
    vec = pl.BlockSpec((1, C), lambda n: (0, 0))
    mat = pl.BlockSpec((9 * C, C), lambda n: (0, 0))
    return pl.pallas_call(
        functools.partial(_basic_blk_kernel, n_repeat=n_repeat, width=width),
        grid=(N,),
        in_specs=[pl.BlockSpec((1, M, C), lambda n: (n, 0, 0)),
                  mat, vec, vec, mat, vec, vec],
        out_specs=pl.BlockSpec((1, M, C), lambda n: (n, 0, 0)),
        out_shape=jax.ShapeDtypeStruct((N, M, C), ACT_DTYPE),
        scratch_shapes=[pltpu.VMEM(((height + 4) * width, C), MXU_DTYPE),
                        pltpu.VMEM((M, C), jnp.float32)],
        compiler_params=pltpu.CompilerParams(dimension_semantics=("parallel",)),
    )(x_flat, p["w1"], p["s1"], p["b1"], p["w2"], p["s2"], p["b2"])


def fused_down_conv(x_flat, lyr, height, width, *, relu, add=None,
                    out_dtype=ACT_DTYPE):
    """3x3 stride-2 conv + BN (+add) (+ReLU): (N,H*W,Cin) -> (N,(H/2)*(W/2),Cout)."""
    N, _, Cin = x_flat.shape
    H, W = height, width
    assert H % 2 == 0 and W % 2 == 0
    Ho, Wo = H // 2, W // 2
    Mo = Ho * Wo
    Cout = lyr["w"].shape[1]
    x5 = x_flat.reshape(N, Ho, 2, Wo, 2 * Cin)       # free parity-split view

    in_specs = [pl.BlockSpec((1, Ho, 2, Wo, 2 * Cin), lambda n: (n, 0, 0, 0, 0)),
                pl.BlockSpec((12 * Cin, Cout), lambda n: (0, 0)),
                pl.BlockSpec((1, Cout), lambda n: (0, 0)),
                pl.BlockSpec((1, Cout), lambda n: (0, 0))]
    args = [x5, lyr["w"], lyr["scale"], lyr["bias"]]
    if add is not None:
        in_specs.append(pl.BlockSpec((1, Mo, Cout), lambda n: (n, 0, 0)))
        args.append(add)
    return pl.pallas_call(
        functools.partial(_down_conv_kernel, relu=relu, has_add=add is not None),
        grid=(N,),
        in_specs=in_specs,
        out_specs=pl.BlockSpec((1, Mo, Cout), lambda n: (n, 0, 0)),
        out_shape=jax.ShapeDtypeStruct((N, Mo, Cout), out_dtype),
        scratch_shapes=[pltpu.VMEM(((Ho + 2) * Wo, 2 * Cin), MXU_DTYPE),
                        pltpu.VMEM(((Ho + 2) * Wo, 2 * Cin), MXU_DTYPE)],
        compiler_params=pltpu.CompilerParams(dimension_semantics=("parallel",)),
    )(*args)


def fused_up_conv(x_flat, lyr, hs, ws, factor, *, relu, add=None,
                  out_dtype=ACT_DTYPE):
    """1x1 conv + BN + nearest x`factor` upsample (+add) (+ReLU).
    x_flat: (N, Hs*Ws, Cin) -> (N, (f*Hs)*(f*Ws), Cout) flat."""
    N, M, Cin = x_flat.shape
    FC = lyr["w"].shape[1]                           # = factor * Cout
    Cout = FC // factor
    in_specs = [pl.BlockSpec((1, M, Cin), lambda n: (n, 0, 0)),
                pl.BlockSpec((Cin, FC), lambda n: (0, 0)),
                pl.BlockSpec((1, FC), lambda n: (0, 0)),
                pl.BlockSpec((1, FC), lambda n: (0, 0))]
    args = [x_flat, lyr["w"], lyr["scale"], lyr["bias"]]
    if add is not None:
        add5 = add.reshape(N, hs, factor, ws, FC)    # free reshape
        in_specs.append(pl.BlockSpec((1, hs, factor, ws, FC),
                                     lambda n: (n, 0, 0, 0, 0)))
        args.append(add5)
    out5 = pl.pallas_call(
        functools.partial(_up_conv_kernel, relu=relu, has_add=add is not None),
        grid=(N,),
        in_specs=in_specs,
        out_specs=pl.BlockSpec((1, hs, factor, ws, FC),
                               lambda n: (n, 0, 0, 0, 0)),
        out_shape=jax.ShapeDtypeStruct((N, hs, factor, ws, FC), out_dtype),
        compiler_params=pltpu.CompilerParams(dimension_semantics=("parallel",)),
    )(*args)
    # (N, Hs, f, Ws, f*Cout) is row-major identical to (N, f*Hs, f*Ws, Cout).
    return out5.reshape(N, factor * hs * factor * ws, Cout)


# --------------------------------------------------------------------------
# Parameter init (deterministic, synthetic) + one-time prep (hoisted)
# --------------------------------------------------------------------------
def _bn_fold(gamma, beta, conv_bias):
    # eval-mode BN with running_mean=0, running_var=1; conv bias folded in.
    scale = gamma / jnp.sqrt(1.0 + BN_EPS)
    bias = scale * conv_bias + beta
    return scale, bias


def _init_conv_bn(key, kh, kw, cin, cout):
    k = jax.random.split(key, 4)
    return {
        "w": 0.05 * jax.random.normal(k[0], (kh, kw, cin, cout), jnp.float32),
        "cb": 0.05 * jax.random.normal(k[1], (cout,), jnp.float32),
        "g": 1.0 + 0.1 * jax.random.normal(k[2], (cout,), jnp.float32),
        "be": 0.05 * jax.random.normal(k[3], (cout,), jnp.float32),
    }


def _prep_basic(raw):
    kh, kw, cin, cout = raw["w"].shape
    scale, bias = _bn_fold(raw["g"], raw["be"], raw["cb"])
    return {"w": raw["w"].reshape(kh * kw * cin, cout).astype(MXU_DTYPE),
            "scale": scale.reshape(1, cout).astype(jnp.float32),
            "bias": bias.reshape(1, cout).astype(jnp.float32)}


def _prep_down(raw):
    # Weight layout for the parity-split stride-2 kernel: 6 taps t = dy*2 + j,
    # each a (2*Cin, Cout) block over [even-col chans | odd-col chans].
    w = raw["w"]                                     # (3, 3, cin, cout)
    _, _, cin, cout = w.shape
    zeros = jnp.zeros((cin, cout), w.dtype)
    blocks = []
    for dy in range(3):
        blocks += [zeros, w[dy, 0]]                  # j=0: odd half = tap dx=0
        blocks += [w[dy, 1], w[dy, 2]]               # j=1: even=dx=1, odd=dx=2
    w2 = jnp.concatenate(blocks, axis=0)             # (12*cin, cout)
    scale, bias = _bn_fold(raw["g"], raw["be"], raw["cb"])
    return {"w": w2.astype(MXU_DTYPE),
            "scale": scale.reshape(1, cout).astype(jnp.float32),
            "bias": bias.reshape(1, cout).astype(jnp.float32)}


def _prep_up(raw, factor):
    # Column-tile the 1x1 weight and the BN affine `factor` times so the matmul
    # emits the upsampled-column channel layout directly (no in-kernel concat).
    w = raw["w"][0, 0]                               # (cin, cout)
    _, cout = w.shape
    scale, bias = _bn_fold(raw["g"], raw["be"], raw["cb"])
    return {"w": jnp.tile(w, (1, factor)).astype(MXU_DTYPE),
            "scale": jnp.tile(scale.reshape(1, cout),
                              (1, factor)).astype(jnp.float32),
            "bias": jnp.tile(bias.reshape(1, cout),
                             (1, factor)).astype(jnp.float32)}


def init_hr_params(key, num_bra):
    params = {"basic": [], "fuze": {}}
    for bra in range(num_bra):
        c = ENCODE[bra]
        key, k1, k2 = jax.random.split(key, 3)
        # The PyTorch BasicBlk reuses the SAME Sequential 4 times (shared
        # weights), so one (conv1, conv2) pair per branch is enough.
        c1 = _prep_basic(_init_conv_bn(k1, 3, 3, c, c))
        c2 = _prep_basic(_init_conv_bn(k2, 3, 3, c, c))
        params["basic"].append({"w1": c1["w"], "s1": c1["scale"], "b1": c1["bias"],
                                "w2": c2["w"], "s2": c2["scale"], "b2": c2["bias"]})
    for bra in range(num_bra):
        for tar in range(num_bra):
            if tar == bra:
                continue
            delta = tar - bra
            if delta > 0:        # downsample chain of `delta` stride-2 3x3 convs
                layers = []
                for i in range(delta):
                    cin = ENCODE[bra]
                    cout = ENCODE[bra] if i < delta - 1 else ENCODE[tar]
                    key, kk = jax.random.split(key)
                    layers.append(_prep_down(_init_conv_bn(kk, 3, 3, cin, cout)))
                params["fuze"][(bra, tar)] = {"kind": "down", "layers": layers}
            else:                # 1x1 conv + nearest upsample + BN
                key, kk = jax.random.split(key)
                factor = 2 ** (-delta)
                params["fuze"][(bra, tar)] = {
                    "kind": "up", "factor": factor,
                    "layer": _prep_up(_init_conv_bn(kk, 1, 1, ENCODE[bra],
                                                    ENCODE[tar]), factor)}
    return params


# --------------------------------------------------------------------------
# Module forward (flat NHWC internally)
# --------------------------------------------------------------------------
def hr_module_forward(inputs_nchw, params, num_bra):
    assert len(inputs_nchw) == num_bra and num_bra >= 2
    xs, shapes = [], []
    for x in inputs_nchw:
        N, C, H, W = x.shape
        shapes.append((H, W, C))
        xs.append(jnp.transpose(x, (0, 2, 3, 1))
                  .reshape(N, H * W, C).astype(ACT_DTYPE))

    basic_out = [fused_basic_blk(xs[b], params["basic"][b],
                                 shapes[b][0], shapes[b][1])
                 for b in range(num_bra)]

    # Cross-branch accumulation is chained through the fuze kernels (extra
    # `add` input); the module-level final ReLU is folded into the LAST
    # contributing kernel of each target (PyTorch skips tar == bra, so there is
    # no identity term, mirrored here).
    acc = [None] * num_bra
    contributors = {t: [b for b in range(num_bra) if b != t]
                    for t in range(num_bra)}
    for bra in range(num_bra):
        for tar in range(num_bra):
            if tar == bra:
                continue
            is_last = bra == contributors[tar][-1]
            out_dt = jnp.float32 if is_last else ACT_DTYPE
            spec = params["fuze"][(bra, tar)]
            if spec["kind"] == "down":
                out = basic_out[bra]
                h, w = shapes[bra][0], shapes[bra][1]
                layers = spec["layers"]
                for li, lyr in enumerate(layers):
                    last_layer = li == len(layers) - 1
                    out = fused_down_conv(
                        out, lyr, h, w,
                        relu=(not last_layer) or is_last,
                        add=acc[tar] if last_layer else None,
                        out_dtype=out_dt if last_layer else ACT_DTYPE)
                    h, w = h // 2, w // 2
                acc[tar] = out
            else:
                hs, ws = shapes[bra][0], shapes[bra][1]
                acc[tar] = fused_up_conv(
                    basic_out[bra], spec["layer"], hs, ws, spec["factor"],
                    relu=is_last, add=acc[tar], out_dtype=out_dt)

    outs = []
    for tar in range(num_bra):
        H, W, C = shapes[tar]
        o = acc[tar].reshape(inputs_nchw[tar].shape[0], H, W, C)
        outs.append(jnp.transpose(o, (0, 3, 1, 2)).astype(jnp.float32))
    return outs


# --------------------------------------------------------------------------
# Example run
# --------------------------------------------------------------------------
if __name__ == "__main__":
    key = jax.random.PRNGKey(0)
    N, H = 2, 16

    # --- num_bra = 2 (matches the PyTorch example scale) ---
    key, kx0, kx1, kp = jax.random.split(key, 4)
    x0 = jax.random.normal(kx0, (N, ENCODE[0], H, H), jnp.float32)
    x1 = jax.random.normal(kx1, (N, ENCODE[1], H // 2, H // 2), jnp.float32)
    params2 = init_hr_params(kp, 2)
    outs2 = hr_module_forward([x0, x1], params2, 2)
    for o in outs2:
        jax.block_until_ready(o)
    assert outs2[0].shape == (N, ENCODE[0], H, H)
    assert outs2[1].shape == (N, ENCODE[1], H // 2, H // 2)

    # --- num_bra = 3 (exercises fused accumulation, 2-deep down chains, x4 up) ---
    key, kx2, kp3 = jax.random.split(key, 3)
    x2 = jax.random.normal(kx2, (N, ENCODE[2], H // 4, H // 4), jnp.float32)
    params3 = init_hr_params(kp3, 3)
    outs3 = hr_module_forward([x0, x1, x2], params3, 3)
    for o in outs3:
        jax.block_until_ready(o)
    assert outs3[0].shape == (N, ENCODE[0], H, H)
    assert outs3[1].shape == (N, ENCODE[1], H // 2, H // 2)
    assert outs3[2].shape == (N, ENCODE[2], H // 4, H // 4)

    print("KERNEL_OK")
</pallas_src>

<mosaic_0001>
module attributes {stable_mosaic.version = 11 : i64} {
  func.func @_basic_blk_kernel(%arg0: i32, %arg1: memref<1x256x32xbf16, #tpu.memory_space<vmem>>, %arg2: memref<288x32xbf16, #tpu.memory_space<vmem>>, %arg3: memref<1x32xf32, #tpu.memory_space<vmem>>, %arg4: memref<1x32xf32, #tpu.memory_space<vmem>>, %arg5: memref<288x32xbf16, #tpu.memory_space<vmem>>, %arg6: memref<1x32xf32, #tpu.memory_space<vmem>>, %arg7: memref<1x32xf32, #tpu.memory_space<vmem>>, %arg8: memref<1x256x32xbf16, #tpu.memory_space<vmem>>, %arg9: memref<320x32xbf16, #tpu.memory_space<vmem>>, %arg10: memref<256x32xf32, #tpu.memory_space<vmem>>) attributes {dimension_semantics = [#tpu.dimension_semantics<parallel>], iteration_bounds = array<i64: 2>, scalar_prefetch = 0 : i64, scratch_operands = 2 : i64, tpu.core_type = #tpu.core_type<tc>, window_params = [{transform_indices = @transform_0, window_bounds = array<i64: 1, 256, 32>}, {pipeline_mode = #tpu.pipeline_mode<synchronous>, transform_indices = @transform_1, window_bounds = array<i64: 288, 32>}, {pipeline_mode = #tpu.pipeline_mode<synchronous>, transform_indices = @transform_2, window_bounds = array<i64: 1, 32>}, {pipeline_mode = #tpu.pipeline_mode<synchronous>, transform_indices = @transform_3, window_bounds = array<i64: 1, 32>}, {pipeline_mode = #tpu.pipeline_mode<synchronous>, transform_indices = @transform_4, window_bounds = array<i64: 288, 32>}, {pipeline_mode = #tpu.pipeline_mode<synchronous>, transform_indices = @transform_5, window_bounds = array<i64: 1, 32>}, {pipeline_mode = #tpu.pipeline_mode<synchronous>, transform_indices = @transform_6, window_bounds = array<i64: 1, 32>}, {transform_indices = @transform_7, window_bounds = array<i64: 1, 256, 32>}]} {
    %cst = arith.constant 0.000000e+00 : bf16
    %0 = vector.broadcast %cst : bf16 to vector<32x32xbf16>
    %c0 = arith.constant 0 : index
    %c0_0 = arith.constant 0 : index
    %1 = vector.load %arg9[%c0, %c0_0] : memref<320x32xbf16, #tpu.memory_space<vmem>>, vector<32x32xbf16>
    tpu.vector_store %arg9[%c0, %c0_0], %0 {strides = array<i32>} : memref<320x32xbf16, #tpu.memory_space<vmem>>, vector<32x32xbf16>,
    %c288 = arith.constant 288 : index
    %c0_1 = arith.constant 0 : index
    %2 = vector.load %arg9[%c288, %c0_1] : memref<320x32xbf16, #tpu.memory_space<vmem>>, vector<32x32xbf16>
    tpu.vector_store %arg9[%c288, %c0_1], %0 {strides = array<i32>} : memref<320x32xbf16, #tpu.memory_space<vmem>>, vector<32x32xbf16>,
    %3 = tpu.iota {dimensions = array<i32: 0>} : vector<256x1xi32>
    %c16_i32 = arith.constant 16 : i32
    %c0_i32 = arith.constant 0 : i32
    %4 = arith.cmpi eq, %c16_i32, %c0_i32 : i32
    %c1_i32 = arith.constant 1 : i32
    %5 = arith.select %4, %c1_i32, %c16_i32 : i32
    %6 = vector.broadcast %5 : i32 to vector<256x1xi32>
    %7 = arith.remsi %3, %6 : vector<256x1xi32>
    %c0_i32_2 = arith.constant 0 : i32
    %8 = vector.broadcast %c0_i32_2 : i32 to vector<256x1xi32>
    %9 = arith.cmpi ne, %7, %8 : vector<256x1xi32>
    %c0_i32_3 = arith.constant 0 : i32
    %10 = vector.broadcast %c0_i32_3 : i32 to vector<256x1xi32>
    %11 = arith.cmpi slt, %7, %10 : vector<256x1xi32>
    %c0_i32_4 = arith.constant 0 : i32
    %12 = arith.cmpi slt, %5, %c0_i32_4 : i32
    %13 = vector.broadcast %12 : i1 to vector<256x1xi1>
    %14 = vector.broadcast %13 : vector<256x1xi1> to vector<256x1xi1>
    %15 = arith.xori %11, %14 : vector<256x1xi1>
    %16 = arith.andi %15, %9 : vector<256x1xi1>
    %17 = vector.broadcast %5 : i32 to vector<256x1xi32>
    %18 = arith.addi %7, %17 : vector<256x1xi32>
    %19 = arith.select %16, %18, %7 : vector<256x1xi1>, vector<256x1xi32>
    %c0_i32_5 = arith.constant 0 : i32
    %20 = vector.broadcast %c0_i32_5 : i32 to vector<256x1xi32>
    %21 = arith.cmpi ne, %19, %20 : vector<256x1xi32>
    %22 = arith.extui %21 : vector<256x1xi1> to vector<256x1xi32>
    %23 = arith.sitofp %22 : vector<256x1xi32> to vector<256x1xf32>
    %c15_i32 = arith.constant 15 : i32
    %24 = vector.broadcast %c15_i32 : i32 to vector<256x1xi32>
    %25 = arith.cmpi ne, %19, %24 : vector<256x1xi32>
    %26 = arith.extui %25 : vector<256x1xi1> to vector<256x1xi32>
    %27 = arith.sitofp %26 : vector<256x1xi32> to vector<256x1xf32>
    %c0_6 = arith.constant 0 : index
    %c0_7 = arith.constant 0 : index
    %c0_8 = arith.constant 0 : index
    %28 = vector.load %arg1[%c0_6, %c0_7, %c0_8] : memref<1x256x32xbf16, #tpu.memory_space<vmem>>, vector<1x256x32xbf16>
    %29 = vector.shape_cast %28 : vector<1x256x32xbf16> to vector<256x32xbf16>
    %30 = arith.extf %29 : vector<256x32xbf16> to vector<256x32xf32>
    %c0_9 = arith.constant 0 : index
    %c0_10 = arith.constant 0 : index
    %31 = vector.load %arg10[%c0_9, %c0_10] : memref<256x32xf32, #tpu.memory_space<vmem>>, vector<256x32xf32>
    tpu.vector_store %arg10[%c0_9, %c0_10], %30 {strides = array<i32>} : memref<256x32xf32, #tpu.memory_space<vmem>>, vector<256x32xf32>,
    %c0_i32_11 = arith.constant 0 : i32
    %c4_i32 = arith.constant 4 : i32
    %32 = arith.addi %c0_i32_11, %c4_i32 : i32
    %c1_i32_12 = arith.constant 1 : i32
    scf.for %arg11 = %c0_i32_11 to %32 step %c1_i32_12  : i32 {
      %c0_18 = arith.constant 0 : index
      %c0_19 = arith.constant 0 : index
      %38 = vector.load %arg10[%c0_18, %c0_19] : memref<256x32xf32, #tpu.memory_space<vmem>>, vector<256x32xf32>
      %39 = arith.truncf %38 : vector<256x32xf32> to vector<256x32xbf16>
      %c32 = arith.constant 32 : index
      %c0_20 = arith.constant 0 : index
      %40 = vector.load %arg9[%c32, %c0_20] : memref<320x32xbf16, #tpu.memory_space<vmem>>, vector<256x32xbf16>
      tpu.vector_store %arg9[%c32, %c0_20], %39 {strides = array<i32>} : memref<320x32xbf16, #tpu.memory_space<vmem>>, vector<256x32xbf16>,
      %c15 = arith.constant 15 : index
      %c0_21 = arith.constant 0 : index
      %41 = vector.load %arg9[%c15, %c0_21] : memref<320x32xbf16, #tpu.memory_space<vmem>>, vector<256x32xbf16>
      %c0_22 = arith.constant 0 : index
      %c0_23 = arith.constant 0 : index
      %42 = vector.load %arg2[%c0_22, %c0_23] : memref<288x32xbf16, #tpu.memory_space<vmem>>, vector<32x32xbf16>
      %cst_24 = arith.constant dense<0.000000e+00> : vector<256x32xf32>
      %43 = tpu.matmul %41, %42, %cst_24 {dimension_numbers = #tpu.dot_dimension_numbers<[1], [0], [0], [1], [0, 0, 1, 1], [], []>} : vector<256x32xbf16>, vector<32x32xbf16>, vector<256x32xf32> -> vector<256x32xf32>
      %c16 = arith.constant 16 : index
      %c0_25 = arith.constant 0 : index
      %44 = vector.load %arg9[%c16, %c0_25] : memref<320x32xbf16, #tpu.memory_space<vmem>>, vector<256x32xbf16>
      %c32_26 = arith.constant 32 : index
      %c0_27 = arith.constant 0 : index
      %45 = vector.load %arg2[%c32_26, %c0_27] : memref<288x32xbf16, #tpu.memory_space<vmem>>, vector<32x32xbf16>
      %cst_28 = arith.constant dense<0.000000e+00> : vector<256x32xf32>
      %46 = tpu.matmul %44, %45, %cst_28 {dimension_numbers = #tpu.dot_dimension_numbers<[1], [0], [0], [1], [0, 0, 1, 1], [], []>} : vector<256x32xbf16>, vector<32x32xbf16>, vector<256x32xf32> -> vector<256x32xf32>
      %c17 = arith.constant 17 : index
      %c0_29 = arith.constant 0 : index
      %47 = vector.load %arg9[%c17, %c0_29] : memref<320x32xbf16, #tpu.memory_space<vmem>>, vector<256x32xbf16>
      %c64 = arith.constant 64 : index
      %c0_30 = arith.constant 0 : index
      %48 = vector.load %arg2[%c64, %c0_30] : memref<288x32xbf16, #tpu.memory_space<vmem>>, vector<32x32xbf16>
      %cst_31 = arith.constant dense<0.000000e+00> : vector<256x32xf32>
      %49 = tpu.matmul %47, %48, %cst_31 {dimension_numbers = #tpu.dot_dimension_numbers<[1], [0], [0], [1], [0, 0, 1, 1], [], []>} : vector<256x32xbf16>, vector<32x32xbf16>, vector<256x32xf32> -> vector<256x32xf32>
      %c31 = arith.constant 31 : index
      %c0_32 = arith.constant 0 : index
      %50 = vector.load %arg9[%c31, %c0_32] : memref<320x32xbf16, #tpu.memory_space<vmem>>, vector<256x32xbf16>
      %c96 = arith.constant 96 : index
      %c0_33 = arith.constant 0 : index
      %51 = vector.load %arg2[%c96, %c0_33] : memref<288x32xbf16, #tpu.memory_space<vmem>>, vector<32x32xbf16>
      %cst_34 = arith.constant dense<0.000000e+00> : vector<256x32xf32>
      %52 = tpu.matmul %50, %51, %cst_34 {dimension_numbers = #tpu.dot_dimension_numbers<[1], [0], [0], [1], [0, 0, 1, 1], [], []>} : vector<256x32xbf16>, vector<32x32xbf16>, vector<256x32xf32> -> vector<256x32xf32>
      %53 = arith.addf %43, %52 : vector<256x32xf32>
      %c32_35 = arith.constant 32 : index
      %c0_36 = arith.constant 0 : index
      %54 = vector.load %arg9[%c32_35, %c0_36] : memref<320x32xbf16, #tpu.memory_space<vmem>>, vector<256x32xbf16>
      %c128 = arith.constant 128 : index
      %c0_37 = arith.constant 0 : index
      %55 = vector.load %arg2[%c128, %c0_37] : memref<288x32xbf16, #tpu.memory_space<vmem>>, vector<32x32xbf16>
      %cst_38 = arith.constant dense<0.000000e+00> : vector<256x32xf32>
      %56 = tpu.matmul %54, %55, %cst_38 {dimension_numbers = #tpu.dot_dimension_numbers<[1], [0], [0], [1], [0, 0, 1, 1], [], []>} : vector<256x32xbf16>, vector<32x32xbf16>, vector<256x32xf32> -> vector<256x32xf32>
      %57 = arith.addf %46, %56 : vector<256x32xf32>
      %c33 = arith.constant 33 : index
      %c0_39 = arith.constant 0 : index
      %58 = vector.load %arg9[%c33, %c0_39] : memref<320x32xbf16, #tpu.memory_space<vmem>>, vector<256x32xbf16>
      %c160 = arith.constant 160 : index
      %c0_40 = arith.constant 0 : index
      %59 = vector.load %arg2[%c160, %c0_40] : memref<288x32xbf16, #tpu.memory_space<vmem>>, vector<32x32xbf16>
      %cst_41 = arith.constant dense<0.000000e+00> : vector<256x32xf32>
      %60 = tpu.matmul %58, %59, %cst_41 {dimension_numbers = #tpu.dot_dimension_numbers<[1], [0], [0], [1], [0, 0, 1, 1], [], []>} : vector<256x32xbf16>, vector<32x32xbf16>, vector<256x32xf32> -> vector<256x32xf32>
      %61 = arith.addf %49, %60 : vector<256x32xf32>
      %c47 = arith.constant 47 : index
      %c0_42 = arith.constant 0 : index
      %62 = vector.load %arg9[%c47, %c0_42] : memref<320x32xbf16, #tpu.memory_space<vmem>>, vector<256x32xbf16>
      %c192 = arith.constant 192 : index
      %c0_43 = arith.constant 0 : index
      %63 = vector.load %arg2[%c192, %c0_43] : memref<288x32xbf16, #tpu.memory_space<vmem>>, vector<32x32xbf16>
      %cst_44 = arith.constant dense<0.000000e+00> : vector<256x32xf32>
      %64 = tpu.matmul %62, %63, %cst_44 {dimension_numbers = #tpu.dot_dimension_numbers<[1], [0], [0], [1], [0, 0, 1, 1], [], []>} : vector<256x32xbf16>, vector<32x32xbf16>, vector<256x32xf32> -> vector<256x32xf32>
      %65 = arith.addf %53, %64 : vector<256x32xf32>
      %c48 = arith.constant 48 : index
      %c0_45 = arith.constant 0 : index
      %66 = vector.load %arg9[%c48, %c0_45] : memref<320x32xbf16, #tpu.memory_space<vmem>>, vector<256x32xbf16>
      %c224 = arith.constant 224 : index
      %c0_46 = arith.constant 0 : index
      %67 = vector.load %arg2[%c224, %c0_46] : memref<288x32xbf16, #tpu.memory_space<vmem>>, vector<32x32xbf16>
      %cst_47 = arith.constant dense<0.000000e+00> : vector<256x32xf32>
      %68 = tpu.matmul %66, %67, %cst_47 {dimension_numbers = #tpu.dot_dimension_numbers<[1], [0], [0], [1], [0, 0, 1, 1], [], []>} : vector<256x32xbf16>, vector<32x32xbf16>, vector<256x32xf32> -> vector<256x32xf32>
      %69 = arith.addf %57, %68 : vector<256x32xf32>
      %c49 = arith.constant 49 : index
      %c0_48 = arith.constant 0 : index
      %70 = vector.load %arg9[%c49, %c0_48] : memref<320x32xbf16, #tpu.memory_space<vmem>>, vector<256x32xbf16>
      %c256 = arith.constant 256 : index
      %c0_49 = arith.constant 0 : index
      %71 = vector.load %arg2[%c256, %c0_49] : memref<288x32xbf16, #tpu.memory_space<vmem>>, vector<32x32xbf16>
      %cst_50 = arith.constant dense<0.000000e+00> : vector<256x32xf32>
      %72 = tpu.matmul %70, %71, %cst_50 {dimension_numbers = #tpu.dot_dimension_numbers<[1], [0], [0], [1], [0, 0, 1, 1], [], []>} : vector<256x32xbf16>, vector<32x32xbf16>, vector<256x32xf32> -> vector<256x32xf32>
      %73 = arith.addf %61, %72 : vector<256x32xf32>
      %74 = vector.broadcast %23 : vector<256x1xf32> to vector<256x32xf32>
      %75 = arith.mulf %74, %65 : vector<256x32xf32>
      %76 = arith.addf %69, %75 : vector<256x32xf32>
      %77 = vector.broadcast %27 : vector<256x1xf32> to vector<256x32xf32>
      %78 = arith.mulf %77, %73 : vector<256x32xf32>
      %79 = arith.addf %76, %78 : vector<256x32xf32>
      %c0_51 = arith.constant 0 : index
      %c0_52 = arith.constant 0 : index
      %80 = vector.load %arg3[%c0_51, %c0_52] : memref<1x32xf32, #tpu.memory_space<vmem>>, vector<1x32xf32>
      %81 = vector.broadcast %80 : vector<1x32xf32> to vector<256x32xf32>
      %82 = arith.mulf %79, %81 : vector<256x32xf32>
      %c0_53 = arith.constant 0 : index
      %c0_54 = arith.constant 0 : index
      %83 = vector.load %arg4[%c0_53, %c0_54] : memref<1x32xf32, #tpu.memory_space<vmem>>, vector<1x32xf32>
      %84 = vector.broadcast %83 : vector<1x32xf32> to vector<256x32xf32>
      %85 = arith.addf %82, %84 : vector<256x32xf32>
      %cst_55 = arith.constant 0.000000e+00 : f32
      %86 = vector.broadcast %cst_55 : f32 to vector<256x32xf32>
      %87 = arith.maximumf %85, %86 : vector<256x32xf32>
      %88 = arith.truncf %87 : vector<256x32xf32> to vector<256x32xbf16>
      %c32_56 = arith.constant 32 : index
      %c0_57 = arith.constant 0 : index
      %89 = vector.load %arg9[%c32_56, %c0_57] : memref<320x32xbf16, #tpu.memory_space<vmem>>, vector<256x32xbf16>
      tpu.vector_store %arg9[%c32_56, %c0_57], %88 {strides = array<i32>} : memref<320x32xbf16, #tpu.memory_space<vmem>>, vector<256x32xbf16>,
      %c15_58 = arith.constant 15 : index
      %c0_59 = arith.constant 0 : index
      %90 = vector.load %arg9[%c15_58, %c0_59] : memref<320x32xbf16, #tpu.memory_space<vmem>>, vector<256x32xbf16>
      %c0_60 = arith.constant 0 : index
      %c0_61 = arith.constant 0 : index
      %91 = vector.load %arg5[%c0_60, %c0_61] : memref<288x32xbf16, #tpu.memory_space<vmem>>, vector<32x32xbf16>
      %cst_62 = arith.constant dense<0.000000e+00> : vector<256x32xf32>
      %92 = tpu.matmul %90, %91, %cst_62 {dimension_numbers = #tpu.dot_dimension_numbers<[1], [0], [0], [1], [0, 0, 1, 1], [], []>} : vector<256x32xbf16>, vector<32x32xbf16>, vector<256x32xf32> -> vector<256x32xf32>
      %c16_63 = arith.constant 16 : index
      %c0_64 = arith.constant 0 : index
      %93 = vector.load %arg9[%c16_63, %c0_64] : memref<320x32xbf16, #tpu.memory_space<vmem>>, vector<256x32xbf16>
      %c32_65 = arith.constant 32 : index
      %c0_66 = arith.constant 0 : index
      %94 = vector.load %arg5[%c32_65, %c0_66] : memref<288x32xbf16, #tpu.memory_space<vmem>>, vector<32x32xbf16>
      %cst_67 = arith.constant dense<0.000000e+00> : vector<256x32xf32>
      %95 = tpu.matmul %93, %94, %cst_67 {dimension_numbers = #tpu.dot_dimension_numbers<[1], [0], [0], [1], [0, 0, 1, 1], [], []>} : vector<256x32xbf16>, vector<32x32xbf16>, vector<256x32xf32> -> vector<256x32xf32>
      %c17_68 = arith.constant 17 : index
      %c0_69 = arith.constant 0 : index
      %96 = vector.load %arg9[%c17_68, %c0_69] : memref<320x32xbf16, #tpu.memory_space<vmem>>, vector<256x32xbf16>
      %c64_70 = arith.constant 64 : index
      %c0_71 = arith.constant 0 : index
      %97 = vector.load %arg5[%c64_70, %c0_71] : memref<288x32xbf16, #tpu.memory_space<vmem>>, vector<32x32xbf16>
      %cst_72 = arith.constant dense<0.000000e+00> : vector<256x32xf32>
      %98 = tpu.matmul %96, %97, %cst_72 {dimension_numbers = #tpu.dot_dimension_numbers<[1], [0], [0], [1], [0, 0, 1, 1], [], []>} : vector<256x32xbf16>, vector<32x32xbf16>, vector<256x32xf32> -> vector<256x32xf32>
      %c31_73 = arith.constant 31 : index
      %c0_74 = arith.constant 0 : index
      %99 = vector.load %arg9[%c31_73, %c0_74] : memref<320x32xbf16, #tpu.memory_space<vmem>>, vector<256x32xbf16>
      %c96_75 = arith.constant 96 : index
      %c0_76 = arith.constant 0 : index
      %100 = vector.load %arg5[%c96_75, %c0_76] : memref<288x32xbf16, #tpu.memory_space<vmem>>, vector<32x32xbf16>
      %cst_77 = arith.constant dense<0.000000e+00> : vector<256x32xf32>
      %101 = tpu.matmul %99, %100, %cst_77 {dimension_numbers = #tpu.dot_dimension_numbers<[1], [0], [0], [1], [0, 0, 1, 1], [], []>} : vector<256x32xbf16>, vector<32x32xbf16>, vector<256x32xf32> -> vector<256x32xf32>
      %102 = arith.addf %92, %101 : vector<256x32xf32>
      %c32_78 = arith.constant 32 : index
      %c0_79 = arith.constant 0 : index
      %103 = vector.load %arg9[%c32_78, %c0_79] : memref<320x32xbf16, #tpu.memory_space<vmem>>, vector<256x32xbf16>
      %c128_80 = arith.constant 128 : index
      %c0_81 = arith.constant 0 : index
      %104 = vector.load %arg5[%c128_80, %c0_81] : memref<288x32xbf16, #tpu.memory_space<vmem>>, vector<32x32xbf16>
      %cst_82 = arith.constant dense<0.000000e+00> : vector<256x32xf32>
      %105 = tpu.matmul %103, %104, %cst_82 {dimension_numbers = #tpu.dot_dimension_numbers<[1], [0], [0], [1], [0, 0, 1, 1], [], []>} : vector<256x32xbf16>, vector<32x32xbf16>, vector<256x32xf32> -> vector<256x32xf32>
      %106 = arith.addf %95, %105 : vector<256x32xf32>
      %c33_83 = arith.constant 33 : index
      %c0_84 = arith.constant 0 : index
      %107 = vector.load %arg9[%c33_83, %c0_84] : memref<320x32xbf16, #tpu.memory_space<vmem>>, vector<256x32xbf16>
      %c160_85 = arith.constant 160 : index
      %c0_86 = arith.constant 0 : index
      %108 = vector.load %arg5[%c160_85, %c0_86] : memref<288x32xbf16, #tpu.memory_space<vmem>>, vector<32x32xbf16>
      %cst_87 = arith.constant dense<0.000000e+00> : vector<256x32xf32>
      %109 = tpu.matmul %107, %108, %cst_87 {dimension_numbers = #tpu.dot_dimension_numbers<[1], [0], [0], [1], [0, 0, 1, 1], [], []>} : vector<256x32xbf16>, vector<32x32xbf16>, vector<256x32xf32> -> vector<256x32xf32>
      %110 = arith.addf %98, %109 : vector<256x32xf32>
      %c47_88 = arith.constant 47 : index
      %c0_89 = arith.constant 0 : index
      %111 = vector.load %arg9[%c47_88, %c0_89] : memref<320x32xbf16, #tpu.memory_space<vmem>>, vector<256x32xbf16>
      %c192_90 = arith.constant 192 : index
      %c0_91 = arith.constant 0 : index
      %112 = vector.load %arg5[%c192_90, %c0_91] : memref<288x32xbf16, #tpu.memory_space<vmem>>, vector<32x32xbf16>
      %cst_92 = arith.constant dense<0.000000e+00> : vector<256x32xf32>
      %113 = tpu.matmul %111, %112, %cst_92 {dimension_numbers = #tpu.dot_dimension_numbers<[1], [0], [0], [1], [0, 0, 1, 1], [], []>} : vector<256x32xbf16>, vector<32x32xbf16>, vector<256x32xf32> -> vector<256x32xf32>
      %114 = arith.addf %102, %113 : vector<256x32xf32>
      %c48_93 = arith.constant 48 : index
      %c0_94 = arith.constant 0 : index
      %115 = vector.load %arg9[%c48_93, %c0_94] : memref<320x32xbf16, #tpu.memory_space<vmem>>, vector<256x32xbf16>
      %c224_95 = arith.constant 224 : index
      %c0_96 = arith.constant 0 : index
      %116 = vector.load %arg5[%c224_95, %c0_96] : memref<288x32xbf16, #tpu.memory_space<vmem>>, vector<32x32xbf16>
      %cst_97 = arith.constant dense<0.000000e+00> : vector<256x32xf32>
      %117 = tpu.matmul %115, %116, %cst_97 {dimension_numbers = #tpu.dot_dimension_numbers<[1], [0], [0], [1], [0, 0, 1, 1], [], []>} : vector<256x32xbf16>, vector<32x32xbf16>, vector<256x32xf32> -> vector<256x32xf32>
      %118 = arith.addf %106, %117 : vector<256x32xf32>
      %c49_98 = arith.constant 49 : index
      %c0_99 = arith.constant 0 : index
      %119 = vector.load %arg9[%c49_98, %c0_99] : memref<320x32xbf16, #tpu.memory_space<vmem>>, vector<256x32xbf16>
      %c256_100 = arith.constant 256 : index
      %c0_101 = arith.constant 0 : index
      %120 = vector.load %arg5[%c256_100, %c0_101] : memref<288x32xbf16, #tpu.memory_space<vmem>>, vector<32x32xbf16>
      %cst_102 = arith.constant dense<0.000000e+00> : vector<256x32xf32>
      %121 = tpu.matmul %119, %120, %cst_102 {dimension_numbers = #tpu.dot_dimension_numbers<[1], [0], [0], [1], [0, 0, 1, 1], [], []>} : vector<256x32xbf16>, vector<32x32xbf16>, vector<256x32xf32> -> vector<256x32xf32>
      %122 = arith.addf %110, %121 : vector<256x32xf32>
      %123 = vector.broadcast %23 : vector<256x1xf32> to vector<256x32xf32>
      %124 = arith.mulf %123, %114 : vector<256x32xf32>
      %125 = arith.addf %118, %124 : vector<256x32xf32>
      %126 = vector.broadcast %27 : vector<256x1xf32> to vector<256x32xf32>
      %127 = arith.mulf %126, %122 : vector<256x32xf32>
      %128 = arith.addf %125, %127 : vector<256x32xf32>
      %c0_103 = arith.constant 0 : index
      %c0_104 = arith.constant 0 : index
      %129 = vector.load %arg6[%c0_103, %c0_104] : memref<1x32xf32, #tpu.memory_space<vmem>>, vector<1x32xf32>
      %130 = vector.broadcast %129 : vector<1x32xf32> to vector<256x32xf32>
      %131 = arith.mulf %128, %130 : vector<256x32xf32>
      %c0_105 = arith.constant 0 : index
      %c0_106 = arith.constant 0 : index
      %132 = vector.load %arg7[%c0_105, %c0_106] : memref<1x32xf32, #tpu.memory_space<vmem>>, vector<1x32xf32>
      %133 = vector.broadcast %132 : vector<1x32xf32> to vector<256x32xf32>
      %134 = arith.addf %131, %133 : vector<256x32xf32>
      %135 = arith.addf %38, %134 : vector<256x32xf32>
      %cst_107 = arith.constant 0.000000e+00 : f32
      %136 = vector.broadcast %cst_107 : f32 to vector<256x32xf32>
      %137 = arith.maximumf %135, %136 : vector<256x32xf32>
      %c0_108 = arith.constant 0 : index
      %c0_109 = arith.constant 0 : index
      %138 = vector.load %arg10[%c0_108, %c0_109] : memref<256x32xf32, #tpu.memory_space<vmem>>, vector<256x32xf32>
      tpu.vector_store %arg10[%c0_108, %c0_109], %137 {strides = array<i32>} : memref<256x32xf32, #tpu.memory_space<vmem>>, vector<256x32xf32>,
    }
    %c0_13 = arith.constant 0 : index
    %c0_14 = arith.constant 0 : index
    %33 = vector.load %arg10[%c0_13, %c0_14] : memref<256x32xf32, #tpu.memory_space<vmem>>, vector<256x32xf32>
    %34 = arith.truncf %33 : vector<256x32xf32> to vector<256x32xbf16>
    %c0_15 = arith.constant 0 : index
    %c0_16 = arith.constant 0 : index
    %c0_17 = arith.constant 0 : index
    %35 = vector.load %arg8[%c0_15, %c0_16, %c0_17] : memref<1x256x32xbf16, #tpu.memory_space<vmem>>, vector<1x256x32xbf16>
    %36 = vector.shape_cast %35 : vector<1x256x32xbf16> to vector<256x32xbf16>
    %37 = vector.shape_cast %34 : vector<256x32xbf16> to vector<1x256x32xbf16>
    tpu.vector_store %arg8[%c0_15, %c0_16, %c0_17], %37 {strides = array<i32>} : memref<1x256x32xbf16, #tpu.memory_space<vmem>>, vector<1x256x32xbf16>,
    return
  }
  func.func @transform_0(%arg0: i32) -> (i32, i32, i32) {
    %c0_i32 = arith.constant 0 : i32
    %c0_i32_0 = arith.constant 0 : i32
    %c0_i32_1 = arith.constant 0 : i32
    return %arg0, %c0_i32, %c0_i32_0 : i32, i32, i32
  }
  func.func @transform_1(%arg0: i32) -> (i32, i32) {
    %c0_i32 = arith.constant 0 : i32
    %c0_i32_0 = arith.constant 0 : i32
    %c0_i32_1 = arith.constant 0 : i32
    return %c0_i32, %c0_i32_0 : i32, i32
  }
  func.func @transform_2(%arg0: i32) -> (i32, i32) {
    %c0_i32 = arith.constant 0 : i32
    %c0_i32_0 = arith.constant 0 : i32
    %c0_i32_1 = arith.constant 0 : i32
    return %c0_i32, %c0_i32_0 : i32, i32
  }
  func.func @transform_3(%arg0: i32) -> (i32, i32) {
    %c0_i32 = arith.constant 0 : i32
    %c0_i32_0 = arith.constant 0 : i32
    %c0_i32_1 = arith.constant 0 : i32
    return %c0_i32, %c0_i32_0 : i32, i32
  }
  func.func @transform_4(%arg0: i32) -> (i32, i32) {
    %c0_i32 = arith.constant 0 : i32
    %c0_i32_0 = arith.constant 0 : i32
    %c0_i32_1 = arith.constant 0 : i32
    return %c0_i32, %c0_i32_0 : i32, i32
  }
  func.func @transform_5(%arg0: i32) -> (i32, i32) {
    %c0_i32 = arith.constant 0 : i32
    %c0_i32_0 = arith.constant 0 : i32
    %c0_i32_1 = arith.constant 0 : i32
    return %c0_i32, %c0_i32_0 : i32, i32
  }
  func.func @transform_6(%arg0: i32) -> (i32, i32) {
    %c0_i32 = arith.constant 0 : i32
    %c0_i32_0 = arith.constant 0 : i32
    %c0_i32_1 = arith.constant 0 : i32
    return %c0_i32, %c0_i32_0 : i32, i32
  }
  func.func @transform_7(%arg0: i32) -> (i32, i32, i32) {
    %c0_i32 = arith.constant 0 : i32
    %c0_i32_0 = arith.constant 0 : i32
    %c0_i32_1 = arith.constant 0 : i32
    return %arg0, %c0_i32, %c0_i32_0 : i32, i32, i32
  }
}

</mosaic_0001>

<bundles_post_ra>
// kernel: tpu_custom_call.1
= control target key start
LH: loop header
LB: loop body
LE: loop exit
PB: predicated region body
PF: predicated region fallthrough
CT: control target
= control target key end

     0   :  { %s8875_s24 = smov 0   ;;  %s11394_s0 = inlined_call_operand.vmem [shape: bf16[2,256,32], index: 0, kind: input, shape index: {}]   ;;  %s11395_s1 = inlined_call_operand.vmem [shape: bf16[288,32], index: 1, kind: input, shape index: {}]   ;;  %s11396_s2 = inlined_call_operand.vmem [shape: f32[1,32], index: 2, kind: input, shape index: {}]   ;;  %s11397_s3 = inlined_call_operand.vmem [shape: f32[1,32], index: 3, kind: input, shape index: {}]   ;;  %s11398_s4 = inlined_call_operand.vmem [shape: bf16[288,32], index: 4, kind: input, shape index: {}]   ;;  %s11399_s5 = inlined_call_operand.vmem [shape: f32[1,32], index: 5, kind: input, shape index: {}]   ;;  %s11400_s6 = inlined_call_operand.vmem [shape: f32[1,32], index: 6, kind: input, shape index: {}]   ;;  %s11401_s7 = inlined_call_operand.vmem [shape: bf16[2,256,32], index: 7, kind: output, shape index: {}]  }
   0x1 LB: > { %s7073_s25 = sadd.s32 4294967295, %s8827_s24   ;;  %p7077_p0 = scmp.ge.s32.totalorder %s8827_s24, 1  ;;  %s8827_s24 = sphi %s8875_s24, %s17_s24  }
   0x2   : > { %p237_p1 = scmp.lt.s32.totalorder %s8827_s24, 3 }
   0x4   : > { %p238_p2 = pnand %p7077_p0, %p237_p1 }
   0x6   : > { %241 = sbr.rel (%p238_p2) target bundleno = 1611 (0x64b), region = 48 }
   0xb   : > { %vm11402_vm0 = vcmask 257024   ;;  %v289_v0 = vlaneseq  ;;  %p269_p3 = scmp.lt.s32.totalorder %s7073_s25, 1  ;;  %v8833_v1 = vmov 0   ;;  %s9308_s10 = smov 0  }
   0xc   : > { %282 = vst.msk [vmem:[#allocation2 + $0x4] sm:$0xf] %vm11402_vm0, %v8833_v1 }
   0xd   : > { %v8884_v2 = vshrl.u32 %v289_v0, 7  ;;  %283 = vst.msk [vmem:[#allocation2 + $0x8] sm:$0xf] %vm11402_vm0, %v8833_v1  ;;  %s12298_s25 = smov (!%p269_p3, %s7073_s25), 1 }
   0xe   : > { %284 = vst.msk [vmem:[#allocation2 + $0xc] sm:$0xf] %vm11402_vm0, %v8833_v1  ;;  %s7804_s26 = sshll.u32 %s12298_s25, 7 }
   0xf   : > { %v8891_v3 = vadd.s32 8, %v8884_v2  ;;  %v8894_v4 = vadd.s32 16, %v8884_v2  ;;  %v8897_v5 = vadd.s32 24, %v8884_v2  ;;  %v8900_v6 = vadd.s32 32, %v8884_v2  ;;  %285 = vst.msk [vmem:[#allocation2 + $0x90] sm:$0xf] %vm11402_vm0, %v8833_v1  ;;  %s8963_s29 = scalar_lea.vmem %s11401_s7, %s7804_s26  ;;  %s9166_s9 = scalar_lea.vmem %s11394_s0, %s7804_s26 }
  0x10   : > { %v8904_v7 = vadd.s32 40, %v8884_v2  ;;  %v8907_v8 = vadd.s32 48, %v8884_v2  ;;  %v8910_v9 = vadd.s32 56, %v8884_v2  ;;  %v8913_v10 = vadd.s32 64, %v8884_v2  ;;  %286 = vst.msk [vmem:[#allocation2 + $0x94] sm:$0xf] %vm11402_vm0, %v8833_v1 }
  0x11   : > { %v8917_v11 = vadd.s32 72, %v8884_v2  ;;  %v300_v12 = vadd.s32 80, %v8884_v2  ;;  %v8921_v13 = vadd.s32 88, %v8884_v2  ;;  %v302_v14 = vadd.s32 96, %v8884_v2  ;;  %287 = vst.msk [vmem:[#allocation2 + $0x98] sm:$0xf] %vm11402_vm0, %v8833_v1 }
  0x12   : > { %v8926_v15 = vadd.s32 104, %v8884_v2  ;;  %v304_v16 = vadd.s32 112, %v8884_v2  ;;  %v8930_v17 = vadd.s32 120, %v8884_v2  ;;  %v306_v18 = vadd.s32 128, %v8884_v2 }
  0x13   : > { %v8934_v19 = vadd.s32 136, %v8884_v2  ;;  %v308_v20 = vadd.s32 144, %v8884_v2  ;;  %v8938_v21 = vadd.s32 152, %v8884_v2  ;;  %v310_v22 = vadd.s32 160, %v8884_v2 }
  0x14   : > { %v8942_v23 = vadd.s32 168, %v8884_v2  ;;  %v312_v24 = vadd.s32 176, %v8884_v2  ;;  %v8946_v25 = vadd.s32 184, %v8884_v2  ;;  %v314_v26 = vadd.s32 192, %v8884_v2 }
  0x15   : > { %v8951_v27 = vadd.s32 200, %v8884_v2  ;;  %v316_v28 = vadd.s32 208, %v8884_v2  ;;  %v8955_v29 = vadd.s32 216, %v8884_v2  ;;  %v318_v30 = vadd.s32 224, %v8884_v2 }
  0x16   : > { %v8966_v31 = vadd.s32 232, %v8884_v2  ;;  %v320_v32 = vadd.s32 240, %v8884_v2  ;;  %v8970_v33 = vadd.s32 248, %v8884_v2  ;;  %v326_v34 = vand.u32 15, %v8884_v2  ;;  %v8235_v2 = vld [vmem:[%s9166_s9 + $0x10] sm:$0xff]  }
  0x17   : > { %v333_v35 = vand.u32 15, %v8891_v3  ;;  %v340_v36 = vand.u32 15, %v8894_v4  ;;  %v347_v37 = vand.u32 15, %v8897_v5  ;;  %v354_v38 = vand.u32 15, %v8900_v6  ;;  %v8241_v5 = vld [vmem:[%s9166_s9 + $0x40] sm:$0xff]  }
  0x18   : > { %v361_v39 = vand.u32 15, %v8904_v7  ;;  %v368_v40 = vand.u32 15, %v8907_v8  ;;  %v375_v41 = vand.u32 15, %v8910_v9  ;;  %v382_v42 = vand.u32 15, %v8913_v10 }
  0x19   : > { %v389_v43 = vand.u32 15, %v8917_v11  ;;  %v396_v44 = vand.u32 15, %v300_v12  ;;  %v403_v45 = vand.u32 15, %v8921_v13  ;;  %v410_v46 = vand.u32 15, %v302_v14  ;;  %v8236_v12 = vld [vmem:[%s9166_s9 + $0x18] sm:$0xff]  }
  0x1a   : > { %v417_v47 = vand.u32 15, %v8926_v15  ;;  %v424_v48 = vand.u32 15, %v304_v16  ;;  %v431_v49 = vand.u32 15, %v8930_v17  ;;  %v438_v50 = vand.u32 15, %v306_v18  ;;  %v8237_v15 = vld [vmem:[%s9166_s9 + $0x20] sm:$0xff]   ;;  %v8238_v18 = vld [vmem:[%s9166_s9 + $0x28] sm:$0xff]  }
  0x1b   : > { %v445_v51 = vand.u32 15, %v8934_v19  ;;  %v452_v52 = vand.u32 15, %v308_v20  ;;  %v459_v53 = vand.u32 15, %v8938_v21  ;;  %v466_v54 = vand.u32 15, %v310_v22 }
  0x1c   : > { %v473_v55 = vand.u32 15, %v8942_v23  ;;  %v480_v56 = vand.u32 15, %v312_v24  ;;  %v487_v57 = vand.u32 15, %v8946_v25  ;;  %v494_v58 = vand.u32 15, %v314_v26 }
  0x1d   : > { %v501_v59 = vand.u32 15, %v8951_v27  ;;  %v508_v60 = vand.u32 15, %v316_v28  ;;  %v515_v61 = vand.u32 15, %v8955_v29  ;;  %v522_v62 = vand.u32 15, %v318_v30 }
  0x1e   : > { %v529_v63 = vand.u32 15, %v8966_v31  ;;  %v536_v0 = vand.u32 15, %v320_v32  ;;  %v543_v1 = vand.u32 15, %v8970_v33  ;;  %vm8993_vm1 = vcmp.ne.s32.totalorder %v326_v34, 0 }
  0x1f   : > { %vm8997_vm2 = vcmp.ne.s32.totalorder %v340_v36, 0  ;;  %vm9001_vm3 = vcmp.ne.s32.totalorder %v354_v38, 0  ;;  %vm9005_vm4 = vcmp.ne.s32.totalorder %v368_v40, 0  ;;  %vm9009_vm5 = vcmp.ne.s32.totalorder %v382_v42, 0  ;;  %v8239_v40 = vld [vmem:[%s9166_s9 + $0x30] sm:$0xff]  }
  0x20   : > { %vm9013_vm6 = vcmp.ne.s32.totalorder %v396_v44, 0  ;;  %vm9017_vm7 = vcmp.ne.s32.totalorder %v410_v46, 0  ;;  %vm9021_vm8 = vcmp.ne.s32.totalorder %v424_v48, 0  ;;  %vm9025_vm9 = vcmp.ne.s32.totalorder %v438_v50, 0  ;;  %v8240_v46 = vld [vmem:[%s9166_s9 + $0x38] sm:$0xff]  }
  0x21   : > { %vm9029_vm10 = vcmp.ne.s32.totalorder %v452_v52, 0  ;;  %vm9033_vm11 = vcmp.ne.s32.totalorder %v466_v54, 0  ;;  %vm9037_vm12 = vcmp.ne.s32.totalorder %v480_v56, 0  ;;  %vm9041_vm13 = vcmp.ne.s32.totalorder %v494_v58, 0  ;;  %v7907_v56 = vld [vmem:[%s9166_s9] sm:$0xff]   ;;  %v8244_v50 = vld [vmem:[%s9166_s9 + $0x58] sm:$0xff]  }
  0x22   : > { %vm9045_vm14 = vcmp.ne.s32.totalorder %v508_v60, 0  ;;  %vm9049_vm15 = vcmp.ne.s32.totalorder %v522_v62, 0  ;;  %vm9053_vm0 = vcmp.ne.s32.totalorder %v536_v0, 0  ;;  %v8834_v20 = vmov 0.0  }
  0x23   : > { %v9059_v21 = vsel %vm8993_vm1, 1.0, %v8834_v20  ;;  %v9063_v22 = vsel %vm8997_vm2, 1.0, %v8834_v20  ;;  %v9067_v23 = vsel %vm9001_vm3, 1.0, %v8834_v20  ;;  %v9071_v24 = vsel %vm9005_vm4, 1.0, %v8834_v20 }
  0x24   : > { %11463 = vst [vmem:[#allocation4_spill] sm:$0xff] %v9059_v21  ;;  %v9075_v25 = vsel %vm9009_vm5, 1.0, %v8834_v20  ;;  %v9079_v26 = vsel %vm9013_vm6, 1.0, %v8834_v20  ;;  %v9083_v27 = vsel %vm9017_vm7, 1.0, %v8834_v20  ;;  %v9087_v28 = vsel %vm9021_vm8, 1.0, %v8834_v20 }
  0x25   : > { %11464 = vst [vmem:[#allocation5_spill] sm:$0xff] %v9063_v22  ;;  %v9091_v29 = vsel %vm9025_vm9, 1.0, %v8834_v20  ;;  %v9095_v30 = vsel %vm9029_vm10, 1.0, %v8834_v20  ;;  %v9099_v31 = vsel %vm9033_vm11, 1.0, %v8834_v20  ;;  %v9103_v32 = vsel %vm9037_vm12, 1.0, %v8834_v20 }
  0x26   : > { %11465 = vst [vmem:[#allocation6_spill] sm:$0xff] %v9067_v23  ;;  %v9107_v33 = vsel %vm9041_vm13, 1.0, %v8834_v20  ;;  %v9111_v34 = vsel %vm9045_vm14, 1.0, %v8834_v20  ;;  %v9115_v36 = vsel %vm9049_vm15, 1.0, %v8834_v20  ;;  %v9119_v38 = vsel %vm9053_vm0, 1.0, %v8834_v20 }
  0x27   : > { %11466 = vst [vmem:[#allocation7_spill] sm:$0xff] %v9071_v24  ;;  %vm9123_vm2 = vcmp.ne.s32.totalorder %v333_v35, 15  ;;  %vm9129_vm3 = vcmp.ne.s32.totalorder %v347_v37, 15  ;;  %vm9133_vm4 = vcmp.ne.s32.totalorder %v361_v39, 15  ;;  %vm9137_vm5 = vcmp.ne.s32.totalorder %v375_v41, 15  ;;  %v8242_v41 = vld [vmem:[%s9166_s9 + $0x48] sm:$0xff]  }
  0x28   : > { %11467 = vst [vmem:[#allocation8_spill] sm:$0xff] %v9075_v25  ;;  %vm9141_vm0 = vcmp.ne.s32.totalorder %v389_v43, 15  ;;  %vm9145_vm6 = vcmp.ne.s32.totalorder %v403_v45, 15  ;;  %vm9149_vm7 = vcmp.ne.s32.totalorder %v417_v47, 15  ;;  %vm9153_vm8 = vcmp.ne.s32.totalorder %v431_v49, 15  ;;  %v8243_v47 = vld [vmem:[%s9166_s9 + $0x50] sm:$0xff]  }
  0x29   : > { %11468 = vst [vmem:[#allocation9_spill] sm:$0xff] %v9079_v26  ;;  %vm9157_vm9 = vcmp.ne.s32.totalorder %v445_v51, 15  ;;  %vm9168_vm10 = vcmp.ne.s32.totalorder %v459_v53, 15  ;;  %vm9172_vm11 = vcmp.ne.s32.totalorder %v473_v55, 15  ;;  %vm9176_vm12 = vcmp.ne.s32.totalorder %v487_v57, 15 }
  0x2a   : > { %11469 = vst [vmem:[#allocation10_spill] sm:$0xff] %v9083_v27  ;;  %vm9180_vm13 = vcmp.ne.s32.totalorder %v501_v59, 15  ;;  %vm9184_vm14 = vcmp.ne.s32.totalorder %v515_v61, 15  ;;  %vm9188_vm15 = vcmp.ne.s32.totalorder %v529_v63, 15  ;;  %vm9192_vm1 = vcmp.ne.s32.totalorder %v543_v1, 15  ;;  %v8234_v61 = vld [vmem:[%s9166_s9 + $0x8] sm:$0xff]  }
  0x2b   : > { %11470 = vst [vmem:[#allocation11_spill] sm:$0xff] %v9087_v28  ;;  %v9198_v51 = vsel %vm9123_vm2, 1.0, %v8834_v20  ;;  %v9202_v52 = vsel %vm9129_vm3, 1.0, %v8834_v20  ;;  %v9206_v53 = vsel %vm9133_vm4, 1.0, %v8834_v20  ;;  %v9210_v54 = vsel %vm9137_vm5, 1.0, %v8834_v20 }
  0x2c   : > { %11471 = vst [vmem:[#allocation12_spill] sm:$0xff] %v9091_v29  ;;  %v9214_v55 = vsel %vm9141_vm0, 1.0, %v8834_v20  ;;  %v9219_v57 = vsel %vm9145_vm6, 1.0, %v8834_v20  ;;  %v9223_v58 = vsel %vm9149_vm7, 1.0, %v8834_v20  ;;  %v9227_v59 = vsel %vm9153_vm8, 1.0, %v8834_v20 }
  0x2d   : > { %11472 = vst [vmem:[#allocation13_spill] sm:$0xff] %v9095_v30  ;;  %v9231_v60 = vsel %vm9157_vm9, 1.0, %v8834_v20  ;;  %v9236_v62 = vsel %vm9168_vm10, 1.0, %v8834_v20  ;;  %v9240_v63 = vsel %vm9172_vm11, 1.0, %v8834_v20  ;;  %v9244_v0 = vsel %vm9176_vm12, 1.0, %v8834_v20 }
  0x2e   : > { %11473 = vst [vmem:[#allocation14_spill] sm:$0xff] %v9099_v31  ;;  %v9248_v1 = vsel %vm9180_vm13, 1.0, %v8834_v20  ;;  %v9253_v4 = vsel %vm9184_vm14, 1.0, %v8834_v20  ;;  %v9257_v6 = vsel %vm9188_vm15, 1.0, %v8834_v20  ;;  %v9261_v7 = vsel %vm9192_vm1, 1.0, %v8834_v20 }
  0x2f   : > { %11474 = vst [vmem:[#allocation15_spill] sm:$0xff] %v9103_v32  ;;  %v7908_v8 = vunpack.c.l.bf16 %v7907_v56  ;;  %v7909_v9 = vunpack.c.h.bf16 %v7907_v56  ;;  %v7912_v10 = vunpack.c.l.bf16 %v8234_v61  ;;  %v7913_v11 = vunpack.c.h.bf16 %v8234_v61 }
  0x30   : > { %11475 = vst [vmem:[#allocation16_spill] sm:$0xff] %v9107_v33  ;;  %vm11527_vm2 = vcmask 261120   ;;  %v7916_v13 = vunpack.c.l.bf16 %v8235_v2  ;;  %v7917_v14 = vunpack.c.h.bf16 %v8235_v2  ;;  %v7920_v16 = vunpack.c.l.bf16 %v8236_v12  ;;  %v8245_v2 = vld [vmem:[%s9166_s9 + $0x60] sm:$0xff]  }
  0x31   : > { %11476 = vst [vmem:[#allocation17_spill] sm:$0xff] %v9111_v34  ;;  %vm11528_vm3 = vmmov %vm11527_vm2  ;;  %v7921_v17 = vunpack.c.h.bf16 %v8236_v12  ;;  %v7924_v19 = vunpack.c.l.bf16 %v8237_v15  ;;  %v7925_v20 = vunpack.c.h.bf16 %v8237_v15  ;;  %v7928_v42 = vunpack.c.l.bf16 %v8238_v18 }
  0x32   : > { %11477 = vst [vmem:[#allocation18_spill] sm:$0xff] %v9115_v36  ;;  %vm11529_vm4 = vmmov %vm11527_vm2  ;;  %v7929_v44 = vunpack.c.h.bf16 %v8238_v18  ;;  %v7932_v3 = vunpack.c.l.bf16 %v8239_v40  ;;  %v7933_v35 = vunpack.c.h.bf16 %v8239_v40  ;;  %v7936_v37 = vunpack.c.l.bf16 %v8240_v46 }
  0x33   : > { %11478 = vst [vmem:[#allocation19_spill] sm:$0xff] %v9119_v38  ;;  %vm11530_vm5 = vmmov %vm11527_vm2  ;;  %v7937_v39 = vunpack.c.h.bf16 %v8240_v46  ;;  %v7940_v43 = vunpack.c.l.bf16 %v8241_v5  ;;  %v7941_v45 = vunpack.c.h.bf16 %v8241_v5  ;;  %v7944_v48 = vunpack.c.l.bf16 %v8242_v41 }
  0x34   : > { %11511 = vst [vmem:[#allocation20_spill] sm:$0xff] %v9198_v51  ;;  %vm11531_vm1 = vmmov %vm11527_vm2  ;;  %v7945_v49 = vunpack.c.h.bf16 %v8242_v41  ;;  %v7948_v56 = vunpack.c.l.bf16 %v8243_v47  ;;  %v7949_v61 = vunpack.c.h.bf16 %v8243_v47  ;;  %v7957_v12 = vunpack.c.h.bf16 %v8245_v2 }
  0x35   : > { %11512 = vst [vmem:[#allocation21_spill] sm:$0xff] %v9202_v52  ;;  %vm11532_vm0 = vmmov %vm11531_vm1 }
  0x36   : > { %11513 = vst [vmem:[#allocation22_spill] sm:$0xff] %v9206_v53  ;;  %vm11533_vm6 = vmmov %vm11532_vm0 }
  0x37   : > { %11514 = vst [vmem:[#allocation23_spill] sm:$0xff] %v9210_v54  ;;  %vm11534_vm7 = vmmov %vm11532_vm0 }
  0x38   : > { %11515 = vst [vmem:[#allocation24_spill] sm:$0xff] %v9214_v55  ;;  %vm11535_vm8 = vmmov %vm11532_vm0 }
  0x39   : > { %11516 = vst [vmem:[#allocation25_spill] sm:$0xff] %v9219_v57  ;;  %vm11536_vm9 = vmmov %vm11532_vm0 }
  0x3a   : > { %11517 = vst [vmem:[#allocation26_spill] sm:$0xff] %v9223_v58  ;;  %vm11537_vm10 = vmmov %vm11532_vm0 }
  0x3b   : > { %11518 = vst [vmem:[#allocation27_spill] sm:$0xff] %v9227_v59  ;;  %vm11538_vm11 = vmmov %vm11532_vm0 }
  0x3c   : > { %11519 = vst [vmem:[#allocation28_spill] sm:$0xff] %v9231_v60  ;;  %vm11539_vm12 = vmmov %vm11532_vm0 }
  0x3d   : > { %11520 = vst [vmem:[#allocation29_spill] sm:$0xff] %v9236_v62  ;;  %vm11540_vm13 = vmmov %vm11532_vm0 }
  0x3e   : > { %11521 = vst [vmem:[#allocation30_spill] sm:$0xff] %v9240_v63  ;;  %vm11541_vm14 = vmmov %vm11532_vm0 }
  0x3f   : > { %11522 = vst [vmem:[#allocation31_spill] sm:$0xff] %v9244_v0  ;;  %vm11542_vm15 = vmmov %vm11532_vm0 }
  0x40   : > { %11523 = vst [vmem:[#allocation32_spill] sm:$0xff] %v9248_v1 }
  0x41   : > { %11524 = vst [vmem:[#allocation33_spill] sm:$0xff] %v9253_v4 }
  0x42   : > { %11525 = vst [vmem:[#allocation34_spill] sm:$0xff] %v9257_v6 }
  0x43   : > { %11526 = vst [vmem:[#allocation35_spill] sm:$0xff] %v9261_v7 }
  0x44   : > { %963 = vst.msk [vmem:[#allocation3] sm:$0xff] %vm11527_vm2, %v7908_v8  ;;  %vm11543_vm2 = vmmov %vm11532_vm0  ;;  %v7952_v8 = vunpack.c.l.bf16 %v8244_v50 }
  0x45   : > { %964 = vst.msk [vmem:[#allocation3 + $0x8] sm:$0xff] %vm11528_vm3, %v7909_v9  ;;  %vm11544_vm3 = vmmov %vm11532_vm0  ;;  %v7953_v9 = vunpack.c.h.bf16 %v8244_v50 }
  0x46   : > { %965 = vst.msk [vmem:[#allocation3 + $0x10] sm:$0xff] %vm11529_vm4, %v7912_v10  ;;  %vm11545_vm4 = vmmov %vm11532_vm0  ;;  %v8246_v10 = vld [vmem:[%s9166_s9 + $0x68] sm:$0xff]  }
  0x47   : > { %966 = vst.msk [vmem:[#allocation3 + $0x18] sm:$0xff] %vm11530_vm5, %v7913_v11  ;;  %vm11546_vm5 = vmmov %vm11532_vm0  ;;  %v7956_v11 = vunpack.c.l.bf16 %v8245_v2  ;;  %v7961_v15 = vunpack.c.h.bf16 %v8246_v10 }
  0x48   : > { %967 = vst.msk [vmem:[#allocation3 + $0x20] sm:$0xff] %vm11531_vm1, %v7916_v13  ;;  %vm11547_vm1 = vmmov %vm11532_vm0  ;;  %v8247_v13 = vld [vmem:[%s9166_s9 + $0x70] sm:$0xff]  }
  0x49   : > { %968 = vst.msk [vmem:[#allocation3 + $0x28] sm:$0xff] %vm11532_vm0, %v7917_v14  ;;  %v7960_v14 = vunpack.c.l.bf16 %v8246_v10  ;;  %v7965_v18 = vunpack.c.h.bf16 %v8247_v13 }
  0x4a   : > { %969 = vst.msk [vmem:[#allocation3 + $0x30] sm:$0xff] %vm11533_vm6, %v7920_v16  ;;  %vm11548_vm6 = vmmov %vm11532_vm0  ;;  %v8248_v16 = vld [vmem:[%s9166_s9 + $0x78] sm:$0xff]  }
  0x4b   : > { %970 = vst.msk [vmem:[#allocation3 + $0x38] sm:$0xff] %vm11534_vm7, %v7921_v17  ;;  %vm11549_vm7 = vmmov %vm11532_vm0  ;;  %v7964_v17 = vunpack.c.l.bf16 %v8247_v13 }
  0x4c   : > { %971 = vst.msk [vmem:[#allocation3 + $0x40] sm:$0xff] %vm11535_vm8, %v7924_v19  ;;  %vm11550_vm8 = vmmov %vm11532_vm0  ;;  %v7968_v19 = vunpack.c.l.bf16 %v8248_v16 }
  0x4d   : > { %972 = vst.msk [vmem:[#allocation3 + $0x48] sm:$0xff] %vm11536_vm9, %v7925_v20  ;;  %vm11551_vm9 = vmmov %vm11532_vm0  ;;  %v7969_v20 = vunpack.c.h.bf16 %v8248_v16 }
  0x4e   : > { %973 = vst.msk [vmem:[#allocation3 + $0x50] sm:$0xff] %vm11537_vm10, %v7928_v42  ;;  %vm11552_vm10 = vmmov %vm11532_vm0 }
  0x4f   : > { %974 = vst.msk [vmem:[#allocation3 + $0x58] sm:$0xff] %vm11538_vm11, %v7929_v44  ;;  %vm11553_vm11 = vmmov %vm11532_vm0 }
  0x50   : > { %975 = vst.msk [vmem:[#allocation3 + $0x60] sm:$0xff] %vm11539_vm12, %v7932_v3  ;;  %vm11554_vm12 = vmmov %vm11532_vm0 }
  0x51   : > { %976 = vst.msk [vmem:[#allocation3 + $0x68] sm:$0xff] %vm11540_vm13, %v7933_v35  ;;  %vm11555_vm13 = vmmov %vm11532_vm0 }
  0x52   : > { %977 = vst.msk [vmem:[#allocation3 + $0x70] sm:$0xff] %vm11541_vm14, %v7936_v37  ;;  %vm11556_vm14 = vmmov %vm11532_vm0 }
  0x53   : > { %978 = vst.msk [vmem:[#allocation3 + $0x78] sm:$0xff] %vm11542_vm15, %v7937_v39  ;;  %vm11557_vm15 = vmmov %vm11532_vm0 }
  0x54   : > { %979 = vst.msk [vmem:[#allocation3 + $0x80] sm:$0xff] %vm11543_vm2, %v7940_v43 }
  0x55   : > { %980 = vst.msk [vmem:[#allocation3 + $0x88] sm:$0xff] %vm11544_vm3, %v7941_v45 }
  0x56   : > { %981 = vst.msk [vmem:[#allocation3 + $0x90] sm:$0xff] %vm11545_vm4, %v7944_v48 }
  0x57   : > { %982 = vst.msk [vmem:[#allocation3 + $0x98] sm:$0xff] %vm11546_vm5, %v7945_v49 }
  0x58   : > { %983 = vst.msk [vmem:[#allocation3 + $0xa0] sm:$0xff] %vm11547_vm1, %v7948_v56 }
  0x59   : > { %984 = vst.msk [vmem:[#allocation3 + $0xa8] sm:$0xff] %vm11532_vm0, %v7949_v61 }
  0x5a   : > { %985 = vst.msk [vmem:[#allocation3 + $0xb0] sm:$0xff] %vm11548_vm6, %v7952_v8 }
  0x5b   : > { %986 = vst.msk [vmem:[#allocation3 + $0xb8] sm:$0xff] %vm11549_vm7, %v7953_v9 }
  0x5c   : > { %987 = vst.msk [vmem:[#allocation3 + $0xc0] sm:$0xff] %vm11550_vm8, %v7956_v11 }
  0x5d   : > { %988 = vst.msk [vmem:[#allocation3 + $0xc8] sm:$0xff] %vm11551_vm9, %v7957_v12 }
  0x5e   : > { %989 = vst.msk [vmem:[#allocation3 + $0xd0] sm:$0xff] %vm11552_vm10, %v7960_v14 }
  0x5f   : > { %990 = vst.msk [vmem:[#allocation3 + $0xd8] sm:$0xff] %vm11553_vm11, %v7961_v15 }
  0x60   : > { %991 = vst.msk [vmem:[#allocation3 + $0xe0] sm:$0xff] %vm11554_vm12, %v7964_v17 }
  0x61   : > { %992 = vst.msk [vmem:[#allocation3 + $0xe8] sm:$0xff] %vm11555_vm13, %v7965_v18 }
  0x62   : > { %993 = vst.msk [vmem:[#allocation3 + $0xf0] sm:$0xff] %vm11556_vm14, %v7968_v19 }
  0x63   : > { %994 = vst.msk [vmem:[#allocation3 + $0xf8] sm:$0xff] %vm11557_vm15, %v7969_v20 }
  0x64 LB: >> { %v11558_v24 = vld [vmem:[#allocation7_spill] sm:$0xff]  ;;  %v11559_v23 = vld [vmem:[#allocation6_spill] sm:$0xff]  ;;  %v11560_v22 = vld [vmem:[#allocation5_spill] sm:$0xff]  ;;  %vm11561_vm2 = vcmask 257024   ;;  %vm1233_vm14 = vsmask.f32 4352  ;;  %s8831_s10 = sphi %s9308_s10, %s1000_s10  }
  0x65   : >> { %v7813_v40 = vld [vmem:[%s11395_s1 + $0x38] sm:$0xff]  ;;  %v7807_v42 = vld [vmem:[%s11395_s1 + $0x8] sm:$0xff]  ;;  %v7812_v44 = vld [vmem:[%s11395_s1 + $0x30] sm:$0xff]  ;;  %s1000_s10 = sadd.s32 1, %s8831_s10  }
  0x66   : >> { %v7806_v46 = vld [vmem:[%s11395_s1] sm:$0xff]  ;;  %v1016_v3 = vld [vmem:[#allocation3 + $0x78] sm:$0xff]  ;;  %8621 = vmatpush.bf16.msra.mxu2 %v7813_v40  ;;  %8623 = vmatpush.bf16.msra.mxu3 %v7807_v42  ;;  %v1018_v5 = vld [vmem:[#allocation3 + $0x88] sm:$0xff]  ;;  %p997_p4 = scmp.ge.s32.totalorder %s1000_s10, 4  }
  0x67   : >> { %v1017_v35 = vld [vmem:[#allocation3 + $0x80] sm:$0xff]  ;;  %v1019_v37 = vld [vmem:[#allocation3 + $0x90] sm:$0xff]  ;;  %v1048_v39 = vpack.c.bf16 %v1016_v3, %v1016_v3  ;;  %v1014_v43 = vld [vmem:[#allocation3 + $0x68] sm:$0xff]  ;;  %1452 = vmatpush.bf16.msra.mxu0 %v7813_v40  ;;  %1598 = vmatpush.bf16.msra.mxu1 %v7807_v42  ;;  %v1050_v45 = vpack.c.bf16 %v1018_v5, %v1018_v5 }
  0x68   : >> { %v1049_v41 = vpack.c.bf16 %v1017_v35, %v1017_v35  ;;  %v1051_v47 = vpack.c.bf16 %v1019_v37, %v1019_v37  ;;  %v1015_v48 = vld [vmem:[#allocation3 + $0x70] sm:$0xff]  ;;  %v7815_v49 = vld [vmem:[%s11395_s1 + $0x48] sm:$0xff]  ;;  %v1046_v50 = vpack.c.bf16 %v1014_v43, %v1014_v43  ;;  %v7809_v56 = vld [vmem:[%s11395_s1 + $0x18] sm:$0xff] }
  0x69   : >> { %1080 = vst.msk [vmem:[#allocation2 + $0x4c] sm:$0xf] %vm11561_vm2, %v1048_v39  ;;  %v1001_v61 = vld [vmem:[#allocation3] sm:$0xff]  ;;  %v1002_v2 = vld [vmem:[#allocation3 + $0x8] sm:$0xff]  ;;  %vm11562_vm3 = vmmov %vm11561_vm2  ;;  %v1047_v8 = vpack.c.bf16 %v1015_v48, %v1015_v48 }
  0x6a   : >> { %1081 = vst.msk [vmem:[#allocation2 + $0x50] sm:$0xf] %vm11562_vm3, %v1049_v41  ;;  %v1003_v9 = vld [vmem:[#allocation3 + $0x10] sm:$0xff]  ;;  %8622 = vmatpush.bf16.msra.mxu2 %v7812_v44  ;;  %8624 = vmatpush.bf16.msra.mxu3 %v7806_v46  ;;  %vm11563_vm4 = vmmov %vm11561_vm2  ;;  %v1033_v10 = vpack.c.bf16 %v1001_v61, %v1001_v61  ;;  %v7833_v11 = vld [vmem:[%s11395_s1 + $0x58] sm:$0xff]  ;;  %v1034_v12 = vpack.c.bf16 %v1002_v2, %v1002_v2 }
  0x6b   : >> { %1082 = vst.msk [vmem:[#allocation2 + $0x54] sm:$0xf] %vm11563_vm4, %v1050_v45  ;;  %1453 = vmatpush.bf16.msra.mxu0 %v7812_v44  ;;  %1599 = vmatpush.bf16.msra.mxu1 %v7806_v46  ;;  %vm11564_vm5 = vmmov %vm11561_vm2  ;;  %v1020_v13 = vld [vmem:[#allocation3 + $0x98] sm:$0xff]  ;;  %v1021_v14 = vld [vmem:[#allocation3 + $0xa0] sm:$0xff]  ;;  %v1035_v15 = vpack.c.bf16 %v1003_v9, %v1003_v9  ;;  %vm11578_vm4 = vcmask 261120  }
  0x6c   : >> { %1083 = vst.msk [vmem:[#allocation2 + $0x58] sm:$0xf] %vm11564_vm5, %v1051_v47  ;;  %vm11565_vm1 = vmmov %vm11561_vm2  ;;  %v8387_v16 = vld [vmem:[#allocation2 + $0x4] sm:$0x8]  ;;  %v1004_v17 = vld [vmem:[#allocation3 + $0x18] sm:$0xff]  ;;  %v1052_v19 = vpack.c.bf16 %v1020_v13, %v1020_v13  ;;  %v1053_v42 = vpack.c.bf16 %v1021_v14, %v1021_v14 }
  0x6d   : >> { %1078 = vst.msk [vmem:[#allocation2 + $0x44] sm:$0xf] %vm11565_vm1, %v1046_v50  ;;  %vm11566_vm0 = vmmov %vm11565_vm1  ;;  %v8625_v18 = vld [vmem:[#allocation2 + $0x4] sm:$0xf0]   ;;  %v1005_v20 = vld [vmem:[#allocation3 + $0x20] sm:$0xff]  ;;  %v1036_v44 = vpack.c.bf16 %v1004_v17, %v1004_v17 }
  0x6e   : >> { %1767 = vmatpush.bf16.msrb.mxu2 %v7815_v49  ;;  %1872 = vmatpush.bf16.msrb.mxu3 %v7809_v56  ;;  %1079 = vst.msk [vmem:[#allocation2 + $0x48] sm:$0xf] %vm11566_vm0, %v1047_v8  ;;  %vm11567_vm6 = vmmov %vm11566_vm0  ;;  %v1143_v40 = vld [vmem:[#allocation2 + $0xc] sm:$0x8]  ;;  %v1023_v35 = vld [vmem:[#allocation3 + $0xb0] sm:$0xff]  ;;  %v8388_v39 = vor.u32 %v8625_v18, %v8387_v16  ;;  %v1037_v41 = vpack.c.bf16 %v1005_v20, %v1005_v20 }
  0x6f   : >> { %2274 = vmatpush.bf16.msrb.mxu0 %v7833_v11  ;;  %1065 = vst.msk [vmem:[#allocation2 + $0x10] sm:$0xf] %vm11567_vm6, %v1033_v10  ;;  %vm11568_vm7 = vmmov %vm11566_vm0  ;;  %v1022_v46 = vld [vmem:[#allocation3 + $0xa8] sm:$0xff]  ;;  %v1007_v49 = vld [vmem:[#allocation3 + $0x30] sm:$0xff]  ;;  %v1183_v50 = vunpack.c.l.b16 %v1143_v40  ;;  %v1055_v56 = vpack.c.bf16 %v1023_v35, %v1023_v35 }
  0x70   : >> { %1066 = vst.msk [vmem:[#allocation2 + $0x14] sm:$0xf] %vm11568_vm7, %v1034_v12  ;;  %vm11569_vm8 = vmmov %vm11566_vm0  ;;  %v1006_v5 = vld [vmem:[#allocation3 + $0x28] sm:$0xff]  ;;  %v1054_v48 = vpack.c.bf16 %v1022_v46, %v1022_v46  ;;  %v1545_v13 = vshrl.u32 %v8388_v39, 16  ;;  %v1548_v14 = vshll.u32 %v8388_v39, 16  ;;  %v11765_v21 = vld [vmem:[#allocation4_spill] sm:$0xff] }
  0x71   : >> { %v8642_v3 = vld [vmem:[#allocation2 + $0x4c] sm:$0xff]   ;;  %1067 = vst.msk [vmem:[#allocation2 + $0x18] sm:$0xf] %vm11569_vm8, %v1035_v15  ;;  %vm11570_vm9 = vmmov %vm11566_vm0  ;;  %v1038_v61 = vpack.c.bf16 %v1006_v5, %v1006_v5  ;;  %v1039_v15 = vpack.c.bf16 %v1007_v49, %v1007_v49  ;;  %v11768_v51 = vld [vmem:[#allocation20_spill] sm:$0xff] }
  0x72   : >> { %v9343_v37 = vld [vmem:[#allocation2 + $0x8] sm:$0xff]   ;;  %1084 = vst.msk [vmem:[#allocation2 + $0x5c] sm:$0xf] %vm11570_vm9, %v1052_v19  ;;  %v1306_v45 = vshrl.u32 %v8642_v3, 16  ;;  %v1309_v47 = vshll.u32 %v8642_v3, 16  ;;  %vm11571_vm10 = vmmov %vm11566_vm0  ;;  %v1550_v49 = vrot.slane %v1548_v14, 4 }
  0x73   : >> { %v8644_v43 = vld [vmem:[#allocation2 + $0x54] sm:$0xff]   ;;  %1085 = vst.msk [vmem:[#allocation2 + $0x60] sm:$0xf] %vm11571_vm10, %v1053_v42  ;;  %vm11572_vm11 = vmmov %vm11566_vm0  ;;  %v7973_v12 = vunpack.c.h.b16 %v9343_v37  ;;  %v11774_v52 = vld [vmem:[#allocation21_spill] sm:$0xff] }
  0x74   : >> { %1068 = vst.msk [vmem:[#allocation2 + $0x1c] sm:$0xf] %vm11572_vm11, %v1036_v44  ;;  %v1308_v2 = vrot.slane %v1306_v45, 3  ;;  %v1311_v8 = vrot.slane %v1309_v47, 4  ;;  %v1315_v9 = vshrl.u32 %v8644_v43, 16  ;;  %v1318_v10 = vshll.u32 %v8644_v43, 16  ;;  %vm11573_vm12 = vmmov %vm11566_vm0 }
  0x75   : >> { %v8640_v11 = vld [vmem:[#allocation2 + $0x44] sm:$0xff]   ;;  %1069 = vst.msk [vmem:[#allocation2 + $0x20] sm:$0xf] %vm11573_vm12, %v1037_v41  ;;  %vm11574_vm13 = vmmov %vm11566_vm0  ;;  %v11780_v53 = vld [vmem:[#allocation22_spill] sm:$0xff] }
  0x76   : >> { %v1312_v16 = vor.u32 %v1311_v8, %v1308_v2  ;;  %v1317_v17 = vrot.slane %v1315_v9, 3  ;;  %v1320_v18 = vrot.slane %v1318_v10, 4  ;;  %v1297_v19 = vshrl.u32 %v8640_v11, 16  ;;  %1086 = vst.msk [vmem:[#allocation2 + $0x64] sm:$0xf] %vm11574_vm13, %v1054_v48  ;;  %vm11575_vm15 = vmmov %vm11566_vm0 }
  0x77   : >> { %v9350_v20 = vld [vmem:[#allocation2 + $0x10] sm:$0xff]   ;;  %v1300_v40 = vshll.u32 %v8640_v11, 16  ;;  %1087 = vst.msk [vmem:[#allocation2 + $0x68] sm:$0xf] %vm11575_vm15, %v1055_v56  ;;  %vm11576_vm2 = vmmov %vm11566_vm0  ;;  %v1547_v48 = vrot.slane %v1545_v13, 3  ;;  %v1024_v13 = vld [vmem:[#allocation3 + $0xb8] sm:$0xff] }
  0x78   : >> { %v7976_v42 = vunpack.c.l.b16 %v9350_v20  ;;  %v8628_v44 = vld [vmem:[#allocation2 + $0x14] sm:$0xff]   ;;  %v1321_v46 = vor.u32 %v1320_v18, %v1317_v17  ;;  %v1299_v3 = vrot.slane %v1297_v19, 3  ;;  %1070 = vst.msk [vmem:[#allocation2 + $0x24] sm:$0xf] %vm11576_vm2, %v1038_v61  ;;  %vm11577_vm3 = vmmov %vm11566_vm0 }
  0x79   : >> { %v1302_v35 = vrot.slane %v1300_v40, 4  ;;  %v1243_v39 = vshrl.u32 %v8628_v44, 16  ;;  %v1246_v41 = vshll.u32 %v8628_v44, 16  ;;  %1071 = vst.msk [vmem:[#allocation2 + $0x28] sm:$0xf] %vm11577_vm3, %v1039_v15  ;;  %vm11579_vm5 = vmmov %vm11578_vm4  ;;  %v1551_v19 = vor.u32 %v1550_v49, %v1547_v48 }
  0x7a   : >> { %v1216_v5 = vpack.c.b16 %v7976_v42, %v1183_v50  ;;  %v8646_v43 = vld [vmem:[#allocation2 + $0x5c] sm:$0xff]   ;;  %v1322_v45 = vsel %vm1233_vm14, %v1312_v16, %v1321_v46  ;;  %v1542_v47 = vpack.c.b16 %v7976_v42, %v7973_v12  ;;  %vm11580_vm1 = vmmov %vm11578_vm4 }
  0x7b   : >> { %7130 = vmatmul.msk.bf16.vlgmr.msra.gmra.mxu2 %vm11578_vm4, %v1322_v45  ;;  %v9359_v2 = vor.u32 %v1302_v35, %v1299_v3  ;;  %v1245_v9 = vrot.slane %v1243_v39, 3  ;;  %v1248_v61 = vrot.slane %v1246_v41, 4  ;;  %v1324_v11 = vshrl.u32 %v8646_v43, 16  ;;  %vm11581_vm6 = vmmov %vm11580_vm1 }
  0x7c   : >> { %v1235_v56 = vshrl.u32 %v1216_v5, 16  ;;  %v1238_v8 = vshll.u32 %v1216_v5, 16  ;;  %v1553_v10 = vshrl.u32 %v1542_v47, 16  ;;  %v1556_v50 = vshll.u32 %v1542_v47, 16  ;;  %v8630_v3 = vld [vmem:[#allocation2 + $0x1c] sm:$0xff]   ;;  %vm11582_vm7 = vmmov %vm11566_vm0 }
  0x7d   : >> { %v9363_v17 = vsel %vm1233_vm14, %v9359_v2, %v1312_v16  ;;  %v1327_v12 = vshll.u32 %v8646_v43, 16  ;;  %v1249_v14 = vor.u32 %v1248_v61, %v1245_v9  ;;  %v1326_v5 = vrot.slane %v1324_v11, 3  ;;  %v1025_v47 = vld [vmem:[#allocation3 + $0xc0] sm:$0xff]  ;;  %vm11583_vm8 = vmmov %vm11566_vm0 }
  0x7e   : >> { %v1237_v15 = vrot.slane %v1235_v56, 3  ;;  %v1240_v18 = vrot.slane %v1238_v8, 4  ;;  %7154 = vmatmul.msk.bf16.vlgmr.msra.gmra.mxu3 %vm11579_vm5, %v9363_v17  ;;  %v1555_v40 = vrot.slane %v1553_v10, 3  ;;  %v1558_v42 = vrot.slane %v1556_v50, 4  ;;  %v1008_v56 = vld [vmem:[#allocation3 + $0x38] sm:$0xff]  ;;  %v1009_v8 = vld [vmem:[#allocation3 + $0x40] sm:$0xff]  ;;  %vm11584_vm9 = vmmov %vm11566_vm0 }
  0x7f   : >> { %v1329_v39 = vrot.slane %v1327_v12, 4  ;;  %v1056_v41 = vpack.c.bf16 %v1024_v13, %v1024_v13  ;;  %v1252_v48 = vshrl.u32 %v8630_v3, 16  ;;  %v1255_v49 = vshll.u32 %v8630_v3, 16  ;;  %v8648_v12 = vld [vmem:[#allocation2 + $0x64] sm:$0xff]   ;;  %vm11585_vm10 = vmmov %vm11580_vm1 }
  0x80   : >> { %v1241_v44 = vor.u32 %v1240_v18, %v1237_v15  ;;  %v1559_v35 = vor.u32 %v1558_v42, %v1555_v40  ;;  %v1057_v61 = vpack.c.bf16 %v1025_v47, %v1025_v47  ;;  %v1040_v10 = vpack.c.bf16 %v1008_v56, %v1008_v56  ;;  %v1026_v42 = vld [vmem:[#allocation3 + $0xc8] sm:$0xff]  ;;  %vm11586_vm11 = vmmov %vm11580_vm1 }
  0x81   : >> { %1088 = vst.msk [vmem:[#allocation2 + $0x6c] sm:$0xf] %vm11566_vm0, %v1056_v41  ;;  %v1330_v9 = vor.u32 %v1329_v39, %v1326_v5  ;;  %v1041_v50 = vpack.c.bf16 %v1009_v8, %v1009_v8  ;;  %v1254_v11 = vrot.slane %v1252_v48, 3  ;;  %v1257_v15 = vrot.slane %v1255_v49, 4  ;;  %v8632_v41 = vld [vmem:[#allocation2 + $0x24] sm:$0xff]   ;;  %vm11587_vm12 = vmmov %vm11566_vm0  ;;  %v1011_v8 = vld [vmem:[#allocation3 + $0x50] sm:$0xff] }
  0x82   : >> { %v1250_v16 = vsel %vm1233_vm14, %v1241_v44, %v1249_v14  ;;  %v1560_v43 = vsel %vm1233_vm14, %v1551_v19, %v1559_v35  ;;  %1089 = vst.msk [vmem:[#allocation2 + $0x70] sm:$0xf] %vm11582_vm7, %v1057_v61  ;;  %v1333_v19 = vshrl.u32 %v8648_v12, 16  ;;  %v1336_v40 = vshll.u32 %v8648_v12, 16  ;;  %v1027_v44 = vld [vmem:[#allocation3 + $0xd0] sm:$0xff]  ;;  %v1010_v56 = vld [vmem:[#allocation3 + $0x48] sm:$0xff]  ;;  %vm11588_vm13 = vmmov %vm11566_vm0 }
  0x83   : >> { %7122 = vmatmul.msk.bf16.vlgmr.msra.gmra.mxu0 %vm11580_vm1, %v1250_v16  ;;  %7146 = vmatmul.msk.bf16.vlgmr.msra.gmra.mxu1 %vm11581_vm6, %v1560_v43  ;;  %1072 = vst.msk [vmem:[#allocation2 + $0x2c] sm:$0xf] %vm11583_vm8, %v1040_v10  ;;  %v1331_v18 = vsel %vm1233_vm14, %v1321_v46, %v1330_v9  ;;  %v1258_v13 = vor.u32 %v1257_v15, %v1254_v11  ;;  %vm11589_vm15 = vmmov %vm11580_vm1  ;;  %v1264_v49 = vshll.u32 %v8632_v41, 16 }
  0x84   : >> { %1073 = vst.msk [vmem:[#allocation2 + $0x30] sm:$0xf] %vm11584_vm9, %v1041_v50  ;;  %v1058_v3 = vpack.c.bf16 %v1026_v42, %v1026_v42  ;;  %v1059_v5 = vpack.c.bf16 %v1027_v44, %v1027_v44  ;;  %v1561_v16 = vsel %vm1233_vm14, %v1559_v35, %v1249_v14  ;;  %v1335_v46 = vrot.slane %v1333_v19, 3  ;;  %vm11590_vm2 = vmmov %vm11580_vm1  ;;  %v1028_v19 = vld [vmem:[#allocation3 + $0xd8] sm:$0xff]  ;;  %v7814_v42 = vld [vmem:[%s11395_s1 + $0x40] sm:$0xff] }
  0x85   : >> { %v1259_v39 = vsel %vm1233_vm14, %v1249_v14, %v1258_v13  ;;  %v1338_v47 = vrot.slane %v1336_v40, 4  ;;  %v1042_v43 = vpack.c.bf16 %v1010_v56, %v1010_v56  ;;  %v1043_v48 = vpack.c.bf16 %v1011_v8, %v1011_v8  ;;  %vm11591_vm3 = vmmov %vm11566_vm0  ;;  %v1029_v40 = vld [vmem:[#allocation3 + $0xe0] sm:$0xff]  ;;  %v7808_v44 = vld [vmem:[%s11395_s1 + $0x10] sm:$0xff]  ;;  %1768 = vmatpush.bf16.msrb.mxu2 %v7814_v42 }
  0x86   : >> { %1090 = vst.msk [vmem:[#allocation2 + $0x74] sm:$0xf] %vm11587_vm12, %v1058_v3  ;;  %vm11592_vm4 = vmmov %vm11566_vm0  ;;  %v1266_v35 = vrot.slane %v1264_v49, 4  ;;  %v1060_v3 = vpack.c.bf16 %v1028_v19, %v1028_v19  ;;  %1873 = vmatpush.bf16.msrb.mxu3 %v7808_v44 }
  0x87   : >> { %1091 = vst.msk [vmem:[#allocation2 + $0x78] sm:$0xf] %vm11588_vm13, %v1059_v5  ;;  %v1339_v61 = vor.u32 %v1338_v47, %v1335_v46  ;;  %vm11593_vm5 = vmmov %vm11580_vm1  ;;  %v1013_v47 = vld [vmem:[#allocation3 + $0x60] sm:$0xff] }
  0x88   : >> { %1074 = vst.msk [vmem:[#allocation2 + $0x34] sm:$0xf] %vm11591_vm3, %v1042_v43  ;;  %vm11594_vm6 = vmmov %vm11566_vm0  ;;  %v1045_v8 = vpack.c.bf16 %v1013_v47, %v1013_v47 }
  0x89   : >> { %1075 = vst.msk [vmem:[#allocation2 + $0x38] sm:$0xf] %vm11592_vm4, %v1043_v48  ;;  %v1340_v10 = vsel %vm1233_vm14, %v1330_v9, %v1339_v61  ;;  %v8650_v50 = vld [vmem:[#allocation2 + $0x6c] sm:$0xff]   ;;  %vm11595_vm7 = vmmov %vm11580_vm1 }
  0x8a   : >> { %v1342_v15 = vshrl.u32 %v8650_v50, 16  ;;  %v1345_v12 = vshll.u32 %v8650_v50, 16  ;;  %1092 = vst.msk [vmem:[#allocation2 + $0x7c] sm:$0xf] %vm11566_vm0, %v1060_v3  ;;  %vm11596_vm8 = vmmov %vm11580_vm1  ;;  %v7832_v48 = vld [vmem:[%s11395_s1 + $0x50] sm:$0xff] }
  0x8b   : >> { %7131 = vmatmul.msk.bf16.gmra.mxu2 %vm11585_vm10, %v1331_v18  ;;  %v8634_v5 = vld [vmem:[#allocation2 + $0x2c] sm:$0xff]   ;;  %vm11597_vm9 = vmmov %vm11566_vm0  ;;  %2275 = vmatpush.bf16.msrb.mxu0 %v7832_v48 }
  0x8c   : >> { %v1347_v46 = vrot.slane %v1345_v12, 4  ;;  %v1270_v43 = vshrl.u32 %v8634_v5, 16  ;;  %vm11598_vm10 = vmmov %vm11566_vm0  ;;  %v1031_v12 = vld [vmem:[#allocation3 + $0xf0] sm:$0xff] }
  0x8d   : >> { %1077 = vst.msk [vmem:[#allocation2 + $0x40] sm:$0xf] %vm11598_vm10, %v1045_v8  ;;  %v1063_v42 = vpack.c.bf16 %v1031_v12, %v1031_v12  ;;  %vm11600_vm12 = vmmov %vm11566_vm0 }
  0x8e   : >> { %7155 = vmatmul.msk.bf16.gmra.mxu3 %vm11586_vm11, %v1322_v45  ;;  %v1261_v45 = vshrl.u32 %v8632_v41, 16  ;;  %v1061_v41 = vpack.c.bf16 %v1029_v40, %v1029_v40  ;;  %v1272_v49 = vrot.slane %v1270_v43, 3  ;;  %v8652_v50 = vld [vmem:[#allocation2 + $0x74] sm:$0xff]   ;;  %vm11599_vm11 = vmmov %vm11580_vm1 }
  0x8f   : >> { %v1351_v3 = vshrl.u32 %v8652_v50, 16  ;;  %vm11601_vm13 = vmmov %vm11580_vm1 }
  0x90   : >> { %v1263_v14 = vrot.slane %v1261_v45, 3  ;;  %1093 = vst.msk [vmem:[#allocation2 + $0x80] sm:$0xf] %vm11594_vm6, %v1061_v41  ;;  %v8636_v41 = vld [vmem:[#allocation2 + $0x34] sm:$0xff]   ;;  %vm11604_vm3 = vmmov %vm11580_vm1 }
  0x91   : >> { %vm11605_vm4 = vmmov %vm11580_vm1  ;;  %v1282_v47 = vshll.u32 %v8636_v41, 16 }
  0x92   : >> { %v1267_v11 = vor.u32 %v1266_v35, %v1263_v14 }
  0x93   : >> { %7123 = vmatmul.msk.bf16.gmra.mxu0 %vm11589_vm15, %v1259_v39  ;;  %7147 = vmatmul.msk.bf16.gmra.mxu1 %vm11590_vm2, %v1561_v16  ;;  %v1344_v16 = vrot.slane %v1342_v15, 3  ;;  %v1030_v15 = vld [vmem:[#allocation3 + $0xe8] sm:$0xff]  ;;  %vm11602_vm15 = vmmov %vm11566_vm0  ;;  %v1284_v43 = vrot.slane %v1282_v47, 4 }
  0x94   : >> { %v1268_v9 = vsel %vm1233_vm14, %v1258_v13, %v1267_v11  ;;  %v1273_v13 = vshll.u32 %v8634_v5, 16  ;;  %v1062_v40 = vpack.c.bf16 %v1030_v15, %v1030_v15  ;;  %v1354_v5 = vshll.u32 %v8652_v50, 16  ;;  %1095 = vst.msk [vmem:[#allocation2 + $0x88] sm:$0xf] %vm11602_vm15, %v1063_v42  ;;  %vm11603_vm2 = vmmov %vm11566_vm0 }
  0x95   : >> { %v1348_v45 = vor.u32 %v1347_v46, %v1344_v16  ;;  %v1353_v16 = vrot.slane %v1351_v3, 3  ;;  %vm11607_vm0 = vmmov %vm11580_vm1 }
  0x96   : >> { %v1275_v14 = vrot.slane %v1273_v13, 4  ;;  %1094 = vst.msk [vmem:[#allocation2 + $0x84] sm:$0xf] %vm11600_vm12, %v1062_v40  ;;  %v1356_v46 = vrot.slane %v1354_v5, 4  ;;  %vm11608_vm6 = vmmov %vm11607_vm0 }
  0x97   : >> { %v1349_v35 = vsel %vm1233_vm14, %v1339_v61, %v1348_v45  ;;  %v8653_v13 = vld [vmem:[#allocation2 + $0x7c] sm:$0xff]   ;;  %vm11612_vm10 = vmmov %vm11607_vm0 }
  0x98   : >> { %v1276_v19 = vor.u32 %v1275_v14, %v1272_v49  ;;  %v1360_v48 = vshrl.u32 %v8653_v13, 16  ;;  %v1363_v49 = vshll.u32 %v8653_v13, 16  ;;  %vm11614_vm12 = vmmov %vm11607_vm0 }
  0x99   : >> { %vm11616_vm15 = vmmov %vm11607_vm0 }
  0x9a   : >> { %v1277_v61 = vsel %vm1233_vm14, %v1267_v11, %v1276_v19  ;;  %v1362_v15 = vrot.slane %v1360_v48, 3 }
  0x9b   : >> { %7132 = vmatmul.msk.bf16.gmra.mxu2 %vm11593_vm5, %v1340_v10  ;;  %vm11606_vm5 = vmmov %vm11580_vm1 }
  0x9d   : >> { %v9418_v12 = vld [vmem:[#allocation2 + $0x80] sm:$0xff]  }
  0x9e   : >> { %7156 = vmatmul.msk.bf16.gmra.mxu3 %vm11580_vm1, %v1331_v18  ;;  %v1012_v18 = vld [vmem:[#allocation3 + $0x58] sm:$0xff] }
  0x9f   : >> { %v1044_v56 = vpack.c.bf16 %v1012_v18, %v1012_v18  ;;  %v1279_v18 = vshrl.u32 %v8636_v41, 16 }
  0xa1   : >> { %1076 = vst.msk [vmem:[#allocation2 + $0x3c] sm:$0xf] %vm11597_vm9, %v1044_v56  ;;  %v1357_v56 = vor.u32 %v1356_v46, %v1353_v16  ;;  %v1281_v8 = vrot.slane %v1279_v18, 3  ;;  %vm11611_vm9 = vmmov %vm11607_vm0 }
  0xa3   : >> { %7124 = vmatmul.msk.bf16.gmra.mxu0 %vm11595_vm7, %v1268_v9  ;;  %7148 = vmatmul.msk.bf16.gmra.mxu1 %vm11596_vm8, %v1259_v39  ;;  %v1032_v39 = vld [vmem:[#allocation3 + $0xf8] sm:$0xff]  ;;  %v1285_v11 = vor.u32 %v1284_v43, %v1281_v8  ;;  %vm11609_vm7 = vmmov %vm11607_vm0 }
  0xa4   : >> { %v1064_v44 = vpack.c.bf16 %v1032_v39, %v1032_v39  ;;  %vm11610_vm8 = vmmov %vm11607_vm0 }
  0xa5   : >> { %v1286_v14 = vsel %vm1233_vm14, %v1276_v19, %v1285_v11 }
  0xa6   : >> { %1096 = vst.msk [vmem:[#allocation2 + $0x8c] sm:$0xf] %vm11603_vm2, %v1064_v44  ;;  %v8033_v44 = vunpack.c.h.b16 %v9418_v12  ;;  %vm11617_vm2 = vmmov %vm11607_vm0 }
  0xa8   : >> { %v8638_v50 = vld [vmem:[#allocation2 + $0x3c] sm:$0xff]  }
  0xa9   : >> { %v1291_v40 = vshll.u32 %v8638_v50, 16 }
  0xab   : >> { %7133 = vmatmul.msk.bf16.gmra.mxu2 %vm11599_vm11, %v1349_v35  ;;  %v1293_v19 = vrot.slane %v1291_v40, 4  ;;  %vm11613_vm11 = vmmov %vm11607_vm0 }
  0xad   : >> { %v9420_v39 = vld [vmem:[#allocation2 + $0x88] sm:$0xff]  }
  0xae   : >> { %7157 = vmatmul.msk.bf16.gmra.mxu3 %vm11601_vm13, %v1340_v10  ;;  %v1358_v10 = vsel %vm1233_vm14, %v1348_v45, %v1357_v56  ;;  %v1288_v45 = vshrl.u32 %v8638_v50, 16  ;;  %v8037_v13 = vunpack.c.h.b16 %v9420_v39  ;;  %vm11615_vm13 = vmmov %vm11607_vm0 }
  0xb0   : >> { %v1290_v3 = vrot.slane %v1288_v45, 3 }
  0xb2   : >> { %v1294_v16 = vor.u32 %v1293_v19, %v1290_v3  ;;  %v7837_v3 = vld [vmem:[%s11395_s1 + $0x78] sm:$0xff] }
  0xb3   : >> { %7125 = vmatmul.msk.bf16.gmra.mxu0 %vm11604_vm3, %v1277_v61  ;;  %7149 = vmatmul.msk.bf16.gmra.mxu1 %vm11605_vm4, %v1268_v9  ;;  %v1365_v9 = vrot.slane %v1363_v49, 4  ;;  %v1232_v49 = vpack.c.b16 %v8037_v13, %v8037_v13  ;;  %vm11618_vm3 = vmmov %vm11607_vm0 }
  0xb4   : >> { %3164 = vmatpush.bf16.msra.mxu3 %v7837_v3  ;;  %vm11619_vm4 = vmmov %vm11607_vm0 }
  0xb5   : >> { %v1366_v42 = vor.u32 %v1365_v9, %v1362_v15  ;;  %v1381_v50 = vshll.u32 %v1232_v49, 16  ;;  %v1304_v15 = vsel %vm1233_vm14, %v1294_v16, %v9359_v2  ;;  %v7855_v2 = vld [vmem:[%s11395_s1 + $0x88] sm:$0xff] }
  0xb6   : >> { %3597 = vmatpush.bf16.msra.mxu0 %v7855_v2  ;;  %v9477_v2 = vld [vmem:[#allocation2 + $0x18] sm:$0xff]  }
  0xb7   : >> { %v1367_v5 = vsel %vm1233_vm14, %v1357_v56, %v1366_v42  ;;  %v7811_v56 = vld [vmem:[%s11395_s1 + $0x28] sm:$0xff] }
  0xb8   : >> { %2542 = vmatpush.bf16.msrb.mxu1 %v7811_v56  ;;  %v2362_v56 = vshll.u32 %v9343_v37, 16 }
  0xbb   : >> { %7134 = vmatmul.msk.bf16.gmra.mxu2 %vm11606_vm5, %v1358_v10  ;;  %vm11620_vm5 = vmmov %vm11607_vm0 }
  0xbe   : >> { %7158 = vmatmul.msk.bf16.gmra.mxu3 %vm11580_vm1, %v1349_v35  ;;  %v8036_v35 = vunpack.c.l.b16 %v9420_v39  ;;  %vm11621_vm1 = vmmov %vm11607_vm0 }
  0xc0   : >> { %v1231_v41 = vpack.c.b16 %v8036_v35, %v8033_v44  ;;  %v1383_v35 = vrot.slane %v1381_v50, 4 }
  0xc2   : >> { %v1369_v46 = vshrl.u32 %v1231_v41, 16  ;;  %v1372_v18 = vshll.u32 %v1231_v41, 16 }
  0xc3   : >> { %7126 = vmatmul.msk.bf16.gmra.mxu0 %vm11607_vm0, %v1286_v14  ;;  %7150 = vmatmul.msk.bf16.gmra.mxu1 %vm11608_vm6, %v1277_v61  ;;  %v1295_v61 = vsel %vm1233_vm14, %v1285_v11, %v1294_v16  ;;  %v1378_v11 = vshrl.u32 %v1232_v49, 16  ;;  %vm2075_vm0 = vsmask.f32 7424  ;;  %vm11622_vm6 = vmmov %vm11621_vm1 }
  0xc4   : >> { %v1371_v47 = vrot.slane %v1369_v46, 3  ;;  %v1374_v8 = vrot.slane %v1372_v18, 4 }
  0xc5   : >> { %v1380_v40 = vrot.slane %v1378_v11, 3 }
  0xc6   : >> { %v1375_v43 = vor.u32 %v1374_v8, %v1371_v47  ;;  %v7817_v47 = vld [vmem:[#allocation2 + $0x18] sm:$0xff] }
  0xc7   : >> { %v1384_v41 = vor.u32 %v1383_v35, %v1380_v40  ;;  %v2084_v49 = vshll.u32 %v7817_v47, 16 }
  0xc8   : >> { %v1376_v48 = vsel %vm1233_vm14, %v1366_v42, %v1375_v43 }
  0xc9   : >> { %v1385_v46 = vsel %vm1233_vm14, %v1375_v43, %v1384_v41  ;;  %v2360_v43 = vshrl.u32 %v9343_v37, 16  ;;  %v2086_v50 = vrot.slane %v2084_v49, 1 }
  0xcb   : >> { %7135 = vmatmul.msk.bf16.gmra.mxu2 %vm11609_vm7, %v1367_v5  ;;  %vm11623_vm7 = vmmov %vm11621_vm1 }
  0xce   : >> { %7159 = vmatmul.msk.bf16.gmra.mxu3 %vm11610_vm8, %v1358_v10  ;;  %v1543_v10 = vpack.c.b16 %v8033_v44, %v8033_v44  ;;  %v7835_v44 = vld [vmem:[%s11395_s1 + $0x68] sm:$0xff]  ;;  %vm11625_vm8 = vmmov %vm11621_vm1 }
  0xcf   : >> { %2963 = vmatpush.bf16.msra.mxu2 %v7835_v44 }
  0xd0   : >> { %v1563_v9 = vshrl.u32 %v1543_v10, 16  ;;  %v1566_v45 = vshll.u32 %v1543_v10, 16  ;;  %v2364_v10 = vrot.slane %v2362_v56, 1 }
  0xd2   : >> { %v1565_v19 = vrot.slane %v1563_v9, 3 }
  0xd3   : >> { %7127 = vmatmul.msk.bf16.gmra.mxu0 %vm11611_vm9, %v1295_v61  ;;  %7151 = vmatmul.msk.bf16.gmra.mxu1 %vm11612_vm10, %v1286_v14  ;;  %v7810_v14 = vld [vmem:[%s11395_s1 + $0x20] sm:$0xff]  ;;  %vm11627_vm9 = vmmov %vm11621_vm1 }
  0xd4   : >> { %2543 = vmatpush.bf16.msrb.mxu1 %v7810_v14  ;;  %vm11628_vm10 = vmmov %vm11621_vm1 }
  0xdb   : >> { %7136 = vmatmul.msk.bf16.gmra.mxu2 %vm11613_vm11, %v1376_v48  ;;  %vm11629_vm11 = vmmov %vm11621_vm1 }
  0xde   : >> { %7160 = vmatmul.msk.bf16.gmra.mxu3 %vm11614_vm12, %v1367_v5  ;;  %v1568_v5 = vrot.slane %v1566_v45, 4  ;;  %vm11631_vm12 = vmmov %vm11621_vm1 }
  0xe0   : >> { %v1569_v16 = vor.u32 %v1568_v5, %v1565_v19  ;;  %v7818_v5 = vld [vmem:[#allocation2 + $0x20] sm:$0xff] }
  0xe2   : >> { %v1570_v18 = vsel %vm1233_vm14, %v1366_v42, %v1569_v16  ;;  %v2366_v42 = vshll.u32 %v9350_v20, 16  ;;  %v2088_v16 = vshrl.u32 %v7817_v47, 16 }
  0xe3   : >> { %7128 = vmatmul.msk.bf16.gmra.mxu0 %vm11615_vm13, %v1304_v15  ;;  %7152 = vmatmul.msk.bf16.gmra.mxu1 %vm11616_vm15, %v1295_v61  ;;  %v7816_v61 = vld [vmem:[#allocation2 + $0x10] sm:$0xff]  ;;  %vm11633_vm13 = vmmov %vm11621_vm1 }
  0xe4   : >> { %v2079_v8 = vshll.u32 %v7816_v61, 16  ;;  %v2077_v13 = vshrl.u32 %v7816_v61, 16  ;;  %v2368_v14 = vrot.slane %v2366_v42, 1  ;;  %v2370_v61 = vshrl.u32 %v9350_v20, 16  ;;  %vm11634_vm15 = vmmov %vm11621_vm1 }
  0xe5   : >> { %v2090_v49 = vor.u32 %v2088_v16, %v2086_v50 }
  0xe6   : >> { %v2081_v48 = vrot.slane %v2079_v8, 1  ;;  %v2373_v8 = vshll.u32 %v9477_v2, 16 }
  0xe8   : >> { %v2082_v11 = vor.u32 %v2081_v48, %v2077_v13  ;;  %v2375_v42 = vrot.slane %v2373_v8, 1 }
  0xea   : >> { %v2087_v45 = vsel %vm2075_vm0, %v2082_v11, %v2086_v50  ;;  %v7819_v50 = vld [vmem:[#allocation2 + $0x28] sm:$0xff] }
  0xeb   : >> { %7137 = vmatmul.msk.bf16.gmra.mxu2 %vm11617_vm2, %v1385_v46  ;;  %v2092_v46 = vshll.u32 %v7818_v5, 16  ;;  %vm11635_vm2 = vmmov %vm11621_vm1 }
  0xee   : >> { %7161 = vmatmul.msk.bf16.gmra.mxu3 %vm11618_vm3, %v1570_v18  ;;  %vm11637_vm3 = vmmov %vm11621_vm1 }
  0xf3   : >> { %7129 = vmatmul.msk.bf16.gmra.mxu0 %vm11619_vm4, %v9363_v17  ;;  %7153 = vmatmul.msk.bf16.gmra.mxu1 %vm11620_vm5, %v1304_v15  ;;  %v2365_v17 = vor.u32 %v2364_v10, %v2360_v43  ;;  %v2094_v43 = vrot.slane %v2092_v46, 1  ;;  %v2372_v10 = vor.u32 %v2370_v61, %v2368_v14  ;;  %v2377_v46 = vshrl.u32 %v9477_v2, 16  ;;  %vm11639_vm4 = vmmov %vm11621_vm1 }
  0xf4   : >> { %vm11640_vm5 = vmmov %vm11621_vm1 }
  0xf5   : >> { %v2369_v35 = vsel %vm2075_vm0, %v2365_v17, %v2368_v14  ;;  %v2095_v17 = vsel %vm2075_vm0, %v2090_v49, %v2094_v43  ;;  %v9497_v14 = vld [vmem:[#allocation2 + $0x20] sm:$0xff]  }
  0xfb   : >> { %7170 = vmatmul.msk.bf16.vlgmr.msrb.gmra.mxu2 %vm11621_vm1, %v9350_v20 }
  0xfe   : >> { %7194 = vmatmul.msk.bf16.vlgmr.msrb.gmra.mxu3 %vm11622_vm6, %v9343_v37  ;;  %v1495_v15 = vpop.f32.mrf.mxu2  ;;  %vm11642_vm6 = vmmov %vm11621_vm1 }
 0x100   : >> { %v1455_v9 = vpop.f32.mrf.mxu0  ;;  %v1601_v40 = vpop.f32.mrf.mxu1 }
 0x101   : >> { %v9471_v44 = vadd.f32 %v1601_v40, %v1455_v9  ;;  %v1641_v3 = vpop.f32.mrf.mxu3  ;;  %v2376_v9 = vsel %vm2075_vm0, %v2372_v10, %v2375_v42 }
 0x102   : >> { %v9474_v19 = vadd.f32 %v1641_v3, %v1495_v15 }
 0x103   : >> { %7282 = vmatmul.msk.bf16.vlgmr.msrb.gmra.mxu0 %vm11623_vm7, %v2087_v45  ;;  %7306 = vmatmul.msk.bf16.vlgmr.msrb.gmra.mxu1 %vm11625_vm8, %v2369_v35  ;;  %vm11644_vm7 = vmmov %vm11621_vm1 }
 0x104   : >> { %11624 = vst [vmem:[#allocation36_spill] sm:$0xff] %v9474_v19  ;;  %vm11645_vm8 = vmmov %vm11621_vm1 }
 0x106   : >> { %v1497_v37 = vpop.f32.mrf.mxu2 }
 0x108   : >> { %v1457_v41 = vpop.f32.mrf.mxu0  ;;  %v1603_v18 = vpop.f32.mrf.mxu1 }
 0x109   : >> { %v9481_v56 = vadd.f32 %v1603_v18, %v1457_v41  ;;  %v1643_v13 = vpop.f32.mrf.mxu3  ;;  %v2100_v41 = vshll.u32 %v7819_v50, 16  ;;  %v2380_v18 = vshll.u32 %v9497_v14, 16 }
 0x10a   : >> { %v9483_v48 = vadd.f32 %v1643_v13, %v1497_v37  ;;  %v2096_v37 = vshrl.u32 %v7818_v5, 16 }
 0x10b   : >> { %7171 = vmatmul.msk.bf16.gmra.mxu2 %vm11627_vm9, %v9477_v2  ;;  %v2102_v10 = vrot.slane %v2100_v41, 1  ;;  %vm11647_vm9 = vmmov %vm11621_vm1 }
 0x10c   : >> { %11626 = vst [vmem:[#allocation37_spill] sm:$0xff] %v9483_v48  ;;  %v2098_v49 = vor.u32 %v2096_v37, %v2094_v43  ;;  %v7820_v43 = vld [vmem:[#allocation2 + $0x30] sm:$0xff] }
 0x10e   : >> { %7195 = vmatmul.msk.bf16.gmra.mxu3 %vm11628_vm10, %v9350_v20  ;;  %v1500_v47 = vpop.f32.mrf.mxu2  ;;  %vm11649_vm10 = vmmov %vm11621_vm1 }
 0x110   : >> { %v1460_v11 = vpop.f32.mrf.mxu0  ;;  %v1606_v15 = vpop.f32.mrf.mxu1 }
 0x111   : >> { %v9491_v45 = vadd.f32 %v1606_v15, %v1460_v11  ;;  %v1646_v40 = vpop.f32.mrf.mxu3  ;;  %v2382_v11 = vrot.slane %v2380_v18, 1  ;;  %v2103_v15 = vsel %vm2075_vm0, %v2098_v49, %v2102_v10  ;;  %v2108_v18 = vshll.u32 %v7820_v43, 16 }
 0x112   : >> { %v9494_v35 = vadd.f32 %v1646_v40, %v1500_v47  ;;  %v2379_v47 = vor.u32 %v2377_v46, %v2375_v42  ;;  %v9517_v42 = vld [vmem:[#allocation2 + $0x28] sm:$0xff]   ;;  %v2104_v46 = vshrl.u32 %v7819_v50, 16  ;;  %v2384_v49 = vshrl.u32 %v9497_v14, 16 }
 0x113   : >> { %7283 = vmatmul.msk.bf16.gmra.mxu0 %vm11629_vm11, %v2095_v17  ;;  %7307 = vmatmul.msk.bf16.gmra.mxu1 %vm11631_vm12, %v2376_v9  ;;  %v2391_v4 = vshrl.u32 %v9517_v42, 16  ;;  %vm11652_vm11 = vmmov %vm11621_vm1 }
 0x114   : >> { %11630 = vst [vmem:[#allocation38_spill] sm:$0xff] %v9494_v35  ;;  %v2383_v40 = vsel %vm2075_vm0, %v2379_v47, %v2382_v11  ;;  %v2387_v47 = vshll.u32 %v9517_v42, 16  ;;  %vm11653_vm12 = vmmov %vm11621_vm1 }
 0x116   : >> { %v1502_v20 = vpop.f32.mrf.mxu2  ;;  %v2389_v7 = vrot.slane %v2387_v47, 1 }
 0x118   : >> { %v1462_v3 = vpop.f32.mrf.mxu0  ;;  %v1608_v16 = vpop.f32.mrf.mxu1 }
 0x119   : >> { %v9501_v61 = vadd.f32 %v1608_v16, %v1462_v3  ;;  %v1648_v8 = vpop.f32.mrf.mxu3 }
 0x11a   : >> { %v9503_v13 = vadd.f32 %v1648_v8, %v1502_v20 }
 0x11b   : >> { %7172 = vmatmul.msk.bf16.gmra.mxu2 %vm11633_vm13, %v9497_v14  ;;  %vm11655_vm13 = vmmov %vm11621_vm1 }
 0x11c   : >> { %11632 = vst [vmem:[#allocation39_spill] sm:$0xff] %v9503_v13 }
 0x11e   : >> { %7196 = vmatmul.msk.bf16.gmra.mxu3 %vm11634_vm15, %v9477_v2  ;;  %v1505_v5 = vpop.f32.mrf.mxu2  ;;  %vm11657_vm15 = vmmov %vm11621_vm1 }
 0x120   : >> { %v1465_v17 = vpop.f32.mrf.mxu0  ;;  %v1611_v9 = vpop.f32.mrf.mxu1 }
 0x121   : >> { %v9511_v3 = vadd.f32 %v1611_v9, %v1465_v17  ;;  %v1651_v20 = vpop.f32.mrf.mxu3 }
 0x122   : >> { %v9514_v16 = vadd.f32 %v1651_v20, %v1505_v5  ;;  %v2106_v5 = vor.u32 %v2104_v46, %v2102_v10  ;;  %v2386_v20 = vor.u32 %v2384_v49, %v2382_v11  ;;  %v7821_v10 = vld [vmem:[#allocation2 + $0x38] sm:$0xff]  ;;  %v9537_v11 = vld [vmem:[#allocation2 + $0x30] sm:$0xff]   ;;  %v2112_v49 = vshrl.u32 %v7820_v43, 16 }
 0x123   : >> { %7284 = vmatmul.msk.bf16.gmra.mxu0 %vm11635_vm2, %v2103_v15  ;;  %7308 = vmatmul.msk.bf16.gmra.mxu1 %vm11637_vm3, %v2383_v40  ;;  %v2110_v40 = vrot.slane %v2108_v18, 1  ;;  %v2116_v47 = vshll.u32 %v7821_v10, 16  ;;  %vm11660_vm2 = vmmov %vm11621_vm1 }
 0x124   : >> { %11636 = vst [vmem:[#allocation40_spill] sm:$0xff] %v9514_v16  ;;  %vm11661_vm3 = vmmov %vm11621_vm1 }
 0x125   : >> { %v2111_v6 = vsel %vm2075_vm0, %v2106_v5, %v2110_v40 }
 0x126   : >> { %v1507_v37 = vpop.f32.mrf.mxu2 }
 0x128   : >> { %v1467_v41 = vpop.f32.mrf.mxu0  ;;  %v1613_v8 = vpop.f32.mrf.mxu1 }
 0x129   : >> { %v9521_v17 = vadd.f32 %v1613_v8, %v1467_v41  ;;  %v1653_v9 = vpop.f32.mrf.mxu3  ;;  %v2390_v41 = vsel %vm2075_vm0, %v2386_v20, %v2389_v7 }
 0x12a   : >> { %v9523_v15 = vadd.f32 %v1653_v9, %v1507_v37 }
 0x12b   : >> { %7173 = vmatmul.msk.bf16.gmra.mxu2 %vm11639_vm4, %v9517_v42  ;;  %vm11663_vm4 = vmmov %vm11621_vm1 }
 0x12c   : >> { %11638 = vst [vmem:[#allocation41_spill] sm:$0xff] %v9523_v15 }
 0x12e   : >> { %7197 = vmatmul.msk.bf16.gmra.mxu3 %vm11640_vm5, %v9497_v14  ;;  %v1510_v50 = vpop.f32.mrf.mxu2  ;;  %vm11665_vm5 = vmmov %vm11621_vm1 }
 0x130   : >> { %v1470_v38 = vpop.f32.mrf.mxu0  ;;  %v1616_v36 = vpop.f32.mrf.mxu1 }
 0x131   : >> { %v9531_v8 = vadd.f32 %v1616_v36, %v1470_v38  ;;  %v1656_v37 = vpop.f32.mrf.mxu3  ;;  %v2394_v36 = vshll.u32 %v9537_v11, 16 }
 0x132   : >> { %v9534_v9 = vadd.f32 %v1656_v37, %v1510_v50  ;;  %v2114_v50 = vor.u32 %v2112_v49, %v2110_v40  ;;  %v2393_v37 = vor.u32 %v2391_v4, %v2389_v7  ;;  %v7822_v4 = vld [vmem:[#allocation2 + $0x40] sm:$0xff]  ;;  %v9557_v7 = vld [vmem:[#allocation2 + $0x38] sm:$0xff]  }
 0x133   : >> { %7285 = vmatmul.msk.bf16.gmra.mxu0 %vm11621_vm1, %v2111_v6  ;;  %7309 = vmatmul.msk.bf16.gmra.mxu1 %vm11642_vm6, %v2390_v41  ;;  %v2118_v41 = vrot.slane %v2116_v47, 1  ;;  %v2396_v34 = vrot.slane %v2394_v36, 1  ;;  %v2120_v47 = vshrl.u32 %v7821_v10, 16  ;;  %v2124_v36 = vshll.u32 %v7822_v4, 16  ;;  %vm11668_vm6 = vmmov %vm11621_vm1 }
 0x134   : >> { %11641 = vst [vmem:[#allocation42_spill] sm:$0xff] %v9534_v9 }
 0x135   : >> { %v2119_v33 = vsel %vm2075_vm0, %v2114_v50, %v2118_v41 }
 0x136   : >> { %v1512_v46 = vpop.f32.mrf.mxu2 }
 0x138   : >> { %v1472_v18 = vpop.f32.mrf.mxu0  ;;  %v1618_v5 = vpop.f32.mrf.mxu1 }
 0x139   : >> { %v9541_v38 = vadd.f32 %v1618_v5, %v1472_v18  ;;  %v1658_v20 = vpop.f32.mrf.mxu3  ;;  %v2397_v18 = vsel %vm2075_vm0, %v2393_v37, %v2396_v34 }
 0x13a   : >> { %v9543_v6 = vadd.f32 %v1658_v20, %v1512_v46 }
 0x13b   : >> { %7174 = vmatmul.msk.bf16.gmra.mxu2 %vm11644_vm7, %v9537_v11  ;;  %vm11670_vm7 = vmmov %vm11621_vm1 }
 0x13c   : >> { %11643 = vst [vmem:[#allocation43_spill] sm:$0xff] %v9543_v6  ;;  %v2398_v6 = vshrl.u32 %v9537_v11, 16 }
 0x13e   : >> { %7198 = vmatmul.msk.bf16.gmra.mxu3 %vm11645_vm8, %v9517_v42  ;;  %v1515_v43 = vpop.f32.mrf.mxu2  ;;  %vm11672_vm8 = vmmov %vm11621_vm1 }
 0x140   : >> { %v1475_v1 = vpop.f32.mrf.mxu0  ;;  %v1621_v0 = vpop.f32.mrf.mxu1 }
 0x141   : >> { %v9551_v5 = vadd.f32 %v1621_v0, %v1475_v1  ;;  %v1661_v46 = vpop.f32.mrf.mxu3  ;;  %v2401_v0 = vshll.u32 %v9557_v7, 16 }
 0x142   : >> { %v9554_v20 = vadd.f32 %v1661_v46, %v1515_v43  ;;  %v2122_v43 = vor.u32 %v2120_v47, %v2118_v41  ;;  %v2400_v46 = vor.u32 %v2398_v6, %v2396_v34  ;;  %v7823_v34 = vld [vmem:[#allocation2 + $0x48] sm:$0xff]  ;;  %v9577_v6 = vld [vmem:[#allocation2 + $0x40] sm:$0xff]  }
 0x143   : >> { %11646 = vst [vmem:[#allocation44_spill] sm:$0xff] %v9551_v5  ;;  %7286 = vmatmul.msk.bf16.gmra.mxu0 %vm11647_vm9, %v2119_v33  ;;  %7310 = vmatmul.msk.bf16.gmra.mxu1 %vm11649_vm10, %v2397_v18  ;;  %v2126_v18 = vrot.slane %v2124_v36, 1  ;;  %v2128_v36 = vshrl.u32 %v7822_v4, 16  ;;  %vm11675_vm9 = vmmov %vm11621_vm1 }
 0x144   : >> { %11648 = vst [vmem:[#allocation45_spill] sm:$0xff] %v9554_v20  ;;  %v2403_v20 = vrot.slane %v2401_v0, 1  ;;  %v2132_v0 = vshll.u32 %v7823_v34, 16  ;;  %vm11676_vm10 = vmmov %vm11621_vm1 }
 0x145   : >> { %v2127_v9 = vsel %vm2075_vm0, %v2122_v43, %v2126_v18 }
 0x146   : >> { %v1517_v40 = vpop.f32.mrf.mxu2 }
 0x148   : >> { %v1477_v49 = vpop.f32.mrf.mxu0  ;;  %v1623_v50 = vpop.f32.mrf.mxu1 }
 0x149   : >> { %v9561_v1 = vadd.f32 %v1623_v50, %v1477_v49  ;;  %v1663_v37 = vpop.f32.mrf.mxu3  ;;  %v2404_v49 = vsel %vm2075_vm0, %v2400_v46, %v2403_v20 }
 0x14a   : >> { %v9563_v33 = vadd.f32 %v1663_v37, %v1517_v40 }
 0x14b   : >> { %11650 = vst [vmem:[#allocation46_spill] sm:$0xff] %v9561_v1  ;;  %7175 = vmatmul.msk.bf16.gmra.mxu2 %vm11652_vm11, %v9557_v7  ;;  %vm11677_vm11 = vmmov %vm11621_vm1 }
 0x14c   : >> { %11651 = vst [vmem:[#allocation47_spill] sm:$0xff] %v9563_v33  ;;  %v2405_v33 = vshrl.u32 %v9557_v7, 16 }
 0x14e   : >> { %7199 = vmatmul.msk.bf16.gmra.mxu3 %vm11653_vm12, %v9537_v11  ;;  %v1520_v10 = vpop.f32.mrf.mxu2  ;;  %vm11678_vm12 = vmmov %vm11621_vm1 }
 0x150   : >> { %v1480_v32 = vpop.f32.mrf.mxu0  ;;  %v1626_v63 = vpop.f32.mrf.mxu1 }
 0x151   : >> { %v9571_v50 = vadd.f32 %v1626_v63, %v1480_v32  ;;  %v1666_v40 = vpop.f32.mrf.mxu3  ;;  %v2408_v32 = vshll.u32 %v9577_v6, 16 }
 0x152   : >> { %v9574_v37 = vadd.f32 %v1666_v40, %v1520_v10  ;;  %v2130_v10 = vor.u32 %v2128_v36, %v2126_v18  ;;  %v2407_v40 = vor.u32 %v2405_v33, %v2403_v20  ;;  %v7834_v18 = vld [vmem:[%s11395_s1 + $0x60] sm:$0xff]  ;;  %v7836_v20 = vld [vmem:[%s11395_s1 + $0x70] sm:$0xff] }
 0x153   : >> { %11654 = vst [vmem:[#allocation48_spill] sm:$0xff] %v9571_v50  ;;  %7287 = vmatmul.msk.bf16.gmra.mxu0 %vm11655_vm13, %v2127_v9  ;;  %7311 = vmatmul.msk.bf16.gmra.mxu1 %vm11657_vm15, %v2404_v49  ;;  %v2134_v49 = vrot.slane %v2132_v0, 1  ;;  %v7824_v36 = vld [vmem:[#allocation2 + $0x50] sm:$0xff]  ;;  %vm11679_vm13 = vmmov %vm11621_vm1 }
 0x154   : >> { %11656 = vst [vmem:[#allocation49_spill] sm:$0xff] %v9574_v37  ;;  %v2410_v37 = vrot.slane %v2408_v32, 1  ;;  %2964 = vmatpush.bf16.msra.mxu2 %v7834_v18  ;;  %3165 = vmatpush.bf16.msra.mxu3 %v7836_v20  ;;  %vm11680_vm15 = vmmov %vm11621_vm1 }
 0x155   : >> { %v2135_v31 = vsel %vm2075_vm0, %v2130_v10, %v2134_v49  ;;  %v2140_v10 = vshll.u32 %v7824_v36, 16 }
 0x156   : >> { %v1522_v41 = vpop.f32.mrf.mxu2 }
 0x158   : >> { %v1482_v47 = vpop.f32.mrf.mxu0  ;;  %v1628_v43 = vpop.f32.mrf.mxu1 }
 0x159   : >> { %v9581_v63 = vadd.f32 %v1628_v43, %v1482_v47  ;;  %v1668_v46 = vpop.f32.mrf.mxu3  ;;  %v2411_v47 = vsel %vm2075_vm0, %v2407_v40, %v2410_v37 }
 0x15a   : >> { %v9583_v9 = vadd.f32 %v1668_v46, %v1522_v41  ;;  %v2136_v46 = vshrl.u32 %v7823_v34, 16 }
 0x15b   : >> { %11658 = vst [vmem:[#allocation50_spill] sm:$0xff] %v9581_v63  ;;  %7176 = vmatmul.msk.bf16.gmra.mxu2 %vm11660_vm2, %v9577_v6  ;;  %vm11681_vm2 = vmmov %vm11621_vm1 }
 0x15c   : >> { %11659 = vst [vmem:[#allocation51_spill] sm:$0xff] %v9583_v9  ;;  %v2138_v20 = vor.u32 %v2136_v46, %v2134_v49  ;;  %v8258_v49 = vld [vmem:[#allocation2 + $0x50] sm:$0xff]  }
 0x15d   : >> { %v2422_v35 = vshll.u32 %v8258_v49, 16 }
 0x15e   : >> { %7200 = vmatmul.msk.bf16.gmra.mxu3 %vm11661_vm3, %v9557_v7  ;;  %v1525_v4 = vpop.f32.mrf.mxu2  ;;  %vm11682_vm3 = vmmov %vm11621_vm1 }
 0x160   : >> { %v1485_v15 = vpop.f32.mrf.mxu0  ;;  %v1631_v16 = vpop.f32.mrf.mxu1 }
 0x161   : >> { %v9591_v43 = vadd.f32 %v1631_v16, %v1485_v15  ;;  %v1671_v41 = vpop.f32.mrf.mxu3  ;;  %v7854_v16 = vld [vmem:[%s11395_s1 + $0x80] sm:$0xff]  ;;  %v9606_v15 = vld [vmem:[#allocation2 + $0x48] sm:$0xff]  }
 0x162   : >> { %v9600_v33 = vadd.f32 %v1671_v41, %v1525_v4  ;;  %3598 = vmatpush.bf16.msra.mxu0 %v7854_v16  ;;  %v2415_v4 = vshll.u32 %v9606_v15, 16 }
 0x163   : >> { %11662 = vst [vmem:[#allocation52_spill] sm:$0xff] %v9591_v43  ;;  %7288 = vmatmul.msk.bf16.gmra.mxu0 %vm11663_vm4, %v2135_v31  ;;  %7312 = vmatmul.msk.bf16.gmra.mxu1 %vm11665_vm5, %v2411_v47  ;;  %v2412_v31 = vshrl.u32 %v9577_v6, 16  ;;  %vm11683_vm4 = vmmov %vm11621_vm1 }
 0x164   : >> { %11664 = vst [vmem:[#allocation53_spill] sm:$0xff] %v9600_v33  ;;  %v2142_v33 = vrot.slane %v2140_v10, 1  ;;  %v2417_v9 = vrot.slane %v2415_v4, 1  ;;  %vm11684_vm5 = vmmov %vm11621_vm1 }
 0x165   : >> { %v2414_v16 = vor.u32 %v2412_v31, %v2410_v37  ;;  %v7825_v37 = vld [vmem:[#allocation2 + $0x58] sm:$0xff]  ;;  %v2144_v31 = vshrl.u32 %v7824_v36, 16 }
 0x166   : >> { %v1527_v0 = vpop.f32.mrf.mxu2  ;;  %v2143_v13 = vsel %vm2075_vm0, %v2138_v20, %v2142_v33  ;;  %v2148_v4 = vshll.u32 %v7825_v37, 16  ;;  %v2419_v20 = vshrl.u32 %v9606_v15, 16 }
 0x168   : >> { %v1487_v32 = vpop.f32.mrf.mxu0  ;;  %v1633_v40 = vpop.f32.mrf.mxu1 }
 0x169   : >> { %v9610_v47 = vadd.f32 %v1633_v40, %v1487_v32  ;;  %v1673_v41 = vpop.f32.mrf.mxu3  ;;  %v2418_v32 = vsel %vm2075_vm0, %v2414_v16, %v2417_v9 }
 0x16a   : >> { %v9612_v18 = vadd.f32 %v1673_v41, %v1527_v0 }
 0x16b   : >> { %11666 = vst [vmem:[#allocation54_spill] sm:$0xff] %v9610_v47  ;;  %7177 = vmatmul.msk.bf16.gmra.mxu2 %vm11621_vm1, %v9606_v15 }
 0x16c   : >> { %11667 = vst [vmem:[#allocation55_spill] sm:$0xff] %v9612_v18 }
 0x16e   : >> { %7201 = vmatmul.msk.bf16.gmra.mxu3 %vm11668_vm6, %v9577_v6  ;;  %v1530_v34 = vpop.f32.mrf.mxu2  ;;  %vm11685_vm6 = vmmov %vm11621_vm1 }
 0x170   : >> { %v1490_v62 = vpop.f32.mrf.mxu0  ;;  %v1636_v30 = vpop.f32.mrf.mxu1 }
 0x171   : >> { %v9620_v40 = vadd.f32 %v1636_v30, %v1490_v62  ;;  %v1676_v0 = vpop.f32.mrf.mxu3 }
 0x172   : >> { %v9623_v41 = vadd.f32 %v1676_v0, %v1530_v34  ;;  %v2150_v34 = vrot.slane %v2148_v4, 1  ;;  %v2424_v0 = vrot.slane %v2422_v35, 1  ;;  %v7826_v35 = vld [vmem:[#allocation2 + $0x60] sm:$0xff]  ;;  %v2152_v4 = vshrl.u32 %v7825_v37, 16 }
 0x173   : >> { %11669 = vst [vmem:[#allocation56_spill] sm:$0xff] %v9620_v40  ;;  %7289 = vmatmul.msk.bf16.gmra.mxu0 %vm11670_vm7, %v2143_v13  ;;  %7313 = vmatmul.msk.bf16.gmra.mxu1 %vm11672_vm8, %v2418_v32  ;;  %v2146_v13 = vor.u32 %v2144_v31, %v2142_v33  ;;  %v2421_v32 = vor.u32 %v2419_v20, %v2417_v9  ;;  %v9642_v9 = vld [vmem:[#allocation2 + $0x58] sm:$0xff]   ;;  %v2156_v20 = vshll.u32 %v7826_v35, 16  ;;  %vm11686_vm7 = vmmov %vm11621_vm1 }
 0x174   : >> { %11671 = vst [vmem:[#allocation57_spill] sm:$0xff] %v9623_v41  ;;  %vm11687_vm8 = vmmov %vm11621_vm1 }
 0x175   : >> { %v2151_v60 = vsel %vm2075_vm0, %v2146_v13, %v2150_v34 }
 0x176   : >> { %v1532_v46 = vpop.f32.mrf.mxu2 }
 0x178   : >> { %v1492_v10 = vpop.f32.mrf.mxu0  ;;  %v1638_v18 = vpop.f32.mrf.mxu1 }
 0x179   : >> { %v9627_v16 = vadd.f32 %v1638_v18, %v1492_v10  ;;  %v1678_v30 = vpop.f32.mrf.mxu3  ;;  %v2425_v18 = vsel %vm2075_vm0, %v2421_v32, %v2424_v0  ;;  %v2429_v32 = vshll.u32 %v9642_v9, 16 }
 0x17a   : >> { %v9629_v62 = vadd.f32 %v1678_v30, %v1532_v46 }
 0x17b   : >> { %11673 = vst [vmem:[#allocation58_spill] sm:$0xff] %v9627_v16  ;;  %7178 = vmatmul.msk.bf16.gmra.mxu2 %vm11675_vm9, %v8258_v49  ;;  %vm11688_vm9 = vmmov %vm11621_vm1 }
 0x17c   : >> { %11674 = vst [vmem:[#allocation59_spill] sm:$0xff] %v9629_v62  ;;  %v2426_v62 = vshrl.u32 %v8258_v49, 16 }
 0x17e   : >> { %7202 = vmatmul.msk.bf16.gmra.mxu3 %vm11676_vm10, %v9606_v15  ;;  %v1770_v36 = vpop.f32.mrf.mxu2  ;;  %vm11689_vm10 = vmmov %vm11621_vm1 }
 0x180   : >> { %v2277_v41 = vpop.f32.mrf.mxu0  ;;  %v2545_v48 = vpop.f32.mrf.mxu1 }
 0x181   : >> { %v9636_v10 = vadd.f32 %v2545_v48, %v2277_v41  ;;  %v1875_v46 = vpop.f32.mrf.mxu3 }
 0x182   : >> { %v9639_v30 = vadd.f32 %v1875_v46, %v1770_v36  ;;  %v2158_v36 = vrot.slane %v2156_v20, 1  ;;  %v2431_v46 = vrot.slane %v2429_v32, 1 }
 0x183   : >> { %7290 = vmatmul.msk.bf16.gmra.mxu0 %vm11677_vm11, %v2151_v60  ;;  %7314 = vmatmul.msk.bf16.gmra.mxu1 %vm11678_vm12, %v2425_v18  ;;  %v2154_v60 = vor.u32 %v2152_v4, %v2150_v34  ;;  %v2428_v18 = vor.u32 %v2426_v62, %v2424_v0  ;;  %v7827_v62 = vld [vmem:[#allocation2 + $0x68] sm:$0xff]  ;;  %v8260_v34 = vld [vmem:[#allocation2 + $0x60] sm:$0xff]   ;;  %v2160_v4 = vshrl.u32 %v7826_v35, 16  ;;  %vm11691_vm11 = vmmov %vm11621_vm1 }
 0x184   : >> { %v2164_v20 = vshll.u32 %v7827_v62, 16  ;;  %v2436_v28 = vshll.u32 %v8260_v34, 16  ;;  %vm11692_vm12 = vmmov %vm11621_vm1 }
 0x185   : >> { %v2159_v59 = vsel %vm2075_vm0, %v2154_v60, %v2158_v36  ;;  %v2433_v60 = vshrl.u32 %v9642_v9, 16 }
 0x186   : >> { %v1772_v33 = vpop.f32.mrf.mxu2  ;;  %v2438_v35 = vrot.slane %v2436_v28, 1  ;;  %v7828_v28 = vld [vmem:[#allocation2 + $0x70] sm:$0xff] }
 0x188   : >> { %v2279_v31 = vpop.f32.mrf.mxu0  ;;  %v2547_v13 = vpop.f32.mrf.mxu1 }
 0x189   : >> { %v9645_v48 = vadd.f32 %v2547_v13, %v2279_v31  ;;  %v1877_v41 = vpop.f32.mrf.mxu3  ;;  %v2432_v31 = vsel %vm2075_vm0, %v2428_v18, %v2431_v46 }
 0x18a   : >> { %v9647_v29 = vadd.f32 %v1877_v41, %v1772_v33 }
 0x18b   : >> { %7179 = vmatmul.msk.bf16.gmra.mxu2 %vm11679_vm13, %v9642_v9  ;;  %vm11694_vm13 = vmmov %vm11621_vm1 }
 0x18e   : >> { %7203 = vmatmul.msk.bf16.gmra.mxu3 %vm11680_vm15, %v8258_v49  ;;  %v1775_v37 = vpop.f32.mrf.mxu2  ;;  %vm11696_vm15 = vmmov %vm11621_vm1 }
 0x190   : >> { %v2282_v19 = vpop.f32.mrf.mxu0  ;;  %v2550_v16 = vpop.f32.mrf.mxu1 }
 0x191   : >> { %v9654_v13 = vadd.f32 %v2550_v16, %v2282_v19  ;;  %v1880_v33 = vpop.f32.mrf.mxu3 }
 0x192   : >> { %v9657_v41 = vadd.f32 %v1880_v33, %v1775_v37  ;;  %v2162_v37 = vor.u32 %v2160_v4, %v2158_v36  ;;  %v2435_v33 = vor.u32 %v2433_v60, %v2431_v46  ;;  %v8261_v46 = vld [vmem:[#allocation2 + $0x68] sm:$0xff]   ;;  %v2168_v60 = vshrl.u32 %v7827_v62, 16 }
 0x193   : >> { %7291 = vmatmul.msk.bf16.gmra.mxu0 %vm11681_vm2, %v2159_v59  ;;  %7315 = vmatmul.msk.bf16.gmra.mxu1 %vm11682_vm3, %v2432_v31  ;;  %v7863_v59 = vld [vmem:[%s11398_s4 + $0x38] sm:$0xff]  ;;  %v2166_v31 = vrot.slane %v2164_v20, 1  ;;  %v2443_v43 = vshll.u32 %v8261_v46, 16  ;;  %vm11699_vm2 = vmmov %vm11621_vm1 }
 0x194   : >> { %4362 = vmatpush.bf16.msra.mxu1 %v7863_v59  ;;  %v2172_v59 = vshll.u32 %v7828_v28, 16  ;;  %vm11700_vm3 = vmmov %vm11621_vm1 }
 0x196   : >> { %v1777_v0 = vpop.f32.mrf.mxu2 }
 0x198   : >> { %v2284_v49 = vpop.f32.mrf.mxu0  ;;  %v2552_v32 = vpop.f32.mrf.mxu1 }
 0x199   : >> { %v9661_v18 = vadd.f32 %v2552_v32, %v2284_v49  ;;  %v1882_v19 = vpop.f32.mrf.mxu3  ;;  %v2167_v32 = vsel %vm2075_vm0, %v2162_v37, %v2166_v31  ;;  %v2440_v37 = vshrl.u32 %v8260_v34, 16 }
 0x19a   : >> { %v9663_v16 = vadd.f32 %v1882_v19, %v1777_v0  ;;  %v2439_v19 = vsel %vm2075_vm0, %v2435_v33, %v2438_v35 }
 0x19b   : >> { %7180 = vmatmul.msk.bf16.gmra.mxu2 %vm11683_vm4, %v8260_v34  ;;  %vm11702_vm4 = vmmov %vm11621_vm1 }
 0x19e   : >> { %7204 = vmatmul.msk.bf16.gmra.mxu3 %vm11684_vm5, %v9642_v9  ;;  %v1780_v40 = vpop.f32.mrf.mxu2  ;;  %vm11704_vm5 = vmmov %vm11621_vm1 }
 0x1a0   : >> { %v2287_v49 = vpop.f32.mrf.mxu0  ;;  %v2555_v0 = vpop.f32.mrf.mxu1 }
 0x1a1   : >> { %v9673_v58 = vadd.f32 %v2555_v0, %v2287_v49  ;;  %v1885_v47 = vpop.f32.mrf.mxu3  ;;  %v2445_v0 = vrot.slane %v2443_v43, 1  ;;  %v8262_v43 = vld [vmem:[#allocation2 + $0x70] sm:$0xff]  }
 0x1a2   : >> { %v9676_v36 = vadd.f32 %v1885_v47, %v1780_v40  ;;  %v2170_v47 = vor.u32 %v2168_v60, %v2166_v31  ;;  %v2174_v40 = vrot.slane %v2172_v59, 1  ;;  %v7829_v31 = vld [vmem:[#allocation2 + $0x78] sm:$0xff]  ;;  %v2176_v60 = vshrl.u32 %v7828_v28, 16 }
 0x1a3   : >> { %7292 = vmatmul.msk.bf16.gmra.mxu0 %vm11621_vm1, %v2167_v32  ;;  %7316 = vmatmul.msk.bf16.gmra.mxu1 %vm11685_vm6, %v2439_v19  ;;  %v2442_v32 = vor.u32 %v2440_v37, %v2438_v35  ;;  %v2180_v59 = vshll.u32 %v7829_v31, 16  ;;  %vm11707_vm6 = vmmov %vm11621_vm1 }
 0x1a4   : >> { %v2175_v62 = vsel %vm2075_vm0, %v2170_v47, %v2174_v40  ;;  %v2450_v47 = vshll.u32 %v8262_v43, 16 }
 0x1a5   : >> { %v2446_v50 = vsel %vm2075_vm0, %v2442_v32, %v2445_v0  ;;  %v2178_v32 = vor.u32 %v2176_v60, %v2174_v40  ;;  %v7830_v40 = vld [vmem:[#allocation2 + $0x80] sm:$0xff] }
 0x1a6   : >> { %v1782_v4 = vpop.f32.mrf.mxu2 }
 0x1a8   : >> { %v2289_v20 = vpop.f32.mrf.mxu0  ;;  %v2557_v27 = vpop.f32.mrf.mxu1 }
 0x1a9   : >> { %v9679_v57 = vadd.f32 %v2557_v27, %v2289_v20  ;;  %v1887_v33 = vpop.f32.mrf.mxu3 }
 0x1aa   : >> { %v9681_v49 = vadd.f32 %v1887_v33, %v1782_v4  ;;  %v2447_v33 = vshrl.u32 %v8261_v46, 16 }
 0x1ab   : >> { %7181 = vmatmul.msk.bf16.gmra.mxu2 %vm11686_vm7, %v8261_v46  ;;  %vm11709_vm7 = vmmov %vm11621_vm1 }
 0x1ae   : >> { %7205 = vmatmul.msk.bf16.gmra.mxu3 %vm11687_vm8, %v8260_v34  ;;  %v1785_v19 = vpop.f32.mrf.mxu2  ;;  %vm11711_vm8 = vmmov %vm11621_vm1 }
 0x1b0   : >> { %v2292_v63 = vpop.f32.mrf.mxu0  ;;  %v2560_v26 = vpop.f32.mrf.mxu1 }
 0x1b1   : >> { %v9687_v27 = vadd.f32 %v2560_v26, %v2292_v63  ;;  %v1890_v20 = vpop.f32.mrf.mxu3 }
 0x1b2   : >> { %v9690_v4 = vadd.f32 %v1890_v20, %v1785_v19  ;;  %v2182_v19 = vrot.slane %v2180_v59, 1  ;;  %v2184_v59 = vshrl.u32 %v7829_v31, 16 }
 0x1b3   : >> { %7293 = vmatmul.msk.bf16.gmra.mxu0 %vm11688_vm9, %v2175_v62  ;;  %7317 = vmatmul.msk.bf16.gmra.mxu1 %vm11689_vm10, %v2446_v50  ;;  %v2449_v62 = vor.u32 %v2447_v33, %v2445_v0  ;;  %v2452_v50 = vrot.slane %v2450_v47, 1  ;;  %v8263_v0 = vld [vmem:[#allocation2 + $0x78] sm:$0xff]   ;;  %v2188_v33 = vshll.u32 %v7830_v40, 16  ;;  %vm11712_vm9 = vmmov %vm11621_vm1 }
 0x1b4   : >> { %v2183_v28 = vsel %vm2075_vm0, %v2178_v32, %v2182_v19  ;;  %v2457_v32 = vshll.u32 %v8263_v0, 16  ;;  %vm11713_vm10 = vmmov %vm11621_vm1 }
 0x1b5   : >> { %v2453_v5 = vsel %vm2075_vm0, %v2449_v62, %v2452_v50  ;;  %v2186_v62 = vor.u32 %v2184_v59, %v2182_v19  ;;  %v7831_v19 = vld [vmem:[#allocation2 + $0x88] sm:$0xff] }
 0x1b6   : >> { %v1787_v35 = vpop.f32.mrf.mxu2 }
 0x1b8   : >> { %v2294_v34 = vpop.f32.mrf.mxu0  ;;  %v2562_v37 = vpop.f32.mrf.mxu1 }
 0x1b9   : >> { %v9693_v55 = vadd.f32 %v2562_v37, %v2294_v34  ;;  %v1892_v26 = vpop.f32.mrf.mxu3 }
 0x1ba   : >> { %v9695_v63 = vadd.f32 %v1892_v26, %v1787_v35  ;;  %v2454_v26 = vshrl.u32 %v8262_v43, 16 }
 0x1bb   : >> { %7182 = vmatmul.msk.bf16.gmra.mxu2 %vm11691_vm11, %v8262_v43  ;;  %vm11715_vm11 = vmmov %vm11621_vm1 }
 0x1bc   : >> { %11690 = vst [vmem:[#allocation60_spill] sm:$0xff] %v9695_v63 }
 0x1be   : >> { %7206 = vmatmul.msk.bf16.gmra.mxu3 %vm11692_vm12, %v8261_v46  ;;  %v1790_v20 = vpop.f32.mrf.mxu2  ;;  %vm11716_vm12 = vmmov %vm11621_vm1 }
 0x1c0   : >> { %v2297_v1 = vpop.f32.mrf.mxu0  ;;  %v2565_v25 = vpop.f32.mrf.mxu1 }
 0x1c1   : >> { %v9701_v34 = vadd.f32 %v2565_v25, %v2297_v1  ;;  %v1895_v37 = vpop.f32.mrf.mxu3 }
 0x1c2   : >> { %v9704_v35 = vadd.f32 %v1895_v37, %v1790_v20  ;;  %v2190_v20 = vrot.slane %v2188_v33, 1  ;;  %v2196_v33 = vshll.u32 %v7831_v19, 16 }
 0x1c3   : >> { %11693 = vst [vmem:[#allocation61_spill] sm:$0xff] %v9701_v34  ;;  %7294 = vmatmul.msk.bf16.gmra.mxu0 %vm11694_vm13, %v2183_v28  ;;  %7318 = vmatmul.msk.bf16.gmra.mxu1 %vm11696_vm15, %v2453_v5  ;;  %v2456_v28 = vor.u32 %v2454_v26, %v2452_v50  ;;  %v2459_v5 = vrot.slane %v2457_v32, 1  ;;  %v2461_v32 = vshrl.u32 %v8263_v0, 16  ;;  %vm11719_vm13 = vmmov %vm11621_vm1 }
 0x1c4   : >> { %11695 = vst [vmem:[#allocation62_spill] sm:$0xff] %v9704_v35  ;;  %v2191_v31 = vsel %vm2075_vm0, %v2186_v62, %v2190_v20  ;;  %vm11720_vm15 = vmmov %vm11621_vm1 }
 0x1c5   : >> { %v2460_v63 = vsel %vm2075_vm0, %v2456_v28, %v2459_v5 }
 0x1c6   : >> { %v1792_v60 = vpop.f32.mrf.mxu2 }
 0x1c8   : >> { %v2299_v46 = vpop.f32.mrf.mxu0  ;;  %v2567_v47 = vpop.f32.mrf.mxu1 }
 0x1c9   : >> { %v9707_v54 = vadd.f32 %v2567_v47, %v2299_v46  ;;  %v1897_v25 = vpop.f32.mrf.mxu3 }
 0x1ca   : >> { %v9709_v1 = vadd.f32 %v1897_v25, %v1792_v60  ;;  %v2464_v25 = vshll.u32 %v9418_v12, 16 }
 0x1cb   : >> { %11697 = vst [vmem:[#allocation63_spill] sm:$0xff] %v9707_v54  ;;  %7183 = vmatmul.msk.bf16.gmra.mxu2 %vm11699_vm2, %v8263_v0  ;;  %vm11722_vm2 = vmmov %vm11621_vm1 }
 0x1cc   : >> { %11698 = vst [vmem:[#allocation64_spill] sm:$0xff] %v9709_v1 }
 0x1ce   : >> { %7207 = vmatmul.msk.bf16.gmra.mxu3 %vm11700_vm3, %v8262_v43  ;;  %v1795_v37 = vpop.f32.mrf.mxu2  ;;  %v2192_v43 = vshrl.u32 %v7830_v40, 16  ;;  %vm11725_vm3 = vmmov %vm11621_vm1 }
 0x1d0   : >> { %v2302_v34 = vpop.f32.mrf.mxu0  ;;  %v2570_v35 = vpop.f32.mrf.mxu1  ;;  %v2194_v28 = vor.u32 %v2192_v43, %v2190_v20  ;;  %v8391_v43 = vld [vmem:[#allocation2 + $0x14] sm:$0x8] }
 0x1d1   : >> { %v9715_v46 = vadd.f32 %v2570_v35, %v2302_v34  ;;  %v1900_v47 = vpop.f32.mrf.mxu3 }
 0x1d2   : >> { %v9718_v60 = vadd.f32 %v1900_v47, %v1795_v37  ;;  %v2198_v37 = vrot.slane %v2196_v33, 1  ;;  %v1987_v47 = vld [vmem:[#allocation2 + $0x90] sm:$0x1]  ;;  %v8655_v33 = vld [vmem:[#allocation2 + $0x14] sm:$0xf0]  }
 0x1d3   : >> { %11701 = vst [vmem:[#allocation65_spill] sm:$0xff] %v9715_v46  ;;  %7295 = vmatmul.msk.bf16.gmra.mxu0 %vm11702_vm4, %v2191_v31  ;;  %7319 = vmatmul.msk.bf16.gmra.mxu1 %vm11704_vm5, %v2460_v63  ;;  %v2463_v63 = vor.u32 %v2461_v32, %v2459_v5  ;;  %v2466_v31 = vrot.slane %v2464_v25, 1  ;;  %v1138_v46 = vld [vmem:[#allocation2 + $0x88] sm:$0x1]  ;;  %vm11726_vm4 = vmmov %vm11621_vm1 }
 0x1d4   : >> { %11703 = vst [vmem:[#allocation66_spill] sm:$0xff] %v9718_v60  ;;  %v2199_v1 = vsel %vm2075_vm0, %v2194_v28, %v2198_v37  ;;  %v2200_v28 = vshrl.u32 %v7831_v19, 16  ;;  %vm11728_vm5 = vmmov %vm11621_vm1 }
 0x1d6   : >> { %v1797_v50 = vpop.f32.mrf.mxu2 }
 0x1d8   : >> { %v2304_v59 = vpop.f32.mrf.mxu0  ;;  %v2572_v26 = vpop.f32.mrf.mxu1 }
 0x1d9   : >> { %v9722_v62 = vadd.f32 %v2572_v26, %v2304_v59  ;;  %v1902_v34 = vpop.f32.mrf.mxu3  ;;  %v2057_v59 = vunpack.c.l.b16 %v1987_v47  ;;  %v2358_v26 = vunpack.c.l.b16 %v1138_v46  ;;  %v2468_v47 = vshrl.u32 %v9418_v12, 16 }
 0x1da   : >> { %v9724_v35 = vadd.f32 %v1902_v34, %v1797_v50  ;;  %v2467_v50 = vsel %vm2075_vm0, %v2463_v63, %v2466_v31 }
 0x1db   : >> { %11705 = vst [vmem:[#allocation67_spill] sm:$0xff] %v9722_v62  ;;  %7184 = vmatmul.msk.bf16.gmra.mxu2 %vm11621_vm1, %v9418_v12  ;;  %v2074_v5 = vpack.c.b16 %v2057_v59, %v2057_v59 }
 0x1dc   : >> { %11706 = vst [vmem:[#allocation68_spill] sm:$0xff] %v9724_v35 }
 0x1dd   : >> { %v2204_v46 = vshll.u32 %v2074_v5, 16 }
 0x1de   : >> { %7208 = vmatmul.msk.bf16.gmra.mxu3 %vm11707_vm6, %v8263_v0  ;;  %v1800_v40 = vpop.f32.mrf.mxu2  ;;  %v2359_v0 = vpack.c.b16 %v2358_v26, %v2358_v26  ;;  %v2470_v26 = vor.u32 %v2468_v47, %v2466_v31  ;;  %vm11731_vm6 = vmmov %vm11621_vm1 }
 0x1df   : >> { %v2206_v59 = vrot.slane %v2204_v46, 1 }
 0x1e0   : >> { %v2307_v60 = vpop.f32.mrf.mxu0  ;;  %v2575_v62 = vpop.f32.mrf.mxu1  ;;  %v2472_v63 = vshll.u32 %v2359_v0, 16  ;;  %v8767_v0 = vld [vmem:[#allocation2 + $0x80] sm:$0xff]  }
 0x1e1   : >> { %v9731_v34 = vadd.f32 %v2575_v62, %v2307_v60  ;;  %v1905_v35 = vpop.f32.mrf.mxu3  ;;  %v8657_v62 = vld [vmem:[#allocation2 + $0x1c] sm:$0xff]  }
 0x1e2   : >> { %v9734_v20 = vadd.f32 %v1905_v35, %v1800_v40  ;;  %v2202_v40 = vor.u32 %v2200_v28, %v2198_v37  ;;  %v2757_v12 = vshll.u32 %v8657_v62, 16 }
 0x1e3   : >> { %11708 = vst [vmem:[#allocation69_spill] sm:$0xff] %v9731_v34  ;;  %7296 = vmatmul.msk.bf16.gmra.mxu0 %vm11709_vm7, %v2199_v1  ;;  %7320 = vmatmul.msk.bf16.gmra.mxu1 %vm11711_vm8, %v2467_v50  ;;  %v8392_v34 = vor.u32 %v8655_v33, %v8391_v43  ;;  %v2474_v50 = vrot.slane %v2472_v63, 1  ;;  %v7839_v63 = vld [vmem:[#allocation2 + $0x20] sm:$0xff]  ;;  %vm11733_vm7 = vmmov %vm11621_vm1 }
 0x1e4   : >> { %11710 = vst [vmem:[#allocation70_spill] sm:$0xff] %v9734_v20  ;;  %v2754_v20 = vshrl.u32 %v8657_v62, 16  ;;  %v2759_v31 = vrot.slane %v2757_v12, 4  ;;  %vm11736_vm8 = vmmov %vm11621_vm1 }
 0x1e5   : >> { %v2746_v19 = vshrl.u32 %v8392_v34, 16  ;;  %v2749_v5 = vshll.u32 %v8392_v34, 16 }
 0x1e6   : >> { %v1802_v32 = vpop.f32.mrf.mxu2  ;;  %v2756_v28 = vrot.slane %v2754_v20, 3 }
 0x1e7   : >> { %v2751_v37 = vrot.slane %v2749_v5, 4  ;;  %v3407_v5 = vshll.u32 %v7839_v63, 16 }
 0x1e8   : >> { %v2309_v25 = vpop.f32.mrf.mxu0  ;;  %v2577_v60 = vpop.f32.mrf.mxu1 }
 0x1e9   : >> { %v9738_v54 = vadd.f32 %v2577_v60, %v2309_v25  ;;  %v1907_v1 = vpop.f32.mrf.mxu3  ;;  %v2207_v25 = vsel %vm2075_vm0, %v2202_v40, %v2206_v59  ;;  %v7838_v60 = vld [vmem:[#allocation2 + $0x18] sm:$0xff]  ;;  %v2760_v59 = vor.u32 %v2759_v31, %v2756_v28 }
 0x1ea   : >> { %v9740_v35 = vadd.f32 %v1907_v1, %v1802_v32  ;;  %v2475_v32 = vsel %vm2075_vm0, %v2470_v26, %v2474_v50  ;;  %v3402_v62 = vshll.u32 %v7838_v60, 16 }
 0x1eb   : >> { %7185 = vmatmul.msk.bf16.gmra.mxu2 %vm11712_vm9, %v9420_v39  ;;  %v2748_v39 = vrot.slane %v2746_v19, 3  ;;  %vm11737_vm9 = vmmov %vm11621_vm1 }
 0x1ec   : >> { %v3404_v19 = vrot.slane %v3402_v62, 1 }
 0x1ed   : >> { %v2752_v40 = vor.u32 %v2751_v37, %v2748_v39 }
 0x1ee   : >> { %7209 = vmatmul.msk.bf16.gmra.mxu3 %vm11713_vm10, %v8767_v0  ;;  %v1805_v43 = vpop.f32.mrf.mxu2  ;;  %v3400_v0 = vshrl.u32 %v7838_v60, 16  ;;  %vm11739_vm10 = vmmov %vm11621_vm1 }
 0x1ef   : >> { %v2761_v12 = vsel %vm1233_vm14, %v2752_v40, %v2760_v59 }
 0x1f0   : >> { %v2312_v33 = vpop.f32.mrf.mxu0  ;;  %v2580_v1 = vpop.f32.mrf.mxu1 }
 0x1f1   : >> { %v9747_v46 = vadd.f32 %v2580_v1, %v2312_v33  ;;  %v1910_v34 = vpop.f32.mrf.mxu3  ;;  %v8659_v33 = vld [vmem:[#allocation2 + $0x24] sm:$0xff]  }
 0x1f2   : >> { %v9750_v47 = vadd.f32 %v1910_v34, %v1805_v43  ;;  %v3409_v34 = vrot.slane %v3407_v5, 1  ;;  %v2763_v39 = vshrl.u32 %v8659_v33, 16  ;;  %v2766_v37 = vshll.u32 %v8659_v33, 16 }
 0x1f3   : >> { %11714 = vst [vmem:[#allocation71_spill] sm:$0xff] %v9747_v46  ;;  %7297 = vmatmul.msk.bf16.gmra.mxu0 %vm11715_vm11, %v2207_v25  ;;  %7321 = vmatmul.msk.bf16.gmra.mxu1 %vm11716_vm12, %v2475_v32  ;;  %v3405_v32 = vor.u32 %v3404_v19, %v3400_v0  ;;  %v7840_v0 = vld [vmem:[#allocation2 + $0x28] sm:$0xff]  ;;  %vm11742_vm11 = vmmov %vm11621_vm1 }
 0x1f4   : >> { %v2765_v40 = vrot.slane %v2763_v39, 3  ;;  %vm11743_vm12 = vmmov %vm11621_vm1 }
 0x1f5   : >> { %v3410_v31 = vsel %vm2075_vm0, %v3405_v32, %v3409_v34  ;;  %v8661_v32 = vld [vmem:[#allocation2 + $0x2c] sm:$0xff]  }
 0x1f6   : >> { %v1807_v26 = vpop.f32.mrf.mxu2 }
 0x1f8   : >> { %v2314_v50 = vpop.f32.mrf.mxu0  ;;  %v2582_v20 = vpop.f32.mrf.mxu1 }
 0x1f9   : >> { %v9754_v1 = vadd.f32 %v2582_v20, %v2314_v50  ;;  %v1912_v25 = vpop.f32.mrf.mxu3  ;;  %v2768_v50 = vrot.slane %v2766_v37, 4 }
 0x1fa   : >> { %v9756_v43 = vadd.f32 %v1912_v25, %v1807_v26  ;;  %v3411_v25 = vshrl.u32 %v7839_v63, 16 }
 0x1fb   : >> { %11717 = vst [vmem:[#allocation72_spill] sm:$0xff] %v9754_v1  ;;  %7330 = vmatmul.msk.bf16.vlgmr.msra.gmra.mxu2 %vm11719_vm13, %v2761_v12  ;;  %v2769_v19 = vor.u32 %v2768_v50, %v2765_v40  ;;  %vm11745_vm13 = vmmov %vm11621_vm1 }
 0x1fc   : >> { %11718 = vst [vmem:[#allocation73_spill] sm:$0xff] %v9756_v43 }
 0x1fd   : >> { %v2770_v1 = vsel %vm1233_vm14, %v2760_v59, %v2769_v19 }
 0x1fe   : >> { %7354 = vmatmul.msk.bf16.vlgmr.msra.gmra.mxu3 %vm11720_vm15, %v9477_v2  ;;  %v1810_v60 = vpop.f32.mrf.mxu2  ;;  %v3415_v2 = vshll.u32 %v7840_v0, 16  ;;  %vm11748_vm15 = vmmov %vm11621_vm1 }
 0x200   : >> { %v2317_v28 = vpop.f32.mrf.mxu0  ;;  %v2585_v62 = vpop.f32.mrf.mxu1 }
 0x201   : >> { %v9762_v20 = vadd.f32 %v2585_v62, %v2317_v28  ;;  %v1915_v26 = vpop.f32.mrf.mxu3  ;;  %v3413_v28 = vor.u32 %v3411_v25, %v3409_v34  ;;  %v2775_v62 = vshll.u32 %v8661_v32, 16  ;;  %v7841_v34 = vld [vmem:[#allocation2 + $0x30] sm:$0xff] }
 0x202   : >> { %v9765_v12 = vadd.f32 %v1915_v26, %v1810_v60  ;;  %v3417_v60 = vrot.slane %v3415_v2, 1 }
 0x203   : >> { %11721 = vst [vmem:[#allocation74_spill] sm:$0xff] %v9762_v20  ;;  %7442 = vmatmul.msk.bf16.vlgmr.msra.gmra.mxu0 %vm11722_vm2, %v3410_v31  ;;  %v2772_v31 = vshrl.u32 %v8661_v32, 16  ;;  %vm11749_vm2 = vmmov %vm11621_vm1 }
 0x204   : >> { %v3418_v50 = vsel %vm2075_vm0, %v3413_v28, %v3417_v60  ;;  %v8663_v28 = vld [vmem:[#allocation2 + $0x34] sm:$0xff]  }
 0x205   : >> { %v2774_v26 = vrot.slane %v2772_v31, 3 }
 0x206   : >> { %v1812_v5 = vpop.f32.mrf.mxu2 }
 0x208   : >> { %v2319_v33 = vpop.f32.mrf.mxu0  ;;  %v2587_v43 = vpop.f32.mrf.mxu1 }
 0x209   : >> { %v9768_v46 = vadd.f32 %v2587_v43, %v2319_v33  ;;  %v1917_v39 = vpop.f32.mrf.mxu3  ;;  %v2777_v43 = vrot.slane %v2775_v62, 4 }
 0x20a   : >> { %v9770_v37 = vadd.f32 %v1917_v39, %v1812_v5  ;;  %v3419_v39 = vshrl.u32 %v7840_v0, 16  ;;  %v2784_v0 = vshll.u32 %v8663_v28, 16 }
 0x20b   : >> { %11723 = vst [vmem:[#allocation75_spill] sm:$0xff] %v9768_v46  ;;  %7331 = vmatmul.msk.bf16.gmra.mxu2 %vm11725_vm3, %v2770_v1  ;;  %v2778_v25 = vor.u32 %v2777_v43, %v2774_v26  ;;  %vm11751_vm3 = vmmov %vm11621_vm1 }
 0x20c   : >> { %11724 = vst [vmem:[#allocation76_spill] sm:$0xff] %v9770_v37 }
 0x20d   : >> { %v2779_v46 = vsel %vm1233_vm14, %v2769_v19, %v2778_v25 }
 0x20e   : >> { %7355 = vmatmul.msk.bf16.gmra.mxu3 %vm11726_vm4, %v9497_v14  ;;  %v1815_v63 = vpop.f32.mrf.mxu2  ;;  %v3423_v14 = vshll.u32 %v7841_v34, 16  ;;  %vm11754_vm4 = vmmov %vm11621_vm1 }
 0x210   : >> { %v2322_v40 = vpop.f32.mrf.mxu0  ;;  %v2590_v59 = vpop.f32.mrf.mxu1 }
 0x211   : >> { %v9776_v33 = vadd.f32 %v2590_v59, %v2322_v40  ;;  %v1920_v5 = vpop.f32.mrf.mxu3  ;;  %v3421_v40 = vor.u32 %v3419_v39, %v3417_v60  ;;  %v2781_v59 = vshrl.u32 %v8663_v28, 16  ;;  %v7842_v60 = vld [vmem:[#allocation2 + $0x38] sm:$0xff] }
 0x212   : >> { %v9779_v1 = vadd.f32 %v1920_v5, %v1815_v63  ;;  %v7862_v63 = vld [vmem:[%s11398_s4 + $0x30] sm:$0xff] }
 0x213   : >> { %11727 = vst [vmem:[#allocation77_spill] sm:$0xff] %v9776_v33  ;;  %7443 = vmatmul.msk.bf16.gmra.mxu0 %vm11728_vm5, %v3418_v50  ;;  %v3425_v50 = vrot.slane %v3423_v14, 1  ;;  %4363 = vmatpush.bf16.msra.mxu1 %v7862_v63  ;;  %v2783_v5 = vrot.slane %v2781_v59, 3  ;;  %v3427_v63 = vshrl.u32 %v7841_v34, 16  ;;  %vm11755_vm5 = vmmov %vm11621_vm1 }
 0x215   : >> { %v3426_v26 = vsel %vm2075_vm0, %v3421_v40, %v3425_v50  ;;  %v8665_v40 = vld [vmem:[#allocation2 + $0x3c] sm:$0xff]  }
 0x216   : >> { %v1817_v2 = vpop.f32.mrf.mxu2 }
 0x218   : >> { %v2324_v32 = vpop.f32.mrf.mxu0  ;;  %v2592_v37 = vpop.f32.mrf.mxu1 }
 0x219   : >> { %v9782_v20 = vadd.f32 %v2592_v37, %v2324_v32  ;;  %v1922_v31 = vpop.f32.mrf.mxu3 }
 0x21a   : >> { %v9784_v62 = vadd.f32 %v1922_v31, %v1817_v2  ;;  %v2786_v2 = vrot.slane %v2784_v0, 4 }
 0x21b   : >> { %11729 = vst [vmem:[#allocation78_spill] sm:$0xff] %v9782_v20  ;;  %7332 = vmatmul.msk.bf16.gmra.mxu2 %vm11621_vm1, %v2779_v46 }
 0x21c   : >> { %11730 = vst [vmem:[#allocation79_spill] sm:$0xff] %v9784_v62  ;;  %v2787_v39 = vor.u32 %v2786_v2, %v2783_v5 }
 0x21e   : >> { %7356 = vmatmul.msk.bf16.gmra.mxu3 %vm11731_vm6, %v9517_v42  ;;  %v1820_v19 = vpop.f32.mrf.mxu2  ;;  %v3431_v42 = vshll.u32 %v7842_v60, 16  ;;  %v2788_v20 = vsel %vm1233_vm14, %v2778_v25, %v2787_v39  ;;  %vm11760_vm6 = vmmov %vm11621_vm1 }
 0x220   : >> { %v2327_v37 = vpop.f32.mrf.mxu0  ;;  %v2595_v43 = vpop.f32.mrf.mxu1 }
 0x221   : >> { %v9793_v32 = vadd.f32 %v2595_v43, %v2327_v37  ;;  %v1925_v31 = vpop.f32.mrf.mxu3  ;;  %v3429_v37 = vor.u32 %v3427_v63, %v3425_v50  ;;  %v2793_v43 = vshll.u32 %v8665_v40, 16  ;;  %v7843_v50 = vld [vmem:[#allocation2 + $0x40] sm:$0xff] }
 0x222   : >> { %v9796_v46 = vadd.f32 %v1925_v31, %v1820_v19  ;;  %v3433_v19 = vrot.slane %v3431_v42, 1 }
 0x223   : >> { %11732 = vst [vmem:[#allocation80_spill] sm:$0xff] %v9793_v32  ;;  %7444 = vmatmul.msk.bf16.gmra.mxu0 %vm11733_vm7, %v3426_v26  ;;  %v2790_v26 = vshrl.u32 %v8665_v40, 16  ;;  %vm11761_vm7 = vmmov %vm11621_vm1 }
 0x224   : >> { %v3434_v2 = vsel %vm2075_vm0, %v3429_v37, %v3433_v19  ;;  %v8667_v37 = vld [vmem:[#allocation2 + $0x44] sm:$0xff]  }
 0x225   : >> { %v2792_v31 = vrot.slane %v2790_v26, 3 }
 0x226   : >> { %v1822_v14 = vpop.f32.mrf.mxu2 }
 0x228   : >> { %v2329_v28 = vpop.f32.mrf.mxu0  ;;  %v2597_v62 = vpop.f32.mrf.mxu1 }
 0x229   : >> { %v9799_v33 = vadd.f32 %v2597_v62, %v2329_v28  ;;  %v1927_v59 = vpop.f32.mrf.mxu3  ;;  %v2795_v62 = vrot.slane %v2793_v43, 4 }
 0x22a   : >> { %v9801_v0 = vadd.f32 %v1927_v59, %v1822_v14  ;;  %v3435_v59 = vshrl.u32 %v7842_v60, 16 }
 0x22b   : >> { %11734 = vst [vmem:[#allocation81_spill] sm:$0xff] %v9799_v33  ;;  %7333 = vmatmul.msk.bf16.gmra.mxu2 %vm11736_vm8, %v2788_v20  ;;  %v2796_v63 = vor.u32 %v2795_v62, %v2792_v31  ;;  %vm11762_vm8 = vmmov %vm11621_vm1 }
 0x22c   : >> { %11735 = vst [vmem:[#allocation82_spill] sm:$0xff] %v9801_v0 }
 0x22d   : >> { %v2797_v33 = vsel %vm1233_vm14, %v2787_v39, %v2796_v63 }
 0x22e   : >> { %7357 = vmatmul.msk.bf16.gmra.mxu3 %vm11737_vm9, %v9537_v11  ;;  %v1825_v34 = vpop.f32.mrf.mxu2  ;;  %v3439_v11 = vshll.u32 %v7843_v50, 16  ;;  %vm11763_vm9 = vmmov %vm11621_vm1 }
 0x230   : >> { %v2332_v5 = vpop.f32.mrf.mxu0  ;;  %v2600_v25 = vpop.f32.mrf.mxu1 }
 0x231   : >> { %v9807_v28 = vadd.f32 %v2600_v25, %v2332_v5  ;;  %v1930_v14 = vpop.f32.mrf.mxu3  ;;  %v3437_v5 = vor.u32 %v3435_v59, %v3433_v19  ;;  %v2802_v25 = vshll.u32 %v8667_v37, 16  ;;  %v7844_v19 = vld [vmem:[#allocation2 + $0x48] sm:$0xff] }
 0x232   : >> { %v9810_v20 = vadd.f32 %v1930_v14, %v1825_v34  ;;  %v3441_v34 = vrot.slane %v3439_v11, 1 }
 0x233   : >> { %11738 = vst [vmem:[#allocation83_spill] sm:$0xff] %v9807_v28  ;;  %7445 = vmatmul.msk.bf16.gmra.mxu0 %vm11739_vm10, %v3434_v2  ;;  %v2799_v2 = vshrl.u32 %v8667_v37, 16  ;;  %vm11764_vm10 = vmmov %vm11621_vm1 }
 0x234   : >> { %v3442_v62 = vsel %vm2075_vm0, %v3437_v5, %v3441_v34  ;;  %v8669_v5 = vld [vmem:[#allocation2 + $0x4c] sm:$0xff]  }
 0x235   : >> { %v2801_v14 = vrot.slane %v2799_v2, 3 }
 0x236   : >> { %v1827_v42 = vpop.f32.mrf.mxu2 }
 0x238   : >> { %v2334_v40 = vpop.f32.mrf.mxu0  ;;  %v2602_v0 = vpop.f32.mrf.mxu1 }
 0x239   : >> { %v9813_v32 = vadd.f32 %v2602_v0, %v2334_v40  ;;  %v1932_v26 = vpop.f32.mrf.mxu3  ;;  %v2804_v0 = vrot.slane %v2802_v25, 4 }
 0x23a   : >> { %v9815_v43 = vadd.f32 %v1932_v26, %v1827_v42  ;;  %v3443_v26 = vshrl.u32 %v7843_v50, 16 }
 0x23b   : >> { %11740 = vst [vmem:[#allocation84_spill] sm:$0xff] %v9813_v32  ;;  %7334 = vmatmul.msk.bf16.gmra.mxu2 %vm11742_vm11, %v2797_v33  ;;  %v2805_v59 = vor.u32 %v2804_v0, %v2801_v14  ;;  %vm11766_vm11 = vmmov %vm11621_vm1 }
 0x23c   : >> { %11741 = vst [vmem:[#allocation85_spill] sm:$0xff] %v9815_v43 }
 0x23d   : >> { %v2806_v32 = vsel %vm1233_vm14, %v2796_v63, %v2805_v59 }
 0x23e   : >> { %7358 = vmatmul.msk.bf16.gmra.mxu3 %vm11743_vm12, %v9557_v7  ;;  %v1830_v60 = vpop.f32.mrf.mxu2  ;;  %v3447_v7 = vshll.u32 %v7844_v19, 16  ;;  %vm11767_vm12 = vmmov %vm11621_vm1 }
 0x240   : >> { %v2337_v31 = vpop.f32.mrf.mxu0  ;;  %v2605_v39 = vpop.f32.mrf.mxu1 }
 0x241   : >> { %v9821_v40 = vadd.f32 %v2605_v39, %v2337_v31  ;;  %v1935_v42 = vpop.f32.mrf.mxu3  ;;  %v3445_v31 = vor.u32 %v3443_v26, %v3441_v34  ;;  %v2811_v39 = vshll.u32 %v8669_v5, 16  ;;  %v7845_v34 = vld [vmem:[#allocation2 + $0x50] sm:$0xff] }
 0x242   : >> { %v9824_v33 = vadd.f32 %v1935_v42, %v1830_v60  ;;  %v3449_v60 = vrot.slane %v3447_v7, 1 }
 0x243   : >> { %11744 = vst [vmem:[#allocation86_spill] sm:$0xff] %v9821_v40  ;;  %7446 = vmatmul.msk.bf16.gmra.mxu0 %vm11745_vm13, %v3442_v62  ;;  %v2808_v62 = vshrl.u32 %v8669_v5, 16  ;;  %vm11769_vm13 = vmmov %vm11621_vm1 }
 0x244   : >> { %v3450_v0 = vsel %vm2075_vm0, %v3445_v31, %v3449_v60  ;;  %v8671_v31 = vld [vmem:[#allocation2 + $0x54] sm:$0xff]  }
 0x245   : >> { %v2810_v42 = vrot.slane %v2808_v62, 3 }
 0x246   : >> { %v1832_v11 = vpop.f32.mrf.mxu2 }
 0x248   : >> { %v2339_v37 = vpop.f32.mrf.mxu0  ;;  %v2607_v43 = vpop.f32.mrf.mxu1 }
 0x249   : >> { %v9827_v28 = vadd.f32 %v2607_v43, %v2339_v37  ;;  %v1937_v2 = vpop.f32.mrf.mxu3  ;;  %v2813_v43 = vrot.slane %v2811_v39, 4 }
 0x24a   : >> { %v9829_v25 = vadd.f32 %v1937_v2, %v1832_v11  ;;  %v3451_v2 = vshrl.u32 %v7844_v19, 16 }
 0x24b   : >> { %11746 = vst [vmem:[#allocation87_spill] sm:$0xff] %v9827_v28  ;;  %7335 = vmatmul.msk.bf16.gmra.mxu2 %vm11748_vm15, %v2806_v32  ;;  %v2814_v26 = vor.u32 %v2813_v43, %v2810_v42  ;;  %vm11770_vm15 = vcmask 257024  }
 0x24c   : >> { %11747 = vst [vmem:[#allocation88_spill] sm:$0xff] %v9829_v25 }
 0x24d   : >> { %v2815_v28 = vsel %vm1233_vm14, %v2805_v59, %v2814_v26 }
 0x24e   : >> { %7359 = vmatmul.msk.bf16.gmra.mxu3 %vm11749_vm2, %v9577_v6  ;;  %v1835_v50 = vpop.f32.mrf.mxu2  ;;  %v3455_v6 = vshll.u32 %v7845_v34, 16  ;;  %vm11771_vm2 = vmmov %vm11621_vm1 }
 0x250   : >> { %v2342_v14 = vpop.f32.mrf.mxu0  ;;  %v2610_v63 = vpop.f32.mrf.mxu1 }
 0x251   : >> { %v9835_v37 = vadd.f32 %v2610_v63, %v2342_v14  ;;  %v1940_v11 = vpop.f32.mrf.mxu3  ;;  %v3453_v14 = vor.u32 %v3451_v2, %v3449_v60  ;;  %v2820_v63 = vshll.u32 %v8671_v31, 16  ;;  %v7846_v60 = vld [vmem:[#allocation2 + $0x58] sm:$0xff] }
 0x252   : >> { %v9838_v32 = vadd.f32 %v1940_v11, %v1835_v50  ;;  %v3457_v50 = vrot.slane %v3455_v6, 1 }
 0x253   : >> { %11750 = vst [vmem:[#allocation89_spill] sm:$0xff] %v9835_v37  ;;  %7447 = vmatmul.msk.bf16.gmra.mxu0 %vm11751_vm3, %v3450_v0  ;;  %v2817_v0 = vshrl.u32 %v8671_v31, 16  ;;  %vm11772_vm3 = vmmov %vm11770_vm15 }
 0x254   : >> { %v3458_v43 = vsel %vm2075_vm0, %v3453_v14, %v3457_v50  ;;  %v8673_v14 = vld [vmem:[#allocation2 + $0x5c] sm:$0xff]  }
 0x255   : >> { %v2819_v11 = vrot.slane %v2817_v0, 3 }
 0x256   : >> { %v1837_v7 = vpop.f32.mrf.mxu2 }
 0x258   : >> { %v2344_v5 = vpop.f32.mrf.mxu0  ;;  %v2612_v25 = vpop.f32.mrf.mxu1 }
 0x259   : >> { %v9841_v40 = vadd.f32 %v2612_v25, %v2344_v5  ;;  %v1942_v62 = vpop.f32.mrf.mxu3  ;;  %v2822_v25 = vrot.slane %v2820_v63, 4 }
 0x25a   : >> { %v9843_v39 = vadd.f32 %v1942_v62, %v1837_v7  ;;  %v3459_v62 = vshrl.u32 %v7845_v34, 16 }
 0x25b   : >> { %11752 = vst [vmem:[#allocation90_spill] sm:$0xff] %v9841_v40  ;;  %7336 = vmatmul.msk.bf16.gmra.mxu2 %vm11754_vm4, %v2815_v28  ;;  %v2823_v2 = vor.u32 %v2822_v25, %v2819_v11  ;;  %v2829_v11 = vshll.u32 %v8673_v14, 16  ;;  %vm11773_vm4 = vmmov %vm11621_vm1 }
 0x25c   : >> { %11753 = vst [vmem:[#allocation91_spill] sm:$0xff] %v9843_v39 }
 0x25d   : >> { %v2824_v40 = vsel %vm1233_vm14, %v2814_v26, %v2823_v2 }
 0x25e   : >> { %7360 = vmatmul.msk.bf16.gmra.mxu3 %vm11755_vm5, %v9606_v15  ;;  %v1840_v19 = vpop.f32.mrf.mxu2  ;;  %v3463_v15 = vshll.u32 %v7846_v60, 16  ;;  %vm11775_vm5 = vmmov %vm11621_vm1 }
 0x260   : >> { %v2347_v42 = vpop.f32.mrf.mxu0  ;;  %v2615_v59 = vpop.f32.mrf.mxu1 }
 0x261   : >> { %v9849_v5 = vadd.f32 %v2615_v59, %v2347_v42  ;;  %v1945_v7 = vpop.f32.mrf.mxu3  ;;  %v8273_v42 = vld [vmem:[#allocation2 + $0x50] sm:$0xff]   ;;  %v2826_v59 = vshrl.u32 %v8673_v14, 16 }
 0x262   : >> { %v9852_v28 = vadd.f32 %v1945_v7, %v1840_v19  ;;  %v3461_v19 = vor.u32 %v3459_v62, %v3457_v50  ;;  %v7847_v50 = vld [vmem:[#allocation2 + $0x60] sm:$0xff] }
 0x263   : >> { %11756 = vst [vmem:[#allocation92_spill] sm:$0xff] %v9849_v5  ;;  %7448 = vmatmul.msk.bf16.gmra.mxu0 %vm11621_vm1, %v3458_v43  ;;  %v3465_v43 = vrot.slane %v3463_v15, 1  ;;  %v2828_v5 = vrot.slane %v2826_v59, 3  ;;  %vm11776_vm1 = vmmov %vm11772_vm3 }
 0x264   : >> { %11757 = vst [vmem:[#allocation93_spill] sm:$0xff] %v9852_v28 }
 0x265   : >> { %v3466_v7 = vsel %vm2075_vm0, %v3461_v19, %v3465_v43  ;;  %v8675_v19 = vld [vmem:[#allocation2 + $0x64] sm:$0xff]  }
 0x266   : >> { %v1842_v6 = vpop.f32.mrf.mxu2 }
 0x268   : >> { %v2349_v31 = vpop.f32.mrf.mxu0  ;;  %v2617_v39 = vpop.f32.mrf.mxu1 }
 0x269   : >> { %v9855_v37 = vadd.f32 %v2617_v39, %v2349_v31  ;;  %v1947_v0 = vpop.f32.mrf.mxu3  ;;  %v2831_v39 = vrot.slane %v2829_v11, 4 }
 0x26a   : >> { %v9857_v63 = vadd.f32 %v1947_v0, %v1842_v6  ;;  %v3467_v0 = vshrl.u32 %v7846_v60, 16 }
 0x26b   : >> { %11758 = vst [vmem:[#allocation94_spill] sm:$0xff] %v9855_v37  ;;  %7337 = vmatmul.msk.bf16.gmra.mxu2 %vm11760_vm6, %v2824_v40  ;;  %v2832_v62 = vor.u32 %v2831_v39, %v2828_v5  ;;  %vm11777_vm6 = vmmov %vm11771_vm2 }
 0x26c   : >> { %11759 = vst [vmem:[#allocation95_spill] sm:$0xff] %v9857_v63 }
 0x26d   : >> { %v2833_v37 = vsel %vm1233_vm14, %v2823_v2, %v2832_v62 }
 0x26e   : >> { %7361 = vmatmul.msk.bf16.gmra.mxu3 %vm11761_vm7, %v8273_v42  ;;  %v1845_v34 = vpop.f32.mrf.mxu2  ;;  %v3471_v42 = vshll.u32 %v7847_v50, 16  ;;  %vm11778_vm7 = vmmov %vm11776_vm1 }
 0x270   : >> { %v2352_v25 = vpop.f32.mrf.mxu0  ;;  %v2620_v26 = vpop.f32.mrf.mxu1 }
 0x271   : >> { %v9862_v31 = vadd.f32 %v2620_v26, %v2352_v25  ;;  %v1950_v6 = vpop.f32.mrf.mxu3  ;;  %v3469_v25 = vor.u32 %v3467_v0, %v3465_v43  ;;  %v2838_v26 = vshll.u32 %v8675_v19, 16  ;;  %v9880_v43 = vld [vmem:[#allocation2 + $0x68] sm:$0xff] }
 0x272   : >> { %v9865_v40 = vadd.f32 %v1950_v6, %v1845_v34  ;;  %v3473_v34 = vrot.slane %v3471_v42, 1  ;;  %v9886_v42 = vld [vmem:[%s11396_s2] ss:$0 sm:$0xff] }
 0x273   : >> { %7449 = vmatmul.msk.bf16.gmra.mxu0 %vm11762_vm8, %v3466_v7  ;;  %v2835_v7 = vshrl.u32 %v8675_v19, 16  ;;  %v2840_v6 = vrot.slane %v2838_v26, 4  ;;  %v3479_v26 = vshll.u32 %v9880_v43, 16  ;;  %vm11779_vm8 = vmmov %vm11771_vm2 }
 0x274   : >> { %v3474_v39 = vsel %vm2075_vm0, %v3469_v25, %v3473_v34 }
 0x276   : >> { %v1847_v15 = vpop.f32.mrf.mxu2 }
 0x278   : >> { %v2354_v14 = vpop.f32.mrf.mxu0  ;;  %v2622_v63 = vpop.f32.mrf.mxu1 }
 0x279   : >> { %v9868_v28 = vadd.f32 %v2622_v63, %v2354_v14  ;;  %v1952_v59 = vpop.f32.mrf.mxu3  ;;  %v2837_v63 = vrot.slane %v2835_v7, 3 }
 0x27a   : >> { %v9870_v11 = vadd.f32 %v1952_v59, %v1847_v15  ;;  %v9891_v59 = vld [vmem:[%s11397_s3] ss:$0 sm:$0xff] }
 0x27b   : >> { %7338 = vmatmul.msk.bf16.gmra.mxu2 %vm11763_vm9, %v2833_v37  ;;  %vm11781_vm9 = vmmov %vm11771_vm2 }
 0x27e   : >> { %7362 = vmatmul.msk.bf16.gmra.mxu3 %vm11764_vm10, %v9642_v9  ;;  %v2966_v5 = vpop.f32.mrf.mxu2  ;;  %vm11782_vm10 = vmmov %vm11776_vm1 }
 0x27f   : >> { %v3046_v2 = vadd.f32 %v2966_v5, %v9471_v44  ;;  %v2841_v44 = vor.u32 %v2840_v6, %v2837_v63  ;;  %v8677_v5 = vld [vmem:[#allocation2 + $0x6c] sm:$0xff]  }
 0x280   : >> { %v3600_v60 = vpop.f32.mrf.mxu0 }
 0x281   : >> { %v3712_v15 = vmul.f32 %v11765_v21, %v3046_v2  ;;  %v3167_v14 = vpop.f32.mrf.mxu3  ;;  %v3680_v0 = vadd.f32 %v3600_v60, %v9636_v10  ;;  %v2842_v2 = vsel %vm1233_vm14, %v2832_v62, %v2841_v44 }
 0x282   : >> { %v3247_v37 = vadd.f32 %v3167_v14, %v9639_v30  ;;  %v3475_v30 = vshrl.u32 %v7847_v50, 16  ;;  %v8275_v14 = vld [vmem:[#allocation2 + $0x60] sm:$0xff]  }
 0x283   : >> { %7450 = vmatmul.msk.bf16.gmra.mxu0 %vm11766_vm11, %v3474_v39  ;;  %vm11783_vm11 = vmmov %vm11771_vm2 }
 0x284   : >> { %v3744_v9 = vadd.f32 %v3712_v15, %v3247_v37  ;;  %v3477_v50 = vor.u32 %v3475_v30, %v3473_v34  ;;  %v3481_v37 = vrot.slane %v3479_v26, 1 }
 0x286   : >> { %v3808_v19 = vadd.f32 %v3744_v9, %v3680_v0  ;;  %v2968_v25 = vpop.f32.mrf.mxu2  ;;  %v2844_v0 = vshrl.u32 %v8677_v5, 16 }
 0x287   : >> { %v3047_v39 = vadd.f32 %v2968_v25, %v9481_v56 }
 0x288   : >> { %v3602_v7 = vpop.f32.mrf.mxu0  ;;  %v3844_v10 = vmul.f32 %v9886_v42, %v3808_v19  ;;  %v2846_v30 = vrot.slane %v2844_v0, 3 }
 0x289   : >> { %v3681_v60 = vadd.f32 %v3602_v7, %v9645_v48  ;;  %v3169_v63 = vpop.f32.mrf.mxu3  ;;  %v2847_v48 = vshll.u32 %v8677_v5, 16 }
 0x28a   : >> { %v3880_v6 = vadd.f32 %v9891_v59, %v3844_v10  ;;  %v3248_v15 = vadd.f32 %v3169_v63, %v9647_v29  ;;  %v3482_v10 = vsel %vm2075_vm0, %v3477_v50, %v3481_v37 }
 0x28b   : >> { %7339 = vmatmul.msk.bf16.gmra.mxu2 %vm11767_vm12, %v2842_v2  ;;  %v3777_v19 = vmul.f32 %v11768_v51, %v3681_v60  ;;  %v2849_v26 = vrot.slane %v2847_v48, 4  ;;  %v9911_v2 = vld [vmem:[#allocation2 + $0x70] sm:$0xff]  ;;  %vm11784_vm12 = vmmov %vm11771_vm2 }
 0x28c   : >> { %v3912_v9 = vmax.f32 %v3880_v6, 0.0  ;;  %v3745_v21 = vadd.f32 %v3248_v15, %v3047_v39 }
 0x28d   : >> { %v9914_v15 = vor.u32 %v2849_v26, %v2846_v30  ;;  %v8276_v30 = vld [vmem:[#allocation2 + $0x68] sm:$0xff]  }
 0x28e   : >> { %v3944_v7 = vpack.c.bf16 %v3912_v9, %v3912_v9  ;;  %v3809_v56 = vadd.f32 %v3777_v19, %v3745_v21  ;;  %7363 = vmatmul.msk.bf16.gmra.mxu3 %vm11769_vm13, %v8275_v14  ;;  %v2971_v62 = vpop.f32.mrf.mxu2  ;;  %v3483_v9 = vshrl.u32 %v9880_v43, 16  ;;  %v3487_v19 = vshll.u32 %v9911_v2, 16  ;;  %vm11785_vm13 = vmmov %vm11776_vm1 }
 0x28f   : >> { %v3048_v29 = vadd.f32 %v2971_v62, %v9491_v45  ;;  %v2851_v62 = vsel %vm1233_vm14, %v2841_v44, %v9914_v15 }
 0x290   : >> { %v3605_v25 = vpop.f32.mrf.mxu0  ;;  %3976 = vst.msk [vmem:[#allocation2 + $0x10] sm:$0xf] %vm11770_vm15, %v3944_v7  ;;  %v3845_v34 = vmul.f32 %v9886_v42, %v3809_v56  ;;  %v8679_v7 = vld [vmem:[#allocation2 + $0x74] sm:$0xff]   ;;  %vm11787_vm15 = vmmov %vm11771_vm2 }
 0x291   : >> { %v3714_v60 = vmul.f32 %v11560_v22, %v3048_v29  ;;  %v3172_v39 = vpop.f32.mrf.mxu3  ;;  %v3682_v45 = vadd.f32 %v3605_v25, %v9654_v13  ;;  %v3485_v29 = vor.u32 %v3483_v9, %v3481_v37  ;;  %v2853_v26 = vshrl.u32 %v8679_v7, 16  ;;  %v9930_v37 = vld [vmem:[#allocation2 + $0x8] sm:$0xff]  }
 0x292   : >> { %v3881_v5 = vadd.f32 %v9891_v59, %v3845_v34  ;;  %v3249_v21 = vadd.f32 %v3172_v39, %v9657_v41  ;;  %v3489_v34 = vrot.slane %v3487_v19, 1  ;;  %v4054_v39 = vld [vmem:[#allocation2 + $0xc] sm:$0x8]  ;;  %v8105_v19 = vunpack.c.h.b16 %v9930_v37 }
 0x293   : >> { %7451 = vmatmul.msk.bf16.gmra.mxu0 %vm11771_vm2, %v3482_v10 }
 0x294   : >> { %v3913_v63 = vmax.f32 %v3881_v5, 0.0  ;;  %v3746_v6 = vadd.f32 %v3714_v60, %v3249_v21  ;;  %v2856_v60 = vshll.u32 %v8679_v7, 16  ;;  %v3490_v44 = vsel %vm2075_vm0, %v3485_v29, %v3489_v34 }
 0x296   : >> { %v3945_v14 = vpack.c.bf16 %v3913_v63, %v3913_v63  ;;  %v3810_v50 = vadd.f32 %v3746_v6, %v3682_v45  ;;  %v2973_v0 = vpop.f32.mrf.mxu2 }
 0x297   : >> { %v3049_v13 = vadd.f32 %v2973_v0, %v9501_v61  ;;  %v2858_v0 = vrot.slane %v2856_v60, 4 }
 0x298   : >> { %v3607_v48 = vpop.f32.mrf.mxu0  ;;  %3977 = vst.msk [vmem:[#allocation2 + $0x14] sm:$0xf] %vm11772_vm3, %v3945_v14  ;;  %v3846_v41 = vmul.f32 %v9886_v42, %v3810_v50  ;;  %v2855_v50 = vrot.slane %v2853_v26, 3  ;;  %vm11790_vm3 = vmmov %vm11776_vm1 }
 0x299   : >> { %v3683_v56 = vadd.f32 %v3607_v48, %v9661_v18  ;;  %v3174_v25 = vpop.f32.mrf.mxu3 }
 0x29a   : >> { %v3882_v10 = vadd.f32 %v9891_v59, %v3846_v41  ;;  %v3250_v43 = vadd.f32 %v3174_v25, %v9663_v16  ;;  %v4094_v16 = vunpack.c.l.b16 %v4054_v39  ;;  %v7857_v41 = vld [vmem:[%s11398_s4 + $0x8] sm:$0xff]  ;;  %v9951_v29 = vor.u32 %v2858_v0, %v2855_v50 }
 0x29b   : >> { %7340 = vmatmul.msk.bf16.gmra.mxu2 %vm11773_vm4, %v2851_v62  ;;  %v3779_v18 = vmul.f32 %v11774_v52, %v3683_v56  ;;  %vm11791_vm4 = vmmov %vm11771_vm2 }
 0x29c   : >> { %v3914_v5 = vmax.f32 %v3882_v10, 0.0  ;;  %v3747_v61 = vadd.f32 %v3250_v43, %v3049_v13  ;;  %v9949_v10 = vld [vmem:[#allocation2 + $0x78] sm:$0xff]  ;;  %4508 = vmatpush.bf16.msrb.mxu2 %v7857_v41 }
 0x29e   : >> { %v3946_v21 = vpack.c.bf16 %v3914_v5, %v3914_v5  ;;  %v3811_v63 = vadd.f32 %v3779_v18, %v3747_v61  ;;  %7364 = vmatmul.msk.bf16.gmra.mxu3 %vm11775_vm5, %v8276_v30  ;;  %v2976_v45 = vpop.f32.mrf.mxu2  ;;  %v3491_v5 = vshrl.u32 %v9911_v2, 16  ;;  %vm11793_vm5 = vmmov %vm11771_vm2 }
 0x29f   : >> { %v3050_v14 = vadd.f32 %v2976_v45, %v9511_v3  ;;  %v9933_v9 = vld [vmem:[#allocation2 + $0x10] sm:$0xff]   ;;  %v7865_v3 = vld [vmem:[%s11398_s4 + $0x48] sm:$0xff]  ;;  %v8681_v45 = vld [vmem:[#allocation2 + $0x7c] sm:$0xff]  }
 0x2a0   : >> { %v3610_v6 = vpop.f32.mrf.mxu0  ;;  %3978 = vst.msk [vmem:[#allocation2 + $0x18] sm:$0xf] %vm11776_vm1, %v3946_v21  ;;  %v3847_v48 = vmul.f32 %v9886_v42, %v3811_v63  ;;  %v8108_v7 = vunpack.c.l.b16 %v9933_v9  ;;  %4677 = vmatpush.bf16.msrb.mxu3 %v7865_v3 }
 0x2a1   : >> { %v3716_v56 = vmul.f32 %v11559_v23, %v3050_v14  ;;  %v3177_v13 = vpop.f32.mrf.mxu3  ;;  %v3684_v60 = vadd.f32 %v3610_v6, %v9673_v58  ;;  %v2860_v14 = vsel %vm1233_vm14, %v9914_v15, %v9951_v29  ;;  %v7883_v15 = vld [vmem:[%s11398_s4 + $0x58] sm:$0xff] }
 0x2a2   : >> { %v3883_v62 = vadd.f32 %v9891_v59, %v3847_v48  ;;  %v3251_v25 = vadd.f32 %v3177_v13, %v9676_v36  ;;  %v4127_v43 = vpack.c.b16 %v8108_v7, %v4094_v16  ;;  %v4452_v30 = vpack.c.b16 %v8108_v7, %v8105_v19  ;;  %v7859_v7 = vld [vmem:[%s11398_s4 + $0x18] sm:$0xff]  ;;  %5183 = vmatpush.bf16.msrb.mxu1 %v7883_v15 }
 0x2a3   : >> { %7452 = vmatmul.msk.bf16.gmra.mxu0 %vm11777_vm6, %v3490_v44  ;;  %v3495_v36 = vshll.u32 %v9949_v10, 16  ;;  %v3493_v48 = vor.u32 %v3491_v5, %v3489_v34  ;;  %v8277_v34 = vld [vmem:[#allocation2 + $0x70] sm:$0xff]   ;;  %vm11799_vm6 = vmmov %vm11771_vm2 }
 0x2a4   : >> { %v3915_v26 = vmax.f32 %v3883_v62, 0.0  ;;  %v3748_v39 = vadd.f32 %v3716_v56, %v3251_v25  ;;  %v4145_v18 = vshrl.u32 %v4127_v43, 16  ;;  %v4148_v61 = vshll.u32 %v4127_v43, 16  ;;  %4782 = vmatpush.bf16.msrb.mxu0 %v7859_v7 }
 0x2a5   : >> { %v4463_v0 = vshrl.u32 %v4452_v30, 16  ;;  %v4466_v19 = vshll.u32 %v4452_v30, 16  ;;  %v3497_v43 = vrot.slane %v3495_v36, 1 }
 0x2a6   : >> { %v3947_v21 = vpack.c.bf16 %v3915_v26, %v3915_v26  ;;  %v3812_v63 = vadd.f32 %v3748_v39, %v3684_v60  ;;  %v2978_v44 = vpop.f32.mrf.mxu2  ;;  %v4147_v3 = vrot.slane %v4145_v18, 3  ;;  %v4150_v56 = vrot.slane %v4148_v61, 4 }
 0x2a7   : >> { %v8688_v50 = vld [vmem:[#allocation2 + $0x14] sm:$0xff]   ;;  %v3051_v6 = vadd.f32 %v2978_v44, %v9521_v17  ;;  %v2862_v17 = vshrl.u32 %v8681_v45, 16  ;;  %v4465_v60 = vrot.slane %v4463_v0, 3  ;;  %v4468_v39 = vrot.slane %v4466_v19, 4 }
 0x2a8   : >> { %v3612_v16 = vpop.f32.mrf.mxu0  ;;  %3979 = vst.msk [vmem:[#allocation2 + $0x1c] sm:$0xf] %vm11778_vm7, %v3947_v21  ;;  %v3848_v58 = vmul.f32 %v9886_v42, %v3812_v63  ;;  %v4153_v13 = vshrl.u32 %v8688_v50, 16  ;;  %v4156_v62 = vshll.u32 %v8688_v50, 16  ;;  %v2865_v21 = vshll.u32 %v8681_v45, 16  ;;  %vm11801_vm7 = vmmov %vm11771_vm2 }
 0x2a9   : >> { %v3685_v2 = vadd.f32 %v3612_v16, %v9679_v57  ;;  %v3179_v41 = vpop.f32.mrf.mxu3  ;;  %v4151_v63 = vor.u32 %v4150_v56, %v4147_v3  ;;  %v9980_v19 = vor.u32 %v4468_v39, %v4465_v60  ;;  %v9994_v3 = vld [vmem:[#allocation2 + $0x80] sm:$0xff] }
 0x2aa   : >> { %v3884_v25 = vadd.f32 %v9891_v59, %v3848_v58  ;;  %v3252_v57 = vadd.f32 %v3179_v41, %v9681_v49  ;;  %v4155_v30 = vrot.slane %v4153_v13, 3  ;;  %v4158_v26 = vrot.slane %v4156_v62, 4 }
 0x2ab   : >> { %7341 = vmatmul.msk.bf16.gmra.mxu2 %vm11779_vm8, %v2860_v14  ;;  %v3781_v18 = vmul.f32 %v11780_v53, %v3685_v2  ;;  %v3498_v14 = vsel %vm2075_vm0, %v3493_v48, %v3497_v43  ;;  %v2864_v2 = vrot.slane %v2862_v17, 3  ;;  %v3503_v60 = vshll.u32 %v9994_v3, 16  ;;  %vm11803_vm8 = vmmov %vm11776_vm1 }
 0x2ac   : >> { %v3916_v5 = vmax.f32 %v3884_v25, 0.0  ;;  %v3749_v61 = vadd.f32 %v3252_v57, %v3051_v6  ;;  %v9973_v44 = vor.u32 %v4158_v26, %v4155_v30  ;;  %v2867_v6 = vrot.slane %v2865_v21, 4 }
 0x2ad   : >> { %v3499_v30 = vshrl.u32 %v9949_v10, 16 }
 0x2ae   : >> { %v3948_v49 = vpack.c.bf16 %v3916_v5, %v3916_v5  ;;  %v3813_v36 = vadd.f32 %v3781_v18, %v3749_v61  ;;  %7365 = vmatmul.msk.bf16.gmra.mxu3 %vm11781_vm9, %v8277_v34  ;;  %v2981_v16 = vpop.f32.mrf.mxu2  ;;  %v4160_v0 = vsel %vm1233_vm14, %v4151_v63, %v9973_v44  ;;  %v9997_v25 = vor.u32 %v2867_v6, %v2864_v2  ;;  %v8683_v5 = vld [vmem:[#allocation2 + $0x84] sm:$0xff]   ;;  %v11788_v2 = vld [vmem:[#allocation23_spill] sm:$0xff]  ;;  %vm11804_vm9 = vmmov %vm11771_vm2 }
 0x2af   : >> { %v3052_v58 = vadd.f32 %v2981_v16, %v9531_v8  ;;  %7466 = vmatmul.msk.bf16.vlgmr.msra.gmra.mxu1 %vm11783_vm11, %v4160_v0  ;;  %v9989_v8 = vsel %vm1233_vm14, %v9980_v19, %v9973_v44  ;;  %vm11809_vm11 = vmmov %vm11776_vm1 }
 0x2b0   : >> { %v3615_v50 = vpop.f32.mrf.mxu0  ;;  %3980 = vst.msk [vmem:[#allocation2 + $0x20] sm:$0xf] %vm11782_vm10, %v3948_v49  ;;  %v3849_v45 = vmul.f32 %v9886_v42, %v3813_v36  ;;  %v2869_v61 = vsel %vm1233_vm14, %v9951_v29, %v9997_v25  ;;  %v11786_v36 = vld [vmem:[#allocation60_spill] sm:$0xff]  ;;  %v2874_v29 = vshll.u32 %v8683_v5, 16  ;;  %vm11806_vm10 = vmmov %vm11771_vm2 }
 0x2b1   : >> { %v3718_v7 = vmul.f32 %v11558_v24, %v3052_v58  ;;  %v3182_v15 = vpop.f32.mrf.mxu3  ;;  %v3686_v13 = vadd.f32 %v3615_v50, %v9687_v27  ;;  %v3501_v50 = vor.u32 %v3499_v30, %v3497_v43  ;;  %v3505_v58 = vrot.slane %v3503_v60, 1  ;;  %v11792_v60 = vld [vmem:[#allocation8_spill] sm:$0xff] }
 0x2b2   : >> { %v3885_v48 = vadd.f32 %v9891_v59, %v3849_v45  ;;  %v3253_v41 = vadd.f32 %v3182_v15, %v9690_v4  ;;  %v2871_v45 = vshrl.u32 %v8683_v5, 16 }
 0x2b3   : >> { %7453 = vmatmul.msk.bf16.gmra.mxu0 %vm11784_vm12, %v3498_v14  ;;  %v8278_v14 = vld [vmem:[#allocation2 + $0x78] sm:$0xff]   ;;  %v3506_v43 = vsel %vm2075_vm0, %v3501_v50, %v3505_v58  ;;  %vm11813_vm12 = vmmov %vm11771_vm2 }
 0x2b4   : >> { %v3917_v56 = vmax.f32 %v3885_v48, 0.0  ;;  %v3750_v62 = vadd.f32 %v3718_v7, %v3253_v41  ;;  %v2873_v30 = vrot.slane %v2871_v45, 3 }
 0x2b6   : >> { %v3949_v57 = vpack.c.bf16 %v3917_v56, %v3917_v56  ;;  %v3814_v17 = vadd.f32 %v3750_v62, %v3686_v13  ;;  %v2983_v34 = vpop.f32.mrf.mxu2  ;;  %v11789_v62 = vld [vmem:[#allocation44_spill] sm:$0xff] }
 0x2b7   : >> { %v8690_v39 = vld [vmem:[#allocation2 + $0x1c] sm:$0xff]   ;;  %v3053_v27 = vadd.f32 %v2983_v34, %v9541_v38 }
 0x2b8   : >> { %v3617_v26 = vpop.f32.mrf.mxu0  ;;  %3981 = vst.msk [vmem:[#allocation2 + $0x24] sm:$0xf] %vm11785_vm13, %v3949_v57  ;;  %v3850_v4 = vmul.f32 %v9886_v42, %v3814_v17  ;;  %v4162_v63 = vshrl.u32 %v8690_v39, 16  ;;  %v4165_v10 = vshll.u32 %v8690_v39, 16  ;;  %vm11815_vm13 = vmmov %vm11771_vm2 }
 0x2b9   : >> { %v3687_v18 = vadd.f32 %v3617_v26, %v9693_v55  ;;  %v3184_v21 = vpop.f32.mrf.mxu3  ;;  %v2876_v26 = vrot.slane %v2874_v29, 4 }
 0x2ba   : >> { %v3886_v49 = vadd.f32 %v9891_v59, %v3850_v4  ;;  %v3254_v16 = vadd.f32 %v3184_v21, %v11786_v36  ;;  %v4164_v0 = vrot.slane %v4162_v63, 3  ;;  %v4167_v55 = vrot.slane %v4165_v10, 4  ;;  %v11795_v21 = vld [vmem:[#allocation61_spill] sm:$0xff] }
 0x2bb   : >> { %7342 = vmatmul.msk.bf16.gmra.mxu2 %vm11787_vm15, %v2869_v61  ;;  %v3783_v6 = vmul.f32 %v11788_v2, %v3687_v18  ;;  %v11794_v18 = vld [vmem:[#allocation62_spill] sm:$0xff]  ;;  %vm11817_vm15 = vmmov %vm11776_vm1 }
 0x2bc   : >> { %v3918_v38 = vmax.f32 %v3886_v49, 0.0  ;;  %v3751_v7 = vadd.f32 %v3254_v16, %v3053_v27  ;;  %v4168_v15 = vor.u32 %v4167_v55, %v4164_v0  ;;  %v10030_v49 = vor.u32 %v2876_v26, %v2873_v30  ;;  %v8279_v26 = vld [vmem:[#allocation2 + $0x80] sm:$0xff]  }
 0x2be   : >> { %v3950_v48 = vpack.c.bf16 %v3918_v38, %v3918_v38  ;;  %v3815_v41 = vadd.f32 %v3783_v6, %v3751_v7  ;;  %7366 = vmatmul.msk.bf16.gmra.mxu3 %vm11771_vm2, %v8278_v14  ;;  %v2986_v56 = vpop.f32.mrf.mxu2  ;;  %v10017_v17 = vsel %vm1233_vm14, %v9973_v44, %v4168_v15  ;;  %v10027_v44 = vld [vmem:[#allocation2 + $0x88] sm:$0xff]  ;;  %v3507_v14 = vshrl.u32 %v9994_v3, 16  ;;  %v11796_v7 = vld [vmem:[#allocation63_spill] sm:$0xff] }
 0x2bf   : >> { %v3054_v57 = vadd.f32 %v2986_v56, %v11789_v62  ;;  %7467 = vmatmul.msk.bf16.gmra.mxu1 %vm11791_vm4, %v10017_v17  ;;  %v3511_v55 = vshll.u32 %v10027_v44, 16  ;;  %v8684_v38 = vld [vmem:[#allocation2 + $0x8c] sm:$0xff]   ;;  %v2878_v56 = vsel %vm1233_vm14, %v9997_v25, %v10030_v49  ;;  %vm11822_vm4 = vmmov %vm11776_vm1 }
 0x2c0   : >> { %v3620_v13 = vpop.f32.mrf.mxu0  ;;  %3982 = vst.msk [vmem:[#allocation2 + $0x28] sm:$0xf] %vm11790_vm3, %v3950_v48  ;;  %v3851_v34 = vmul.f32 %v9886_v42, %v3815_v41  ;;  %v11797_v48 = vld [vmem:[#allocation46_spill] sm:$0xff]  ;;  %v3509_v30 = vor.u32 %v3507_v14, %v3505_v58  ;;  %v2883_v25 = vshll.u32 %v8684_v38, 16  ;;  %vm11819_vm3 = vmmov %vm11771_vm2 }
 0x2c1   : >> { %v3720_v39 = vmul.f32 %v11792_v60, %v3054_v57  ;;  %v3187_v5 = vpop.f32.mrf.mxu3  ;;  %v3688_v63 = vadd.f32 %v3620_v13, %v11795_v21  ;;  %v11798_v57 = vld [vmem:[#allocation64_spill] sm:$0xff] }
 0x2c2   : >> { %v3887_v4 = vadd.f32 %v9891_v59, %v3851_v34  ;;  %v3255_v27 = vadd.f32 %v3187_v5, %v11794_v18  ;;  %v2880_v18 = vshrl.u32 %v8684_v38, 16 }
 0x2c3   : >> { %7454 = vmatmul.msk.bf16.gmra.mxu0 %vm11793_vm5, %v3506_v43  ;;  %vm11824_vm5 = vmmov %vm11771_vm2 }
 0x2c4   : >> { %v3919_v61 = vmax.f32 %v3887_v4, 0.0  ;;  %v3752_v10 = vadd.f32 %v3720_v39, %v3255_v27  ;;  %v3513_v39 = vrot.slane %v3511_v55, 1 }
 0x2c6   : >> { %v3951_v36 = vpack.c.bf16 %v3919_v61, %v3919_v61  ;;  %v3816_v16 = vadd.f32 %v3752_v10, %v3688_v63  ;;  %v2988_v50 = vpop.f32.mrf.mxu2  ;;  %v11800_v61 = vld [vmem:[#allocation24_spill] sm:$0xff]  ;;  %v3514_v14 = vsel %vm2075_vm0, %v3509_v30, %v3513_v39 }
 0x2c7   : >> { %v8692_v45 = vld [vmem:[#allocation2 + $0x24] sm:$0xff]   ;;  %v3055_v41 = vadd.f32 %v2988_v50, %v11797_v48 }
 0x2c8   : >> { %v3622_v0 = vpop.f32.mrf.mxu0  ;;  %3983 = vst.msk [vmem:[#allocation2 + $0x2c] sm:$0xf] %vm11776_vm1, %v3951_v36  ;;  %v3852_v6 = vmul.f32 %v9886_v42, %v3816_v16  ;;  %v4171_v43 = vshrl.u32 %v8692_v45, 16  ;;  %v4174_v3 = vshll.u32 %v8692_v45, 16  ;;  %v11805_v48 = vld [vmem:[#allocation9_spill] sm:$0xff]  ;;  %vm11826_vm1 = vmmov %vm11771_vm2 }
 0x2c9   : >> { %v3689_v29 = vadd.f32 %v3622_v0, %v11796_v7  ;;  %v3189_v13 = vpop.f32.mrf.mxu3  ;;  %v11802_v0 = vld [vmem:[#allocation48_spill] sm:$0xff]  ;;  %v2885_v7 = vrot.slane %v2883_v25, 4 }
 0x2ca   : >> { %v3888_v62 = vadd.f32 %v9891_v59, %v3852_v6  ;;  %v3256_v34 = vadd.f32 %v3189_v13, %v11798_v57  ;;  %v4173_v5 = vrot.slane %v4171_v43, 3  ;;  %v4176_v4 = vrot.slane %v4174_v3, 4  ;;  %v10064_v3 = vld [vmem:[#allocation2 + $0x90] sm:$0xff] }
 0x2cb   : >> { %7343 = vmatmul.msk.bf16.gmra.mxu2 %vm11799_vm6, %v2878_v56  ;;  %v3785_v21 = vmul.f32 %v11800_v61, %v3689_v29  ;;  %v2882_v6 = vrot.slane %v2880_v18, 3  ;;  %v10058_v29 = vld [vmem:[#allocation2 + $0x90] sm:$0xff]   ;;  %v3519_v25 = vshll.u32 %v10064_v3, 16  ;;  %vm11828_vm6 = vmmov %vm11822_vm4 }
 0x2cc   : >> { %v3920_v27 = vmax.f32 %v3888_v62, 0.0  ;;  %v3753_v63 = vadd.f32 %v3256_v34, %v3055_v41  ;;  %v10045_v10 = vor.u32 %v4176_v4, %v4173_v5  ;;  %v8101_v62 = vunpack.c.h.b16 %v10058_v29  ;;  %v11808_v34 = vld [vmem:[#allocation65_spill] sm:$0xff] }
 0x2cd   : >> { %v10068_v5 = vor.u32 %v2885_v7, %v2882_v6 }
 0x2ce   : >> { %v3952_v36 = vpack.c.bf16 %v3920_v27, %v3920_v27  ;;  %v3817_v16 = vadd.f32 %v3785_v21, %v3753_v63  ;;  %7367 = vmatmul.msk.bf16.gmra.mxu3 %vm11801_vm7, %v8279_v26  ;;  %v2991_v50 = vpop.f32.mrf.mxu2  ;;  %v10052_v45 = vsel %vm1233_vm14, %v4168_v15, %v10045_v10  ;;  %v11807_v15 = vld [vmem:[#allocation66_spill] sm:$0xff]  ;;  %v3515_v21 = vshrl.u32 %v10027_v44, 16  ;;  %vm11829_vm7 = vmmov %vm11826_vm1 }
 0x2cf   : >> { %v3056_v55 = vadd.f32 %v2991_v50, %v11802_v0  ;;  %7468 = vmatmul.msk.bf16.gmra.mxu1 %vm11804_vm9, %v10052_v45  ;;  %vm11833_vm9 = vmmov %vm11822_vm4 }
 0x2d0   : >> { %v3625_v58 = vpop.f32.mrf.mxu0  ;;  %3984 = vst.msk [vmem:[#allocation2 + $0x30] sm:$0xf] %vm11803_vm8, %v3952_v36  ;;  %v3853_v38 = vmul.f32 %v9886_v42, %v3817_v16  ;;  %v2744_v16 = vpack.c.b16 %v8101_v62, %v8101_v62  ;;  %v3521_v62 = vrot.slane %v3519_v25, 1  ;;  %vm11831_vm8 = vmmov %vm11826_vm1 }
 0x2d1   : >> { %v3722_v41 = vmul.f32 %v11805_v48, %v3056_v55  ;;  %v3192_v56 = vpop.f32.mrf.mxu3  ;;  %v3690_v30 = vadd.f32 %v3625_v58, %v11808_v34  ;;  %v11811_v58 = vld [vmem:[#allocation50_spill] sm:$0xff] }
 0x2d2   : >> { %v3889_v13 = vadd.f32 %v9891_v59, %v3853_v38  ;;  %v3257_v43 = vadd.f32 %v3192_v56, %v11807_v15  ;;  %v2887_v38 = vsel %vm1233_vm14, %v10030_v49, %v10068_v5  ;;  %v11812_v56 = vld [vmem:[#allocation68_spill] sm:$0xff]  ;;  %v8280_v15 = vld [vmem:[#allocation2 + $0x88] sm:$0xff]  }
 0x2d3   : >> { %7455 = vmatmul.msk.bf16.gmra.mxu0 %vm11806_vm10, %v3514_v14  ;;  %v11810_v14 = vld [vmem:[#allocation67_spill] sm:$0xff]  ;;  %v7864_v49 = vld [vmem:[%s11398_s4 + $0x40] sm:$0xff]  ;;  %vm11837_vm10 = vmmov %vm11826_vm1 }
 0x2d4   : >> { %v3921_v57 = vmax.f32 %v3889_v13, 0.0  ;;  %v3754_v26 = vadd.f32 %v3722_v41, %v3257_v43  ;;  %v3517_v43 = vor.u32 %v3515_v21, %v3513_v39  ;;  %v3311_v39 = vld [vmem:[#allocation2 + $0x98] sm:$0x1]  ;;  %4678 = vmatpush.bf16.msrb.mxu3 %v7864_v49 }
 0x2d6   : >> { %v3953_v4 = vpack.c.bf16 %v3921_v57, %v3921_v57  ;;  %v3818_v18 = vadd.f32 %v3754_v26, %v3690_v30  ;;  %v2993_v27 = vpop.f32.mrf.mxu2  ;;  %v2889_v30 = vshrl.u32 %v2744_v16, 16  ;;  %v7856_v26 = vld [vmem:[%s11398_s4] sm:$0xff] }
 0x2d7   : >> { %v8694_v36 = vld [vmem:[#allocation2 + $0x2c] sm:$0xff]   ;;  %v3057_v55 = vadd.f32 %v2993_v27, %v11811_v58  ;;  %4509 = vmatpush.bf16.msrb.mxu2 %v7856_v26 }
 0x2d8   : >> { %v3627_v63 = vpop.f32.mrf.mxu0  ;;  %3985 = vst.msk [vmem:[#allocation2 + $0x34] sm:$0xf] %vm11809_vm11, %v3953_v4  ;;  %v3854_v50 = vmul.f32 %v9886_v42, %v3818_v18  ;;  %v4180_v7 = vshrl.u32 %v8694_v36, 16  ;;  %v4183_v44 = vshll.u32 %v8694_v36, 16  ;;  %v11814_v18 = vld [vmem:[#allocation25_spill] sm:$0xff]  ;;  %v2892_v36 = vshll.u32 %v2744_v16, 16  ;;  %vm11839_vm11 = vmmov %vm11826_vm1 }
 0x2d9   : >> { %v3691_v0 = vadd.f32 %v3627_v63, %v11810_v14  ;;  %v3194_v6 = vpop.f32.mrf.mxu3  ;;  %v7858_v58 = vld [vmem:[%s11398_s4 + $0x10] sm:$0xff] }
 0x2da   : >> { %v3890_v41 = vadd.f32 %v9891_v59, %v3854_v50  ;;  %v3258_v13 = vadd.f32 %v3194_v6, %v11812_v56  ;;  %v4182_v57 = vrot.slane %v4180_v7, 3  ;;  %v4185_v34 = vrot.slane %v4183_v44, 4  ;;  %4783 = vmatpush.bf16.msrb.mxu0 %v7858_v58 }
 0x2db   : >> { %7344 = vmatmul.msk.bf16.gmra.mxu2 %vm11813_vm12, %v2887_v38  ;;  %v3787_v27 = vmul.f32 %v11814_v18, %v3691_v0  ;;  %v3522_v6 = vsel %vm2075_vm0, %v3517_v43, %v3521_v62  ;;  %v11816_v0 = vld [vmem:[#allocation52_spill] sm:$0xff]  ;;  %v3381_v7 = vunpack.c.l.b16 %v3311_v39  ;;  %v2894_v56 = vrot.slane %v2892_v36, 4  ;;  %vm11841_vm12 = vmmov %vm11822_vm4 }
 0x2dc   : >> { %v3922_v4 = vmax.f32 %v3890_v41, 0.0  ;;  %v3755_v63 = vadd.f32 %v3258_v13, %v3057_v55  ;;  %v10089_v21 = vor.u32 %v4185_v34, %v4182_v57  ;;  %v2891_v41 = vrot.slane %v2889_v30, 3  ;;  %v11818_v13 = vld [vmem:[#allocation10_spill] sm:$0xff]  ;;  %v8540_v36 = vld [vmem:[#allocation2 + $0x4] sm:$0x8] }
 0x2dd   : >> { %v3398_v26 = vpack.c.b16 %v3381_v7, %v3381_v7  ;;  %v3523_v58 = vshrl.u32 %v10064_v3, 16 }
 0x2de   : >> { %v3954_v25 = vpack.c.bf16 %v3922_v4, %v3922_v4  ;;  %v3819_v50 = vadd.f32 %v3787_v27, %v3755_v63  ;;  %7368 = vmatmul.msk.bf16.gmra.mxu3 %vm11815_vm13, %v8280_v15  ;;  %v2996_v14 = vpop.f32.mrf.mxu2  ;;  %v10100_v16 = vsel %vm1233_vm14, %v10045_v10, %v10089_v21  ;;  %v11820_v10 = vld [vmem:[#allocation70_spill] sm:$0xff]  ;;  %v11821_v4 = vld [vmem:[#allocation69_spill] sm:$0xff]  ;;  %v2895_v39 = vor.u32 %v2894_v56, %v2891_v41  ;;  %vm11842_vm13 = vmmov %vm11826_vm1 }
 0x2df   : >> { %v3058_v55 = vadd.f32 %v2996_v14, %v11816_v0  ;;  %7469 = vmatmul.msk.bf16.gmra.mxu1 %vm11771_vm2, %v10100_v16  ;;  %v3527_v0 = vshll.u32 %v3398_v26, 16  ;;  %v3525_v26 = vor.u32 %v3523_v58, %v3521_v62  ;;  %v11827_v62 = vld [vmem:[#allocation56_spill] sm:$0xff]  ;;  %vm11846_vm2 = vmmov %vm11822_vm4 }
 0x2e0   : >> { %v3630_v38 = vpop.f32.mrf.mxu0  ;;  %3986 = vst.msk [vmem:[#allocation2 + $0x38] sm:$0xf] %vm11817_vm15, %v3954_v25  ;;  %v3855_v44 = vmul.f32 %v9886_v42, %v3819_v50  ;;  %v2896_v41 = vsel %vm1233_vm14, %v10068_v5, %v2895_v39  ;;  %vm11844_vm15 = vmmov %vm11826_vm1 }
 0x2e1   : >> { %v3724_v15 = vmul.f32 %v11818_v13, %v3058_v55  ;;  %v3197_v43 = vpop.f32.mrf.mxu3  ;;  %v3692_v27 = vadd.f32 %v3630_v38, %v11821_v4 }
 0x2e2   : >> { %v3891_v57 = vadd.f32 %v9891_v59, %v3855_v44  ;;  %v3259_v34 = vadd.f32 %v3197_v43, %v11820_v10  ;;  %v8685_v44 = vld [vmem:[#allocation2 + $0x4] sm:$0xf0]   ;;  %v11823_v43 = vld [vmem:[#allocation54_spill] sm:$0xff] }
 0x2e3   : >> { %7456 = vmatmul.msk.bf16.gmra.mxu0 %vm11819_vm3, %v3522_v6  ;;  %vm11850_vm3 = vmmov %vm11826_vm1 }
 0x2e4   : >> { %v3923_v49 = vmax.f32 %v3891_v57, 0.0  ;;  %v3756_v63 = vadd.f32 %v3724_v15, %v3259_v34  ;;  %v8541_v34 = vor.u32 %v8685_v44, %v8540_v36 }
 0x2e6   : >> { %v3955_v25 = vpack.c.bf16 %v3923_v49, %v3923_v49  ;;  %v3820_v50 = vadd.f32 %v3756_v63, %v3692_v27  ;;  %v2998_v30 = vpop.f32.mrf.mxu2  ;;  %v3529_v49 = vrot.slane %v3527_v0, 1  ;;  %v11825_v63 = vld [vmem:[#allocation26_spill] sm:$0xff] }
 0x2e7   : >> { %v8696_v55 = vld [vmem:[#allocation2 + $0x34] sm:$0xff]   ;;  %v3059_v38 = vadd.f32 %v2998_v30, %v11823_v43 }
 0x2e8   : >> { %v3632_v14 = vpop.f32.mrf.mxu0  ;;  %3987 = vst.msk [vmem:[#allocation2 + $0x3c] sm:$0xf] %vm11822_vm4, %v3955_v25  ;;  %v3856_v6 = vmul.f32 %v9886_v42, %v3820_v50  ;;  %v4189_v15 = vshrl.u32 %v8696_v55, 16  ;;  %v4192_v57 = vshll.u32 %v8696_v55, 16  ;;  %v4455_v55 = vshrl.u32 %v8541_v34, 16  ;;  %vm11852_vm4 = vmmov %vm11826_vm1 }
 0x2e9   : >> { %v3693_v7 = vadd.f32 %v3632_v14, %v9738_v54  ;;  %v3199_v56 = vpop.f32.mrf.mxu3  ;;  %v3530_v44 = vsel %vm2075_vm0, %v3525_v26, %v3529_v49 }
 0x2ea   : >> { %v3892_v10 = vadd.f32 %v9891_v59, %v3856_v6  ;;  %v3260_v3 = vadd.f32 %v3199_v56, %v9740_v35  ;;  %v4191_v4 = vrot.slane %v4189_v15, 3  ;;  %v4194_v27 = vrot.slane %v4192_v57, 4  ;;  %v11832_v57 = vld [vmem:[#allocation71_spill] sm:$0xff] }
 0x2eb   : >> { %7345 = vmatmul.msk.bf16.gmra.mxu2 %vm11824_vm5, %v2896_v41  ;;  %v3789_v25 = vmul.f32 %v11825_v63, %v3693_v7  ;;  %v4458_v35 = vshll.u32 %v8541_v34, 16  ;;  %v4457_v56 = vrot.slane %v4455_v55, 3  ;;  %vm11854_vm5 = vmmov %vm11846_vm2 }
 0x2ec   : >> { %v3924_v54 = vmax.f32 %v3892_v10, 0.0  ;;  %v3757_v50 = vadd.f32 %v3260_v3, %v3059_v38  ;;  %v4195_v30 = vor.u32 %v4194_v27, %v4191_v4 }
 0x2ed   : >> { %v4460_v15 = vrot.slane %v4458_v35, 4 }
 0x2ee   : >> { %v3956_v5 = vpack.c.bf16 %v3924_v54, %v3924_v54  ;;  %v3821_v39 = vadd.f32 %v3789_v25, %v3757_v50  ;;  %7369 = vmatmul.msk.bf16.gmra.mxu3 %vm11826_vm1, %v10058_v29  ;;  %v3001_v14 = vpop.f32.mrf.mxu2  ;;  %v10128_v0 = vsel %vm1233_vm14, %v10089_v21, %v4195_v30  ;;  %v11830_v29 = vld [vmem:[#allocation11_spill] sm:$0xff]  ;;  %v11834_v50 = vld [vmem:[#allocation72_spill] sm:$0xff] }
 0x2ef   : >> { %v3060_v58 = vadd.f32 %v3001_v14, %v11827_v62  ;;  %7470 = vmatmul.msk.bf16.gmra.mxu1 %vm11829_vm7, %v10128_v0  ;;  %v4461_v4 = vor.u32 %v4460_v15, %v4457_v56  ;;  %vm11858_vm7 = vmmov %vm11846_vm2 }
 0x2f0   : >> { %v3635_v36 = vpop.f32.mrf.mxu0  ;;  %3988 = vst.msk [vmem:[#allocation2 + $0x40] sm:$0xf] %vm11828_vm6, %v3956_v5  ;;  %v3857_v6 = vmul.f32 %v9886_v42, %v3821_v39  ;;  %v11835_v39 = vld [vmem:[#allocation58_spill] sm:$0xff]  ;;  %vm11856_vm6 = vmmov %vm11826_vm1 }
 0x2f1   : >> { %v3726_v7 = vmul.f32 %v11830_v29, %v3060_v58  ;;  %v3202_v43 = vpop.f32.mrf.mxu3  ;;  %v3694_v10 = vadd.f32 %v3635_v36, %v11832_v57  ;;  %v4470_v58 = vsel %vm1233_vm14, %v4461_v4, %v9980_v19  ;;  %v11843_v4 = vld [vmem:[#allocation12_spill] sm:$0xff] }
 0x2f2   : >> { %v3893_v38 = vadd.f32 %v9891_v59, %v3857_v6  ;;  %v3261_v41 = vadd.f32 %v3202_v43, %v9750_v47 }
 0x2f3   : >> { %7457 = vmatmul.msk.bf16.gmra.mxu0 %vm11831_vm8, %v3530_v44  ;;  %v11836_v44 = vld [vmem:[#allocation73_spill] sm:$0xff]  ;;  %vm11862_vm8 = vmmov %vm11826_vm1 }
 0x2f4   : >> { %v3925_v21 = vmax.f32 %v3893_v38, 0.0  ;;  %v3758_v3 = vadd.f32 %v3726_v7, %v3261_v41  ;;  %v11838_v38 = vld [vmem:[#allocation27_spill] sm:$0xff] }
 0x2f6   : >> { %v3957_v34 = vpack.c.bf16 %v3925_v21, %v3925_v21  ;;  %v3822_v26 = vadd.f32 %v3758_v3, %v3694_v10  ;;  %v3003_v49 = vpop.f32.mrf.mxu2 }
 0x2f7   : >> { %v8698_v54 = vld [vmem:[#allocation2 + $0x3c] sm:$0xff]   ;;  %v3061_v47 = vadd.f32 %v3003_v49, %v11835_v39 }
 0x2f8   : >> { %v3637_v27 = vpop.f32.mrf.mxu0  ;;  %3989 = vst.msk [vmem:[#allocation2 + $0x44] sm:$0xf] %vm11833_vm9, %v3957_v34  ;;  %v3858_v25 = vmul.f32 %v9886_v42, %v3822_v26  ;;  %v4198_v55 = vshrl.u32 %v8698_v54, 16  ;;  %v4201_v35 = vshll.u32 %v8698_v54, 16  ;;  %v11840_v34 = vld [vmem:[#allocation36_spill] sm:$0xff]  ;;  %vm11864_vm9 = vmmov %vm11826_vm1 }
 0x2f9   : >> { %v3695_v5 = vadd.f32 %v3637_v27, %v11834_v50  ;;  %v3204_v14 = vpop.f32.mrf.mxu3 }
 0x2fa   : >> { %v3894_v36 = vadd.f32 %v9891_v59, %v3858_v25  ;;  %v3262_v62 = vadd.f32 %v3204_v14, %v11836_v44  ;;  %v4200_v6 = vrot.slane %v4198_v55, 3  ;;  %v4203_v7 = vrot.slane %v4201_v35, 4 }
 0x2fb   : >> { %7490 = vmatmul.msk.bf16.vlgmr.msrb.gmra.mxu2 %vm11837_vm10, %v4470_v58  ;;  %v3791_v41 = vmul.f32 %v11838_v38, %v3695_v5  ;;  %v11847_v58 = vld [vmem:[#allocation75_spill] sm:$0xff]  ;;  %vm11866_vm10 = vmmov %vm11846_vm2 }
 0x2fc   : >> { %v3926_v43 = vmax.f32 %v3894_v36, 0.0  ;;  %v3759_v56 = vadd.f32 %v3262_v62, %v3061_v47  ;;  %v4204_v15 = vor.u32 %v4203_v7, %v4200_v6  ;;  %v11848_v7 = vld [vmem:[#allocation37_spill] sm:$0xff]  ;;  %v11926_v38 = vld [vmem:[#allocation55_spill] sm:$0xff] }
 0x2fe   : >> { %v3958_v21 = vpack.c.bf16 %v3926_v43, %v3926_v43  ;;  %v3823_v57 = vadd.f32 %v3791_v41, %v3759_v56  ;;  %7514 = vmatmul.msk.bf16.vlgmr.msrb.gmra.mxu3 %vm11839_vm11, %v9933_v9  ;;  %v3006_v10 = vpop.f32.mrf.mxu2  ;;  %v10153_v19 = vsel %vm1233_vm14, %v4195_v30, %v4204_v15  ;;  %v11845_v30 = vld [vmem:[#allocation74_spill] sm:$0xff]  ;;  %vm11867_vm11 = vmmov %vm11826_vm1 }
 0x2ff   : >> { %v3062_v26 = vadd.f32 %v3006_v10, %v11840_v34  ;;  %7471 = vmatmul.msk.bf16.gmra.mxu1 %vm11842_vm13, %v10153_v19  ;;  %vm11871_vm13 = vmmov %vm11846_vm2 }
 0x300   : >> { %v3640_v3 = vpop.f32.mrf.mxu0  ;;  %3990 = vst.msk [vmem:[#allocation2 + $0x48] sm:$0xf] %vm11841_vm12, %v3958_v21  ;;  %v3859_v49 = vmul.f32 %v9886_v42, %v3823_v57  ;;  %v11849_v21 = vld [vmem:[#allocation76_spill] sm:$0xff]  ;;  %vm11869_vm12 = vmmov %vm11826_vm1 }
 0x301   : >> { %v3728_v27 = vmul.f32 %v11843_v4, %v3062_v26  ;;  %v3207_v54 = vpop.f32.mrf.mxu3  ;;  %v3696_v39 = vadd.f32 %v3640_v3, %v11845_v30  ;;  %v11851_v26 = vld [vmem:[#allocation28_spill] sm:$0xff] }
 0x302   : >> { %v3895_v25 = vadd.f32 %v9891_v59, %v3859_v49  ;;  %v3263_v50 = vadd.f32 %v3207_v54, %v9765_v12  ;;  %v8284_v54 = vld [vmem:[#allocation2 + $0x18] sm:$0xff]  }
 0x303   : >> { %7538 = vmatmul.msk.bf16.vlgmr.msrb.gmra.mxu0 %vm11844_vm15, %v9930_v37  ;;  %vm11875_vm15 = vmmov %vm11826_vm1 }
 0x304   : >> { %v3927_v5 = vmax.f32 %v3895_v25, 0.0  ;;  %v3760_v47 = vadd.f32 %v3728_v27, %v3263_v50 }
 0x306   : >> { %v3959_v14 = vpack.c.bf16 %v3927_v5, %v3927_v5  ;;  %v3824_v55 = vadd.f32 %v3760_v47, %v3696_v39  ;;  %v3008_v35 = vpop.f32.mrf.mxu2  ;;  %v11853_v47 = vld [vmem:[#allocation38_spill] sm:$0xff] }
 0x307   : >> { %v8700_v44 = vld [vmem:[#allocation2 + $0x44] sm:$0xff]   ;;  %v3063_v43 = vadd.f32 %v3008_v35, %v11848_v7 }
 0x308   : >> { %v3642_v36 = vpop.f32.mrf.mxu0  ;;  %3991 = vst.msk [vmem:[#allocation2 + $0x4c] sm:$0xf] %vm11846_vm2, %v3959_v14  ;;  %v3860_v62 = vmul.f32 %v9886_v42, %v3824_v55  ;;  %v4207_v41 = vshrl.u32 %v8700_v44, 16  ;;  %v4210_v12 = vshll.u32 %v8700_v44, 16  ;;  %v11855_v35 = vld [vmem:[#allocation13_spill] sm:$0xff]  ;;  %vm11877_vm2 = vmmov %vm11826_vm1 }
 0x309   : >> { %v3697_v6 = vadd.f32 %v3642_v36, %v11847_v58  ;;  %v3209_v37 = vpop.f32.mrf.mxu3 }
 0x30a   : >> { %v3896_v56 = vadd.f32 %v9891_v59, %v3860_v62  ;;  %v3264_v57 = vadd.f32 %v3209_v37, %v11849_v21  ;;  %v4209_v10 = vrot.slane %v4207_v41, 3  ;;  %v4212_v3 = vrot.slane %v4210_v12, 4 }
 0x30b   : >> { %7491 = vmatmul.msk.bf16.gmra.mxu2 %vm11850_vm3, %v9989_v8  ;;  %v3793_v49 = vmul.f32 %v11851_v26, %v3697_v6  ;;  %vm11879_vm3 = vmmov %vm11854_vm5 }
 0x30c   : >> { %v3928_v34 = vmax.f32 %v3896_v56, 0.0  ;;  %v3761_v27 = vadd.f32 %v3264_v57, %v3063_v43  ;;  %v4213_v25 = vor.u32 %v4212_v3, %v4209_v10  ;;  %v11859_v10 = vld [vmem:[#allocation78_spill] sm:$0xff] }
 0x30e   : >> { %v3960_v50 = vpack.c.bf16 %v3928_v34, %v3928_v34  ;;  %v3825_v5 = vadd.f32 %v3793_v49, %v3761_v27  ;;  %7515 = vmatmul.msk.bf16.gmra.mxu3 %vm11852_vm4, %v8284_v54  ;;  %v3011_v30 = vpop.f32.mrf.mxu2  ;;  %v10177_v55 = vsel %vm1233_vm14, %v4204_v15, %v4213_v25  ;;  %v11857_v15 = vld [vmem:[#allocation77_spill] sm:$0xff]  ;;  %v11860_v34 = vld [vmem:[#allocation39_spill] sm:$0xff]  ;;  %vm11880_vm4 = vmmov %vm11826_vm1 }
 0x30f   : >> { %v3064_v14 = vadd.f32 %v3011_v30, %v11853_v47  ;;  %7472 = vmatmul.msk.bf16.gmra.mxu1 %vm11826_vm1, %v10177_v55  ;;  %v10353_v18 = vld [vmem:[#allocation2 + $0x48] sm:$0xff]  }
 0x310   : >> { %v3645_v39 = vpop.f32.mrf.mxu0  ;;  %3992 = vst.msk [vmem:[#allocation2 + $0x50] sm:$0xf] %vm11854_vm5, %v3960_v50  ;;  %v3861_v8 = vmul.f32 %v9886_v42, %v3825_v5  ;;  %v11861_v5 = vld [vmem:[#allocation79_spill] sm:$0xff]  ;;  %vm11882_vm5 = vmmov %vm11826_vm1 }
 0x311   : >> { %v3730_v36 = vmul.f32 %v11855_v35, %v3064_v14  ;;  %v3212_v44 = vpop.f32.mrf.mxu3  ;;  %v3698_v7 = vadd.f32 %v3645_v39, %v11857_v15  ;;  %vm11884_vm1 = vmmov %vm11879_vm3 }
 0x312   : >> { %v3897_v62 = vadd.f32 %v9891_v59, %v3861_v8  ;;  %v3265_v58 = vadd.f32 %v3212_v44, %v9779_v1  ;;  %v11863_v8 = vld [vmem:[#allocation29_spill] sm:$0xff] }
 0x313   : >> { %7539 = vmatmul.msk.bf16.gmra.mxu0 %vm11856_vm6, %v9933_v9  ;;  %vm11888_vm6 = vmmov %vm11877_vm2 }
 0x314   : >> { %v3929_v6 = vmax.f32 %v3897_v62, 0.0  ;;  %v3762_v43 = vadd.f32 %v3730_v36, %v3265_v58  ;;  %v8285_v62 = vld [vmem:[#allocation2 + $0x20] sm:$0xff]  }
 0x316   : >> { %v3961_v37 = vpack.c.bf16 %v3929_v6, %v3929_v6  ;;  %v3826_v41 = vadd.f32 %v3762_v43, %v3698_v7  ;;  %v3013_v12 = vpop.f32.mrf.mxu2 }
 0x317   : >> { %v8702_v21 = vld [vmem:[#allocation2 + $0x4c] sm:$0xff]   ;;  %v3065_v49 = vadd.f32 %v3013_v12, %v11860_v34 }
 0x318   : >> { %v3647_v56 = vpop.f32.mrf.mxu0  ;;  %3993 = vst.msk [vmem:[#allocation2 + $0x54] sm:$0xf] %vm11858_vm7, %v3961_v37  ;;  %v3862_v57 = vmul.f32 %v9886_v42, %v3826_v41  ;;  %v4216_v27 = vshrl.u32 %v8702_v21, 16  ;;  %v4219_v1 = vshll.u32 %v8702_v21, 16  ;;  %v11865_v37 = vld [vmem:[#allocation40_spill] sm:$0xff]  ;;  %vm11890_vm7 = vmmov %vm11877_vm2 }
 0x319   : >> { %v3699_v3 = vadd.f32 %v3647_v56, %v11859_v10  ;;  %v3214_v9 = vpop.f32.mrf.mxu3  ;;  %v11868_v56 = vld [vmem:[#allocation14_spill] sm:$0xff] }
 0x31a   : >> { %v3898_v50 = vadd.f32 %v9891_v59, %v3862_v57  ;;  %v3266_v30 = vadd.f32 %v3214_v9, %v11861_v5  ;;  %v4218_v39 = vrot.slane %v4216_v27, 3  ;;  %v4221_v47 = vrot.slane %v4219_v1, 4 }
 0x31b   : >> { %7492 = vmatmul.msk.bf16.gmra.mxu2 %vm11862_vm8, %v10017_v17  ;;  %v3795_v36 = vmul.f32 %v11863_v8, %v3699_v3  ;;  %vm11892_vm8 = vmmov %vm11884_vm1  ;;  %v10322_v8 = vld [vmem:[#allocation2 + $0x40] sm:$0xff]  }
 0x31c   : >> { %v3930_v14 = vmax.f32 %v3898_v50, 0.0  ;;  %v3763_v44 = vadd.f32 %v3266_v30, %v3065_v49  ;;  %v4222_v58 = vor.u32 %v4221_v47, %v4218_v39  ;;  %v11870_v49 = vld [vmem:[#allocation80_spill] sm:$0xff]  ;;  %v11873_v39 = vld [vmem:[#allocation41_spill] sm:$0xff] }
 0x31d   : >> { %v10216_v30 = vld [vmem:[%s11396_s2] ss:$0 sm:$0xff] }
 0x31e   : >> { %v3962_v6 = vpack.c.bf16 %v3930_v14, %v3930_v14  ;;  %v3827_v15 = vadd.f32 %v3795_v36, %v3763_v44  ;;  %7516 = vmatmul.msk.bf16.gmra.mxu3 %vm11864_vm9, %v8285_v62  ;;  %v3016_v7 = vpop.f32.mrf.mxu2  ;;  %v10201_v12 = vsel %vm1233_vm14, %v4213_v25, %v4222_v58  ;;  %v7882_v14 = vld [vmem:[%s11398_s4 + $0x50] sm:$0xff]  ;;  %vm11893_vm9 = vmmov %vm11877_vm2 }
 0x31f   : >> { %v3066_v41 = vadd.f32 %v3016_v7, %v11865_v37  ;;  %7473 = vmatmul.msk.bf16.gmra.mxu1 %vm11867_vm11, %v10201_v12  ;;  %vm11897_vm11 = vmmov %vm11884_vm1 }
 0x320   : >> { %v3650_v43 = vpop.f32.mrf.mxu0  ;;  %3994 = vst.msk [vmem:[#allocation2 + $0x58] sm:$0xf] %vm11866_vm10, %v3962_v6  ;;  %v3863_v17 = vmul.f32 %v9886_v42, %v3827_v15  ;;  %v10227_v15 = vld [vmem:[%s11397_s3] ss:$0 sm:$0xff]  ;;  %5184 = vmatpush.bf16.msrb.mxu1 %v7882_v14  ;;  %vm11895_vm10 = vmmov %vm11877_vm2 }
 0x321   : >> { %v3732_v21 = vmul.f32 %v11868_v56, %v3066_v41  ;;  %v3217_v57 = vpop.f32.mrf.mxu3  ;;  %v3700_v25 = vadd.f32 %v3650_v43, %v11870_v49  ;;  %v11874_v43 = vld [vmem:[#allocation82_spill] sm:$0xff] }
 0x322   : >> { %v3899_v10 = vadd.f32 %v9891_v59, %v3863_v17  ;;  %v3267_v3 = vadd.f32 %v3217_v57, %v9796_v46  ;;  %v11876_v57 = vld [vmem:[#allocation30_spill] sm:$0xff] }
 0x323   : >> { %7540 = vmatmul.msk.bf16.gmra.mxu0 %vm11869_vm12, %v8284_v54  ;;  %v11872_v54 = vld [vmem:[#allocation81_spill] sm:$0xff]  ;;  %vm11901_vm12 = vmmov %vm11877_vm2 }
 0x324   : >> { %v3931_v34 = vmax.f32 %v3899_v10, 0.0  ;;  %v3764_v9 = vadd.f32 %v3732_v21, %v3267_v3 }
 0x326   : >> { %v3963_v27 = vpack.c.bf16 %v3931_v34, %v3931_v34  ;;  %v3828_v1 = vadd.f32 %v3764_v9, %v3700_v25  ;;  %v3018_v50 = vpop.f32.mrf.mxu2  ;;  %v8286_v34 = vld [vmem:[#allocation2 + $0x28] sm:$0xff]  }
 0x327   : >> { %v8704_v5 = vld [vmem:[#allocation2 + $0x54] sm:$0xff]   ;;  %v3067_v47 = vadd.f32 %v3018_v50, %v11873_v39 }
 0x328   : >> { %v3652_v42 = vpop.f32.mrf.mxu0  ;;  %3995 = vst.msk [vmem:[#allocation2 + $0x5c] sm:$0xf] %vm11871_vm13, %v3963_v27  ;;  %v3864_v59 = vmul.f32 %v10216_v30, %v3828_v1  ;;  %v4225_v44 = vshrl.u32 %v8704_v5, 16  ;;  %v4228_v6 = vshll.u32 %v8704_v5, 16  ;;  %vm11903_vm13 = vmmov %vm11877_vm2 }
 0x329   : >> { %v3701_v46 = vadd.f32 %v3652_v42, %v11872_v54  ;;  %v3219_v36 = vpop.f32.mrf.mxu3  ;;  %v11878_v42 = vld [vmem:[#allocation42_spill] sm:$0xff]  ;;  %v11881_v54 = vld [vmem:[#allocation15_spill] sm:$0xff] }
 0x32a   : >> { %v3900_v7 = vadd.f32 %v10227_v15, %v3864_v59  ;;  %v3268_v37 = vadd.f32 %v3219_v36, %v11874_v43  ;;  %v4227_v41 = vrot.slane %v4225_v44, 3  ;;  %v4230_v17 = vrot.slane %v4228_v6, 4  ;;  %v11883_v44 = vld [vmem:[#allocation83_spill] sm:$0xff] }
 0x32b   : >> { %7493 = vmatmul.msk.bf16.gmra.mxu2 %vm11875_vm15, %v10052_v45  ;;  %v3797_v10 = vmul.f32 %v11876_v57, %v3701_v46  ;;  %vm11905_vm15 = vmmov %vm11884_vm1 }
 0x32c   : >> { %v3932_v21 = vmax.f32 %v3900_v7, 0.0  ;;  %v3765_v3 = vadd.f32 %v3268_v37, %v3067_v47  ;;  %v10234_v49 = vpop.f32.mrf.mxu1  ;;  %v4231_v25 = vor.u32 %v4230_v17, %v4227_v41 }
 0x32e   : >> { %v3964_v9 = vpack.c.bf16 %v3932_v21, %v3932_v21  ;;  %v3829_v27 = vadd.f32 %v3797_v10, %v3765_v3  ;;  %7517 = vmatmul.msk.bf16.gmra.mxu3 %vm11877_vm2, %v8286_v34  ;;  %v3021_v1 = vpop.f32.mrf.mxu2  ;;  %v10239_v45 = vsel %vm1233_vm14, %v4222_v58, %v4231_v25  ;;  %v11885_v3 = vld [vmem:[#allocation84_spill] sm:$0xff] }
 0x32f   : >> { %v3068_v5 = vadd.f32 %v3021_v1, %v11878_v42  ;;  %7474 = vmatmul.msk.bf16.gmra.mxu1 %vm11880_vm4, %v10239_v45  ;;  %vm11909_vm4 = vmmov %vm11884_vm1 }
 0x330   : >> { %v3655_v50 = vpop.f32.mrf.mxu0  ;;  %3996 = vst.msk [vmem:[#allocation2 + $0x60] sm:$0xf] %vm11879_vm3, %v3964_v9  ;;  %v3865_v59 = vmul.f32 %v10216_v30, %v3829_v27  ;;  %vm11907_vm3 = vmmov %vm11877_vm2 }
 0x331   : >> { %v3734_v46 = vmul.f32 %v11881_v54, %v3068_v5  ;;  %v3222_v39 = vpop.f32.mrf.mxu3  ;;  %v3702_v58 = vadd.f32 %v3655_v50, %v11883_v44  ;;  %v11887_v5 = vld [vmem:[#allocation85_spill] sm:$0xff] }
 0x332   : >> { %v3901_v47 = vadd.f32 %v10227_v15, %v3865_v59  ;;  %v3269_v14 = vadd.f32 %v3222_v39, %v9810_v20 }
 0x333   : >> { %7541 = vmatmul.msk.bf16.gmra.mxu0 %vm11882_vm5, %v8285_v62  ;;  %v11886_v62 = vld [vmem:[#allocation43_spill] sm:$0xff]  ;;  %vm11913_vm5 = vmmov %vm11877_vm2 }
 0x334   : >> { %v3933_v36 = vmax.f32 %v3901_v47, 0.0  ;;  %v3766_v6 = vadd.f32 %v3734_v46, %v3269_v14  ;;  %v10250_v7 = vpop.f32.mrf.mxu1  ;;  %v11889_v14 = vld [vmem:[#allocation31_spill] sm:$0xff] }
 0x336   : >> { %v3965_v43 = vpack.c.bf16 %v3933_v36, %v3933_v36  ;;  %v3830_v37 = vadd.f32 %v3766_v6, %v3702_v58  ;;  %v3023_v41 = vpop.f32.mrf.mxu2  ;;  %v10261_v58 = vld [vmem:[#allocation2 + $0x30] sm:$0xff]  }
 0x337   : >> { %v8706_v21 = vld [vmem:[#allocation2 + $0x5c] sm:$0xff]   ;;  %v3069_v27 = vadd.f32 %v3023_v41, %v11886_v62 }
 0x338   : >> { %v3657_v17 = vpop.f32.mrf.mxu0  ;;  %3997 = vst.msk [vmem:[#allocation2 + $0x64] sm:$0xf] %vm11884_vm1, %v3965_v43  ;;  %v3866_v10 = vmul.f32 %v10216_v30, %v3830_v37  ;;  %v4234_v1 = vshrl.u32 %v8706_v21, 16  ;;  %v4237_v42 = vshll.u32 %v8706_v21, 16  ;;  %v11894_v62 = vld [vmem:[#allocation16_spill] sm:$0xff]  ;;  %vm11915_vm1 = vmmov %vm11877_vm2 }
 0x339   : >> { %v3703_v9 = vadd.f32 %v3657_v17, %v11885_v3  ;;  %v3224_v20 = vpop.f32.mrf.mxu3 }
 0x33a   : >> { %v3902_v50 = vadd.f32 %v10227_v15, %v3866_v10  ;;  %v3270_v59 = vadd.f32 %v3224_v20, %v11887_v5  ;;  %v4236_v46 = vrot.slane %v4234_v1, 3  ;;  %v4239_v39 = vrot.slane %v4237_v42, 4  ;;  %v11891_v10 = vld [vmem:[#allocation45_spill] sm:$0xff]  ;;  %v11896_v5 = vld [vmem:[#allocation86_spill] sm:$0xff] }
 0x33b   : >> { %7494 = vmatmul.msk.bf16.gmra.mxu2 %vm11888_vm6, %v10100_v16  ;;  %v3799_v36 = vmul.f32 %v11889_v14, %v3703_v9  ;;  %v11911_v14 = vld [vmem:[#allocation51_spill] sm:$0xff]  ;;  %vm11917_vm6 = vmmov %vm11909_vm4 }
 0x33c   : >> { %v3934_v47 = vmax.f32 %v3902_v50, 0.0  ;;  %v3767_v44 = vadd.f32 %v3270_v59, %v3069_v27  ;;  %v10263_v6 = vpop.f32.mrf.mxu1  ;;  %v4240_v43 = vor.u32 %v4239_v39, %v4236_v46 }
 0x33e   : >> { %v3966_v37 = vpack.c.bf16 %v3934_v47, %v3934_v47  ;;  %v3831_v41 = vadd.f32 %v3799_v36, %v3767_v44  ;;  %7518 = vmatmul.msk.bf16.gmra.mxu3 %vm11890_vm7, %v10261_v58  ;;  %v3026_v17 = vpop.f32.mrf.mxu2  ;;  %v10269_v3 = vsel %vm1233_vm14, %v4231_v25, %v4240_v43  ;;  %vm11918_vm7 = vmmov %vm11915_vm1 }
 0x33f   : >> { %v3070_v16 = vadd.f32 %v3026_v17, %v11891_v10  ;;  %7475 = vmatmul.msk.bf16.gmra.mxu1 %vm11893_vm9, %v10269_v3  ;;  %v11898_v17 = vld [vmem:[#allocation87_spill] sm:$0xff]  ;;  %vm11924_vm9 = vmmov %vm11909_vm4 }
 0x340   : >> { %v3660_v21 = vpop.f32.mrf.mxu0  ;;  %3998 = vst.msk [vmem:[#allocation2 + $0x68] sm:$0xf] %vm11892_vm8, %v3966_v37  ;;  %v3867_v9 = vmul.f32 %v10216_v30, %v3831_v41  ;;  %vm11920_vm8 = vmmov %vm11915_vm1 }
 0x341   : >> { %v3736_v27 = vmul.f32 %v11894_v62, %v3070_v16  ;;  %v3227_v20 = vpop.f32.mrf.mxu3  ;;  %v3704_v25 = vadd.f32 %v3660_v21, %v11896_v5 }
 0x342   : >> { %v3903_v1 = vadd.f32 %v10227_v15, %v3867_v9  ;;  %v3271_v42 = vadd.f32 %v3227_v20, %v9824_v33 }
 0x343   : >> { %7542 = vmatmul.msk.bf16.gmra.mxu0 %vm11895_vm10, %v8286_v34  ;;  %v11899_v34 = vld [vmem:[#allocation47_spill] sm:$0xff]  ;;  %vm11928_vm10 = vmmov %vm11915_vm1 }
 0x344   : >> { %v3935_v50 = vmax.f32 %v3903_v1, 0.0  ;;  %v3768_v59 = vadd.f32 %v3736_v27, %v3271_v42  ;;  %v10280_v46 = vpop.f32.mrf.mxu1  ;;  %v11900_v27 = vld [vmem:[#allocation88_spill] sm:$0xff] }
 0x346   : >> { %v3967_v39 = vpack.c.bf16 %v3935_v50, %v3935_v50  ;;  %v3832_v47 = vadd.f32 %v3768_v59, %v3704_v25  ;;  %v3028_v36 = vpop.f32.mrf.mxu2  ;;  %v11902_v25 = vld [vmem:[#allocation32_spill] sm:$0xff] }
 0x347   : >> { %v8708_v37 = vld [vmem:[#allocation2 + $0x64] sm:$0xff]   ;;  %v3071_v16 = vadd.f32 %v3028_v36, %v11899_v34 }
 0x348   : >> { %v3662_v44 = vpop.f32.mrf.mxu0  ;;  %3999 = vst.msk [vmem:[#allocation2 + $0x6c] sm:$0xf] %vm11897_vm11, %v3967_v39  ;;  %v3868_v41 = vmul.f32 %v10216_v30, %v3832_v47  ;;  %v4243_v9 = vshrl.u32 %v8708_v37, 16  ;;  %v4246_v20 = vshll.u32 %v8708_v37, 16  ;;  %v10291_v47 = vld [vmem:[#allocation2 + $0x38] sm:$0xff]   ;;  %vm11931_vm11 = vmmov %vm11915_vm1 }
 0x349   : >> { %v3705_v10 = vadd.f32 %v3662_v44, %v11898_v17  ;;  %v3229_v33 = vpop.f32.mrf.mxu3 }
 0x34a   : >> { %v3904_v21 = vadd.f32 %v10227_v15, %v3868_v41  ;;  %v3272_v1 = vadd.f32 %v3229_v33, %v11900_v27  ;;  %v4245_v42 = vrot.slane %v4243_v9, 3  ;;  %v4248_v50 = vrot.slane %v4246_v20, 4  ;;  %v11904_v33 = vld [vmem:[#allocation49_spill] sm:$0xff] }
 0x34b   : >> { %7495 = vmatmul.msk.bf16.gmra.mxu2 %vm11901_vm12, %v10128_v0  ;;  %v3801_v59 = vmul.f32 %v11902_v25, %v3705_v10  ;;  %vm11933_vm12 = vmmov %vm11909_vm4 }
 0x34c   : >> { %v3936_v5 = vmax.f32 %v3904_v21, 0.0  ;;  %v3769_v39 = vadd.f32 %v3272_v1, %v3071_v16  ;;  %v10293_v44 = vpop.f32.mrf.mxu1  ;;  %v4249_v36 = vor.u32 %v4248_v50, %v4245_v42  ;;  %v11906_v16 = vld [vmem:[#allocation17_spill] sm:$0xff] }
 0x34e   : >> { %v3968_v17 = vpack.c.bf16 %v3936_v5, %v3936_v5  ;;  %v3833_v37 = vadd.f32 %v3801_v59, %v3769_v39  ;;  %7519 = vmatmul.msk.bf16.gmra.mxu3 %vm11903_vm13, %v10291_v47  ;;  %v3031_v41 = vpop.f32.mrf.mxu2  ;;  %v10299_v9 = vsel %vm1233_vm14, %v4240_v43, %v4249_v36  ;;  %v11908_v43 = vld [vmem:[#allocation89_spill] sm:$0xff]  ;;  %vm11934_vm13 = vmmov %vm11915_vm1 }
 0x34f   : >> { %v3072_v0 = vadd.f32 %v3031_v41, %v11904_v33  ;;  %7476 = vmatmul.msk.bf16.gmra.mxu1 %vm11877_vm2, %v10299_v9  ;;  %vm11938_vm2 = vmmov %vm11909_vm4 }
 0x350   : >> { %v3665_v34 = vpop.f32.mrf.mxu0  ;;  %4000 = vst.msk [vmem:[#allocation2 + $0x70] sm:$0xf] %vm11905_vm15, %v3968_v17  ;;  %v3869_v10 = vmul.f32 %v10216_v30, %v3833_v37  ;;  %vm11936_vm15 = vmmov %vm11915_vm1 }
 0x351   : >> { %v3738_v20 = vmul.f32 %v11906_v16, %v3072_v0  ;;  %v3232_v21 = vpop.f32.mrf.mxu3  ;;  %v3706_v50 = vadd.f32 %v3665_v34, %v11908_v43 }
 0x352   : >> { %v3905_v27 = vadd.f32 %v10227_v15, %v3869_v10  ;;  %v3273_v1 = vadd.f32 %v3232_v21, %v9838_v32  ;;  %v11910_v10 = vld [vmem:[#allocation90_spill] sm:$0xff] }
 0x353   : >> { %7543 = vmatmul.msk.bf16.gmra.mxu0 %vm11907_vm3, %v10261_v58  ;;  %vm11940_vm3 = vmmov %vm11915_vm1 }
 0x354   : >> { %v3937_v42 = vmax.f32 %v3905_v27, 0.0  ;;  %v3770_v5 = vadd.f32 %v3738_v20, %v3273_v1  ;;  %v10311_v59 = vpop.f32.mrf.mxu1  ;;  %v11912_v20 = vld [vmem:[#allocation91_spill] sm:$0xff] }
 0x356   : >> { %v3969_v39 = vpack.c.bf16 %v3937_v42, %v3937_v42  ;;  %v3834_v17 = vadd.f32 %v3770_v5, %v3706_v50  ;;  %v3033_v37 = vpop.f32.mrf.mxu2  ;;  %v11914_v5 = vld [vmem:[#allocation33_spill] sm:$0xff] }
 0x357   : >> { %v8710_v33 = vld [vmem:[#allocation2 + $0x6c] sm:$0xff]   ;;  %v3073_v57 = vadd.f32 %v3033_v37, %v11911_v14 }
 0x358   : >> { %v3667_v41 = vpop.f32.mrf.mxu0  ;;  %4001 = vst.msk [vmem:[#allocation2 + $0x74] sm:$0xf] %vm11909_vm4, %v3969_v39  ;;  %v3870_v0 = vmul.f32 %v10216_v30, %v3834_v17  ;;  %v4252_v21 = vshrl.u32 %v8710_v33, 16  ;;  %v4255_v27 = vshll.u32 %v8710_v33, 16  ;;  %vm11943_vm4 = vmmov %vm11915_vm1 }
 0x359   : >> { %v3707_v25 = vadd.f32 %v3667_v41, %v11910_v10  ;;  %v3234_v32 = vpop.f32.mrf.mxu3 }
 0x35a   : >> { %v3906_v34 = vadd.f32 %v10227_v15, %v3870_v0  ;;  %v3274_v1 = vadd.f32 %v3234_v32, %v11912_v20  ;;  %v4254_v42 = vrot.slane %v4252_v21, 3  ;;  %v4257_v43 = vrot.slane %v4255_v27, 4  ;;  %v11916_v32 = vld [vmem:[#allocation53_spill] sm:$0xff] }
 0x35b   : >> { %7496 = vmatmul.msk.bf16.gmra.mxu2 %vm11913_vm5, %v10153_v19  ;;  %v3803_v39 = vmul.f32 %v11914_v5, %v3707_v25  ;;  %v11919_v25 = vld [vmem:[#allocation18_spill] sm:$0xff]  ;;  %vm11944_vm5 = vmmov %vm11938_vm2 }
 0x35c   : >> { %v3938_v50 = vmax.f32 %v3906_v34, 0.0  ;;  %v3771_v17 = vadd.f32 %v3274_v1, %v3073_v57  ;;  %v10324_v41 = vpop.f32.mrf.mxu1  ;;  %v4258_v14 = vor.u32 %v4257_v43, %v4254_v42  ;;  %v11921_v1 = vld [vmem:[#allocation93_spill] sm:$0xff] }
 0x35e   : >> { %v3970_v37 = vpack.c.bf16 %v3938_v50, %v3938_v50  ;;  %v3835_v33 = vadd.f32 %v3803_v39, %v3771_v17  ;;  %7520 = vmatmul.msk.bf16.gmra.mxu3 %vm11915_vm1, %v10322_v8  ;;  %v3036_v0 = vpop.f32.mrf.mxu2  ;;  %v10330_v21 = vsel %vm1233_vm14, %v4249_v36, %v4258_v14  ;;  %v11922_v36 = vld [vmem:[#allocation92_spill] sm:$0xff] }
 0x35f   : >> { %v3074_v19 = vadd.f32 %v3036_v0, %v11916_v32  ;;  %7477 = vmatmul.msk.bf16.gmra.mxu1 %vm11918_vm7, %v10330_v21  ;;  %vm11947_vm7 = vmmov %vm11938_vm2 }
 0x360   : >> { %v3670_v10 = vpop.f32.mrf.mxu0  ;;  %4002 = vst.msk [vmem:[#allocation2 + $0x78] sm:$0xf] %vm11917_vm6, %v3970_v37  ;;  %v3871_v57 = vmul.f32 %v10216_v30, %v3835_v33  ;;  %vm11945_vm6 = vmmov %vm11915_vm1 }
 0x361   : >> { %v3740_v27 = vmul.f32 %v11919_v25, %v3074_v19  ;;  %v3237_v34 = vpop.f32.mrf.mxu3  ;;  %v3708_v50 = vadd.f32 %v3670_v10, %v11922_v36 }
 0x362   : >> { %v3907_v20 = vadd.f32 %v10227_v15, %v3871_v57  ;;  %v3275_v42 = vadd.f32 %v3237_v34, %v11921_v1  ;;  %v11925_v57 = vld [vmem:[#allocation94_spill] sm:$0xff] }
 0x363   : >> { %7544 = vmatmul.msk.bf16.gmra.mxu0 %vm11920_vm8, %v10291_v47  ;;  %vm11948_vm8 = vmmov %vm11915_vm1 }
 0x364   : >> { %v3939_v43 = vmax.f32 %v3907_v20, 0.0  ;;  %v3772_v39 = vadd.f32 %v3740_v27, %v3275_v42  ;;  %v10342_v17 = vpop.f32.mrf.mxu1  ;;  %v11927_v27 = vld [vmem:[#allocation95_spill] sm:$0xff] }
 0x365   : >> { %11923 = vst [vmem:[#allocation60_spill] sm:$0xff] %v10342_v17 }
 0x366   : >> { %v3971_v37 = vpack.c.bf16 %v3939_v43, %v3939_v43  ;;  %v3836_v33 = vadd.f32 %v3772_v39, %v3708_v50  ;;  %v3038_v0 = vpop.f32.mrf.mxu2  ;;  %v11929_v39 = vld [vmem:[#allocation34_spill] sm:$0xff] }
 0x367   : >> { %v8712_v5 = vld [vmem:[#allocation2 + $0x74] sm:$0xff]   ;;  %v3075_v63 = vadd.f32 %v3038_v0, %v11926_v38 }
 0x368   : >> { %v3672_v32 = vpop.f32.mrf.mxu0  ;;  %4003 = vst.msk [vmem:[#allocation2 + $0x7c] sm:$0xf] %vm11924_vm9, %v3971_v37  ;;  %v3872_v19 = vmul.f32 %v10216_v30, %v3836_v33  ;;  %v4261_v20 = vshrl.u32 %v8712_v5, 16  ;;  %v4264_v1 = vshll.u32 %v8712_v5, 16  ;;  %vm11950_vm9 = vmmov %vm11915_vm1 }
 0x369   : >> { %v3709_v26 = vadd.f32 %v3672_v32, %v11925_v57  ;;  %v3239_v34 = vpop.f32.mrf.mxu3 }
 0x36a   : >> { %v3908_v10 = vadd.f32 %v10227_v15, %v3872_v19  ;;  %v3276_v42 = vadd.f32 %v3239_v34, %v11927_v27  ;;  %v4263_v43 = vrot.slane %v4261_v20, 3  ;;  %v4266_v36 = vrot.slane %v4264_v1, 4  ;;  %v11932_v34 = vld [vmem:[#allocation57_spill] sm:$0xff] }
 0x36b   : >> { %7497 = vmatmul.msk.bf16.gmra.mxu2 %vm11928_vm10, %v10177_v55  ;;  %v3805_v37 = vmul.f32 %v11929_v39, %v3709_v26  ;;  %v11935_v26 = vld [vmem:[#allocation19_spill] sm:$0xff]  ;;  %vm11951_vm10 = vmmov %vm11915_vm1 }
 0x36c   : >> { %v3940_v50 = vmax.f32 %v3908_v10, 0.0  ;;  %v3773_v33 = vadd.f32 %v3276_v42, %v3075_v63  ;;  %v10355_v32 = vpop.f32.mrf.mxu1  ;;  %v4267_v38 = vor.u32 %v4266_v36, %v4263_v43 }
 0x36d   : >> { %11930 = vst [vmem:[#allocation44_spill] sm:$0xff] %v10355_v32 }
 0x36e   : >> { %v3972_v0 = vpack.c.bf16 %v3940_v50, %v3940_v50  ;;  %v3837_v5 = vadd.f32 %v3805_v37, %v3773_v33  ;;  %7521 = vmatmul.msk.bf16.gmra.mxu3 %vm11931_vm11, %v10353_v18  ;;  %v3041_v19 = vpop.f32.mrf.mxu2  ;;  %v10361_v20 = vsel %vm1233_vm14, %v4258_v14, %v4267_v38  ;;  %vm11953_vm11 = vmmov %vm11915_vm1 }
 0x36f   : >> { %v3076_v55 = vadd.f32 %v3041_v19, %v11932_v34  ;;  %7478 = vmatmul.msk.bf16.gmra.mxu1 %vm11934_vm13, %v10361_v20  ;;  %vm11956_vm13 = vmmov %vm11915_vm1 }
 0x370   : >> { %v3675_v57 = vpop.f32.mrf.mxu0  ;;  %4004 = vst.msk [vmem:[#allocation2 + $0x80] sm:$0xf] %vm11933_vm12, %v3972_v0  ;;  %v3873_v63 = vmul.f32 %v10216_v30, %v3837_v5  ;;  %vm11954_vm12 = vmmov %vm11915_vm1 }
 0x371   : >> { %v3742_v1 = vmul.f32 %v11935_v26, %v3076_v55  ;;  %v3242_v10 = vpop.f32.mrf.mxu3  ;;  %v3710_v14 = vadd.f32 %v3675_v57, %v9862_v31 }
 0x372   : >> { %v3909_v27 = vadd.f32 %v10227_v15, %v3873_v63  ;;  %v3277_v42 = vadd.f32 %v3242_v10, %v9865_v40  ;;  %v11939_v63 = vld [vmem:[#allocation59_spill] sm:$0xff] }
 0x373   : >> { %7545 = vmatmul.msk.bf16.gmra.mxu0 %vm11936_vm15, %v10322_v8  ;;  %vm11957_vm15 = vmmov %vm11915_vm1 }
 0x374   : >> { %v3941_v43 = vmax.f32 %v3909_v27, 0.0  ;;  %v3774_v36 = vadd.f32 %v3742_v1, %v3277_v42  ;;  %v10373_v50 = vpop.f32.mrf.mxu1 }
 0x375   : >> { %11937 = vst [vmem:[#allocation62_spill] sm:$0xff] %v10373_v50 }
 0x376   : >> { %v3973_v37 = vpack.c.bf16 %v3941_v43, %v3941_v43  ;;  %v3838_v33 = vadd.f32 %v3774_v36, %v3710_v14  ;;  %v3043_v0 = vpop.f32.mrf.mxu2  ;;  %v11941_v14 = vld [vmem:[#allocation35_spill] sm:$0xff] }
 0x377   : >> { %v8713_v19 = vld [vmem:[#allocation2 + $0x7c] sm:$0xff]   ;;  %v3077_v39 = vadd.f32 %v3043_v0, %v11939_v63 }
 0x378   : >> { %v3677_v5 = vpop.f32.mrf.mxu0  ;;  %4005 = vst.msk [vmem:[#allocation2 + $0x84] sm:$0xf] %vm11938_vm2, %v3973_v37  ;;  %v3874_v34 = vmul.f32 %v10216_v30, %v3838_v33  ;;  %v4270_v10 = vshrl.u32 %v8713_v19, 16  ;;  %v4273_v27 = vshll.u32 %v8713_v19, 16  ;;  %v10384_v33 = vld [vmem:[#allocation2 + $0x50] sm:$0xff]   ;;  %vm11959_vm2 = vmmov %vm11915_vm1 }
 0x379   : >> { %v3711_v55 = vadd.f32 %v3677_v5, %v9868_v28  ;;  %v3244_v40 = vpop.f32.mrf.mxu3 }
 0x37a   : >> { %v3910_v31 = vadd.f32 %v10227_v15, %v3874_v34  ;;  %v3278_v57 = vadd.f32 %v3244_v40, %v9870_v11  ;;  %v4272_v1 = vrot.slane %v4270_v10, 3  ;;  %v4275_v42 = vrot.slane %v4273_v27, 4 }
 0x37b   : >> { %7498 = vmatmul.msk.bf16.gmra.mxu2 %vm11940_vm3, %v10201_v12  ;;  %v3807_v36 = vmul.f32 %v11941_v14, %v3711_v55  ;;  %vm11960_vm3 = vmmov %vm11915_vm1 }
 0x37c   : >> { %v3942_v43 = vmax.f32 %v3910_v31, 0.0  ;;  %v3775_v37 = vadd.f32 %v3278_v57, %v3077_v39  ;;  %v10386_v28 = vpop.f32.mrf.mxu1  ;;  %v4276_v0 = vor.u32 %v4275_v42, %v4272_v1 }
 0x37d   : >> { %11942 = vst [vmem:[#allocation61_spill] sm:$0xff] %v10386_v28 }
 0x37e   : >> { %v3974_v5 = vpack.c.bf16 %v3942_v43, %v3942_v43  ;;  %v3839_v19 = vadd.f32 %v3807_v36, %v3775_v37  ;;  %7522 = vmatmul.msk.bf16.gmra.mxu3 %vm11943_vm4, %v10384_v33  ;;  %v10390_v11 = vpop.f32.mrf.mxu2  ;;  %v10393_v12 = vsel %vm1233_vm14, %v4267_v38, %v4276_v0  ;;  %vm11962_vm4 = vmmov %vm11915_vm1 }
 0x37f   : >> { %v10395_v63 = vld [vmem:[#allocation2 + $0x80] sm:$0xff]   ;;  %7479 = vmatmul.msk.bf16.gmra.mxu1 %vm11915_vm1, %v10393_v12 }
 0x380   : >> { %v4785_v34 = vpop.f32.mrf.mxu0  ;;  %4006 = vst.msk [vmem:[#allocation2 + $0x88] sm:$0xf] %vm11944_vm5, %v3974_v5  ;;  %v3875_v39 = vmul.f32 %v10216_v30, %v3839_v19  ;;  %v8165_v55 = vunpack.c.h.b16 %v10395_v63  ;;  %vm11963_vm5 = vmmov %vm11915_vm1 }
 0x381   : >> { %v4680_v40 = vpop.f32.mrf.mxu3 }
 0x382   : >> { %v3911_v10 = vadd.f32 %v10227_v15, %v3875_v39  ;;  %v10405_v27 = vadd.f32 %v4785_v34, %v4680_v40  ;;  %v4453_v38 = vpack.c.b16 %v8165_v55, %v8165_v55  ;;  %v10419_v40 = vld [vmem:[#allocation2 + $0x58] sm:$0xff]  }
 0x383   : >> { %7546 = vmatmul.msk.bf16.gmra.mxu0 %vm11945_vm6, %v10353_v18  ;;  %vm11967_vm6 = vmmov %vm11915_vm1 }
 0x384   : >> { %v3943_v31 = vmax.f32 %v3911_v10, 0.0  ;;  %v4473_v57 = vshrl.u32 %v4453_v38, 16  ;;  %v4476_v1 = vshll.u32 %v4453_v38, 16  ;;  %v10407_v42 = vpop.f32.mrf.mxu1 }
 0x385   : >> { %11946 = vst [vmem:[#allocation63_spill] sm:$0xff] %v10407_v42 }
 0x386   : >> { %v3975_v30 = vpack.c.bf16 %v3943_v31, %v3943_v31  ;;  %v10409_v43 = vpop.f32.mrf.mxu2  ;;  %v4475_v36 = vrot.slane %v4473_v57, 3  ;;  %v4478_v37 = vrot.slane %v4476_v1, 4 }
 0x388   : >> { %v4787_v5 = vpop.f32.mrf.mxu0  ;;  %4007 = vst.msk [vmem:[#allocation2 + $0x8c] sm:$0xf] %vm11947_vm7, %v3975_v30  ;;  %v4479_v15 = vor.u32 %v4478_v37, %v4475_v36  ;;  %v7861_v37 = vld [vmem:[%s11398_s4 + $0x28] sm:$0xff]  ;;  %vm11969_vm7 = vmmov %vm11915_vm1 }
 0x389   : >> { %v4682_v19 = vpop.f32.mrf.mxu3  ;;  %5451 = vmatpush.bf16.msra.mxu2 %v7861_v37 }
 0x38a   : >> { %v10412_v39 = vadd.f32 %v4787_v5, %v4682_v19  ;;  %v10415_v34 = vsel %vm1233_vm14, %v4276_v0, %v4479_v15 }
 0x38b   : >> { %7499 = vmatmul.msk.bf16.gmra.mxu2 %vm11948_vm8, %v10239_v45  ;;  %vm11971_vm8 = vmmov %vm11915_vm1 }
 0x38c   : >> { %v10421_v10 = vpop.f32.mrf.mxu1 }
 0x38d   : >> { %11949 = vst [vmem:[#allocation46_spill] sm:$0xff] %v10421_v10 }
 0x38e   : >> { %7523 = vmatmul.msk.bf16.gmra.mxu3 %vm11950_vm9, %v10419_v40  ;;  %v10425_v38 = vpop.f32.mrf.mxu2  ;;  %vm11976_vm9 = vmmov %vm11915_vm1 }
 0x38f   : >> { %v10427_v57 = vld [vmem:[#allocation2 + $0x88] sm:$0xff]  }
 0x390   : >> { %v4790_v31 = vpop.f32.mrf.mxu0  ;;  %v8168_v1 = vunpack.c.l.b16 %v10427_v57  ;;  %v8169_v2 = vunpack.c.h.b16 %v10427_v57 }
 0x391   : >> { %v4685_v30 = vpop.f32.mrf.mxu3 }
 0x392   : >> { %v10432_v36 = vadd.f32 %v4790_v31, %v4685_v30  ;;  %v4142_v45 = vpack.c.b16 %v8168_v1, %v8165_v55  ;;  %v7885_v55 = vld [vmem:[%s11398_s4 + $0x68] sm:$0xff]  ;;  %v4143_v37 = vpack.c.b16 %v8169_v2, %v8169_v2 }
 0x393   : >> { %7547 = vmatmul.msk.bf16.gmra.mxu0 %vm11951_vm10, %v10384_v33  ;;  %5872 = vmatpush.bf16.msra.mxu3 %v7885_v55  ;;  %vm11977_vm10 = vmmov %vm11915_vm1 }
 0x394   : >> { %v4279_v5 = vshrl.u32 %v4142_v45, 16  ;;  %v4282_v15 = vshll.u32 %v4142_v45, 16  ;;  %v10437_v19 = vpop.f32.mrf.mxu1 }
 0x395   : >> { %11952 = vst [vmem:[#allocation64_spill] sm:$0xff] %v10437_v19 }
 0x396   : >> { %v10439_v14 = vpop.f32.mrf.mxu2  ;;  %v4281_v61 = vrot.slane %v4279_v5, 3  ;;  %v4284_v26 = vrot.slane %v4282_v15, 4  ;;  %v7887_v5 = vld [vmem:[%s11398_s4 + $0x78] sm:$0xff] }
 0x397   : >> { %6073 = vmatpush.bf16.msra.mxu0 %v7887_v5 }
 0x398   : >> { %v4792_v25 = vpop.f32.mrf.mxu0  ;;  %v4285_v31 = vor.u32 %v4284_v26, %v4281_v61  ;;  %v7905_v61 = vld [vmem:[%s11398_s4 + $0x88] sm:$0xff]  ;;  %v10457_v26 = vld [vmem:[#allocation2 + $0x60] sm:$0xff]  }
 0x399   : >> { %v4687_v1 = vpop.f32.mrf.mxu3  ;;  %6506 = vmatpush.bf16.msra.mxu1 %v7905_v61 }
 0x39a   : >> { %v10445_v30 = vadd.f32 %v4792_v25, %v4687_v1  ;;  %v4286_v45 = vsel %vm1233_vm14, %v4276_v0, %v4285_v31  ;;  %v4291_v0 = vshll.u32 %v4143_v37, 16 }
 0x39b   : >> { %7480 = vmatmul.msk.bf16.gmra.mxu1 %vm11953_vm11, %v4286_v45  ;;  %7500 = vmatmul.msk.bf16.gmra.mxu2 %vm11954_vm12, %v10269_v3  ;;  %v4288_v3 = vshrl.u32 %v4143_v37, 16  ;;  %vm11979_vm11 = vmmov %vm11915_vm1 }
 0x39c   : >> { %v10459_v25 = vpop.f32.mrf.mxu1  ;;  %v4293_v53 = vrot.slane %v4291_v0, 4  ;;  %v7867_v0 = vld [vmem:[#allocation2 + $0x18] sm:$0xff]  ;;  %vm11981_vm12 = vmmov %vm11915_vm1 }
 0x39d   : >> { %11955 = vst [vmem:[#allocation48_spill] sm:$0xff] %v10459_v25  ;;  %v4290_v45 = vrot.slane %v4288_v3, 3 }
 0x39e   : >> { %7524 = vmatmul.msk.bf16.gmra.mxu3 %vm11956_vm13, %v10457_v26  ;;  %v10463_v2 = vpop.f32.mrf.mxu2  ;;  %vm11986_vm13 = vmmov %vm11915_vm1 }
 0x39f   : >> { %v4294_v61 = vor.u32 %v4293_v53, %v4290_v45 }
 0x3a0   : >> { %v4795_v15 = vpop.f32.mrf.mxu0 }
 0x3a1   : >> { %v4690_v55 = vpop.f32.mrf.mxu3  ;;  %v4295_v37 = vsel %vm1233_vm14, %v4285_v31, %v4294_v61 }
 0x3a2   : >> { %v10467_v1 = vadd.f32 %v4795_v15, %v4690_v55  ;;  %v7866_v15 = vld [vmem:[#allocation2 + $0x10] sm:$0xff]  ;;  %v10479_v55 = vld [vmem:[#allocation2 + $0x68] sm:$0xff]  }
 0x3a3   : >> { %7548 = vmatmul.msk.bf16.gmra.mxu0 %vm11957_vm15, %v10419_v40  ;;  %v4986_v56 = vshrl.u32 %v7866_v15, 16  ;;  %vm11987_vm15 = vmmov %vm11915_vm1 }
 0x3a4   : >> { %v10469_v16 = vpop.f32.mrf.mxu1 }
 0x3a5   : >> { %11958 = vst [vmem:[#allocation66_spill] sm:$0xff] %v10469_v16 }
 0x3a6   : >> { %v10471_v5 = vpop.f32.mrf.mxu2 }
 0x3a8   : >> { %v4797_v52 = vpop.f32.mrf.mxu0 }
 0x3a9   : >> { %v4692_v62 = vpop.f32.mrf.mxu3 }
 0x3aa   : >> { %v10473_v51 = vadd.f32 %v4797_v52, %v4692_v62  ;;  %v4988_v62 = vshll.u32 %v7866_v15, 16  ;;  %v7868_v15 = vld [vmem:[#allocation2 + $0x20] sm:$0xff] }
 0x3ab   : >> { %7481 = vmatmul.msk.bf16.gmra.mxu1 %vm11959_vm2, %v4295_v37  ;;  %7501 = vmatmul.msk.bf16.gmra.mxu2 %vm11960_vm3, %v10299_v9  ;;  %v4993_v9 = vshll.u32 %v7867_v0, 16  ;;  %vm11988_vm2 = vmmov %vm11915_vm1 }
 0x3ac   : >> { %v10481_v3 = vpop.f32.mrf.mxu1  ;;  %v4990_v61 = vrot.slane %v4988_v62, 1  ;;  %vm11991_vm3 = vmmov %vm11915_vm1 }
 0x3ad   : >> { %11961 = vst [vmem:[#allocation65_spill] sm:$0xff] %v10481_v3  ;;  %v4995_v35 = vrot.slane %v4993_v9, 1 }
 0x3ae   : >> { %7525 = vmatmul.msk.bf16.gmra.mxu3 %vm11962_vm4, %v10479_v55  ;;  %v10485_v53 = vpop.f32.mrf.mxu2  ;;  %v4991_v3 = vor.u32 %v4990_v61, %v4986_v56  ;;  %vm11996_vm4 = vmmov %vm11915_vm1 }
 0x3b0   : >> { %v4800_v52 = vpop.f32.mrf.mxu0  ;;  %v4996_v25 = vsel %vm2075_vm0, %v4991_v3, %v4995_v35 }
 0x3b1   : >> { %v4695_v45 = vpop.f32.mrf.mxu3 }
 0x3b2   : >> { %v10489_v31 = vadd.f32 %v4800_v52, %v4695_v45  ;;  %v8295_v52 = vld [vmem:[#allocation2 + $0x70] sm:$0xff]  }
 0x3b3   : >> { %7549 = vmatmul.msk.bf16.gmra.mxu0 %vm11963_vm5, %v10457_v26  ;;  %vm11997_vm5 = vmmov %vm11915_vm1 }
 0x3b4   : >> { %v10491_v37 = vpop.f32.mrf.mxu1 }
 0x3b5   : >> { %11964 = vst [vmem:[#allocation67_spill] sm:$0xff] %v10491_v37 }
 0x3b6   : >> { %v10493_v54 = vpop.f32.mrf.mxu2 }
 0x3b7   : >> { %11965 = vst [vmem:[#allocation50_spill] sm:$0xff] %v10493_v54 }
 0x3b8   : >> { %v4802_v4 = vpop.f32.mrf.mxu0 }
 0x3b9   : >> { %v4697_v16 = vpop.f32.mrf.mxu3 }
 0x3ba   : >> { %v10495_v29 = vadd.f32 %v4802_v4, %v4697_v16  ;;  %v5001_v16 = vshll.u32 %v7868_v15, 16 }
 0x3bb   : >> { %7626 = vmatmul.msk.bf16.vlgmr.msrb.gmra.mxu1 %vm11915_vm1, %v4996_v25  ;;  %7502 = vmatmul.msk.bf16.gmra.mxu2 %vm11967_vm6, %v10330_v21  ;;  %v4997_v21 = vshrl.u32 %v7867_v0, 16  ;;  %v7869_v0 = vld [vmem:[#allocation2 + $0x28] sm:$0xff]  ;;  %vm12000_vm6 = vmmov %vm11915_vm1 }
 0x3bc   : >> { %11966 = vst [vmem:[#allocation68_spill] sm:$0xff] %v10495_v29  ;;  %v10501_v62 = vpop.f32.mrf.mxu1  ;;  %v5003_v61 = vrot.slane %v5001_v16, 1 }
 0x3bd   : >> { %11968 = vst [vmem:[#allocation52_spill] sm:$0xff] %v10501_v62  ;;  %v4999_v37 = vor.u32 %v4997_v21, %v4995_v35 }
 0x3be   : >> { %7526 = vmatmul.msk.bf16.gmra.mxu3 %vm11969_vm7, %v8295_v52  ;;  %v10504_v45 = vpop.f32.mrf.mxu2  ;;  %vm12004_vm7 = vmmov %vm11915_vm1 }
 0x3bf   : >> { %11970 = vst [vmem:[#allocation70_spill] sm:$0xff] %v10504_v45  ;;  %v5004_v10 = vsel %vm2075_vm0, %v4999_v37, %v5003_v61  ;;  %v5009_v37 = vshll.u32 %v7869_v0, 16 }
 0x3c0   : >> { %v4805_v9 = vpop.f32.mrf.mxu0 }
 0x3c1   : >> { %v4700_v56 = vpop.f32.mrf.mxu3  ;;  %v5011_v21 = vrot.slane %v5009_v37, 1 }
 0x3c2   : >> { %v10508_v4 = vadd.f32 %v4805_v9, %v4700_v56  ;;  %v8296_v9 = vld [vmem:[#allocation2 + $0x78] sm:$0xff]  }
 0x3c3   : >> { %7550 = vmatmul.msk.bf16.gmra.mxu0 %vm11971_vm8, %v10479_v55  ;;  %vm12005_vm8 = vmmov %vm11915_vm1 }
 0x3c4   : >> { %11972 = vst [vmem:[#allocation69_spill] sm:$0xff] %v10508_v4  ;;  %v10510_v25 = vpop.f32.mrf.mxu1 }
 0x3c5   : >> { %11973 = vst [vmem:[#allocation54_spill] sm:$0xff] %v10510_v25 }
 0x3c6   : >> { %v10512_v3 = vpop.f32.mrf.mxu2 }
 0x3c7   : >> { %11974 = vst [vmem:[#allocation56_spill] sm:$0xff] %v10512_v3 }
 0x3c8   : >> { %v4807_v62 = vpop.f32.mrf.mxu0 }
 0x3c9   : >> { %v4702_v19 = vpop.f32.mrf.mxu3 }
 0x3ca   : >> { %v10514_v13 = vadd.f32 %v4807_v62, %v4702_v19 }
 0x3cb   : >> { %7627 = vmatmul.msk.bf16.gmra.mxu1 %vm11976_vm9, %v5004_v10  ;;  %7503 = vmatmul.msk.bf16.gmra.mxu2 %vm11977_vm10, %v10361_v20  ;;  %v5005_v20 = vshrl.u32 %v7868_v15, 16  ;;  %v7884_v15 = vld [vmem:[%s11398_s4 + $0x60] sm:$0xff]  ;;  %vm12007_vm9 = vmmov %vm11915_vm1 }
 0x3cc   : >> { %11975 = vst [vmem:[#allocation71_spill] sm:$0xff] %v10514_v13  ;;  %v10520_v56 = vpop.f32.mrf.mxu1  ;;  %5873 = vmatpush.bf16.msra.mxu3 %v7884_v15  ;;  %vm12009_vm10 = vmmov %vm11915_vm1 }
 0x3cd   : >> { %11978 = vst [vmem:[#allocation72_spill] sm:$0xff] %v10520_v56  ;;  %v5007_v56 = vor.u32 %v5005_v20, %v5003_v61  ;;  %v5013_v20 = vshrl.u32 %v7869_v0, 16 }
 0x3ce   : >> { %7527 = vmatmul.msk.bf16.gmra.mxu3 %vm11979_vm11, %v8296_v9  ;;  %v10523_v25 = vpop.f32.mrf.mxu2  ;;  %vm12014_vm11 = vmmov %vm11915_vm1 }
 0x3cf   : >> { %11980 = vst [vmem:[#allocation58_spill] sm:$0xff] %v10523_v25  ;;  %v5012_v25 = vsel %vm2075_vm0, %v5007_v56, %v5011_v21 }
 0x3d0   : >> { %v4810_v16 = vpop.f32.mrf.mxu0 }
 0x3d1   : >> { %v4705_v35 = vpop.f32.mrf.mxu3 }
 0x3d2   : >> { %v10526_v19 = vadd.f32 %v4810_v16, %v4705_v35 }
 0x3d3   : >> { %7551 = vmatmul.msk.bf16.gmra.mxu0 %vm11981_vm12, %v8295_v52  ;;  %v7860_v52 = vld [vmem:[%s11398_s4 + $0x20] sm:$0xff]  ;;  %vm12015_vm12 = vmmov %vm11915_vm1 }
 0x3d4   : >> { %11982 = vst [vmem:[#allocation73_spill] sm:$0xff] %v10526_v19  ;;  %v10528_v62 = vpop.f32.mrf.mxu1  ;;  %5452 = vmatpush.bf16.msra.mxu2 %v7860_v52 }
 0x3d5   : >> { %11983 = vst [vmem:[#allocation36_spill] sm:$0xff] %v10528_v62  ;;  %v5015_v62 = vor.u32 %v5013_v20, %v5011_v21  ;;  %v8770_v21 = vld [vmem:[#allocation2 + $0x8] sm:$0xff]  }
 0x3d6   : >> { %v10530_v10 = vpop.f32.mrf.mxu2 }
 0x3d7   : >> { %11984 = vst [vmem:[#allocation74_spill] sm:$0xff] %v10530_v10 }
 0x3d8   : >> { %v4812_v42 = vpop.f32.mrf.mxu0 }
 0x3d9   : >> { %v4707_v48 = vpop.f32.mrf.mxu3 }
 0x3da   : >> { %v10532_v28 = vadd.f32 %v4812_v42, %v4707_v48 }
 0x3db   : >> { %7628 = vmatmul.msk.bf16.gmra.mxu1 %vm11986_vm13, %v5012_v25  ;;  %7504 = vmatmul.msk.bf16.gmra.mxu2 %vm11987_vm15, %v10393_v12  ;;  %v7870_v25 = vld [vmem:[#allocation2 + $0x30] sm:$0xff]  ;;  %vm12016_vm13 = vmmov %vm11915_vm1 }
 0x3dc   : >> { %11985 = vst [vmem:[#allocation75_spill] sm:$0xff] %v10532_v28  ;;  %v10546_v48 = vpop.f32.mrf.mxu1  ;;  %v7886_v12 = vld [vmem:[%s11398_s4 + $0x70] sm:$0xff]  ;;  %v5017_v35 = vshll.u32 %v7870_v25, 16  ;;  %vm12018_vm15 = vmmov %vm11915_vm1 }
 0x3dd   : >> { %11989 = vst [vmem:[#allocation37_spill] sm:$0xff] %v10546_v48  ;;  %6074 = vmatpush.bf16.msra.mxu0 %v7886_v12  ;;  %v10570_v12 = vld [vmem:[#allocation2 + $0x38] sm:$0xff] }
 0x3de   : >> { %7528 = vmatmul.msk.bf16.gmra.mxu3 %vm11988_vm2, %v10395_v63  ;;  %v10548_v42 = vpop.f32.mrf.mxu2  ;;  %v5019_v52 = vrot.slane %v5017_v35, 1  ;;  %vm12022_vm2 = vmmov %vm11915_vm1 }
 0x3df   : >> { %11990 = vst [vmem:[#allocation76_spill] sm:$0xff] %v10548_v42 }
 0x3e0   : >> { %v4815_v61 = vpop.f32.mrf.mxu0  ;;  %v5020_v10 = vsel %vm2075_vm0, %v5015_v62, %v5019_v52 }
 0x3e1   : >> { %v4710_v56 = vpop.f32.mrf.mxu3 }
 0x3e2   : >> { %v10554_v16 = vadd.f32 %v4815_v61, %v4710_v56  ;;  %v8717_v61 = vld [vmem:[#allocation2 + $0x1c] sm:$0xff]   ;;  %v5271_v56 = vshll.u32 %v8770_v21, 16 }
 0x3e3   : >> { %7552 = vmatmul.msk.bf16.gmra.mxu0 %vm11991_vm3, %v8296_v9  ;;  %v8715_v9 = vld [vmem:[#allocation2 + $0x14] sm:$0xf0]   ;;  %vm12023_vm3 = vmmov %vm11915_vm1 }
 0x3e4   : >> { %11992 = vst [vmem:[#allocation38_spill] sm:$0xff] %v10554_v16  ;;  %v10558_v48 = vpop.f32.mrf.mxu1 }
 0x3e5   : >> { %11994 = vst [vmem:[#allocation78_spill] sm:$0xff] %v10558_v48  ;;  %v5666_v48 = vshll.u32 %v8717_v61, 16 }
 0x3e6   : >> { %v10556_v37 = vpop.f32.mrf.mxu2 }
 0x3e7   : >> { %11993 = vst [vmem:[#allocation77_spill] sm:$0xff] %v10556_v37  ;;  %v8771_v37 = vld [vmem:[#allocation2 + $0x10] sm:$0xff]  }
 0x3e8   : >> { %v4817_v15 = vpop.f32.mrf.mxu0  ;;  %v5275_v16 = vshll.u32 %v8771_v37, 16 }
 0x3e9   : >> { %v4712_v42 = vpop.f32.mrf.mxu3 }
 0x3ea   : >> { %v10560_v28 = vadd.f32 %v4817_v15, %v4712_v42  ;;  %v8544_v42 = vld [vmem:[#allocation2 + $0x14] sm:$0x8]  ;;  %v5269_v15 = vshrl.u32 %v8770_v21, 16  ;;  %v5021_v21 = vshrl.u32 %v7870_v25, 16 }
 0x3eb   : >> { %7629 = vmatmul.msk.bf16.gmra.mxu1 %vm11996_vm4, %v5020_v10  ;;  %7505 = vmatmul.msk.bf16.gmra.mxu2 %vm11997_vm5, %v10415_v34  ;;  %v8545_v20 = vor.u32 %v8715_v9, %v8544_v42  ;;  %v5663_v10 = vshrl.u32 %v8717_v61, 16  ;;  %v5668_v9 = vrot.slane %v5666_v48, 4  ;;  %vm12024_vm4 = vmmov %vm11915_vm1 }
 0x3ec   : >> { %11995 = vst [vmem:[#allocation39_spill] sm:$0xff] %v10560_v28  ;;  %v10572_v28 = vpop.f32.mrf.mxu1  ;;  %vm12026_vm5 = vmmov %vm11915_vm1 }
 0x3ed   : >> { %11999 = vst [vmem:[#allocation40_spill] sm:$0xff] %v10572_v28  ;;  %v5655_v19 = vshrl.u32 %v8545_v20, 16  ;;  %v5658_v13 = vshll.u32 %v8545_v20, 16  ;;  %v5665_v3 = vrot.slane %v5663_v10, 3  ;;  %v5277_v28 = vrot.slane %v5275_v16, 1 }
 0x3ee   : >> { %7529 = vmatmul.msk.bf16.gmra.mxu3 %vm11915_vm1, %v10427_v57  ;;  %v10568_v0 = vpop.f32.mrf.mxu2  ;;  %v5025_v57 = vshll.u32 %v10570_v12, 16 }
 0x3ef   : >> { %11998 = vst [vmem:[#allocation79_spill] sm:$0xff] %v10568_v0  ;;  %v5273_v0 = vrot.slane %v5271_v56, 1  ;;  %v5657_v4 = vrot.slane %v5655_v19, 3  ;;  %v8719_v19 = vld [vmem:[#allocation2 + $0x24] sm:$0xff]  }
 0x3f0   : >> { %v4820_v35 = vpop.f32.mrf.mxu0  ;;  %v5027_v61 = vrot.slane %v5025_v57, 1  ;;  %v8772_v57 = vld [vmem:[#allocation2 + $0x18] sm:$0xff]  }
 0x3f1   : >> { %v4715_v62 = vpop.f32.mrf.mxu3  ;;  %v5274_v50 = vor.u32 %v5273_v0, %v5269_v15  ;;  %v5672_v15 = vshrl.u32 %v8719_v19, 16 }
 0x3f2   : >> { %v10576_v34 = vadd.f32 %v4820_v35, %v4715_v62  ;;  %v5023_v35 = vor.u32 %v5021_v21, %v5019_v52  ;;  %v8299_v52 = vld [vmem:[#allocation2 + $0x18] sm:$0xff]  }
 0x3f3   : >> { %7553 = vmatmul.msk.bf16.gmra.mxu0 %vm12000_vm6, %v10395_v63  ;;  %v5660_v63 = vrot.slane %v5658_v13, 4  ;;  %v5278_v20 = vsel %vm2075_vm0, %v5274_v50, %v5277_v28  ;;  %v5675_v50 = vshll.u32 %v8719_v19, 16  ;;  %v5674_v21 = vrot.slane %v5672_v15, 3  ;;  %vm12030_vm6 = vmmov %vm11915_vm1 }
 0x3f4   : >> { %12001 = vst [vmem:[#allocation80_spill] sm:$0xff] %v10576_v34  ;;  %v5669_v34 = vor.u32 %v5668_v9, %v5665_v3  ;;  %v5028_v56 = vsel %vm2075_vm0, %v5023_v35, %v5027_v61  ;;  %v10587_v25 = vpop.f32.mrf.mxu1  ;;  %v5282_v9 = vshll.u32 %v8772_v57, 16 }
 0x3f5   : >> { %v5661_v48 = vor.u32 %v5660_v63, %v5657_v4  ;;  %12006 = vst [vmem:[#allocation82_spill] sm:$0xff] %v10587_v25  ;;  %v5677_v63 = vrot.slane %v5675_v50, 4  ;;  %v8721_v50 = vld [vmem:[#allocation2 + $0x2c] sm:$0xff]  }
 0x3f6   : >> { %v10579_v42 = vpop.f32.mrf.mxu2 }
 0x3f7   : >> { %12002 = vst [vmem:[#allocation81_spill] sm:$0xff] %v10579_v42  ;;  %v5670_v16 = vsel %vm1233_vm14, %v5661_v48, %v5669_v34  ;;  %v5279_v48 = vshrl.u32 %v8771_v37, 16 }
 0x3f8   : >> { %v4822_v60 = vpop.f32.mrf.mxu0 }
 0x3f9   : >> { %v4717_v62 = vpop.f32.mrf.mxu3 }
 0x3fa   : >> { %v10581_v45 = vadd.f32 %v4822_v60, %v4717_v62  ;;  %v7872_v60 = vld [vmem:[#allocation2 + $0x40] sm:$0xff] }
 0x3fb   : >> { %7630 = vmatmul.msk.bf16.gmra.mxu1 %vm12004_vm7, %v5028_v56  ;;  %7650 = vmatmul.msk.bf16.vlgmr.msra.gmra.mxu2 %vm12005_vm8, %v5278_v20  ;;  %v5033_v4 = vshll.u32 %v7872_v60, 16  ;;  %v5029_v56 = vshrl.u32 %v10570_v12, 16  ;;  %vm12031_vm7 = vmmov %vm11915_vm1 }
 0x3fc   : >> { %12003 = vst [vmem:[#allocation41_spill] sm:$0xff] %v10581_v45  ;;  %v10596_v35 = vpop.f32.mrf.mxu1  ;;  %vm12033_vm8 = vmmov %vm11915_vm1 }
 0x3fd   : >> { %12011 = vst [vmem:[#allocation84_spill] sm:$0xff] %v10596_v35  ;;  %v5035_v20 = vrot.slane %v5033_v4, 1  ;;  %v5031_v19 = vor.u32 %v5029_v56, %v5027_v61  ;;  %v8773_v56 = vld [vmem:[#allocation2 + $0x20] sm:$0xff]  }
 0x3fe   : >> { %7674 = vmatmul.msk.bf16.vlgmr.msra.gmra.mxu3 %vm12007_vm9, %v5670_v16  ;;  %v10591_v13 = vpop.f32.mrf.mxu2  ;;  %v5284_v16 = vrot.slane %v5282_v9, 1  ;;  %vm12037_vm9 = vmmov %vm11915_vm1 }
 0x3ff   : >> { %12008 = vst [vmem:[#allocation42_spill] sm:$0xff] %v10591_v13  ;;  %v5281_v13 = vor.u32 %v5279_v48, %v5277_v28  ;;  %v7873_v28 = vld [vmem:[#allocation2 + $0x48] sm:$0xff] }
 0x400   : >> { %v4825_v3 = vpop.f32.mrf.mxu0 }
 0x401   : >> { %v4720_v0 = vpop.f32.mrf.mxu3  ;;  %v5285_v15 = vsel %vm2075_vm0, %v5281_v13, %v5284_v16 }
 0x402   : >> { %v10594_v10 = vadd.f32 %v4825_v3, %v4720_v0  ;;  %v5678_v3 = vor.u32 %v5677_v63, %v5674_v21  ;;  %v5681_v21 = vshrl.u32 %v8721_v50, 16  ;;  %v5684_v63 = vshll.u32 %v8721_v50, 16 }
 0x403   : >> { %7698 = vmatmul.msk.bf16.vlgmr.msra.gmra.mxu0 %vm12009_vm10, %v8299_v52  ;;  %vm12038_vm10 = vmmov %vm11915_vm1 }
 0x404   : >> { %12010 = vst [vmem:[#allocation83_spill] sm:$0xff] %v10594_v10  ;;  %v5036_v10 = vsel %vm2075_vm0, %v5031_v19, %v5035_v20  ;;  %v5679_v12 = vsel %vm1233_vm14, %v5669_v34, %v5678_v3  ;;  %v10611_v4 = vpop.f32.mrf.mxu1  ;;  %v5289_v34 = vshll.u32 %v8773_v56, 16  ;;  %v5683_v48 = vrot.slane %v5681_v21, 3 }
 0x405   : >> { %v5686_v19 = vrot.slane %v5684_v63, 4  ;;  %v8301_v63 = vld [vmem:[#allocation2 + $0x28] sm:$0xff]  }
 0x406   : >> { %v10598_v62 = vpop.f32.mrf.mxu2 }
 0x407   : >> { %12012 = vst [vmem:[#allocation43_spill] sm:$0xff] %v10598_v62 }
 0x408   : >> { %v4827_v25 = vpop.f32.mrf.mxu0 }
 0x409   : >> { %v4722_v52 = vpop.f32.mrf.mxu3 }
 0x40a   : >> { %v10601_v0 = vadd.f32 %v4827_v25, %v4722_v52  ;;  %v8300_v25 = vld [vmem:[#allocation2 + $0x20] sm:$0xff]   ;;  %v5286_v52 = vshrl.u32 %v8772_v57, 16 }
 0x40b   : >> { %7631 = vmatmul.msk.bf16.gmra.mxu1 %vm12014_vm11, %v5036_v10  ;;  %7651 = vmatmul.msk.bf16.gmra.mxu2 %vm12015_vm12, %v5285_v15  ;;  %v5041_v10 = vshll.u32 %v7873_v28, 16  ;;  %vm12039_vm11 = vmmov %vm11915_vm1 }
 0x40c   : >> { %12013 = vst [vmem:[#allocation85_spill] sm:$0xff] %v10601_v0  ;;  %v5288_v50 = vor.u32 %v5286_v52, %v5284_v16  ;;  %v7874_v16 = vld [vmem:[#allocation2 + $0x50] sm:$0xff]  ;;  %vm12041_vm12 = vmmov %vm11915_vm1 }
 0x40d   : >> { %v5043_v35 = vrot.slane %v5041_v10, 1  ;;  %v5049_v52 = vshll.u32 %v7874_v16, 16 }
 0x40e   : >> { %7675 = vmatmul.msk.bf16.gmra.mxu3 %vm12016_vm13, %v5679_v12  ;;  %v10609_v37 = vpop.f32.mrf.mxu2  ;;  %v5037_v12 = vshrl.u32 %v7872_v60, 16  ;;  %v7904_v60 = vld [vmem:[%s11398_s4 + $0x80] sm:$0xff]  ;;  %vm12045_vm13 = vmmov %vm11915_vm1 }
 0x40f   : >> { %12017 = vst [vmem:[#allocation45_spill] sm:$0xff] %v10609_v37  ;;  %v5291_v37 = vrot.slane %v5289_v34, 1  ;;  %6507 = vmatpush.bf16.msra.mxu1 %v7904_v60 }
 0x410   : >> { %v4830_v61 = vpop.f32.mrf.mxu0  ;;  %v5039_v45 = vor.u32 %v5037_v12, %v5035_v20  ;;  %v8723_v20 = vld [vmem:[#allocation2 + $0x34] sm:$0xff]  }
 0x411   : >> { %v4725_v9 = vpop.f32.mrf.mxu3  ;;  %v5292_v21 = vsel %vm2075_vm0, %v5288_v50, %v5291_v37  ;;  %v5690_v34 = vshrl.u32 %v8723_v20, 16 }
 0x412   : >> { %v10614_v13 = vadd.f32 %v4830_v61, %v4725_v9  ;;  %v5044_v9 = vsel %vm2075_vm0, %v5039_v45, %v5043_v35 }
 0x413   : >> { %7699 = vmatmul.msk.bf16.gmra.mxu0 %vm12018_vm15, %v8300_v25  ;;  %v5687_v25 = vor.u32 %v5686_v19, %v5683_v48  ;;  %v5693_v48 = vshll.u32 %v8723_v20, 16  ;;  %v5692_v50 = vrot.slane %v5690_v34, 3  ;;  %vm12046_vm15 = vmmov %vm11915_vm1 }
 0x414   : >> { %12019 = vst [vmem:[#allocation86_spill] sm:$0xff] %v10614_v13 }
 0x415   : >> { %v5688_v57 = vsel %vm1233_vm14, %v5678_v3, %v5687_v25  ;;  %v8774_v3 = vld [vmem:[#allocation2 + $0x28] sm:$0xff]  }
 0x416   : >> { %v10616_v15 = vpop.f32.mrf.mxu2  ;;  %v5296_v12 = vshll.u32 %v8774_v3, 16 }
 0x417   : >> { %12020 = vst [vmem:[#allocation87_spill] sm:$0xff] %v10616_v15 }
 0x418   : >> { %v4832_v0 = vpop.f32.mrf.mxu0  ;;  %v10618_v62 = vpop.f32.mrf.mxu1 }
 0x419   : >> { %v4727_v42 = vpop.f32.mrf.mxu3 }
 0x41a   : >> { %v10620_v61 = vadd.f32 %v4832_v0, %v4727_v42 }
 0x41b   : >> { %7632 = vmatmul.msk.bf16.gmra.mxu1 %vm12022_vm2, %v5044_v9  ;;  %7652 = vmatmul.msk.bf16.gmra.mxu2 %vm12023_vm3, %v5292_v21  ;;  %v5695_v9 = vrot.slane %v5693_v48, 4  ;;  %v5293_v21 = vshrl.u32 %v8773_v56, 16  ;;  %v8725_v56 = vld [vmem:[#allocation2 + $0x3c] sm:$0xff]   ;;  %vm12047_vm2 = vmmov %vm11915_vm1 }
 0x41c   : >> { %12021 = vst [vmem:[#allocation47_spill] sm:$0xff] %v10620_v61  ;;  %v5298_v61 = vrot.slane %v5296_v12, 1  ;;  %v5702_v12 = vshll.u32 %v8725_v56, 16  ;;  %vm12049_vm3 = vmmov %vm11915_vm1 }
 0x41d   : >> { %v5295_v20 = vor.u32 %v5293_v21, %v5291_v37 }
 0x41e   : >> { %7676 = vmatmul.msk.bf16.gmra.mxu3 %vm12024_vm4, %v5688_v57  ;;  %v10631_v42 = vpop.f32.mrf.mxu2  ;;  %v5045_v57 = vshrl.u32 %v7873_v28, 16  ;;  %vm12052_vm4 = vmmov %vm11915_vm1 }
 0x41f   : >> { %12025 = vst [vmem:[#allocation88_spill] sm:$0xff] %v10631_v42  ;;  %v5051_v42 = vrot.slane %v5049_v52, 1  ;;  %v5299_v34 = vsel %vm2075_vm0, %v5295_v20, %v5298_v61  ;;  %v5300_v20 = vshrl.u32 %v8774_v3, 16  ;;  %v8727_v3 = vld [vmem:[#allocation2 + $0x44] sm:$0xff]  }
 0x420   : >> { %v4835_v45 = vpop.f32.mrf.mxu0  ;;  %v10633_v0 = vpop.f32.mrf.mxu1  ;;  %v5047_v32 = vor.u32 %v5045_v57, %v5043_v35  ;;  %v7875_v35 = vld [vmem:[#allocation2 + $0x58] sm:$0xff]  ;;  %v5704_v57 = vrot.slane %v5702_v12, 4 }
 0x421   : >> { %v4730_v10 = vpop.f32.mrf.mxu3 }
 0x422   : >> { %v10636_v19 = vadd.f32 %v4835_v45, %v4730_v10  ;;  %v5052_v10 = vsel %vm2075_vm0, %v5047_v32, %v5051_v42  ;;  %v5699_v32 = vshrl.u32 %v8725_v56, 16  ;;  %v5302_v56 = vor.u32 %v5300_v20, %v5298_v61  ;;  %v7876_v61 = vld [vmem:[#allocation2 + $0x60] sm:$0xff] }
 0x423   : >> { %7700 = vmatmul.msk.bf16.gmra.mxu0 %vm12026_vm5, %v8301_v63  ;;  %v5696_v63 = vor.u32 %v5695_v9, %v5692_v50  ;;  %v5057_v9 = vshll.u32 %v7875_v35, 16  ;;  %vm12053_vm5 = vmmov %vm11915_vm1 }
 0x424   : >> { %12027 = vst [vmem:[#allocation49_spill] sm:$0xff] %v10636_v19  ;;  %v5701_v21 = vrot.slane %v5699_v32, 3 }
 0x425   : >> { %v5697_v28 = vsel %vm1233_vm14, %v5687_v25, %v5696_v63  ;;  %v5303_v25 = vshll.u32 %v10261_v58, 16 }
 0x426   : >> { %v10638_v60 = vpop.f32.mrf.mxu2 }
 0x427   : >> { %12028 = vst [vmem:[#allocation89_spill] sm:$0xff] %v10638_v60 }
 0x428   : >> { %v4837_v15 = vpop.f32.mrf.mxu0  ;;  %v10640_v13 = vpop.f32.mrf.mxu1 }
 0x429   : >> { %v4732_v29 = vpop.f32.mrf.mxu3 }
 0x42a   : >> { %v10642_v45 = vadd.f32 %v4837_v15, %v4732_v29  ;;  %v8302_v29 = vld [vmem:[#allocation2 + $0x30] sm:$0xff]  }
 0x42b   : >> { %7633 = vmatmul.msk.bf16.gmra.mxu1 %vm11915_vm1, %v5052_v10  ;;  %7653 = vmatmul.msk.bf16.gmra.mxu2 %vm12030_vm6, %v5299_v34  ;;  %v5053_v34 = vshrl.u32 %v7874_v16, 16  ;;  %vm12055_vm6 = vmmov %vm11915_vm1 }
 0x42c   : >> { %12029 = vst [vmem:[#allocation90_spill] sm:$0xff] %v10642_v45 }
 0x42d   : >> { %v5055_v19 = vor.u32 %v5053_v34, %v5051_v42  ;;  %v8775_v34 = vld [vmem:[#allocation2 + $0x30] sm:$0xff]  }
 0x42e   : >> { %7677 = vmatmul.msk.bf16.gmra.mxu3 %vm12031_vm7, %v5697_v28  ;;  %v10650_v48 = vpop.f32.mrf.mxu2  ;;  %v5059_v28 = vrot.slane %v5057_v9, 1  ;;  %v5711_v9 = vshll.u32 %v8727_v3, 16  ;;  %vm12058_vm7 = vmmov %vm11915_vm1 }
 0x42f   : >> { %12032 = vst [vmem:[#allocation51_spill] sm:$0xff] %v10650_v48  ;;  %v5305_v48 = vrot.slane %v5303_v25, 1 }
 0x430   : >> { %v4840_v37 = vpop.f32.mrf.mxu0  ;;  %v10652_v52 = vpop.f32.mrf.mxu1  ;;  %v5713_v20 = vrot.slane %v5711_v9, 4  ;;  %v8729_v9 = vld [vmem:[#allocation2 + $0x4c] sm:$0xff]  }
 0x431   : >> { %v4735_v15 = vpop.f32.mrf.mxu3  ;;  %v5306_v58 = vsel %vm2075_vm0, %v5302_v56, %v5305_v48  ;;  %v5307_v56 = vshrl.u32 %v8775_v34, 16  ;;  %v5720_v34 = vshll.u32 %v8729_v9, 16 }
 0x432   : >> { %v10655_v50 = vadd.f32 %v4840_v37, %v4735_v15  ;;  %v5060_v15 = vsel %vm2075_vm0, %v5055_v19, %v5059_v28  ;;  %v5708_v19 = vshrl.u32 %v8727_v3, 16 }
 0x433   : >> { %7701 = vmatmul.msk.bf16.gmra.mxu0 %vm12033_vm8, %v8302_v29  ;;  %v5705_v29 = vor.u32 %v5704_v57, %v5701_v21  ;;  %v5065_v21 = vshll.u32 %v7876_v61, 16  ;;  %vm12059_vm8 = vmmov %vm11915_vm1 }
 0x434   : >> { %12034 = vst [vmem:[#allocation91_spill] sm:$0xff] %v10655_v50  ;;  %v5710_v57 = vrot.slane %v5708_v19, 3  ;;  %v5309_v50 = vor.u32 %v5307_v56, %v5305_v48  ;;  %v7877_v48 = vld [vmem:[#allocation2 + $0x68] sm:$0xff] }
 0x435   : >> { %v5706_v16 = vsel %vm1233_vm14, %v5696_v63, %v5705_v29  ;;  %v5310_v63 = vshll.u32 %v10291_v47, 16  ;;  %v5073_v56 = vshll.u32 %v7877_v48, 16 }
 0x436   : >> { %v10658_v10 = vpop.f32.mrf.mxu2 }
 0x437   : >> { %12035 = vst [vmem:[#allocation53_spill] sm:$0xff] %v10658_v10 }
 0x438   : >> { %v4842_v45 = vpop.f32.mrf.mxu0  ;;  %v10660_v60 = vpop.f32.mrf.mxu1 }
 0x439   : >> { %v4737_v54 = vpop.f32.mrf.mxu3 }
 0x43a   : >> { %v10662_v37 = vadd.f32 %v4842_v45, %v4737_v54  ;;  %v8303_v54 = vld [vmem:[#allocation2 + $0x38] sm:$0xff]  }
 0x43b   : >> { %7634 = vmatmul.msk.bf16.gmra.mxu1 %vm12037_vm9, %v5060_v15  ;;  %7654 = vmatmul.msk.bf16.gmra.mxu2 %vm12038_vm10, %v5306_v58  ;;  %v5061_v58 = vshrl.u32 %v7875_v35, 16  ;;  %vm12060_vm9 = vmmov %vm11915_vm1 }
 0x43c   : >> { %12036 = vst [vmem:[#allocation93_spill] sm:$0xff] %v10662_v37  ;;  %vm12062_vm10 = vmmov %vm11915_vm1 }
 0x43d   : >> { %v5063_v3 = vor.u32 %v5061_v58, %v5059_v28 }
 0x43e   : >> { %7678 = vmatmul.msk.bf16.gmra.mxu3 %vm12039_vm11, %v5706_v16  ;;  %v10670_v32 = vpop.f32.mrf.mxu2  ;;  %v5067_v16 = vrot.slane %v5065_v21, 1  ;;  %vm12064_vm11 = vmmov %vm11915_vm1 }
 0x43f   : >> { %12040 = vst [vmem:[#allocation92_spill] sm:$0xff] %v10670_v32  ;;  %v5312_v32 = vrot.slane %v5310_v63, 1 }
 0x440   : >> { %v4845_v42 = vpop.f32.mrf.mxu0  ;;  %v10672_v12 = vpop.f32.mrf.mxu1  ;;  %v5068_v47 = vsel %vm2075_vm0, %v5063_v3, %v5067_v16  ;;  %v5722_v3 = vrot.slane %v5720_v34, 4 }
 0x441   : >> { %v4740_v45 = vpop.f32.mrf.mxu3  ;;  %v5313_v19 = vsel %vm2075_vm0, %v5309_v50, %v5312_v32 }
 0x442   : >> { %v10675_v25 = vadd.f32 %v4845_v42, %v4740_v45  ;;  %v5714_v42 = vor.u32 %v5713_v20, %v5710_v57  ;;  %v5717_v20 = vshrl.u32 %v8729_v9, 16 }
 0x443   : >> { %7702 = vmatmul.msk.bf16.gmra.mxu0 %vm12041_vm12, %v8303_v54  ;;  %vm12065_vm12 = vmmov %vm11915_vm1 }
 0x444   : >> { %12042 = vst [vmem:[#allocation94_spill] sm:$0xff] %v10675_v25  ;;  %v5715_v35 = vsel %vm1233_vm14, %v5705_v29, %v5714_v42  ;;  %v5317_v29 = vshll.u32 %v10322_v8, 16  ;;  %v5719_v58 = vrot.slane %v5717_v20, 3 }
 0x446   : >> { %v10678_v15 = vpop.f32.mrf.mxu2 }
 0x447   : >> { %12043 = vst [vmem:[#allocation55_spill] sm:$0xff] %v10678_v15 }
 0x448   : >> { %v4847_v37 = vpop.f32.mrf.mxu0  ;;  %v10680_v10 = vpop.f32.mrf.mxu1 }
 0x449   : >> { %v4742_v54 = vpop.f32.mrf.mxu3 }
 0x44a   : >> { %v10682_v45 = vadd.f32 %v4847_v37, %v4742_v54  ;;  %v8304_v37 = vld [vmem:[#allocation2 + $0x40] sm:$0xff]   ;;  %v8776_v54 = vld [vmem:[#allocation2 + $0x38] sm:$0xff]  }
 0x44b   : >> { %7635 = vmatmul.msk.bf16.gmra.mxu1 %vm12045_vm13, %v5068_v47  ;;  %7655 = vmatmul.msk.bf16.gmra.mxu2 %vm12046_vm15, %v5313_v19  ;;  %v5314_v47 = vshrl.u32 %v8776_v54, 16  ;;  %vm12066_vm13 = vmmov %vm11915_vm1 }
 0x44c   : >> { %12044 = vst [vmem:[#allocation95_spill] sm:$0xff] %v10682_v45  ;;  %v5319_v45 = vrot.slane %v5317_v29, 1  ;;  %v8305_v29 = vld [vmem:[#allocation2 + $0x48] sm:$0xff]   ;;  %vm12067_vm15 = vmmov %vm11915_vm1 }
 0x44e   : >> { %7679 = vmatmul.msk.bf16.gmra.mxu3 %vm12047_vm2, %v5715_v35  ;;  %v10690_v21 = vpop.f32.mrf.mxu2  ;;  %v5069_v35 = vshrl.u32 %v7876_v61, 16  ;;  %vm12069_vm2 = vmmov %vm11915_vm1 }
 0x44f   : >> { %12048 = vst [vmem:[#allocation57_spill] sm:$0xff] %v10690_v21  ;;  %v5075_v21 = vrot.slane %v5073_v56, 1 }
 0x450   : >> { %v4850_v28 = vpop.f32.mrf.mxu0  ;;  %v10692_v63 = vpop.f32.mrf.mxu1 }
 0x451   : >> { %v4745_v57 = vpop.f32.mrf.mxu3 }
 0x452   : >> { %v10695_v50 = vadd.f32 %v4850_v28, %v4745_v57  ;;  %v5316_v28 = vor.u32 %v5314_v47, %v5312_v32 }
 0x453   : >> { %7703 = vmatmul.msk.bf16.gmra.mxu0 %vm12049_vm3, %v8304_v37  ;;  %v5071_v37 = vor.u32 %v5069_v35, %v5067_v16  ;;  %v7878_v16 = vld [vmem:[#allocation2 + $0x70] sm:$0xff]  ;;  %vm12070_vm3 = vmmov %vm11915_vm1 }
 0x454   : >> { %12050 = vst [vmem:[#allocation59_spill] sm:$0xff] %v10695_v50  ;;  %v5723_v50 = vor.u32 %v5722_v3, %v5719_v58  ;;  %v5320_v20 = vsel %vm2075_vm0, %v5316_v28, %v5319_v45  ;;  %v8777_v28 = vld [vmem:[#allocation2 + $0x40] sm:$0xff]  }
 0x455   : >> { %v5076_v8 = vsel %vm2075_vm0, %v5071_v37, %v5075_v21 }
 0x456   : >> { %v4578_v19 = vpop.f32.mrf.mxu2  ;;  %v5724_v61 = vsel %vm1233_vm14, %v5714_v42, %v5723_v50  ;;  %v5081_v42 = vshll.u32 %v7878_v16, 16 }
 0x457   : >> { %v10699_v25 = vadd.f32 %v4578_v19, %v10611_v4  ;;  %v8731_v4 = vld [vmem:[#allocation2 + $0x54] sm:$0xff]   ;;  %v5324_v19 = vshll.u32 %v10353_v18, 16 }
 0x458   : >> { %v4852_v15 = vpop.f32.mrf.mxu0  ;;  %v10701_v9 = vpop.f32.mrf.mxu1  ;;  %v5726_v3 = vshrl.u32 %v8731_v4, 16  ;;  %v5729_v54 = vshll.u32 %v8731_v4, 16 }
 0x459   : >> { %12051 = vst [vmem:[#allocation96_spill] sm:$0xff] %v10699_v25  ;;  %v4747_v57 = vpop.f32.mrf.mxu3 }
 0x45a   : >> { %v10703_v17 = vadd.f32 %v4852_v15, %v4747_v57  ;;  %v5728_v35 = vrot.slane %v5726_v3, 3  ;;  %v5731_v37 = vrot.slane %v5729_v54, 4  ;;  %v5321_v57 = vshrl.u32 %v8777_v28, 16 }
 0x45b   : >> { %7636 = vmatmul.msk.bf16.gmra.mxu1 %vm12052_vm4, %v5076_v8  ;;  %7656 = vmatmul.msk.bf16.gmra.mxu2 %vm12053_vm5, %v5320_v20  ;;  %v5083_v20 = vrot.slane %v5081_v42, 1  ;;  %vm12071_vm4 = vmmov %vm11915_vm1 }
 0x45c   : >> { %vm12072_vm5 = vmmov %vm11915_vm1 }
 0x45e   : >> { %7680 = vmatmul.msk.bf16.gmra.mxu3 %vm11915_vm1, %v5724_v61  ;;  %v4581_v34 = vpop.f32.mrf.mxu2  ;;  %v5326_v61 = vrot.slane %v5324_v19, 1 }
 0x45f   : >> { %v10712_v56 = vadd.f32 %v4581_v34, %v10618_v62  ;;  %v5077_v62 = vshrl.u32 %v7877_v48, 16 }
 0x460   : >> { %v4855_v32 = vpop.f32.mrf.mxu0  ;;  %v10714_v15 = vpop.f32.mrf.mxu1 }
 0x461   : >> { %12054 = vst [vmem:[#allocation97_spill] sm:$0xff] %v10712_v56  ;;  %v4750_v58 = vpop.f32.mrf.mxu3 }
 0x462   : >> { %v10717_v47 = vadd.f32 %v4855_v32, %v4750_v58  ;;  %v5323_v32 = vor.u32 %v5321_v57, %v5319_v45 }
 0x463   : >> { %7704 = vmatmul.msk.bf16.gmra.mxu0 %vm12055_vm6, %v8305_v29  ;;  %v5079_v29 = vor.u32 %v5077_v62, %v5075_v21  ;;  %v10733_v21 = vld [vmem:[#allocation2 + $0x78] sm:$0xff]  ;;  %v5331_v62 = vshll.u32 %v10384_v33, 16  ;;  %vm12073_vm6 = vmmov %vm11915_vm1 }
 0x464   : >> { %12056 = vst [vmem:[#allocation98_spill] sm:$0xff] %v10717_v47  ;;  %v5732_v47 = vor.u32 %v5731_v37, %v5728_v35  ;;  %v5327_v3 = vsel %vm2075_vm0, %v5323_v32, %v5326_v61  ;;  %v8306_v35 = vld [vmem:[#allocation2 + $0x50] sm:$0xff]   ;;  %v8778_v32 = vld [vmem:[#allocation2 + $0x48] sm:$0xff]  }
 0x465   : >> { %v5084_v18 = vsel %vm2075_vm0, %v5079_v29, %v5083_v20 }
 0x466   : >> { %v4583_v8 = vpop.f32.mrf.mxu2  ;;  %v5733_v48 = vsel %vm1233_vm14, %v5723_v50, %v5732_v47  ;;  %v5089_v50 = vshll.u32 %v10733_v21, 16 }
 0x467   : >> { %v10721_v56 = vadd.f32 %v4583_v8, %v10633_v0  ;;  %v8733_v0 = vld [vmem:[#allocation2 + $0x5c] sm:$0xff]  }
 0x468   : >> { %v4857_v34 = vpop.f32.mrf.mxu0  ;;  %v10723_v4 = vpop.f32.mrf.mxu1  ;;  %v5735_v28 = vshrl.u32 %v8733_v0, 16  ;;  %v5738_v57 = vshll.u32 %v8733_v0, 16 }
 0x469   : >> { %12057 = vst [vmem:[#allocation99_spill] sm:$0xff] %v10721_v56  ;;  %v4752_v58 = vpop.f32.mrf.mxu3 }
 0x46a   : >> { %v10725_v25 = vadd.f32 %v4857_v34, %v4752_v58  ;;  %v5737_v34 = vrot.slane %v5735_v28, 3  ;;  %v5740_v29 = vrot.slane %v5738_v57, 4  ;;  %v5328_v58 = vshrl.u32 %v8778_v32, 16 }
 0x46b   : >> { %7637 = vmatmul.msk.bf16.gmra.mxu1 %vm12058_vm7, %v5084_v18  ;;  %7657 = vmatmul.msk.bf16.gmra.mxu2 %vm12059_vm8, %v5327_v3  ;;  %v5085_v18 = vshrl.u32 %v7878_v16, 16  ;;  %v5091_v3 = vrot.slane %v5089_v50, 1  ;;  %vm12074_vm7 = vmmov %vm11915_vm1 }
 0x46c   : >> { %vm12075_vm8 = vmmov %vm11915_vm1 }
 0x46e   : >> { %7681 = vmatmul.msk.bf16.gmra.mxu3 %vm12060_vm9, %v5733_v48  ;;  %v4586_v54 = vpop.f32.mrf.mxu2  ;;  %v5333_v48 = vrot.slane %v5331_v62, 1  ;;  %vm12076_vm9 = vmmov %vm11915_vm1 }
 0x46f   : >> { %v10736_v42 = vadd.f32 %v4586_v54, %v10640_v13 }
 0x470   : >> { %v4860_v45 = vpop.f32.mrf.mxu0  ;;  %v10738_v19 = vpop.f32.mrf.mxu1 }
 0x471   : >> { %12061 = vst [vmem:[#allocation100_spill] sm:$0xff] %v10736_v42  ;;  %v4755_v37 = vpop.f32.mrf.mxu3 }
 0x472   : >> { %v10741_v8 = vadd.f32 %v4860_v45, %v4755_v37  ;;  %v5087_v45 = vor.u32 %v5085_v18, %v5083_v20  ;;  %v10758_v20 = vld [vmem:[#allocation2 + $0x80] sm:$0xff] }
 0x473   : >> { %7705 = vmatmul.msk.bf16.gmra.mxu0 %vm12062_vm10, %v8306_v35  ;;  %v5330_v35 = vor.u32 %v5328_v58, %v5326_v61  ;;  %v8307_v58 = vld [vmem:[#allocation2 + $0x58] sm:$0xff]   ;;  %vm12077_vm10 = vmmov %vm11915_vm1 }
 0x474   : >> { %12063 = vst [vmem:[#allocation101_spill] sm:$0xff] %v10741_v8  ;;  %v5741_v8 = vor.u32 %v5740_v29, %v5737_v34  ;;  %v5092_v28 = vsel %vm2075_vm0, %v5087_v45, %v5091_v3  ;;  %v4512_v34 = vadd.f32 %v10390_v11, %v10234_v49  ;;  %v5097_v45 = vshll.u32 %v10758_v20, 16 }
 0x475   : >> { %v5334_v57 = vsel %vm2075_vm0, %v5330_v35, %v5333_v48  ;;  %v5338_v35 = vshll.u32 %v10419_v40, 16  ;;  %v4514_v40 = vadd.f32 %v10409_v43, %v10250_v7  ;;  %v8737_v43 = vld [vmem:[#allocation2 + $0x6c] sm:$0xff]  }
 0x476   : >> { %v4588_v13 = vpop.f32.mrf.mxu2  ;;  %v5742_v16 = vsel %vm1233_vm14, %v5732_v47, %v5741_v8 }
 0x477   : >> { %v10746_v42 = vadd.f32 %v4588_v13, %v10652_v52  ;;  %v8735_v52 = vld [vmem:[#allocation2 + $0x64] sm:$0xff]  }
 0x478   : >> { %v4862_v54 = vpop.f32.mrf.mxu0  ;;  %v10748_v0 = vpop.f32.mrf.mxu1  ;;  %v5744_v47 = vshrl.u32 %v8735_v52, 16  ;;  %v5747_v18 = vshll.u32 %v8735_v52, 16  ;;  %v5340_v52 = vrot.slane %v5338_v35, 1 }
 0x479   : >> { %v4757_v37 = vpop.f32.mrf.mxu3 }
 0x47a   : >> { %v10750_v56 = vadd.f32 %v4862_v54, %v4757_v37  ;;  %v5746_v49 = vrot.slane %v5744_v47, 3  ;;  %v5749_v11 = vrot.slane %v5747_v18, 4 }
 0x47b   : >> { %7638 = vmatmul.msk.bf16.gmra.mxu1 %vm12064_vm11, %v5092_v28  ;;  %7658 = vmatmul.msk.bf16.gmra.mxu2 %vm12065_vm12, %v5334_v57  ;;  %v5335_v28 = vshrl.u32 %v10384_v33, 16  ;;  %vm12078_vm11 = vmmov %vm11915_vm1 }
 0x47c   : >> { %v5750_v18 = vor.u32 %v5749_v11, %v5746_v49  ;;  %v8308_v49 = vld [vmem:[#allocation2 + $0x60] sm:$0xff]   ;;  %vm12079_vm12 = vmmov %vm11915_vm1 }
 0x47d   : >> { %v5337_v47 = vor.u32 %v5335_v28, %v5333_v48 }
 0x47e   : >> { %7682 = vmatmul.msk.bf16.gmra.mxu3 %vm12066_vm13, %v5742_v16  ;;  %v5454_v50 = vpop.f32.mrf.mxu2  ;;  %v5093_v16 = vshrl.u32 %v10733_v21, 16  ;;  %v5751_v7 = vsel %vm1233_vm14, %v5741_v8, %v5750_v18  ;;  %v5753_v8 = vshrl.u32 %v8737_v43, 16  ;;  %vm12083_vm13 = vmmov %vm11915_vm1 }
 0x47f   : >> { %v10761_v62 = vadd.f32 %v5454_v50, %v10660_v60  ;;  %v12068_v60 = vld [vmem:[#allocation4_spill] sm:$0xff]  ;;  %v5099_v50 = vrot.slane %v5097_v45, 1  ;;  %v5341_v45 = vsel %vm2075_vm0, %v5337_v47, %v5340_v52 }
 0x480   : >> { %v6076_v61 = vpop.f32.mrf.mxu0  ;;  %v10766_v32 = vpop.f32.mrf.mxu1  ;;  %v5095_v33 = vor.u32 %v5093_v16, %v5091_v3  ;;  %v10792_v3 = vld [vmem:[#allocation2 + $0x88] sm:$0xff] }
 0x481   : >> { %v6156_v29 = vadd.f32 %v6076_v61, %v10405_v27  ;;  %v5875_v13 = vpop.f32.mrf.mxu3 }
 0x482   : >> { %v5955_v54 = vadd.f32 %v5875_v13, %v4512_v34  ;;  %v5100_v21 = vsel %vm2075_vm0, %v5095_v33, %v5099_v50 }
 0x483   : >> { %7706 = vmatmul.msk.bf16.gmra.mxu0 %vm12067_vm15, %v8307_v58  ;;  %vm12084_vm15 = vmmov %vm11915_vm1 }
 0x484   : >> { %v6621_v37 = vmul.f32 %v12068_v60, %v5955_v54  ;;  %v4517_v60 = vadd.f32 %v10425_v38, %v10263_v6  ;;  %v5755_v6 = vrot.slane %v5753_v8, 3 }
 0x486   : >> { %v10773_v27 = vadd.f32 %v6621_v37, %v6156_v29  ;;  %v5456_v57 = vpop.f32.mrf.mxu2 }
 0x487   : >> { %v10777_v34 = vadd.f32 %v5456_v57, %v10672_v12  ;;  %v5756_v57 = vshll.u32 %v8737_v43, 16  ;;  %v4897_v43 = vld [vmem:[#allocation2 + $0x90] sm:$0x1] }
 0x488   : >> { %v6078_v61 = vpop.f32.mrf.mxu0  ;;  %v10782_v13 = vpop.f32.mrf.mxu1 }
 0x489   : >> { %v6157_v58 = vadd.f32 %v6078_v61, %v10412_v39  ;;  %v5877_v29 = vpop.f32.mrf.mxu3  ;;  %v5105_v61 = vshll.u32 %v10792_v3, 16  ;;  %v5758_v38 = vrot.slane %v5756_v57, 4 }
 0x48a   : >> { %v5956_v54 = vadd.f32 %v5877_v29, %v4514_v40  ;;  %v5345_v40 = vshll.u32 %v10457_v26, 16  ;;  %v5101_v29 = vshrl.u32 %v10758_v20, 16  ;;  %v4519_v26 = vadd.f32 %v10439_v14, %v10280_v46  ;;  %v8739_v14 = vld [vmem:[#allocation2 + $0x74] sm:$0xff]  }
 0x48b   : >> { %7639 = vmatmul.msk.bf16.gmra.mxu1 %vm12069_vm2, %v5100_v21  ;;  %7659 = vmatmul.msk.bf16.gmra.mxu2 %vm12070_vm3, %v5341_v45  ;;  %vm12085_vm2 = vmmov %vm11915_vm1 }
 0x48c   : >> { %v10788_v12 = vadd.f32 %v6157_v58, %v5956_v54  ;;  %v8779_v58 = vld [vmem:[#allocation2 + $0x58] sm:$0xff]   ;;  %v5107_v54 = vrot.slane %v5105_v61, 1  ;;  %v5347_v21 = vrot.slane %v5345_v40, 1  ;;  %v4522_v40 = vadd.f32 %v10463_v2, %v10293_v44  ;;  %vm12089_vm3 = vmmov %vm11915_vm1 }
 0x48d   : >> { %v5342_v33 = vshrl.u32 %v8779_v58, 16 }
 0x48e   : >> { %7683 = vmatmul.msk.bf16.gmra.mxu3 %vm12071_vm4, %v5751_v7  ;;  %v5459_v39 = vpop.f32.mrf.mxu2  ;;  %vm12096_vm4 = vmmov %vm11915_vm1 }
 0x48f   : >> { %v10795_v35 = vadd.f32 %v5459_v39, %v10680_v10 }
 0x490   : >> { %v6081_v48 = vpop.f32.mrf.mxu0  ;;  %v10800_v28 = vpop.f32.mrf.mxu1 }
 0x491   : >> { %v6158_v37 = vadd.f32 %v6081_v48, %v10432_v36  ;;  %v5880_v11 = vpop.f32.mrf.mxu3 }
 0x492   : >> { %v5957_v16 = vadd.f32 %v5880_v11, %v4517_v60  ;;  %v5103_v60 = vor.u32 %v5101_v29, %v5099_v50  ;;  %v5759_v11 = vor.u32 %v5758_v38, %v5755_v6  ;;  %v5762_v38 = vshrl.u32 %v8739_v14, 16 }
 0x493   : >> { %7707 = vmatmul.msk.bf16.gmra.mxu0 %vm12072_vm5, %v8308_v49  ;;  %vm12097_vm5 = vmmov %vm11915_vm1 }
 0x494   : >> { %v6623_v10 = vmul.f32 %v11560_v22, %v5957_v16  ;;  %v5108_v20 = vsel %vm2075_vm0, %v5103_v60, %v5107_v54  ;;  %v4967_v16 = vunpack.c.l.b16 %v4897_v43  ;;  %v5760_v46 = vsel %vm1233_vm14, %v5750_v18, %v5759_v11 }
 0x495   : >> { %v5765_v18 = vshll.u32 %v8739_v14, 16  ;;  %v5109_v43 = vshrl.u32 %v10792_v3, 16  ;;  %v5764_v2 = vrot.slane %v5762_v38, 3 }
 0x496   : >> { %v10806_v36 = vadd.f32 %v6623_v10, %v6158_v37  ;;  %v5461_v47 = vpop.f32.mrf.mxu2  ;;  %v5344_v37 = vor.u32 %v5342_v33, %v5340_v52  ;;  %v4984_v50 = vpack.c.b16 %v4967_v16, %v4967_v16  ;;  %v8309_v33 = vld [vmem:[#allocation2 + $0x68] sm:$0xff]  }
 0x497   : >> { %v10810_v7 = vadd.f32 %v5461_v47, %v10692_v63 }
 0x498   : >> { %v6083_v45 = vpop.f32.mrf.mxu0  ;;  %v10815_v48 = vpop.f32.mrf.mxu1  ;;  %v5348_v57 = vsel %vm2075_vm0, %v5344_v37, %v5347_v21  ;;  %v5113_v29 = vshll.u32 %v4984_v50, 16  ;;  %v5111_v37 = vor.u32 %v5109_v43, %v5107_v54 }
 0x499   : >> { %v6159_v39 = vadd.f32 %v6083_v45, %v10445_v30  ;;  %v5882_v49 = vpop.f32.mrf.mxu3  ;;  %v5352_v45 = vshll.u32 %v10479_v55, 16  ;;  %v4524_v55 = vadd.f32 %v10471_v5, %v10311_v59 }
 0x49a   : >> { %v5958_v8 = vadd.f32 %v5882_v49, %v4519_v26  ;;  %v8780_v26 = vld [vmem:[#allocation2 + $0x60] sm:$0xff]   ;;  %v5115_v49 = vrot.slane %v5113_v29, 1  ;;  %v8310_v29 = vld [vmem:[#allocation2 + $0x70] sm:$0xff]  }
 0x49b   : >> { %7640 = vmatmul.msk.bf16.gmra.mxu1 %vm11915_vm1, %v5108_v20  ;;  %7660 = vmatmul.msk.bf16.gmra.mxu2 %vm12073_vm6, %v5348_v57  ;;  %v5349_v44 = vshrl.u32 %v8780_v26, 16  ;;  %vm12101_vm6 = vmmov %vm11915_vm1 }
 0x49c   : >> { %v10821_v63 = vadd.f32 %v6159_v39, %v5958_v8  ;;  %v5354_v8 = vrot.slane %v5352_v45, 1 }
 0x49e   : >> { %7684 = vmatmul.msk.bf16.gmra.mxu3 %vm12074_vm7, %v5760_v46  ;;  %v5464_v30 = vpop.f32.mrf.mxu2  ;;  %v5351_v46 = vor.u32 %v5349_v44, %v5347_v21  ;;  %v10855_v21 = vld [vmem:[#allocation2 + $0x20] sm:$0xff]  ;;  %v8781_v44 = vld [vmem:[#allocation2 + $0x70] sm:$0xff]   ;;  %vm12108_vm7 = vmmov %vm11915_vm1 }
 0x49f   : >> { %v10826_v61 = vadd.f32 %v5464_v30, %v10701_v9  ;;  %v6316_v26 = vshll.u32 %v10855_v21, 16 }
 0x4a0   : >> { %v6086_v52 = vpop.f32.mrf.mxu0  ;;  %v10831_v58 = vpop.f32.mrf.mxu1  ;;  %v5355_v54 = vsel %vm2075_vm0, %v5351_v46, %v5354_v8 }
 0x4a1   : >> { %v6160_v10 = vadd.f32 %v6086_v52, %v10467_v1  ;;  %v5885_v6 = vpop.f32.mrf.mxu3  ;;  %v5767_v1 = vrot.slane %v5765_v18, 4  ;;  %v5116_v52 = vsel %vm2075_vm0, %v5111_v37, %v5115_v49 }
 0x4a2   : >> { %v5959_v47 = vadd.f32 %v5885_v6, %v4522_v40  ;;  %v7888_v40 = vld [vmem:[#allocation2 + $0x18] sm:$0xff]  ;;  %v4527_v6 = vadd.f32 %v10485_v53, %v10324_v41 }
 0x4a3   : >> { %7708 = vmatmul.msk.bf16.gmra.mxu0 %vm12075_vm8, %v8309_v33  ;;  %v5768_v30 = vor.u32 %v5767_v1, %v5764_v2  ;;  %v6309_v41 = vshrl.u32 %v7888_v40, 16  ;;  %vm12109_vm8 = vmmov %vm11915_vm1 }
 0x4a4   : >> { %v6625_v9 = vmul.f32 %v11559_v23, %v5959_v47  ;;  %v6311_v47 = vshll.u32 %v7888_v40, 16  ;;  %v10925_v23 = vld [vmem:[#allocation2 + $0x90] sm:$0xff]  }
 0x4a5   : >> { %v5769_v59 = vsel %vm1233_vm14, %v5759_v11, %v5768_v30 }
 0x4a6   : >> { %v10837_v39 = vadd.f32 %v6625_v9, %v6160_v10  ;;  %v5466_v60 = vpop.f32.mrf.mxu2  ;;  %v6313_v1 = vrot.slane %v6311_v47, 1 }
 0x4a7   : >> { %v10840_v57 = vadd.f32 %v5466_v60, %v10714_v15  ;;  %v8782_v60 = vld [vmem:[#allocation2 + $0x68] sm:$0xff]  }
 0x4a8   : >> { %v6088_v20 = vpop.f32.mrf.mxu0  ;;  %v10845_v3 = vpop.f32.mrf.mxu1  ;;  %v5356_v37 = vshrl.u32 %v8782_v60, 16  ;;  %v6314_v40 = vor.u32 %v6313_v1, %v6309_v41  ;;  %v8311_v41 = vld [vmem:[#allocation2 + $0x78] sm:$0xff]  }
 0x4a9   : >> { %v6161_v16 = vadd.f32 %v6088_v20, %v10473_v51  ;;  %v5887_v14 = vpop.f32.mrf.mxu3  ;;  %v8741_v51 = vld [vmem:[#allocation2 + $0x7c] sm:$0xff]  }
 0x4aa   : >> { %v5960_v50 = vadd.f32 %v5887_v14, %v4524_v55  ;;  %v5771_v45 = vshrl.u32 %v8741_v51, 16  ;;  %v5774_v9 = vshll.u32 %v8741_v51, 16  ;;  %v6318_v55 = vrot.slane %v6316_v26, 1  ;;  %v12086_v26 = vld [vmem:[#allocation44_spill] sm:$0xff] }
 0x4ab   : >> { %7641 = vmatmul.msk.bf16.gmra.mxu1 %vm12076_vm9, %v5116_v52  ;;  %7661 = vmatmul.msk.bf16.gmra.mxu2 %vm12077_vm10, %v5355_v54  ;;  %v12081_v52 = vld [vmem:[#allocation50_spill] sm:$0xff]  ;;  %vm12110_vm9 = vmmov %vm11915_vm1 }
 0x4ac   : >> { %v10851_v15 = vadd.f32 %v6161_v16, %v5960_v50  ;;  %v5773_v53 = vrot.slane %v5771_v45, 3  ;;  %v12080_v50 = vld [vmem:[#allocation60_spill] sm:$0xff]  ;;  %vm12114_vm10 = vmmov %vm11915_vm1 }
 0x4ad   : >> { %v4529_v54 = vadd.f32 %v12081_v52, %v12080_v50  ;;  %v12090_v50 = vld [vmem:[#allocation69_spill] sm:$0xff] }
 0x4ae   : >> { %7685 = vmatmul.msk.bf16.gmra.mxu3 %vm12078_vm11, %v5769_v59  ;;  %v5469_v5 = vpop.f32.mrf.mxu2  ;;  %v12082_v59 = vld [vmem:[#allocation68_spill] sm:$0xff]  ;;  %vm12121_vm11 = vmmov %vm11915_vm1 }
 0x4af   : >> { %v10858_v33 = vadd.f32 %v5469_v5, %v10723_v4  ;;  %v5359_v4 = vshll.u32 %v8781_v44, 16 }
 0x4b0   : >> { %v6091_v10 = vpop.f32.mrf.mxu0  ;;  %v10863_v18 = vpop.f32.mrf.mxu1 }
 0x4b1   : >> { %v6162_v38 = vadd.f32 %v6091_v10, %v10489_v31  ;;  %v5890_v11 = vpop.f32.mrf.mxu3  ;;  %v5776_v31 = vrot.slane %v5774_v9, 4  ;;  %v5361_v16 = vrot.slane %v5359_v4, 1  ;;  %v5358_v10 = vor.u32 %v5356_v37, %v5354_v8  ;;  %v8743_v9 = vld [vmem:[#allocation2 + $0x84] sm:$0xff]   ;;  %v12087_v4 = vld [vmem:[#allocation70_spill] sm:$0xff] }
 0x4b2   : >> { %v5961_v43 = vadd.f32 %v5890_v11, %v4527_v6  ;;  %v5783_v60 = vshll.u32 %v8743_v9, 16 }
 0x4b3   : >> { %7709 = vmatmul.msk.bf16.gmra.mxu0 %vm12079_vm12, %v8310_v29  ;;  %v5777_v47 = vor.u32 %v5776_v31, %v5773_v53  ;;  %v6319_v29 = vsel %vm2075_vm0, %v6314_v40, %v6318_v55  ;;  %v5362_v11 = vsel %vm2075_vm0, %v5358_v10, %v5361_v16  ;;  %v5780_v31 = vshrl.u32 %v8743_v9, 16  ;;  %v12092_v9 = vld [vmem:[#allocation62_spill] sm:$0xff]  ;;  %vm12122_vm12 = vmmov %vm11915_vm1 }
 0x4b4   : >> { %v6627_v2 = vmul.f32 %v11558_v24, %v5961_v43  ;;  %v10886_v43 = vld [vmem:[#allocation2 + $0x28] sm:$0xff]  ;;  %v5785_v10 = vrot.slane %v5783_v60, 4  ;;  %v12105_v24 = vld [vmem:[#allocation74_spill] sm:$0xff] }
 0x4b5   : >> { %v5778_v45 = vsel %vm1233_vm14, %v5768_v30, %v5777_v47  ;;  %v6324_v30 = vshll.u32 %v10886_v43, 16  ;;  %v5782_v40 = vrot.slane %v5780_v31, 3 }
 0x4b6   : >> { %v10868_v49 = vadd.f32 %v6627_v2, %v6162_v38  ;;  %v5471_v20 = vpop.f32.mrf.mxu2  ;;  %v4532_v2 = vadd.f32 %v12087_v4, %v12086_v26  ;;  %v12093_v26 = vld [vmem:[#allocation56_spill] sm:$0xff] }
 0x4b7   : >> { %v10871_v14 = vadd.f32 %v5471_v20, %v10738_v19  ;;  %v8783_v20 = vld [vmem:[#allocation2 + $0x78] sm:$0xff]   ;;  %v4534_v4 = vadd.f32 %v12093_v26, %v12092_v9 }
 0x4b8   : >> { %v6093_v46 = vpop.f32.mrf.mxu0  ;;  %v10876_v5 = vpop.f32.mrf.mxu1 }
 0x4b9   : >> { %v6163_v51 = vadd.f32 %v6093_v46, %v12082_v59  ;;  %v5892_v6 = vpop.f32.mrf.mxu3  ;;  %v5366_v46 = vshll.u32 %v8783_v20, 16 }
 0x4ba   : >> { %v5962_v38 = vadd.f32 %v5892_v6, %v4529_v54  ;;  %v12091_v54 = vld [vmem:[#allocation8_spill] sm:$0xff]  ;;  %v5363_v6 = vshrl.u32 %v8781_v44, 16 }
 0x4bb   : >> { %7786 = vmatmul.msk.bf16.vlgmr.msra.gmra.mxu1 %vm12083_vm13, %v6319_v29  ;;  %7662 = vmatmul.msk.bf16.gmra.mxu2 %vm12084_vm15, %v5362_v11  ;;  %v6326_v29 = vrot.slane %v6324_v30, 1  ;;  %v5368_v11 = vrot.slane %v5366_v46, 1  ;;  %v10911_v46 = vld [vmem:[#allocation2 + $0x30] sm:$0xff]  ;;  %vm12123_vm13 = vmmov %vm11915_vm1 }
 0x4bc   : >> { %v10882_v19 = vadd.f32 %v6163_v51, %v5962_v38  ;;  %v6320_v51 = vshrl.u32 %v10855_v21, 16  ;;  %vm12127_vm15 = vmmov %vm11915_vm1 }
 0x4be   : >> { %7686 = vmatmul.msk.bf16.gmra.mxu3 %vm12085_vm2, %v5778_v45  ;;  %vm12144_vm2 = vmmov %vm11915_vm1 }
 0x4c0   : >> { %v6096_v8 = vpop.f32.mrf.mxu0  ;;  %v10890_v1 = vpop.f32.mrf.mxu1 }
 0x4c1   : >> { %12088 = vst [vmem:[#allocation60_spill] sm:$0xff] %v10890_v1  ;;  %v5895_v53 = vpop.f32.mrf.mxu3  ;;  %v6164_v52 = vadd.f32 %v6096_v8, %v12090_v50  ;;  %v5786_v50 = vor.u32 %v5785_v10, %v5782_v40  ;;  %v8312_v10 = vld [vmem:[#allocation2 + $0x80] sm:$0xff]   ;;  %v12118_v1 = vld [vmem:[#allocation77_spill] sm:$0xff] }
 0x4c2   : >> { %v5963_v37 = vadd.f32 %v5895_v53, %v4532_v2  ;;  %v5365_v53 = vor.u32 %v5363_v6, %v5361_v16 }
 0x4c3   : >> { %7710 = vmatmul.msk.bf16.gmra.mxu0 %vm12089_vm3, %v8311_v41  ;;  %v6322_v41 = vor.u32 %v6320_v51, %v6318_v55  ;;  %v5787_v30 = vsel %vm1233_vm14, %v5777_v47, %v5786_v50  ;;  %v8744_v55 = vld [vmem:[#allocation2 + $0x8c] sm:$0xff]   ;;  %vm12154_vm3 = vmmov %vm11915_vm1 }
 0x4c4   : >> { %v6629_v59 = vmul.f32 %v12091_v54, %v5963_v37  ;;  %v12095_v37 = vld [vmem:[#allocation71_spill] sm:$0xff]  ;;  %v5369_v44 = vsel %vm2075_vm0, %v5365_v53, %v5368_v11  ;;  %v5789_v9 = vshrl.u32 %v8744_v55, 16  ;;  %v5792_v26 = vshll.u32 %v8744_v55, 16  ;;  %v12102_v53 = vld [vmem:[#allocation73_spill] sm:$0xff] }
 0x4c5   : >> { %v6327_v31 = vsel %vm2075_vm0, %v6322_v41, %v6326_v29 }
 0x4c6   : >> { %v10897_v38 = vadd.f32 %v6629_v59, %v6164_v52  ;;  %v12098_v52 = vld [vmem:[#allocation61_spill] sm:$0xff]  ;;  %v12099_v59 = vld [vmem:[#allocation58_spill] sm:$0xff] }
 0x4c7   : >> { %v4537_v51 = vadd.f32 %v12099_v59, %v12098_v52  ;;  %v5370_v52 = vshrl.u32 %v8783_v20, 16  ;;  %v8233_v20 = vunpack.c.h.b16 %v10925_v23 }
 0x4c8   : >> { %v6098_v45 = vpop.f32.mrf.mxu0  ;;  %v10901_v2 = vpop.f32.mrf.mxu1 }
 0x4c9   : >> { %12094 = vst [vmem:[#allocation50_spill] sm:$0xff] %v10901_v2  ;;  %v5897_v8 = vpop.f32.mrf.mxu3  ;;  %v6165_v54 = vadd.f32 %v6098_v45, %v12095_v37  ;;  %v6332_v45 = vshll.u32 %v10911_v46, 16  ;;  %v12103_v37 = vld [vmem:[#allocation9_spill] sm:$0xff] }
 0x4ca   : >> { %v5964_v21 = vadd.f32 %v5897_v8, %v4534_v4  ;;  %v8784_v4 = vld [vmem:[#allocation2 + $0x80] sm:$0xff]  }
 0x4cb   : >> { %7787 = vmatmul.msk.bf16.gmra.mxu1 %vm12096_vm4, %v6327_v31  ;;  %7663 = vmatmul.msk.bf16.gmra.mxu2 %vm12097_vm5, %v5369_v44  ;;  %v5373_v41 = vshll.u32 %v8784_v4, 16  ;;  %v6334_v31 = vrot.slane %v6332_v45, 1  ;;  %v5791_v44 = vrot.slane %v5789_v9, 3  ;;  %v12107_v9 = vld [vmem:[#allocation75_spill] sm:$0xff]  ;;  %vm12166_vm4 = vmmov %vm11915_vm1 }
 0x4cc   : >> { %v10908_v60 = vadd.f32 %v6165_v54, %v5964_v21  ;;  %v6328_v21 = vshrl.u32 %v10886_v43, 16  ;;  %vm12176_vm5 = vmmov %vm11915_vm1 }
 0x4cd   : >> { %v5375_v22 = vrot.slane %v5373_v41, 1 }
 0x4ce   : >> { %7687 = vmatmul.msk.bf16.gmra.mxu3 %vm11915_vm1, %v5787_v30  ;;  %v5794_v30 = vrot.slane %v5792_v26, 4 }
 0x4d0   : >> { %v6101_v16 = vpop.f32.mrf.mxu0  ;;  %v10916_v40 = vpop.f32.mrf.mxu1  ;;  %v5795_v45 = vor.u32 %v5794_v30, %v5791_v44  ;;  %v12111_v30 = vld [vmem:[#allocation46_spill] sm:$0xff] }
 0x4d1   : >> { %12100 = vst [vmem:[#allocation68_spill] sm:$0xff] %v10916_v40  ;;  %v5900_v6 = vpop.f32.mrf.mxu3  ;;  %v6166_v8 = vadd.f32 %v6101_v16, %v12102_v53 }
 0x4d2   : >> { %v5965_v47 = vadd.f32 %v5900_v6, %v4537_v51  ;;  %v4049_v51 = vld [vmem:[#allocation2 + $0x88] sm:$0x1]  ;;  %v12104_v6 = vld [vmem:[#allocation63_spill] sm:$0xff] }
 0x4d3   : >> { %7711 = vmatmul.msk.bf16.gmra.mxu0 %vm12101_vm6, %v8312_v10  ;;  %v6330_v10 = vor.u32 %v6328_v21, %v6326_v29  ;;  %v4539_v40 = vadd.f32 %v12105_v24, %v12104_v6  ;;  %v5796_v29 = vsel %vm1233_vm14, %v5786_v50, %v5795_v45  ;;  %vm12185_vm6 = vmmov %vm11915_vm1 }
 0x4d4   : >> { %v6631_v54 = vmul.f32 %v12103_v37, %v5965_v47  ;;  %v5372_v47 = vor.u32 %v5370_v52, %v5368_v11  ;;  %v5267_v37 = vunpack.c.l.b16 %v4049_v51  ;;  %v5653_v11 = vpack.c.b16 %v8233_v20, %v8233_v20  ;;  %v12112_v52 = vld [vmem:[#allocation76_spill] sm:$0xff]  ;;  %v12115_v20 = vld [vmem:[#allocation38_spill] sm:$0xff] }
 0x4d5   : >> { %v6335_v43 = vsel %vm2075_vm0, %v6330_v10, %v6334_v31  ;;  %v8313_v10 = vld [vmem:[#allocation2 + $0x88] sm:$0xff]  }
 0x4d6   : >> { %v10923_v59 = vadd.f32 %v6631_v54, %v6166_v8  ;;  %v5376_v8 = vsel %vm2075_vm0, %v5372_v47, %v5375_v22  ;;  %v7892_v54 = vld [vmem:[#allocation2 + $0x38] sm:$0xff]  ;;  %v5268_v21 = vpack.c.b16 %v5267_v37, %v5267_v37  ;;  %v5798_v6 = vshrl.u32 %v5653_v11, 16 }
 0x4d7   : >> { %v5801_v47 = vshll.u32 %v5653_v11, 16  ;;  %v12117_v11 = vld [vmem:[#allocation64_spill] sm:$0xff] }
 0x4d8   : >> { %v6103_v55 = vpop.f32.mrf.mxu0  ;;  %v10929_v16 = vpop.f32.mrf.mxu1  ;;  %v5381_v50 = vshll.u32 %v5268_v21, 16  ;;  %v5800_v37 = vrot.slane %v5798_v6, 3 }
 0x4d9   : >> { %12106 = vst [vmem:[#allocation44_spill] sm:$0xff] %v10929_v16  ;;  %v5902_v53 = vpop.f32.mrf.mxu3  ;;  %v6167_v26 = vadd.f32 %v6103_v55, %v12107_v9 }
 0x4da   : >> { %v5966_v41 = vadd.f32 %v5902_v53, %v4539_v40  ;;  %v4542_v40 = vadd.f32 %v12112_v52, %v12111_v30  ;;  %v5383_v16 = vrot.slane %v5381_v50, 1 }
 0x4db   : >> { %7788 = vmatmul.msk.bf16.gmra.mxu1 %vm12108_vm7, %v6335_v43  ;;  %7664 = vmatmul.msk.bf16.gmra.mxu2 %vm12109_vm8, %v5376_v8  ;;  %v6340_v43 = vshll.u32 %v7892_v54, 16  ;;  %v6336_v8 = vshrl.u32 %v10911_v46, 16  ;;  %vm12186_vm7 = vmmov %vm11915_vm1 }
 0x4dc   : >> { %v10937_v24 = vadd.f32 %v6167_v26, %v5966_v41  ;;  %v12116_v26 = vld [vmem:[#allocation10_spill] sm:$0xff]  ;;  %vm12192_vm8 = vmmov %vm11915_vm1 }
 0x4dd   : >> { %v6342_v52 = vrot.slane %v6340_v43, 1  ;;  %v6338_v21 = vor.u32 %v6336_v8, %v6334_v31  ;;  %v12125_v43 = vld [vmem:[#allocation79_spill] sm:$0xff]  ;;  %v12128_v8 = vld [vmem:[#allocation80_spill] sm:$0xff] }
 0x4de   : >> { %7688 = vmatmul.msk.bf16.gmra.mxu3 %vm12110_vm9, %v5796_v29  ;;  %v5803_v29 = vrot.slane %v5801_v47, 4  ;;  %vm12194_vm9 = vmmov %vm11915_vm1 }
 0x4df   : >> { %v6343_v6 = vsel %vm2075_vm0, %v6338_v21, %v6342_v52 }
 0x4e0   : >> { %v6106_v44 = vpop.f32.mrf.mxu0  ;;  %v10943_v55 = vpop.f32.mrf.mxu1 }
 0x4e1   : >> { %12113 = vst [vmem:[#allocation70_spill] sm:$0xff] %v10943_v55  ;;  %v5905_v51 = vpop.f32.mrf.mxu3  ;;  %v6168_v9 = vadd.f32 %v6106_v44, %v12115_v20  ;;  %v5377_v55 = vshrl.u32 %v8784_v4, 16  ;;  %v5804_v20 = vor.u32 %v5803_v29, %v5800_v37  ;;  %v12129_v29 = vld [vmem:[#allocation11_spill] sm:$0xff] }
 0x4e2   : >> { %v5967_v53 = vadd.f32 %v5905_v51, %v4542_v40 }
 0x4e3   : >> { %7712 = vmatmul.msk.bf16.gmra.mxu0 %vm12114_vm10, %v8313_v10  ;;  %v4544_v10 = vadd.f32 %v12118_v1, %v12117_v11  ;;  %v5379_v51 = vor.u32 %v5377_v55, %v5375_v22  ;;  %v5805_v1 = vsel %vm1233_vm14, %v5795_v45, %v5804_v20  ;;  %v7893_v22 = vld [vmem:[#allocation2 + $0x40] sm:$0xff]  ;;  %v12131_v20 = vld [vmem:[#allocation81_spill] sm:$0xff]  ;;  %vm12134_vm14 = vmmov %vm11915_vm1 }
 0x4e4   : >> { %v6633_v41 = vmul.f32 %v12116_v26, %v5967_v53  ;;  %v12120_v53 = vld [vmem:[#allocation39_spill] sm:$0xff]  ;;  %v12124_v55 = vld [vmem:[#allocation48_spill] sm:$0xff]  ;;  %vm12195_vm10 = vmmov %vm11915_vm1 }
 0x4e5   : >> { %v5384_v47 = vsel %vm2075_vm0, %v5379_v51, %v5383_v16 }
 0x4e6   : >> { %v10949_v30 = vadd.f32 %v6633_v41, %v6168_v9  ;;  %v6348_v41 = vshll.u32 %v7893_v22, 16 }
 0x4e8   : >> { %v6108_v2 = vpop.f32.mrf.mxu0  ;;  %v10953_v40 = vpop.f32.mrf.mxu1  ;;  %v6350_v21 = vrot.slane %v6348_v41, 1 }
 0x4e9   : >> { %12119 = vst [vmem:[#allocation69_spill] sm:$0xff] %v10953_v40  ;;  %v5907_v44 = vpop.f32.mrf.mxu3  ;;  %v6169_v26 = vadd.f32 %v6108_v2, %v12120_v53  ;;  %v4547_v2 = vadd.f32 %v12125_v43, %v12124_v55  ;;  %v7894_v43 = vld [vmem:[#allocation2 + $0x48] sm:$0xff] }
 0x4ea   : >> { %v5968_v46 = vadd.f32 %v5907_v44, %v4544_v10  ;;  %v6344_v10 = vshrl.u32 %v7892_v54, 16  ;;  %v12130_v44 = vld [vmem:[#allocation66_spill] sm:$0xff] }
 0x4eb   : >> { %7789 = vmatmul.msk.bf16.gmra.mxu1 %vm12121_vm11, %v6343_v6  ;;  %7665 = vmatmul.msk.bf16.gmra.mxu2 %vm12122_vm12, %v5384_v47  ;;  %v4549_v53 = vadd.f32 %v12131_v20, %v12130_v44  ;;  %v12133_v47 = vld [vmem:[#allocation41_spill] sm:$0xff]  ;;  %v6352_v20 = vshrl.u32 %v7893_v22, 16  ;;  %vm12200_vm11 = vmmov %vm11915_vm1 }
 0x4ec   : >> { %v10960_v4 = vadd.f32 %v6169_v26, %v5968_v46  ;;  %v6346_v46 = vor.u32 %v6344_v10, %v6342_v52  ;;  %v6356_v52 = vshll.u32 %v7894_v43, 16  ;;  %v12139_v10 = vld [vmem:[#allocation12_spill] sm:$0xff]  ;;  %vm12202_vm12 = vmmov %vm11915_vm1 }
 0x4ee   : >> { %7689 = vmatmul.msk.bf16.gmra.mxu3 %vm12123_vm13, %v5805_v1  ;;  %v6351_v55 = vsel %vm2075_vm0, %v6346_v46, %v6350_v21  ;;  %vm12203_vm13 = vmmov %vm11915_vm1 }
 0x4f0   : >> { %v6111_v31 = vpop.f32.mrf.mxu0  ;;  %v10966_v50 = vpop.f32.mrf.mxu1 }
 0x4f1   : >> { %12126 = vst [vmem:[#allocation62_spill] sm:$0xff] %v10966_v50  ;;  %v5910_v9 = vpop.f32.mrf.mxu3  ;;  %v6170_v37 = vadd.f32 %v6111_v31, %v12128_v8 }
 0x4f2   : >> { %v5969_v16 = vadd.f32 %v5910_v9, %v4547_v2  ;;  %v12135_v2 = vld [vmem:[#allocation65_spill] sm:$0xff]  ;;  %v12136_v9 = vld [vmem:[#allocation42_spill] sm:$0xff] }
 0x4f3   : >> { %7713 = vmatmul.msk.bf16.gmra.mxu0 %vm12127_vm15, %v10925_v23  ;;  %vm12208_vm15 = vmmov %vm11915_vm1 }
 0x4f4   : >> { %v6635_v11 = vmul.f32 %v12129_v29, %v5969_v16  ;;  %v4552_v16 = vadd.f32 %v12136_v9, %v12135_v2  ;;  %v12138_v29 = vld [vmem:[#allocation83_spill] sm:$0xff]  ;;  %v12143_v9 = vld [vmem:[#allocation85_spill] sm:$0xff] }
 0x4f6   : >> { %v10972_v45 = vadd.f32 %v6635_v11, %v6170_v37 }
 0x4f8   : >> { %v6113_v51 = vpop.f32.mrf.mxu0  ;;  %v10976_v26 = vpop.f32.mrf.mxu1 }
 0x4f9   : >> { %12132 = vst [vmem:[#allocation56_spill] sm:$0xff] %v10976_v26  ;;  %v5912_v6 = vpop.f32.mrf.mxu3  ;;  %v6171_v23 = vadd.f32 %v6113_v51, %v12133_v47  ;;  %v12141_v47 = vld [vmem:[#allocation43_spill] sm:$0xff] }
 0x4fa   : >> { %v5970_v1 = vadd.f32 %v5912_v6, %v4549_v53  ;;  %v6358_v53 = vrot.slane %v6356_v52, 1  ;;  %v12140_v6 = vld [vmem:[#allocation67_spill] sm:$0xff]  ;;  %v12145_v52 = vld [vmem:[#allocation52_spill] sm:$0xff] }
 0x4fb   : >> { %7790 = vmatmul.msk.bf16.gmra.mxu1 %vm12134_vm14, %v6351_v55  ;;  %v6354_v55 = vor.u32 %v6352_v20, %v6350_v21  ;;  %v12148_v20 = vld [vmem:[#allocation86_spill] sm:$0xff]  ;;  %vm12209_vm14 = vmmov %vm11915_vm1 }
 0x4fc   : >> { %v10981_v31 = vadd.f32 %v6171_v23, %v5970_v1  ;;  %v4554_v23 = vadd.f32 %v12141_v47, %v12140_v6 }
 0x500   : >> { %v6116_v54 = vpop.f32.mrf.mxu0  ;;  %v10985_v41 = vpop.f32.mrf.mxu1 }
 0x501   : >> { %12137 = vst [vmem:[#allocation71_spill] sm:$0xff] %v10985_v41  ;;  %v5915_v8 = vpop.f32.mrf.mxu3  ;;  %v6172_v11 = vadd.f32 %v6116_v54, %v12138_v29  ;;  %v12146_v29 = vld [vmem:[#allocation45_spill] sm:$0xff] }
 0x502   : >> { %v5971_v37 = vadd.f32 %v5915_v8, %v4552_v16  ;;  %v6359_v8 = vsel %vm2075_vm0, %v6354_v55, %v6358_v53  ;;  %v6360_v55 = vshrl.u32 %v7894_v43, 16 }
 0x504   : >> { %v6637_v51 = vmul.f32 %v12139_v10, %v5971_v37  ;;  %v7895_v37 = vld [vmem:[#allocation2 + $0x50] sm:$0xff] }
 0x505   : >> { %v6364_v21 = vshll.u32 %v7895_v37, 16 }
 0x506   : >> { %v10989_v44 = vadd.f32 %v6637_v51, %v6172_v11  ;;  %v4557_v11 = vadd.f32 %v12146_v29, %v12145_v52  ;;  %v6362_v52 = vor.u32 %v6360_v55, %v6358_v53  ;;  %v12159_v55 = vld [vmem:[#allocation49_spill] sm:$0xff] }
 0x508   : >> { %v6118_v46 = vpop.f32.mrf.mxu0  ;;  %v10993_v1 = vpop.f32.mrf.mxu1 }
 0x509   : >> { %12142 = vst [vmem:[#allocation61_spill] sm:$0xff] %v10993_v1  ;;  %v5917_v2 = vpop.f32.mrf.mxu3  ;;  %v6173_v41 = vadd.f32 %v6118_v46, %v12143_v9  ;;  %v12149_v46 = vld [vmem:[#allocation13_spill] sm:$0xff]  ;;  %v6366_v9 = vrot.slane %v6364_v21, 1  ;;  %v12156_v21 = vld [vmem:[#allocation72_spill] sm:$0xff] }
 0x50a   : >> { %v5972_v16 = vadd.f32 %v5917_v2, %v4554_v23 }
 0x50b   : >> { %7791 = vmatmul.msk.bf16.gmra.mxu1 %vm12144_vm2, %v6359_v8  ;;  %v12151_v8 = vld [vmem:[#allocation87_spill] sm:$0xff]  ;;  %vm12210_vm2 = vmmov %vm11915_vm1 }
 0x50c   : >> { %v10998_v54 = vadd.f32 %v6173_v41, %v5972_v16  ;;  %v12150_v16 = vld [vmem:[#allocation54_spill] sm:$0xff] }
 0x50d   : >> { %v4559_v1 = vadd.f32 %v12151_v8, %v12150_v16 }
 0x510   : >> { %v6121_v22 = vpop.f32.mrf.mxu0  ;;  %v11002_v10 = vpop.f32.mrf.mxu1 }
 0x511   : >> { %12147 = vst [vmem:[#allocation58_spill] sm:$0xff] %v11002_v10  ;;  %v5920_v51 = vpop.f32.mrf.mxu3  ;;  %v6174_v47 = vadd.f32 %v6121_v22, %v12148_v20  ;;  %v12153_v10 = vld [vmem:[#allocation47_spill] sm:$0xff]  ;;  %v12157_v20 = vld [vmem:[#allocation88_spill] sm:$0xff] }
 0x512   : >> { %v5973_v6 = vadd.f32 %v5920_v51, %v4557_v11  ;;  %v6367_v51 = vsel %vm2075_vm0, %v6362_v52, %v6366_v9  ;;  %v6368_v52 = vshrl.u32 %v7895_v37, 16 }
 0x514   : >> { %v6639_v23 = vmul.f32 %v12149_v46, %v5973_v6  ;;  %v7896_v6 = vld [vmem:[#allocation2 + $0x58] sm:$0xff] }
 0x515   : >> { %v6372_v53 = vshll.u32 %v7896_v6, 16 }
 0x516   : >> { %v11006_v2 = vadd.f32 %v6639_v23, %v6174_v47  ;;  %v4562_v47 = vadd.f32 %v12157_v20, %v12156_v21  ;;  %v6370_v21 = vor.u32 %v6368_v52, %v6366_v9  ;;  %v12171_v52 = vld [vmem:[#allocation91_spill] sm:$0xff] }
 0x518   : >> { %v6123_v41 = vpop.f32.mrf.mxu0  ;;  %v11010_v26 = vpop.f32.mrf.mxu1 }
 0x519   : >> { %12152 = vst [vmem:[#allocation73_spill] sm:$0xff] %v11010_v26  ;;  %v5922_v29 = vpop.f32.mrf.mxu3  ;;  %v6175_v50 = vadd.f32 %v6123_v41, %v12153_v10  ;;  %v12160_v10 = vld [vmem:[#allocation14_spill] sm:$0xff] }
 0x51a   : >> { %v5974_v11 = vadd.f32 %v5922_v29, %v4559_v1  ;;  %v6374_v29 = vrot.slane %v6372_v53, 1  ;;  %v12168_v53 = vld [vmem:[#allocation37_spill] sm:$0xff] }
 0x51b   : >> { %7792 = vmatmul.msk.bf16.gmra.mxu1 %vm12154_vm3, %v6367_v51  ;;  %v12163_v51 = vld [vmem:[#allocation89_spill] sm:$0xff]  ;;  %vm12212_vm3 = vmmov %vm11915_vm1 }
 0x51c   : >> { %v11015_v22 = vadd.f32 %v6175_v50, %v5974_v11  ;;  %v12162_v11 = vld [vmem:[#allocation36_spill] sm:$0xff] }
 0x51d   : >> { %v4564_v26 = vadd.f32 %v12163_v51, %v12162_v11 }
 0x51e   : >> { %12155 = vst [vmem:[#allocation63_spill] sm:$0xff] %v11015_v22 }
 0x520   : >> { %v6126_v43 = vpop.f32.mrf.mxu0  ;;  %v11019_v46 = vpop.f32.mrf.mxu1 }
 0x521   : >> { %12158 = vst [vmem:[#allocation74_spill] sm:$0xff] %v11019_v46  ;;  %v5925_v23 = vpop.f32.mrf.mxu3  ;;  %v6176_v8 = vadd.f32 %v6126_v43, %v12159_v55  ;;  %v12165_v46 = vld [vmem:[#allocation90_spill] sm:$0xff]  ;;  %v12169_v55 = vld [vmem:[#allocation51_spill] sm:$0xff] }
 0x522   : >> { %v5975_v16 = vadd.f32 %v5925_v23, %v4562_v47  ;;  %v6375_v23 = vsel %vm2075_vm0, %v6370_v21, %v6374_v29  ;;  %v6376_v21 = vshrl.u32 %v7896_v6, 16 }
 0x524   : >> { %v6641_v1 = vmul.f32 %v12160_v10, %v5975_v16  ;;  %v7897_v16 = vld [vmem:[#allocation2 + $0x60] sm:$0xff] }
 0x525   : >> { %v6380_v9 = vshll.u32 %v7897_v16, 16 }
 0x526   : >> { %v11023_v41 = vadd.f32 %v6641_v1, %v6176_v8  ;;  %v4567_v8 = vadd.f32 %v12169_v55, %v12168_v53  ;;  %v11048_v55 = vld [vmem:[%s11399_s5] ss:$0 sm:$0xff] }
 0x528   : >> { %12161 = vst [vmem:[#allocation75_spill] sm:$0xff] %v11023_v41  ;;  %v6128_v50 = vpop.f32.mrf.mxu0  ;;  %v11027_v40 = vpop.f32.mrf.mxu1  ;;  %v6378_v41 = vor.u32 %v6376_v21, %v6374_v29  ;;  %v8785_v21 = vld [vmem:[#allocation3] sm:$0xff] }
 0x529   : >> { %12164 = vst [vmem:[#allocation46_spill] sm:$0xff] %v11027_v40  ;;  %v5927_v20 = vpop.f32.mrf.mxu3  ;;  %v6177_v22 = vadd.f32 %v6128_v50, %v12165_v46  ;;  %v12172_v46 = vld [vmem:[#allocation15_spill] sm:$0xff] }
 0x52a   : >> { %v5976_v47 = vadd.f32 %v5927_v20, %v4564_v26  ;;  %v6382_v20 = vrot.slane %v6380_v9, 1 }
 0x52b   : >> { %7793 = vmatmul.msk.bf16.gmra.mxu1 %vm12166_vm4, %v6375_v23  ;;  %v12174_v23 = vld [vmem:[#allocation53_spill] sm:$0xff]  ;;  %vm12213_vm4 = vmmov %vm11915_vm1 }
 0x52c   : >> { %v11032_v43 = vadd.f32 %v6177_v22, %v5976_v47  ;;  %v12173_v47 = vld [vmem:[#allocation78_spill] sm:$0xff]  ;;  %v6383_v6 = vsel %vm2075_vm0, %v6378_v41, %v6382_v20  ;;  %v12178_v41 = vld [vmem:[#allocation92_spill] sm:$0xff] }
 0x52d   : >> { %v4569_v40 = vadd.f32 %v12174_v23, %v12173_v47 }
 0x52e   : >> { %12167 = vst [vmem:[#allocation76_spill] sm:$0xff] %v11032_v43 }
 0x530   : >> { %v6131_v37 = vpop.f32.mrf.mxu0  ;;  %v11036_v10 = vpop.f32.mrf.mxu1 }
 0x531   : >> { %12170 = vst [vmem:[#allocation38_spill] sm:$0xff] %v11036_v10  ;;  %v5930_v1 = vpop.f32.mrf.mxu3  ;;  %v6178_v51 = vadd.f32 %v6131_v37, %v12171_v52  ;;  %v11056_v52 = vld [vmem:[%s11400_s6] ss:$0 sm:$0xff] }
 0x532   : >> { %v5977_v11 = vadd.f32 %v5930_v1, %v4567_v8  ;;  %v12175_v8 = vld [vmem:[#allocation93_spill] sm:$0xff]  ;;  %v12181_v10 = vld [vmem:[#allocation16_spill] sm:$0xff] }
 0x534   : >> { %v6643_v26 = vmul.f32 %v12172_v46, %v5977_v11  ;;  %v12177_v46 = vld [vmem:[#allocation40_spill] sm:$0xff] }
 0x536   : >> { %v11040_v50 = vadd.f32 %v6643_v26, %v6178_v51  ;;  %v4572_v26 = vadd.f32 %v12178_v41, %v12177_v46  ;;  %v11074_v41 = vpop.f32.mrf.mxu2 }
 0x538   : >> { %v6133_v22 = vpop.f32.mrf.mxu0  ;;  %v6509_v43 = vpop.f32.mrf.mxu1 }
 0x539   : >> { %v6589_v53 = vadd.f32 %v6509_v43, %v10761_v62  ;;  %v5932_v37 = vpop.f32.mrf.mxu3  ;;  %v6179_v1 = vadd.f32 %v6133_v22, %v12175_v8  ;;  %v11062_v43 = vld [vmem:[#allocation2 + $0x68] sm:$0xff] }
 0x53a   : >> { %v5978_v11 = vadd.f32 %v5932_v37, %v4569_v40  ;;  %v6388_v37 = vshll.u32 %v11062_v43, 16 }
 0x53b   : >> { %v6717_v9 = vadd.f32 %v10773_v27, %v6589_v53  ;;  %7794 = vmatmul.msk.bf16.gmra.mxu1 %vm12176_vm5, %v6383_v6  ;;  %v12180_v6 = vld [vmem:[#allocation94_spill] sm:$0xff]  ;;  %vm12214_vm5 = vmmov %vm11915_vm1 }
 0x53c   : >> { %v11059_v62 = vadd.f32 %v6179_v1, %v5978_v11  ;;  %v12179_v1 = vld [vmem:[#allocation20_spill] sm:$0xff] }
 0x53d   : >> { %v6753_v29 = vmul.f32 %v11048_v55, %v6717_v9 }
 0x53f   : >> { %v6789_v51 = vadd.f32 %v11056_v52, %v6753_v29 }
 0x540   : >> { %v6136_v40 = vpop.f32.mrf.mxu0  ;;  %v6511_v27 = vpop.f32.mrf.mxu1 }
 0x541   : >> { %v6821_v22 = vadd.f32 %v8785_v21, %v6789_v51  ;;  %v6590_v47 = vadd.f32 %v6511_v27, %v10777_v34  ;;  %v5935_v23 = vpop.f32.mrf.mxu3  ;;  %v6180_v9 = vadd.f32 %v6136_v40, %v12180_v6  ;;  %v6384_v34 = vshrl.u32 %v7897_v16, 16  ;;  %v8786_v16 = vld [vmem:[#allocation3 + $0x8] sm:$0xff] }
 0x542   : >> { %v5979_v53 = vadd.f32 %v5935_v23, %v4572_v26  ;;  %v6390_v27 = vrot.slane %v6388_v37, 1  ;;  %v12183_v23 = vld [vmem:[#allocation55_spill] sm:$0xff] }
 0x543   : >> { %v6853_v8 = vmax.f32 %v6821_v22, 0.0  ;;  %v6686_v11 = vmul.f32 %v12179_v1, %v6590_v47  ;;  %v12182_v22 = vld [vmem:[#allocation82_spill] sm:$0xff]  ;;  %v6386_v40 = vor.u32 %v6384_v34, %v6382_v20 }
 0x544   : >> { %v6645_v29 = vmul.f32 %v12181_v10, %v5979_v53  ;;  %v4574_v47 = vadd.f32 %v12183_v23, %v12182_v22  ;;  %v11090_v34 = vld [vmem:[#allocation2 + $0x70] sm:$0xff]  ;;  %v12188_v23 = vld [vmem:[#allocation57_spill] sm:$0xff] }
 0x545   : >> { %6885 = vst.msk [vmem:[#allocation3] sm:$0xff] %vm11915_vm1, %v6853_v8  ;;  %v6718_v46 = vadd.f32 %v6686_v11, %v10788_v12  ;;  %v12184_v12 = vld [vmem:[#allocation95_spill] sm:$0xff] }
 0x546   : >> { %v11076_v51 = vadd.f32 %v6645_v29, %v6180_v9  ;;  %v6391_v9 = vsel %vm2075_vm0, %v6386_v40, %v6390_v27  ;;  %v8787_v40 = vld [vmem:[#allocation3 + $0x10] sm:$0xff] }
 0x547   : >> { %v6754_v26 = vmul.f32 %v11048_v55, %v6718_v46 }
 0x548   : >> { %v6138_v21 = vpop.f32.mrf.mxu0  ;;  %v6514_v1 = vpop.f32.mrf.mxu1 }
 0x549   : >> { %v6790_v10 = vadd.f32 %v11056_v52, %v6754_v26  ;;  %v6591_v53 = vadd.f32 %v6514_v1, %v10795_v35  ;;  %v5937_v8 = vpop.f32.mrf.mxu3  ;;  %v6181_v11 = vadd.f32 %v6138_v21, %v12184_v12  ;;  %v12187_v21 = vld [vmem:[#allocation84_spill] sm:$0xff]  ;;  %v11096_v1 = vpop.f32.mrf.mxu2 }
 0x54a   : >> { %v5980_v6 = vadd.f32 %v5937_v8, %v4574_v47  ;;  %v4577_v47 = vadd.f32 %v12188_v23, %v12187_v21 }
 0x54b   : >> { %v6822_v37 = vadd.f32 %v8786_v16, %v6790_v10  ;;  %v6719_v29 = vadd.f32 %v10806_v36, %v6591_v53  ;;  %7795 = vmatmul.msk.bf16.gmra.mxu1 %vm12185_vm6, %v6391_v9  ;;  %v12189_v9 = vld [vmem:[#allocation21_spill] sm:$0xff]  ;;  %vm12216_vm6 = vmmov %vm11915_vm1 }
 0x54c   : >> { %v11087_v46 = vadd.f32 %v6181_v11, %v5980_v6  ;;  %v6396_v11 = vshll.u32 %v11090_v34, 16 }
 0x54d   : >> { %v6854_v22 = vmax.f32 %v6822_v37, 0.0  ;;  %v6755_v20 = vmul.f32 %v11048_v55, %v6719_v29  ;;  %v12190_v37 = vld [vmem:[#allocation59_spill] sm:$0xff] }
 0x54f   : >> { %6886 = vst.msk [vmem:[#allocation3 + $0x8] sm:$0xff] %vm12186_vm7, %v6854_v22  ;;  %v6791_v35 = vadd.f32 %v11056_v52, %v6755_v20  ;;  %v12191_v22 = vld [vmem:[#allocation17_spill] sm:$0xff]  ;;  %vm12217_vm7 = vmmov %vm11915_vm1 }
 0x550   : >> { %v6141_v26 = vpop.f32.mrf.mxu0  ;;  %v6516_v36 = vpop.f32.mrf.mxu1 }
 0x551   : >> { %v6823_v10 = vadd.f32 %v8787_v40, %v6791_v35  ;;  %v6592_v53 = vadd.f32 %v6516_v36, %v10810_v7  ;;  %v5940_v8 = vpop.f32.mrf.mxu3  ;;  %v6182_v29 = vadd.f32 %v6141_v26, %v12190_v37  ;;  %v6392_v35 = vshrl.u32 %v11062_v43, 16  ;;  %v8788_v43 = vld [vmem:[#allocation3 + $0x18] sm:$0xff] }
 0x552   : >> { %v5981_v12 = vadd.f32 %v5940_v8, %v4577_v47  ;;  %v6398_v7 = vrot.slane %v6396_v11, 1 }
 0x553   : >> { %v6855_v6 = vmax.f32 %v6823_v10, 0.0  ;;  %v6688_v16 = vmul.f32 %v12189_v9, %v6592_v53  ;;  %v6394_v10 = vor.u32 %v6392_v35, %v6390_v27  ;;  %v8789_v35 = vld [vmem:[#allocation3 + $0x20] sm:$0xff] }
 0x554   : >> { %v6647_v20 = vmul.f32 %v12191_v22, %v5981_v12  ;;  %v11111_v12 = vpop.f32.mrf.mxu2  ;;  %v11121_v22 = vld [vmem:[#allocation2 + $0x78] sm:$0xff] }
 0x555   : >> { %6887 = vst.msk [vmem:[#allocation3 + $0x10] sm:$0xff] %vm12192_vm8, %v6855_v6  ;;  %v6720_v21 = vadd.f32 %v6688_v16, %v10821_v63  ;;  %v12193_v63 = vld [vmem:[#allocation96_spill] sm:$0xff]  ;;  %v6399_v16 = vsel %vm2075_vm0, %v6394_v10, %v6398_v7  ;;  %vm12219_vm8 = vmmov %vm11915_vm1 }
 0x556   : >> { %v11105_v23 = vadd.f32 %v6647_v20, %v6182_v29 }
 0x557   : >> { %v6756_v47 = vmul.f32 %v11048_v55, %v6720_v21 }
 0x558   : >> { %v6143_v36 = vpop.f32.mrf.mxu0  ;;  %v6519_v40 = vpop.f32.mrf.mxu1 }
 0x559   : >> { %v6792_v53 = vadd.f32 %v11056_v52, %v6756_v47  ;;  %v6593_v26 = vadd.f32 %v6519_v40, %v10826_v61  ;;  %v5942_v8 = vpop.f32.mrf.mxu3  ;;  %v6183_v6 = vadd.f32 %v6143_v36, %v10703_v17  ;;  %v12196_v40 = vld [vmem:[#allocation97_spill] sm:$0xff] }
 0x55a   : >> { %v5982_v9 = vadd.f32 %v5942_v8, %v12193_v63  ;;  %v12197_v8 = vld [vmem:[#allocation22_spill] sm:$0xff] }
 0x55b   : >> { %v6824_v11 = vadd.f32 %v8788_v43, %v6792_v53  ;;  %v6721_v37 = vadd.f32 %v10837_v39, %v6593_v26  ;;  %7796 = vmatmul.msk.bf16.gmra.mxu1 %vm12194_vm9, %v6399_v16  ;;  %v6404_v53 = vshll.u32 %v11121_v22, 16  ;;  %v12199_v43 = vld [vmem:[#allocation18_spill] sm:$0xff]  ;;  %vm12220_vm9 = vmmov %vm11915_vm1 }
 0x55c   : >> { %v11118_v27 = vadd.f32 %v6183_v6, %v5982_v9  ;;  %v11129_v63 = vpop.f32.mrf.mxu2  ;;  %v12198_v9 = vld [vmem:[#allocation98_spill] sm:$0xff] }
 0x55d   : >> { %v6856_v29 = vmax.f32 %v6824_v11, 0.0  ;;  %v6757_v61 = vmul.f32 %v11048_v55, %v6721_v37 }
 0x55f   : >> { %6888 = vst.msk [vmem:[#allocation3 + $0x18] sm:$0xff] %vm12195_vm10, %v6856_v29  ;;  %v6793_v17 = vadd.f32 %v11056_v52, %v6757_v61  ;;  %v6406_v61 = vrot.slane %v6404_v53, 1  ;;  %vm12221_vm10 = vmmov %vm11915_vm1 }
 0x560   : >> { %v6146_v20 = vpop.f32.mrf.mxu0  ;;  %v6521_v21 = vpop.f32.mrf.mxu1 }
 0x561   : >> { %v6825_v47 = vadd.f32 %v8789_v35, %v6793_v17  ;;  %v6594_v36 = vadd.f32 %v6521_v21, %v10840_v57  ;;  %v5945_v39 = vpop.f32.mrf.mxu3  ;;  %v6184_v16 = vadd.f32 %v6146_v20, %v12198_v9  ;;  %v6400_v57 = vshrl.u32 %v11090_v34, 16 }
 0x562   : >> { %v5983_v10 = vadd.f32 %v5945_v39, %v12196_v40 }
 0x563   : >> { %v6857_v26 = vmax.f32 %v6825_v47, 0.0  ;;  %v6690_v6 = vmul.f32 %v12197_v8, %v6594_v36  ;;  %v6402_v47 = vor.u32 %v6400_v57, %v6398_v7  ;;  %v8790_v8 = vld [vmem:[#allocation3 + $0x28] sm:$0xff] }
 0x564   : >> { %v6649_v11 = vmul.f32 %v12199_v43, %v5983_v10  ;;  %v12201_v10 = vld [vmem:[#allocation99_spill] sm:$0xff] }
 0x565   : >> { %6889 = vst.msk [vmem:[#allocation3 + $0x20] sm:$0xff] %vm12200_vm11, %v6857_v26  ;;  %v6722_v37 = vadd.f32 %v6690_v6, %v10851_v15  ;;  %v6407_v15 = vsel %vm2075_vm0, %v6402_v47, %v6406_v61 }
 0x566   : >> { %v11135_v29 = vadd.f32 %v6649_v11, %v6184_v16  ;;  %v11149_v16 = vpop.f32.mrf.mxu2 }
 0x567   : >> { %v6758_v17 = vmul.f32 %v11048_v55, %v6722_v37  ;;  %v8791_v37 = vld [vmem:[#allocation3 + $0x30] sm:$0xff] }
 0x568   : >> { %v6148_v21 = vpop.f32.mrf.mxu0  ;;  %v6524_v35 = vpop.f32.mrf.mxu1 }
 0x569   : >> { %v6794_v36 = vadd.f32 %v11056_v52, %v6758_v17  ;;  %v6595_v20 = vadd.f32 %v6524_v35, %v10858_v33  ;;  %v5947_v39 = vpop.f32.mrf.mxu3  ;;  %v6185_v40 = vadd.f32 %v6148_v21, %v10725_v25  ;;  %v7901_v33 = vld [vmem:[#allocation2 + $0x80] sm:$0xff] }
 0x56a   : >> { %v5984_v26 = vadd.f32 %v5947_v39, %v12201_v10  ;;  %v12204_v21 = vld [vmem:[#allocation100_spill] sm:$0xff]  ;;  %v6412_v47 = vshll.u32 %v7901_v33, 16 }
 0x56b   : >> { %v6826_v6 = vadd.f32 %v8790_v8, %v6794_v36  ;;  %v6723_v34 = vadd.f32 %v10868_v49, %v6595_v20  ;;  %7797 = vmatmul.msk.bf16.gmra.mxu1 %vm12202_vm12, %v6407_v15  ;;  %v12205_v20 = vld [vmem:[#allocation23_spill] sm:$0xff] }
 0x56c   : >> { %v11146_v53 = vadd.f32 %v6185_v40, %v5984_v26  ;;  %v12206_v40 = vld [vmem:[#allocation101_spill] sm:$0xff]  ;;  %v12207_v26 = vld [vmem:[#allocation19_spill] sm:$0xff] }
 0x56d   : >> { %v6858_v7 = vmax.f32 %v6826_v6, 0.0  ;;  %v6759_v9 = vmul.f32 %v11048_v55, %v6723_v34  ;;  %v6408_v34 = vshrl.u32 %v11121_v22, 16 }
 0x56f   : >> { %6890 = vst.msk [vmem:[#allocation3 + $0x28] sm:$0xff] %vm12203_vm13, %v6858_v7  ;;  %v6795_v25 = vadd.f32 %v11056_v52, %v6759_v9  ;;  %v5475_v7 = vadd.f32 %v11074_v41, %v10748_v0 }
 0x570   : >> { %v6151_v43 = vpop.f32.mrf.mxu0  ;;  %v6526_v11 = vpop.f32.mrf.mxu1 }
 0x571   : >> { %v6827_v57 = vadd.f32 %v8791_v37, %v6795_v25  ;;  %v6596_v49 = vadd.f32 %v6526_v11, %v10871_v14  ;;  %v5950_v17 = vpop.f32.mrf.mxu3  ;;  %v6186_v10 = vadd.f32 %v6151_v43, %v12206_v40  ;;  %v6414_v14 = vrot.slane %v6412_v47, 1  ;;  %v11166_v11 = vpop.f32.mrf.mxu2  ;;  %v8793_v40 = vld [vmem:[#allocation3 + $0x40] sm:$0xff] }
 0x572   : >> { %v5985_v35 = vadd.f32 %v5950_v17, %v12204_v21  ;;  %v6410_v37 = vor.u32 %v6408_v34, %v6406_v61  ;;  %v12211_v34 = vld [vmem:[#allocation24_spill] sm:$0xff] }
 0x573   : >> { %v6859_v36 = vmax.f32 %v6827_v57, 0.0  ;;  %v6692_v39 = vmul.f32 %v12205_v20, %v6596_v49  ;;  %v7902_v20 = vld [vmem:[#allocation2 + $0x88] sm:$0xff] }
 0x574   : >> { %v6651_v15 = vmul.f32 %v12207_v26, %v5985_v35  ;;  %v6415_v22 = vsel %vm2075_vm0, %v6410_v37, %v6414_v14  ;;  %v8792_v35 = vld [vmem:[#allocation3 + $0x38] sm:$0xff] }
 0x575   : >> { %6891 = vst.msk [vmem:[#allocation3 + $0x30] sm:$0xff] %vm12208_vm15, %v6859_v36  ;;  %v6724_v8 = vadd.f32 %v6692_v39, %v10882_v19  ;;  %v5477_v39 = vadd.f32 %v11096_v1, %v10766_v32  ;;  %v5480_v1 = vadd.f32 %v11111_v12, %v10782_v13  ;;  %v7903_v12 = vld [vmem:[#allocation2 + $0x90] sm:$0xff] }
 0x576   : >> { %v11160_v6 = vadd.f32 %v6651_v15, %v6186_v10  ;;  %v6420_v15 = vshll.u32 %v7902_v20, 16 }
 0x577   : >> { %v6760_v9 = vmul.f32 %v11048_v55, %v6724_v8 }
 0x578   : >> { %v6153_v25 = vpop.f32.mrf.mxu0  ;;  %v6529_v43 = vpop.f32.mrf.mxu1  ;;  %v6422_v32 = vrot.slane %v6420_v15, 1  ;;  %v6220_v15 = vld [vmem:[#allocation2 + $0x98] sm:$0x1] }
 0x579   : >> { %v6796_v57 = vadd.f32 %v11056_v52, %v6760_v9  ;;  %v6597_v49 = vadd.f32 %v6529_v43, %v5475_v7  ;;  %v5952_v17 = vpop.f32.mrf.mxu3  ;;  %v6187_v19 = vadd.f32 %v6153_v25, %v10750_v56  ;;  %v6416_v25 = vshrl.u32 %v7901_v33, 16 }
 0x57a   : >> { %v5986_v21 = vadd.f32 %v5952_v17, %v10746_v42 }
 0x57b   : >> { %v6828_v47 = vadd.f32 %v8792_v35, %v6796_v57  ;;  %v6725_v0 = vadd.f32 %v10897_v38, %v6597_v49  ;;  %7798 = vmatmul.msk.bf16.gmra.mxu1 %vm12209_vm14, %v6415_v22  ;;  %v11181_v38 = vpop.f32.mrf.mxu2  ;;  %v6418_v57 = vor.u32 %v6416_v25, %v6414_v14  ;;  %v5482_v14 = vadd.f32 %v11129_v63, %v10800_v28 }
 0x57c   : >> { %v11174_v41 = vadd.f32 %v6187_v19, %v5986_v21  ;;  %v8794_v21 = vld [vmem:[#allocation3 + $0x48] sm:$0xff]  ;;  %v6290_v25 = vunpack.c.l.b16 %v6220_v15 }
 0x57d   : >> { %v6860_v36 = vmax.f32 %v6828_v47, 0.0  ;;  %v6761_v61 = vmul.f32 %v11048_v55, %v6725_v0  ;;  %v6423_v19 = vsel %vm2075_vm0, %v6418_v57, %v6422_v32 }
 0x57f   : >> { %6892 = vst.msk [vmem:[#allocation3 + $0x38] sm:$0xff] %vm12210_vm2, %v6860_v36  ;;  %v6797_v56 = vadd.f32 %v11056_v52, %v6761_v61  ;;  %v8795_v36 = vld [vmem:[#allocation3 + $0x50] sm:$0xff] }
 0x580   : >> { %v6531_v42 = vpop.f32.mrf.mxu1 }
 0x581   : >> { %v6829_v10 = vadd.f32 %v8793_v40, %v6797_v56  ;;  %v6598_v26 = vadd.f32 %v6531_v42, %v5477_v39  ;;  %v12215_v42 = vld [vmem:[#allocation25_spill] sm:$0xff] }
 0x583   : >> { %v6861_v8 = vmax.f32 %v6829_v10, 0.0  ;;  %v6694_v7 = vmul.f32 %v12211_v34, %v6598_v26  ;;  %v6424_v10 = vshrl.u32 %v7902_v20, 16  ;;  %v5485_v34 = vadd.f32 %v11149_v16, %v10815_v48 }
 0x584   : >> { %v5487_v48 = vadd.f32 %v11166_v11, %v10831_v58  ;;  %v5490_v11 = vadd.f32 %v11181_v38, %v10845_v3 }
 0x585   : >> { %6893 = vst.msk [vmem:[#allocation3 + $0x40] sm:$0xff] %vm12212_vm3, %v6861_v8  ;;  %v6726_v9 = vadd.f32 %v6694_v7, %v10908_v60  ;;  %v11193_v60 = vpop.f32.mrf.mxu2  ;;  %v6426_v28 = vor.u32 %v6424_v10, %v6422_v32  ;;  %v6307_v32 = vpack.c.b16 %v6290_v25, %v6290_v25  ;;  %v8798_v10 = vld [vmem:[#allocation3 + $0x68] sm:$0xff] }
 0x586   : >> { %v5492_v3 = vadd.f32 %v11193_v60, %v10863_v18 }
 0x587   : >> { %v6762_v43 = vmul.f32 %v11048_v55, %v6726_v9 }
 0x588   : >> { %v6534_v37 = vpop.f32.mrf.mxu1 }
 0x589   : >> { %v6798_v49 = vadd.f32 %v11056_v52, %v6762_v43  ;;  %v6599_v17 = vadd.f32 %v6534_v37, %v5480_v1  ;;  %v8796_v37 = vld [vmem:[#allocation3 + $0x58] sm:$0xff] }
 0x58b   : >> { %v6830_v22 = vadd.f32 %v8794_v21, %v6798_v49  ;;  %v6727_v35 = vadd.f32 %v10923_v59, %v6599_v17  ;;  %7799 = vmatmul.msk.bf16.gmra.mxu1 %vm12213_vm4, %v6423_v19  ;;  %v6428_v59 = vshll.u32 %v7903_v12, 16 }
 0x58d   : >> { %v6862_v33 = vmax.f32 %v6830_v22, 0.0  ;;  %v6763_v13 = vmul.f32 %v11048_v55, %v6727_v35  ;;  %v5494_v8 = vpop.f32.mrf.mxu2  ;;  %v6430_v63 = vrot.slane %v6428_v59, 1  ;;  %v6432_v22 = vshrl.u32 %v7903_v12, 16 }
 0x58e   : >> { %v6436_v35 = vshll.u32 %v6307_v32, 16  ;;  %v8800_v32 = vld [vmem:[#allocation3 + $0x78] sm:$0xff] }
 0x58f   : >> { %6894 = vst.msk [vmem:[#allocation3 + $0x48] sm:$0xff] %vm12214_vm5, %v6862_v33  ;;  %v6799_v47 = vadd.f32 %v11056_v52, %v6763_v13  ;;  %v6431_v20 = vsel %vm2075_vm0, %v6426_v28, %v6430_v63  ;;  %v8797_v33 = vld [vmem:[#allocation3 + $0x60] sm:$0xff] }
 0x590   : >> { %v6536_v0 = vpop.f32.mrf.mxu1 }
 0x591   : >> { %v6831_v61 = vadd.f32 %v8795_v36, %v6799_v47  ;;  %v6600_v39 = vadd.f32 %v6536_v0, %v5482_v14  ;;  %v12218_v47 = vld [vmem:[#allocation26_spill] sm:$0xff]  ;;  %v6434_v36 = vor.u32 %v6432_v22, %v6430_v63  ;;  %v12224_v22 = vld [vmem:[#allocation60_spill] sm:$0xff] }
 0x593   : >> { %v6863_v56 = vmax.f32 %v6831_v61, 0.0  ;;  %v6696_v40 = vmul.f32 %v12215_v42, %v6600_v39  ;;  %v6438_v61 = vrot.slane %v6436_v35, 1 }
 0x595   : >> { %6895 = vst.msk [vmem:[#allocation3 + $0x50] sm:$0xff] %vm11915_vm1, %v6863_v56  ;;  %v6728_v26 = vadd.f32 %v6696_v40, %v10937_v24  ;;  %v5496_v19 = vpop.f32.mrf.mxu2  ;;  %v6439_v12 = vsel %vm2075_vm0, %v6434_v36, %v6438_v61  ;;  %vm12223_vm0 = vmmov %vm11915_vm1 }
 0x596   : >> { %v5497_v35 = vadd.f32 %v5496_v19, %v12224_v22  ;;  %vm12225_vm11 = vmmov %vm12223_vm0 }
 0x597   : >> { %v6764_v7 = vmul.f32 %v11048_v55, %v6728_v26  ;;  %vm12227_vm12 = vmmov %vm12223_vm0 }
 0x598   : >> { %v6539_v9 = vpop.f32.mrf.mxu1  ;;  %vm12230_vm13 = vmmov %vm12223_vm0 }
 0x599   : >> { %v6800_v1 = vadd.f32 %v11056_v52, %v6764_v7  ;;  %v6601_v43 = vadd.f32 %v6539_v9, %v5485_v34  ;;  %v8799_v34 = vld [vmem:[#allocation3 + $0x70] sm:$0xff]  ;;  %vm12232_vm15 = vmmov %vm12223_vm0 }
 0x59a   : >> { %vm12237_vm14 = vmmov %vm12223_vm0 }
 0x59b   : >> { %v6832_v57 = vadd.f32 %v8796_v37, %v6800_v1  ;;  %v6729_v24 = vadd.f32 %v10949_v30, %v6601_v43  ;;  %7800 = vmatmul.msk.bf16.gmra.mxu1 %vm12216_vm6, %v6431_v20  ;;  %v12222_v1 = vld [vmem:[#allocation27_spill] sm:$0xff]  ;;  %v5495_v37 = vadd.f32 %v5494_v8, %v10876_v5  ;;  %v8801_v8 = vld [vmem:[#allocation3 + $0x80] sm:$0xff]  ;;  %vm12239_vm2 = vmmov %vm12223_vm0 }
 0x59c   : >> { %vm12243_vm3 = vmmov %vm12223_vm0 }
 0x59d   : >> { %v6864_v49 = vmax.f32 %v6832_v57, 0.0  ;;  %v6765_v17 = vmul.f32 %v11048_v55, %v6729_v24  ;;  %v5499_v40 = vpop.f32.mrf.mxu2  ;;  %vm12245_vm4 = vmmov %vm12223_vm0 }
 0x59e   : >> { %vm12248_vm5 = vmmov %vm12223_vm0 }
 0x59f   : >> { %6896 = vst.msk [vmem:[#allocation3 + $0x58] sm:$0xff] %vm12217_vm7, %v6864_v49  ;;  %v6801_v16 = vadd.f32 %v11056_v52, %v6765_v17  ;;  %vm12250_vm1 = vmmov %vm12223_vm0 }
 0x5a0   : >> { %v6541_v21 = vpop.f32.mrf.mxu1  ;;  %vm12253_vm6 = vmmov %vm12223_vm0 }
 0x5a1   : >> { %v6833_v13 = vadd.f32 %v8797_v33, %v6801_v16  ;;  %v6602_v30 = vadd.f32 %v6541_v21, %v5487_v48  ;;  %vm12255_vm7 = vmmov %vm12223_vm0 }
 0x5a3   : >> { %v6865_v14 = vmax.f32 %v6833_v13, 0.0  ;;  %v6698_v0 = vmul.f32 %v12218_v47, %v6602_v30 }
 0x5a5   : >> { %6897 = vst.msk [vmem:[#allocation3 + $0x60] sm:$0xff] %vm12219_vm8, %v6865_v14  ;;  %v6730_v58 = vadd.f32 %v6698_v0, %v10960_v4  ;;  %v12226_v14 = vld [vmem:[#allocation28_spill] sm:$0xff]  ;;  %v12228_v0 = vld [vmem:[#allocation50_spill] sm:$0xff]  ;;  %vm12258_vm8 = vmmov %vm12223_vm0 }
 0x5a6   : >> { %v5500_v36 = vadd.f32 %v5499_v40, %v12228_v0 }
 0x5a7   : >> { %v6766_v39 = vmul.f32 %v11048_v55, %v6730_v58 }
 0x5a8   : >> { %v6544_v59 = vpop.f32.mrf.mxu1 }
 0x5a9   : >> { %v6802_v56 = vadd.f32 %v11056_v52, %v6766_v39  ;;  %v6603_v42 = vadd.f32 %v6544_v59, %v5490_v11  ;;  %v8802_v59 = vld [vmem:[#allocation3 + $0x88] sm:$0xff] }
 0x5ab   : >> { %v6834_v26 = vadd.f32 %v8798_v10, %v6802_v56  ;;  %v6731_v15 = vadd.f32 %v10972_v45, %v6603_v42  ;;  %7801 = vmatmul.msk.bf16.gmra.mxu1 %vm12220_vm9, %v6439_v12  ;;  %v5501_v45 = vpop.f32.mrf.mxu2  ;;  %vm12260_vm9 = vmmov %vm12223_vm0 }
 0x5ad   : >> { %v6866_v28 = vmax.f32 %v6834_v26, 0.0  ;;  %v6767_v4 = vmul.f32 %v11048_v55, %v6731_v15  ;;  %v12229_v26 = vld [vmem:[#allocation68_spill] sm:$0xff] }
 0x5ae   : >> { %v5502_v15 = vadd.f32 %v5501_v45, %v12229_v26 }
 0x5af   : >> { %6898 = vst.msk [vmem:[#allocation3 + $0x68] sm:$0xff] %vm12221_vm10, %v6866_v28  ;;  %v6803_v38 = vadd.f32 %v11056_v52, %v6767_v4  ;;  %v8803_v28 = vld [vmem:[#allocation3 + $0x90] sm:$0xff]  ;;  %vm12263_vm10 = vmmov %vm12223_vm0 }
 0x5b0   : >> { %v6546_v63 = vpop.f32.mrf.mxu1 }
 0x5b1   : >> { %v6835_v7 = vadd.f32 %v8799_v34, %v6803_v38  ;;  %v6604_v9 = vadd.f32 %v6546_v63, %v5492_v3  ;;  %v12231_v34 = vld [vmem:[#allocation29_spill] sm:$0xff] }
 0x5b3   : >> { %v6867_v25 = vmax.f32 %v6835_v7, 0.0  ;;  %v6700_v43 = vmul.f32 %v12222_v1, %v6604_v9  ;;  %v5504_v21 = vpop.f32.mrf.mxu2 }
 0x5b5   : >> { %6899 = vst.msk [vmem:[#allocation3 + $0x70] sm:$0xff] %vm12223_vm0, %v6867_v25  ;;  %v6732_v20 = vadd.f32 %v6700_v43, %v10981_v31  ;;  %v12234_v25 = vld [vmem:[#allocation44_spill] sm:$0xff] }
 0x5b6   : >> { %v5505_v1 = vadd.f32 %v5504_v21, %v12234_v25 }
 0x5b7   : >> { %v6768_v18 = vmul.f32 %v11048_v55, %v6732_v20 }
 0x5b8   : >> { %v6549_v60 = vpop.f32.mrf.mxu1 }
 0x5b9   : >> { %v6804_v57 = vadd.f32 %v11056_v52, %v6768_v18  ;;  %v6605_v24 = vadd.f32 %v6549_v60, %v5495_v37  ;;  %v8804_v18 = vld [vmem:[#allocation3 + $0x98] sm:$0xff] }
 0x5bb   : >> { %v6836_v49 = vadd.f32 %v8800_v32, %v6804_v57  ;;  %v6733_v17 = vadd.f32 %v10989_v44, %v6605_v24  ;;  %v5506_v19 = vpop.f32.mrf.mxu2  ;;  %v12235_v57 = vld [vmem:[#allocation75_spill] sm:$0xff] }
 0x5bd   : >> { %v6868_v48 = vmax.f32 %v6836_v49, 0.0  ;;  %v6769_v16 = vmul.f32 %v11048_v55, %v6733_v17 }
 0x5bf   : >> { %6900 = vst.msk [vmem:[#allocation3 + $0x78] sm:$0xff] %vm12225_vm11, %v6868_v48  ;;  %v6805_v5 = vadd.f32 %v11056_v52, %v6769_v16  ;;  %v12236_v48 = vld [vmem:[#allocation70_spill] sm:$0xff]  ;;  %vm12265_vm11 = vmmov %vm12223_vm0 }
 0x5c0   : >> { %v6551_v31 = vpop.f32.mrf.mxu1  ;;  %v5507_v16 = vadd.f32 %v5506_v19, %v12236_v48 }
 0x5c1   : >> { %v6837_v33 = vadd.f32 %v8801_v8, %v6805_v5  ;;  %v6606_v13 = vadd.f32 %v6551_v31, %v5497_v35  ;;  %v8805_v35 = vld [vmem:[#allocation3 + $0xa0] sm:$0xff] }
 0x5c3   : >> { %v6869_v30 = vmax.f32 %v6837_v33, 0.0  ;;  %v6702_v47 = vmul.f32 %v12226_v14, %v6606_v13  ;;  %v5509_v38 = vpop.f32.mrf.mxu2  ;;  %v12238_v33 = vld [vmem:[#allocation30_spill] sm:$0xff] }
 0x5c5   : >> { %6901 = vst.msk [vmem:[#allocation3 + $0x80] sm:$0xff] %vm12227_vm12, %v6869_v30  ;;  %v6734_v44 = vadd.f32 %v6702_v47, %v10998_v54  ;;  %v12240_v30 = vld [vmem:[#allocation76_spill] sm:$0xff]  ;;  %vm12266_vm12 = vcmask (%p997_p4), 257024  }
 0x5c7   : >> { %v6770_v61 = vmul.f32 %v11048_v55, %v6734_v44  ;;  %v12241_v44 = vld [vmem:[#allocation69_spill] sm:$0xff] }
 0x5c8   : >> { %v6554_v58 = vpop.f32.mrf.mxu1  ;;  %v5510_v0 = vadd.f32 %v5509_v38, %v12241_v44  ;;  %v12244_v38 = vld [vmem:[#allocation31_spill] sm:$0xff] }
 0x5c9   : >> { %v6806_v11 = vadd.f32 %v11056_v52, %v6770_v61  ;;  %v6607_v39 = vadd.f32 %v6554_v58, %v5500_v36 }
 0x5cb   : >> { %v6838_v12 = vadd.f32 %v8802_v59, %v6806_v11  ;;  %v6735_v56 = vadd.f32 %v11006_v2, %v6607_v39  ;;  %v12233_v2 = vld [vmem:[#allocation63_spill] sm:$0xff]  ;;  %v5511_v32 = vpop.f32.mrf.mxu2  ;;  %v8806_v11 = vld [vmem:[#allocation3 + $0xa8] sm:$0xff] }
 0x5cd   : >> { %v6870_v42 = vmax.f32 %v6838_v12, 0.0  ;;  %v6771_v10 = vmul.f32 %v11048_v55, %v6735_v56 }
 0x5cf   : >> { %6902 = vst.msk [vmem:[#allocation3 + $0x88] sm:$0xff] %vm12230_vm13, %v6870_v42  ;;  %v6807_v54 = vadd.f32 %v11056_v52, %v6771_v10  ;;  %v12242_v42 = vld [vmem:[#allocation62_spill] sm:$0xff]  ;;  %vm12267_vm13 = vmmov (%p997_p4), %vm12266_vm12 }
 0x5d0   : >> { %v6556_v40 = vpop.f32.mrf.mxu1  ;;  %v5512_v10 = vadd.f32 %v5511_v32, %v12242_v42  ;;  %v12254_v42 = vld [vmem:[#allocation33_spill] sm:$0xff] }
 0x5d1   : >> { %v6839_v4 = vadd.f32 %v8803_v28, %v6807_v54  ;;  %v6608_v3 = vadd.f32 %v6556_v40, %v5502_v15  ;;  %v8807_v40 = vld [vmem:[#allocation3 + $0xb0] sm:$0xff] }
 0x5d3   : >> { %v6871_v63 = vmax.f32 %v6839_v4, 0.0  ;;  %v6704_v7 = vmul.f32 %v12231_v34, %v6608_v3  ;;  %v5514_v47 = vpop.f32.mrf.mxu2  ;;  %v12246_v34 = vld [vmem:[#allocation56_spill] sm:$0xff] }
 0x5d5   : >> { %6903 = vst.msk [vmem:[#allocation3 + $0x90] sm:$0xff] %vm12232_vm15, %v6871_v63  ;;  %v6736_v9 = vadd.f32 %v6704_v7, %v12233_v2  ;;  %v5515_v7 = vadd.f32 %v5514_v47, %v12246_v34  ;;  %vm12268_vm15 = vmmov (%p997_p4), %vm12266_vm12 }
 0x5d7   : >> { %v6772_v43 = vmul.f32 %v11048_v55, %v6736_v9 }
 0x5d8   : >> { %v6559_v45 = vpop.f32.mrf.mxu1 }
 0x5d9   : >> { %v6808_v20 = vadd.f32 %v11056_v52, %v6772_v43  ;;  %v6609_v37 = vadd.f32 %v6559_v45, %v5505_v1  ;;  %v8808_v45 = vld [vmem:[#allocation3 + $0xb8] sm:$0xff] }
 0x5db   : >> { %v6840_v60 = vadd.f32 %v8804_v18, %v6808_v20  ;;  %v6737_v24 = vadd.f32 %v12235_v57, %v6609_v37  ;;  %v5516_v15 = vpop.f32.mrf.mxu2  ;;  %v12247_v57 = vld [vmem:[#allocation71_spill] sm:$0xff] }
 0x5dd   : >> { %v6872_v49 = vmax.f32 %v6840_v60, 0.0  ;;  %v6773_v17 = vmul.f32 %v11048_v55, %v6737_v24  ;;  %v5517_v24 = vadd.f32 %v5516_v15, %v12247_v57  ;;  %v12261_v57 = vld [vmem:[#allocation46_spill] sm:$0xff] }
 0x5df   : >> { %6904 = vst.msk [vmem:[#allocation3 + $0x98] sm:$0xff] %vm12237_vm14, %v6872_v49  ;;  %v6809_v21 = vadd.f32 %v11056_v52, %v6773_v17  ;;  %v8809_v49 = vld [vmem:[#allocation3 + $0xc0] sm:$0xff]  ;;  %vm12269_vm14 = vmmov (%p997_p4), %vm12266_vm12 }
 0x5e0   : >> { %v6561_v22 = vpop.f32.mrf.mxu1 }
 0x5e1   : >> { %v6841_v5 = vadd.f32 %v8805_v35, %v6809_v21  ;;  %v6610_v31 = vadd.f32 %v6561_v22, %v5507_v16  ;;  %v12249_v21 = vld [vmem:[#allocation32_spill] sm:$0xff] }
 0x5e3   : >> { %v6873_v8 = vmax.f32 %v6841_v5, 0.0  ;;  %v6706_v13 = vmul.f32 %v12238_v33, %v6610_v31  ;;  %v5519_v43 = vpop.f32.mrf.mxu2  ;;  %v12251_v5 = vld [vmem:[#allocation61_spill] sm:$0xff] }
 0x5e4   : >> { %v5520_v31 = vadd.f32 %v5519_v43, %v12251_v5  ;;  %v12262_v5 = vld [vmem:[#allocation38_spill] sm:$0xff] }
 0x5e5   : >> { %6905 = vst.msk [vmem:[#allocation3 + $0xa0] sm:$0xff] %vm12239_vm2, %v6873_v8  ;;  %v6738_v14 = vadd.f32 %v6706_v13, %v12240_v30  ;;  %vm12270_vm2 = vmmov (%p997_p4), %vm12266_vm12 }
 0x5e7   : >> { %v6774_v36 = vmul.f32 %v11048_v55, %v6738_v14  ;;  %v8810_v14 = vld [vmem:[#allocation3 + $0xc8] sm:$0xff] }
 0x5e8   : >> { %v6564_v61 = vpop.f32.mrf.mxu1 }
 0x5e9   : >> { %v6810_v19 = vadd.f32 %v11056_v52, %v6774_v36  ;;  %v6611_v58 = vadd.f32 %v6564_v61, %v5510_v0 }
 0x5eb   : >> { %v6842_v39 = vadd.f32 %v8806_v11, %v6810_v19  ;;  %v6739_v59 = vadd.f32 %v11040_v50, %v6611_v58  ;;  %v5521_v35 = vpop.f32.mrf.mxu2  ;;  %v12252_v19 = vld [vmem:[#allocation58_spill] sm:$0xff] }
 0x5ec   : >> { %v5522_v58 = vadd.f32 %v5521_v35, %v12252_v19 }
 0x5ed   : >> { %v6874_v12 = vmax.f32 %v6842_v39, 0.0  ;;  %v6775_v56 = vmul.f32 %v11048_v55, %v6739_v59  ;;  %v8811_v39 = vld [vmem:[#allocation3 + $0xd0] sm:$0xff] }
 0x5ef   : >> { %6906 = vst.msk [vmem:[#allocation3 + $0xa8] sm:$0xff] %vm12243_vm3, %v6874_v12  ;;  %v6811_v26 = vadd.f32 %v11056_v52, %v6775_v56  ;;  %vm12271_vm3 = vmmov (%p997_p4), %vm12270_vm2 }
 0x5f0   : >> { %v6566_v54 = vpop.f32.mrf.mxu1 }
 0x5f1   : >> { %v6843_v28 = vadd.f32 %v8807_v40, %v6811_v26  ;;  %v6612_v4 = vadd.f32 %v6566_v54, %v5512_v10  ;;  %v12256_v26 = vld [vmem:[#allocation73_spill] sm:$0xff] }
 0x5f3   : >> { %v6875_v3 = vmax.f32 %v6843_v28, 0.0  ;;  %v6708_v63 = vmul.f32 %v12244_v38, %v6612_v4  ;;  %v5524_v61 = vpop.f32.mrf.mxu2  ;;  %v8812_v38 = vld [vmem:[#allocation3 + $0xd8] sm:$0xff] }
 0x5f4   : >> { %v5525_v15 = vadd.f32 %v5524_v61, %v12256_v26  ;;  %v8816_v61 = vld [vmem:[#allocation3 + $0xf8] sm:$0xff] }
 0x5f5   : >> { %6907 = vst.msk [vmem:[#allocation3 + $0xb0] sm:$0xff] %vm12245_vm4, %v6875_v3  ;;  %v6740_v50 = vadd.f32 %v6708_v63, %v11059_v62  ;;  %v6924_v26 = vld [vmem:[#allocation3 + $0x38] sm:$0xff] (%p997_p4)  ;;  %vm12272_vm4 = vmmov (%p997_p4), %vm12270_vm2 }
 0x5f7   : >> { %v6776_v2 = vmul.f32 %v11048_v55, %v6740_v50 }
 0x5f8   : >> { %v6569_v9 = vpop.f32.mrf.mxu1 }
 0x5f9   : >> { %v6812_v25 = vadd.f32 %v11056_v52, %v6776_v2  ;;  %v6613_v1 = vadd.f32 %v6569_v9, %v5515_v7  ;;  %v12257_v2 = vld [vmem:[#allocation74_spill] sm:$0xff] }
 0x5fb   : >> { %v6844_v20 = vadd.f32 %v8808_v45, %v6812_v25  ;;  %v6741_v37 = vadd.f32 %v11076_v51, %v6613_v1  ;;  %v5526_v40 = vpop.f32.mrf.mxu2  ;;  %v8813_v1 = vld [vmem:[#allocation3 + $0xe0] sm:$0xff] }
 0x5fc   : >> { %v5527_v9 = vadd.f32 %v5526_v40, %v12257_v2  ;;  %v6930_v2 = vld [vmem:[#allocation3 + $0x68] sm:$0xff] (%p997_p4) }
 0x5fd   : >> { %v6876_v18 = vmax.f32 %v6844_v20, 0.0  ;;  %v6777_v60 = vmul.f32 %v11048_v55, %v6741_v37 }
 0x5ff   : >> { %6908 = vst.msk [vmem:[#allocation3 + $0xb8] sm:$0xff] %vm12248_vm5, %v6876_v18  ;;  %v6813_v62 = vadd.f32 %v11056_v52, %v6777_v60  ;;  %v12259_v18 = vld [vmem:[#allocation34_spill] sm:$0xff]  ;;  %vm12273_vm5 = vmmov (%p997_p4), %vm12270_vm2 }
 0x600   : >> { %v6571_v32 = vpop.f32.mrf.mxu1 }
 0x601   : >> { %v6845_v17 = vadd.f32 %v8809_v49, %v6813_v62  ;;  %v6614_v48 = vadd.f32 %v6571_v32, %v5517_v24 }
 0x603   : >> { %v6877_v16 = vmax.f32 %v6845_v17, 0.0  ;;  %v6710_v22 = vmul.f32 %v12249_v21, %v6614_v48  ;;  %v5529_v20 = vpop.f32.mrf.mxu2  ;;  %v8814_v48 = vld [vmem:[#allocation3 + $0xe8] sm:$0xff] }
 0x604   : >> { %v5530_v24 = vadd.f32 %v5529_v20, %v12261_v57  ;;  %v6936_v57 = vld [vmem:[#allocation3 + $0x98] sm:$0xff] (%p997_p4) }
 0x605   : >> { %6909 = vst.msk [vmem:[#allocation3 + $0xc0] sm:$0xff] %vm12250_vm1, %v6877_v16  ;;  %v6742_v51 = vadd.f32 %v6710_v22, %v11087_v46  ;;  %vm12274_vm1 = vmmov (%p997_p4), %vm12270_vm2 }
 0x607   : >> { %v6778_v8 = vmul.f32 %v11048_v55, %v6742_v51 }
 0x608   : >> { %v6574_v33 = vpop.f32.mrf.mxu1 }
 0x609   : >> { %v6814_v13 = vadd.f32 %v11056_v52, %v6778_v8  ;;  %v6615_v30 = vadd.f32 %v6574_v33, %v5520_v31  ;;  %v8815_v33 = vld [vmem:[#allocation3 + $0xf0] sm:$0xff] }
 0x60b   : >> { %v6846_v47 = vadd.f32 %v8810_v14, %v6814_v13  ;;  %v6743_v44 = vadd.f32 %v11105_v23, %v6615_v30  ;;  %v5531_v22 = vpop.f32.mrf.mxu2 }
 0x60c   : >> { %v5532_v31 = vadd.f32 %v5531_v22, %v12262_v5 }
 0x60d   : >> { %v6878_v0 = vmax.f32 %v6846_v47, 0.0  ;;  %v6779_v36 = vmul.f32 %v11048_v55, %v6743_v44  ;;  %v12264_v47 = vld [vmem:[#allocation35_spill] sm:$0xff] }
 0x60f   : >> { %6910 = vst.msk [vmem:[#allocation3 + $0xc8] sm:$0xff] %vm12253_vm6, %v6878_v0  ;;  %v6815_v46 = vadd.f32 %v11056_v52, %v6779_v36  ;;  %vm12275_vm6 = vmmov (%p997_p4), %vm12274_vm1 }
 0x610   : >> { %v6576_v11 = vpop.f32.mrf.mxu1 }
 0x611   : >> { %v6847_v59 = vadd.f32 %v8811_v39, %v6815_v46  ;;  %v6616_v12 = vadd.f32 %v6576_v11, %v5522_v58  ;;  %v6917_v46 = vld [vmem:[#allocation3] sm:$0xff] (%p997_p4)  ;;  %v6918_v11 = vld [vmem:[#allocation3 + $0x8] sm:$0xff] (%p997_p4) }
 0x612   : > { %v6950_v39 = vpack.c.bf16 (%p997_p4), %v6918_v11, %v6918_v11 }
 0x613   : >> { %v6879_v56 = vmax.f32 %v6847_v59, 0.0  ;;  %v6712_v10 = vmul.f32 %v12254_v42, %v6616_v12  ;;  %v6920_v59 = vld [vmem:[#allocation3 + $0x18] sm:$0xff] (%p997_p4)  ;;  %v6921_v12 = vld [vmem:[#allocation3 + $0x20] sm:$0xff] (%p997_p4) }
 0x614   : > { %v6952_v42 = vpack.c.bf16 (%p997_p4), %v6920_v59, %v6920_v59  ;;  %6982 = vst.msk [vmem:[%s8963_s29 + $0x4] sm:$0xf] (%p997_p4), %vm12267_vm13, %v6950_v39 }
 0x615   : >> { %6911 = vst.msk [vmem:[#allocation3 + $0xd0] sm:$0xff] %vm12255_vm7, %v6879_v56  ;;  %v6744_v23 = vadd.f32 %v6712_v10, %v11118_v27  ;;  %v6922_v56 = vld [vmem:[#allocation3 + $0x28] sm:$0xff] (%p997_p4)  ;;  %v6923_v10 = vld [vmem:[#allocation3 + $0x30] sm:$0xff] (%p997_p4)  ;;  %vm12276_vm7 = vmmov (%p997_p4), %vm12274_vm1 }
 0x616   : > { %v6955_v40 = vpack.c.bf16 (%p997_p4), %v6923_v10, %v6923_v10  ;;  %6984 = vst.msk [vmem:[%s8963_s29 + $0xc] sm:$0xf] (%p997_p4), %vm12269_vm14, %v6952_v42  ;;  %v6942_v5 = vld [vmem:[#allocation3 + $0xc8] sm:$0xff] (%p997_p4) }
 0x617   : >> { %v6780_v54 = vmul.f32 %v11048_v55, %v6744_v23  ;;  %v6953_v23 = vpack.c.bf16 (%p997_p4), %v6921_v12, %v6921_v12 }
 0x618   : >> { %v6579_v28 = vpop.f32.mrf.mxu1  ;;  %6987 = vst.msk [vmem:[%s8963_s29 + $0x18] sm:$0xf] (%p997_p4), %vm12272_vm4, %v6955_v40 }
 0x619   : >> { %v6816_v4 = vadd.f32 %v11056_v52, %v6780_v54  ;;  %v6617_v3 = vadd.f32 %v6579_v28, %v5525_v15  ;;  %v6954_v15 = vpack.c.bf16 (%p997_p4), %v6922_v56, %v6922_v56  ;;  %v6925_v54 = vld [vmem:[#allocation3 + $0x40] sm:$0xff] (%p997_p4)  ;;  %v6926_v28 = vld [vmem:[#allocation3 + $0x48] sm:$0xff] (%p997_p4)  ;;  %6985 = vst.msk [vmem:[%s8963_s29 + $0x10] sm:$0xf] (%p997_p4), %vm12270_vm2, %v6953_v23 }
 0x61b   : >> { %v6848_v63 = vadd.f32 %v8812_v38, %v6816_v4  ;;  %v6745_v50 = vadd.f32 %v11135_v29, %v6617_v3  ;;  %v6956_v4 = vpack.c.bf16 (%p997_p4), %v6924_v26, %v6924_v26  ;;  %v6927_v3 = vld [vmem:[#allocation3 + $0x50] sm:$0xff] (%p997_p4)  ;;  %v6957_v38 = vpack.c.bf16 (%p997_p4), %v6925_v54, %v6925_v54  ;;  %6986 = vst.msk [vmem:[%s8963_s29 + $0x14] sm:$0xf] (%p997_p4), %vm12271_vm3, %v6954_v15 }
 0x61d   : >> { %v6880_v34 = vmax.f32 %v6848_v63, 0.0  ;;  %v6781_v7 = vmul.f32 %v11048_v55, %v6745_v50  ;;  %v6928_v63 = vld [vmem:[#allocation3 + $0x58] sm:$0xff] (%p997_p4)  ;;  %v6958_v50 = vpack.c.bf16 (%p997_p4), %v6926_v28, %v6926_v28  ;;  %6988 = vst.msk [vmem:[%s8963_s29 + $0x1c] sm:$0xf] (%p997_p4), %vm12273_vm5, %v6956_v4 }
 0x61e   : > { %6989 = vst.msk [vmem:[%s8963_s29 + $0x20] sm:$0xf] (%p997_p4), %vm12274_vm1, %v6957_v38 }
 0x61f   : >> { %6912 = vst.msk [vmem:[#allocation3 + $0xd8] sm:$0xff] %vm12258_vm8, %v6880_v34  ;;  %v6817_v27 = vadd.f32 %v11056_v52, %v6781_v7  ;;  %v6929_v34 = vld [vmem:[#allocation3 + $0x60] sm:$0xff] (%p997_p4)  ;;  %v6959_v7 = vpack.c.bf16 (%p997_p4), %v6927_v3, %v6927_v3  ;;  %vm12277_vm8 = vmmov (%p997_p4), %vm12274_vm1 }
 0x620   : >> { %v6581_v25 = vpop.f32.mrf.mxu1  ;;  %6990 = vst.msk [vmem:[%s8963_s29 + $0x24] sm:$0xf] (%p997_p4), %vm12275_vm6, %v6958_v50 }
 0x621   : >> { %v6849_v43 = vadd.f32 %v8813_v1, %v6817_v27  ;;  %v6618_v45 = vadd.f32 %v6581_v25, %v5527_v9  ;;  %v6960_v9 = vpack.c.bf16 (%p997_p4), %v6928_v63, %v6928_v63  ;;  %v6931_v27 = vld [vmem:[#allocation3 + $0x70] sm:$0xff] (%p997_p4)  ;;  %v6961_v25 = vpack.c.bf16 (%p997_p4), %v6929_v34, %v6929_v34  ;;  %v6932_v1 = vld [vmem:[#allocation3 + $0x78] sm:$0xff] (%p997_p4)  ;;  %6991 = vst.msk [vmem:[%s8963_s29 + $0x28] sm:$0xf] (%p997_p4), %vm12276_vm7, %v6959_v7 }
 0x622   : > { %v6963_v20 = vpack.c.bf16 (%p997_p4), %v6931_v27, %v6931_v27 }
 0x623   : >> { %v6881_v37 = vmax.f32 %v6849_v43, 0.0  ;;  %v6714_v60 = vmul.f32 %v12259_v18, %v6618_v45  ;;  %v6962_v43 = vpack.c.bf16 (%p997_p4), %v6930_v2, %v6930_v2  ;;  %v6933_v45 = vld [vmem:[#allocation3 + $0x80] sm:$0xff] (%p997_p4)  ;;  %6992 = vst.msk [vmem:[%s8963_s29 + $0x2c] sm:$0xf] (%p997_p4), %vm12277_vm8, %v6960_v9  ;;  %v6964_v18 = vpack.c.bf16 (%p997_p4), %v6932_v1, %v6932_v1 }
 0x625   : >> { %6913 = vst.msk [vmem:[#allocation3 + $0xe0] sm:$0xff] %vm12260_vm9, %v6881_v37  ;;  %v6746_v29 = vadd.f32 %v6714_v60, %v11146_v53  ;;  %v6934_v37 = vld [vmem:[#allocation3 + $0x88] sm:$0xff] (%p997_p4)  ;;  %v6935_v60 = vld [vmem:[#allocation3 + $0x90] sm:$0xff] (%p997_p4)  ;;  %vm12278_vm9 = vmmov (%p997_p4), %vm12274_vm1 }
 0x626   : > { %6993 = vst.msk [vmem:[%s8963_s29 + $0x30] sm:$0xf] (%p997_p4), %vm12278_vm9, %v6961_v25 }
 0x627   : >> { %v6782_v62 = vmul.f32 %v11048_v55, %v6746_v29  ;;  %v6965_v29 = vpack.c.bf16 (%p997_p4), %v6933_v45, %v6933_v45 }
 0x628   : >> { %v6584_v32 = vpop.f32.mrf.mxu1 }
 0x629   : >> { %v6818_v49 = vadd.f32 %v11056_v52, %v6782_v62  ;;  %v6619_v17 = vadd.f32 %v6584_v32, %v5530_v24  ;;  %v6966_v24 = vpack.c.bf16 (%p997_p4), %v6934_v37, %v6934_v37  ;;  %v6937_v62 = vld [vmem:[#allocation3 + $0xa0] sm:$0xff] (%p997_p4)  ;;  %v6967_v32 = vpack.c.bf16 (%p997_p4), %v6935_v60, %v6935_v60 }
 0x62b   : >> { %v6850_v16 = vadd.f32 %v8814_v48, %v6818_v49  ;;  %v6747_v21 = vadd.f32 %v11160_v6, %v6619_v17  ;;  %v6938_v49 = vld [vmem:[#allocation3 + $0xa8] sm:$0xff] (%p997_p4)  ;;  %v6968_v17 = vpack.c.bf16 (%p997_p4), %v6936_v57, %v6936_v57  ;;  %v6939_v48 = vld [vmem:[#allocation3 + $0xb0] sm:$0xff] (%p997_p4) }
 0x62c   : > { %v6970_v22 = vpack.c.bf16 (%p997_p4), %v6938_v49, %v6938_v49 }
 0x62d   : >> { %v6882_v35 = vmax.f32 %v6850_v16, 0.0  ;;  %v6783_v51 = vmul.f32 %v11048_v55, %v6747_v21  ;;  %v6969_v16 = vpack.c.bf16 (%p997_p4), %v6937_v62, %v6937_v62  ;;  %v6940_v21 = vld [vmem:[#allocation3 + $0xb8] sm:$0xff] (%p997_p4) }
 0x62f   : >> { %6914 = vst.msk [vmem:[#allocation3 + $0xe8] sm:$0xff] %vm12263_vm10, %v6882_v35  ;;  %v6819_v53 = vadd.f32 %v11056_v52, %v6783_v51  ;;  %vm12279_vm10 = vmmov (%p997_p4), %vm12274_vm1  ;;  %v6941_v35 = vld [vmem:[#allocation3 + $0xc0] sm:$0xff] (%p997_p4)  ;;  %v6971_v51 = vpack.c.bf16 (%p997_p4), %v6939_v48, %v6939_v48 }
 0x630   : >> { %v6586_v8 = vpop.f32.mrf.mxu1  ;;  %6994 = vst.msk [vmem:[%s8963_s29 + $0x34] sm:$0xf] (%p997_p4), %vm12279_vm10, %v6962_v43 }
 0x631   : >> { %v6851_v13 = vadd.f32 %v8815_v33, %v6819_v53  ;;  %v6620_v30 = vadd.f32 %v6586_v8, %v5532_v31  ;;  %v6972_v31 = vpack.c.bf16 (%p997_p4), %v6940_v21, %v6940_v21  ;;  %v6943_v53 = vld [vmem:[#allocation3 + $0xd0] sm:$0xff] (%p997_p4)  ;;  %v6973_v8 = vpack.c.bf16 (%p997_p4), %v6941_v35, %v6941_v35  ;;  %v6944_v33 = vld [vmem:[#allocation3 + $0xd8] sm:$0xff] (%p997_p4) }
 0x633   : >> { %v6883_v14 = vmax.f32 %v6851_v13, 0.0  ;;  %v6716_v44 = vmul.f32 %v12264_v47, %v6620_v30  ;;  %v6974_v13 = vpack.c.bf16 (%p997_p4), %v6942_v5, %v6942_v5  ;;  %v6945_v30 = vld [vmem:[#allocation3 + $0xe0] sm:$0xff] (%p997_p4) }
 0x635   : >> { %6915 = vst.msk [vmem:[#allocation3 + $0xf0] sm:$0xff] %vm12223_vm0, %v6883_v14  ;;  %v6748_v6 = vadd.f32 %v6716_v44, %v11174_v41  ;;  %v6919_v41 = vld [vmem:[#allocation3 + $0x10] sm:$0xff] (%p997_p4)  ;;  %vm12280_vm0 = vmmov (%p997_p4), %vm12274_vm1  ;;  %v6975_v14 = vpack.c.bf16 (%p997_p4), %v6943_v53, %v6943_v53  ;;  %v6976_v44 = vpack.c.bf16 (%p997_p4), %v6944_v33, %v6944_v33 }
 0x636   : > { %6995 = vst.msk [vmem:[%s8963_s29 + $0x38] sm:$0xf] (%p997_p4), %vm12280_vm0, %v6963_v20  ;;  %vm12283_vm13 = vmmov (%p997_p4), %vm12280_vm0  ;;  %v6946_v47 = vld [vmem:[#allocation3 + $0xe8] sm:$0xff] (%p997_p4) }
 0x637   : >> { %v6784_v0 = vmul.f32 %v11048_v55, %v6748_v6  ;;  %v6949_v55 = vpack.c.bf16 (%p997_p4), %v6917_v46, %v6917_v46  ;;  %6998 = vst.msk [vmem:[%s8963_s29 + $0x44] sm:$0xf] (%p997_p4), %vm12283_vm13, %v6966_v24  ;;  %vm12285_vm14 = vmmov (%p997_p4), %vm12280_vm0 }
 0x638   : > { %7000 = vst.msk [vmem:[%s8963_s29 + $0x4c] sm:$0xf] (%p997_p4), %vm12285_vm14, %v6968_v17  ;;  %vm12286_vm2 = vmmov (%p997_p4), %vm12280_vm0 }
 0x639   : >> { %v6820_v36 = vadd.f32 %v11056_v52, %v6784_v0  ;;  %v6951_v52 = vpack.c.bf16 (%p997_p4), %v6919_v41, %v6919_v41  ;;  %6981 = vst.msk [vmem:[%s8963_s29] sm:$0xf] (%p997_p4), %vm12266_vm12, %v6949_v55  ;;  %vm12282_vm12 = vmmov (%p997_p4), %vm12280_vm0  ;;  %v6977_v0 = vpack.c.bf16 (%p997_p4), %v6945_v30, %v6945_v30 }
 0x63a   : > { %6997 = vst.msk [vmem:[%s8963_s29 + $0x40] sm:$0xf] (%p997_p4), %vm12282_vm12, %v6965_v29  ;;  %vm12287_vm3 = vmmov (%p997_p4), %vm12280_vm0 }
 0x63b   : >> { %v6852_v19 = vadd.f32 %v8816_v61, %v6820_v36  ;;  %999 = sbr.rel (!%p997_p4) target bundleno = 100 (0x64), region = 85  ;;  %6983 = vst.msk [vmem:[%s8963_s29 + $0x8] sm:$0xf] (%p997_p4), %vm12268_vm15, %v6951_v52  ;;  %vm12284_vm15 = vmmov (%p997_p4), %vm12280_vm0  ;;  %v6978_v61 = vpack.c.bf16 (%p997_p4), %v6946_v47, %v6946_v47 }
 0x63c   : > { %6999 = vst.msk [vmem:[%s8963_s29 + $0x48] sm:$0xf] (%p997_p4), %vm12284_vm15, %v6967_v32  ;;  %vm12288_vm4 = vmmov (%p997_p4), %vm12280_vm0  ;;  %v6947_v6 = vld [vmem:[#allocation3 + $0xf0] sm:$0xff] (%p997_p4) }
 0x63d   : >> { %v6884_v58 = vmax.f32 %v6852_v19, 0.0  ;;  %7001 = vst.msk [vmem:[%s8963_s29 + $0x50] sm:$0xf] (%p997_p4), %vm12286_vm2, %v6969_v16  ;;  %vm12289_vm5 = vmmov (%p997_p4), %vm12280_vm0  ;;  %v6979_v19 = vpack.c.bf16 (%p997_p4), %v6947_v6, %v6947_v6 }
 0x63e   : > { %7002 = vst.msk [vmem:[%s8963_s29 + $0x54] sm:$0xf] (%p997_p4), %vm12287_vm3, %v6970_v22  ;;  %vm12290_vm1 = vmmov (%p997_p4), %vm12280_vm0 }
 0x63f   : >> { %6916 = vst.msk [vmem:[#allocation3 + $0xf8] sm:$0xff] %vm12265_vm11, %v6884_v58  ;;  %vm12281_vm11 = vmmov (%p997_p4), %vm12280_vm0 }
 0x640   : > { %6996 = vst.msk [vmem:[%s8963_s29 + $0x3c] sm:$0xf] %vm12281_vm11, %v6964_v18  ;;  %vm12291_vm6 = vmmov %vm12280_vm0 }
 0x641   : > { %7003 = vst.msk [vmem:[%s8963_s29 + $0x58] sm:$0xf] %vm12288_vm4, %v6971_v51  ;;  %vm12292_vm7 = vmmov %vm12280_vm0 }
 0x642   : > { %7004 = vst.msk [vmem:[%s8963_s29 + $0x5c] sm:$0xf] %vm12289_vm5, %v6972_v31  ;;  %vm12293_vm8 = vmmov %vm12280_vm0 }
 0x643   : > { %7005 = vst.msk [vmem:[%s8963_s29 + $0x60] sm:$0xf] %vm12290_vm1, %v6973_v8  ;;  %vm12294_vm9 = vmmov %vm12280_vm0 }
 0x644   : > { %7006 = vst.msk [vmem:[%s8963_s29 + $0x64] sm:$0xf] %vm12291_vm6, %v6974_v13  ;;  %vm12295_vm10 = vmmov %vm12280_vm0 }
 0x645   : > { %7007 = vst.msk [vmem:[%s8963_s29 + $0x68] sm:$0xf] %vm12292_vm7, %v6975_v14  ;;  %vm12296_vm11 = vmmov %vm12280_vm0 }
 0x646   : > { %v6948_v36 = vld [vmem:[#allocation3 + $0xf8] sm:$0xff]  ;;  %7008 = vst.msk [vmem:[%s8963_s29 + $0x6c] sm:$0xf] %vm12293_vm8, %v6976_v44 }
 0x647   : > { %v6980_v58 = vpack.c.bf16 %v6948_v36, %v6948_v36  ;;  %7009 = vst.msk [vmem:[%s8963_s29 + $0x70] sm:$0xf] %vm12294_vm9, %v6977_v0 }
 0x648   : > { %7010 = vst.msk [vmem:[%s8963_s29 + $0x74] sm:$0xf] %vm12295_vm10, %v6978_v61 }
 0x649   : > { %7011 = vst.msk [vmem:[%s8963_s29 + $0x78] sm:$0xf] %vm12280_vm0, %v6979_v19 }
 0x64a   : > { %7012 = vst.msk [vmem:[%s8963_s29 + $0x7c] sm:$0xf] %vm12296_vm11, %v6980_v58 }
 0x64b PF: > { %s17_s24 = sadd.s32 1, %s8827_s24  }
 0x64c   : > { %p14_p5 = scmp.ge.s32.totalorder %s17_s24, 4  }
 0x64e   :  { %16 = sbr.rel (!%p14_p5) target bundleno = 1 (0x1), region = 96 }

</bundles_post_ra>
